<compile_context>
chip_gen: v7x
topology: tpu7x:2x2x1
jax: 0.10.0
libtpu: 0.0.40
codegen_flags: <defaults>
</compile_context>

<pallas_src>
import functools

import jax
import jax.numpy as jnp
from jax.experimental import pallas as pl
from jax.experimental.pallas import tpu as pltpu

ZD_DIM = 64   # args.zd_dim
D_DIM = 8     # args.d_dim
Y_DIM = 10    # args.y_dim
BN_EPS = 1e-5
C_PAD = 128                       # lane-dense conv channel padding
VMEM_LIMIT = 32 * 1024 * 1024     # safe on v5e/v6e (128 MiB) and v7x (64 MiB)


# ------------------------------ small helpers -------------------------------

def _round_up(x, m):
    return (x + m - 1) // m * m


def _row_tile(m, max_tile):
    """Largest row tile (preferring multiples of 16) that divides m."""
    assert m % 8 == 0, m
    if m <= max_tile:
        return m
    for t in range(max_tile - max_tile % 16, 15, -16):
        if m % t == 0:
            return t
    for t in range(max_tile - max_tile % 8, 7, -8):
        if m % t == 0:
            return t
    return m


def _cparams(sem):
    return pltpu.CompilerParams(dimension_semantics=sem,
                                vmem_limit_bytes=VMEM_LIMIT)


# --------------------- conv matmul + fused BN statistics ---------------------

def _conv_mm_stats_kernel(x_ref, w_ref, o_ref, s_ref):
    acc = jnp.dot(x_ref[...], w_ref[...], preferred_element_type=jnp.float32)
    o_ref[...] = acc.astype(o_ref.dtype)                 # bf16 conv intermediate
    ssum = jnp.sum(acc, axis=0, keepdims=True)
    ssq = jnp.sum(acc * acc, axis=0, keepdims=True)
    # single full-block store of the per-tile partial stats (rows 0/1 used)
    s_ref[...] = jnp.concatenate(
        [ssum, ssq, jnp.zeros((6, acc.shape[1]), jnp.float32)], axis=0)


def conv_matmul_stats(patches, weights, *, max_tile=1024):
    """patches (E,M,K) bf16, weights (E,K,C) bf16 -> conv (E,M,C) bf16 and
    per-tile partial stats (E, n_mt*8, C) f32 (row 0 = sum, row 1 = sumsq)."""
    E, M, K = patches.shape
    C = weights.shape[-1]
    tm = _row_tile(M, max_tile)
    n_mt = M // tm
    return pl.pallas_call(
        _conv_mm_stats_kernel,
        out_shape=(jax.ShapeDtypeStruct((E, M, C), jnp.bfloat16),
                   jax.ShapeDtypeStruct((E, n_mt * 8, C), jnp.float32)),
        grid=(E, n_mt),
        in_specs=[pl.BlockSpec((None, tm, K), lambda e, i: (e, i, 0)),
                  pl.BlockSpec((None, K, C), lambda e, i: (e, 0, 0))],
        out_specs=(pl.BlockSpec((None, tm, C), lambda e, i: (e, i, 0)),
                   pl.BlockSpec((None, 8, C), lambda e, i: (e, i, 0))),
        compiler_params=_cparams(("parallel", "parallel")),
    )(patches.astype(jnp.bfloat16), weights.astype(jnp.bfloat16))


# ------------------ fused BatchNorm(train) + ReLU + MaxPool2x2 ---------------

def _bn_relu_pool_kernel(x0_ref, x1_ref, x2_ref, x3_ref, s_ref, g_ref, b_ref,
                         o_ref, *, n_mt, inv_count):
    # finish the cross-tile stats reduction (tiny: n_mt blocks of 8 rows)
    red = s_ref[0:8, :]
    for t in range(1, n_mt):
        red = red + s_ref[t * 8:(t + 1) * 8, :]
    mean = red[0:1, :] * inv_count
    var = jnp.maximum(red[1:2, :] * inv_count - mean * mean, 0.0)  # clamp >= 0
    scale = jax.lax.rsqrt(var + BN_EPS) * g_ref[...]
    shift = b_ref[...] - mean * scale

    def norm(r):
        return jnp.maximum(r[...].astype(jnp.float32) * scale + shift, 0.0)

    o_ref[...] = jnp.maximum(jnp.maximum(norm(x0_ref), norm(x1_ref)),
                             jnp.maximum(norm(x2_ref), norm(x3_ref))
                             ).astype(o_ref.dtype)


def bn_relu_pool(conv, stats, gamma, beta, *, max_tile=256):
    """conv (E, 4*G, C) bf16 in pool-partner-major row order -> (E, G, C) bf16."""
    E, M, C = conv.shape
    G = M // 4
    n_mt = stats.shape[1] // 8
    tg = _row_tile(G, max_tile)
    n_gt = G // tg

    def part_spec(k):
        return pl.BlockSpec((None, tg, C), lambda e, i, k=k: (e, i + k * n_gt, 0))

    return pl.pallas_call(
        functools.partial(_bn_relu_pool_kernel, n_mt=n_mt,
                          inv_count=1.0 / float(M)),
        out_shape=jax.ShapeDtypeStruct((E, G, C), jnp.bfloat16),
        grid=(E, n_gt),
        in_specs=[part_spec(0), part_spec(1), part_spec(2), part_spec(3),
                  pl.BlockSpec((None, n_mt * 8, C), lambda e, i: (e, 0, 0)),
                  pl.BlockSpec((None, 1, C), lambda e, i: (e, 0, 0)),
                  pl.BlockSpec((None, 1, C), lambda e, i: (e, 0, 0))],
        out_specs=pl.BlockSpec((None, tg, C), lambda e, i: (e, i, 0)),
        compiler_params=_cparams(("parallel", "parallel")),
    )(conv, conv, conv, conv, stats, gamma, beta)


# ------------------------------ conv-stage glue ------------------------------

def im2col_pool_major(x, k=5):
    """x (N,H,W,C) -> (4*G, k*k*C) rows ordered (pool_partner, n, oi, oj):
    the 2x2 pool partners of pool-group j sit at rows {j, j+G, j+2G, j+3G}."""
    N, H, W, C = x.shape
    Ho, Wo = H - k + 1, W - k + 1
    cols = [x[:, di:di + Ho, dj:dj + Wo, :] for di in range(k) for dj in range(k)]
    pat = jnp.concatenate(cols, axis=-1)                       # (N,Ho,Wo,k*k*C)
    Kp = k * k * C
    pat = pat.reshape(N, Ho // 2, 2, Wo // 2, 2, Kp)
    pat = jnp.transpose(pat, (2, 4, 0, 1, 3, 5))               # (2,2,N,Ho/2,Wo/2,Kp)
    return pat.reshape(4 * N * (Ho // 2) * (Wo // 2), Kp)


def conv_bn_pool_stage(patches, weights, gamma, beta):
    """Conv(bias=False) -> BatchNorm(train stats) -> ReLU -> MaxPool2x2.

    patches (E,M,K), weights (E,K,Cout), gamma/beta (E,Cout).
    Returns (E, M//4, C_PAD) bf16 (first Cout channels real, rest zero)."""
    E, M, K = patches.shape
    Cout = weights.shape[-1]
    Kp = _round_up(K, 32)
    if Kp != K:  # sublane-align the contraction dim (conv1: 25 -> 32)
        patches = jnp.pad(patches, ((0, 0), (0, 0), (0, Kp - K)))
        weights = jnp.pad(weights, ((0, 0), (0, Kp - K), (0, 0)))
    w_pad = jnp.pad(weights, ((0, 0), (0, 0), (0, C_PAD - Cout)))
    g_pad = jnp.pad(gamma, ((0, 0), (0, C_PAD - Cout))).reshape(E, 1, C_PAD)
    b_pad = jnp.pad(beta, ((0, 0), (0, C_PAD - Cout))).reshape(E, 1, C_PAD)
    conv, stats = conv_matmul_stats(patches, w_pad)
    return bn_relu_pool(conv, stats, g_pad, b_pad)


def encoders_forward(x_nhwc, p):
    """Both conv encoders. Stage 1 shares the image (fused filters); stage 2
    runs both branches in one pallas_call (2-wide 'parallel' grid axis)."""
    N = x_nhwc.shape[0]
    xb = x_nhwc.astype(jnp.bfloat16)

    # stage 1: one fused (25 -> 64ch) matmul for both encoders
    pat1 = im2col_pool_major(xb, 5)[None]                                # (1,N*576,25)
    w1 = jnp.concatenate([p['qzd_conv1_w'], p['py_conv1_w']], axis=1)[None]
    g1 = jnp.concatenate([p['qzd_bn1_g'], p['py_bn1_g']])[None]
    b1 = jnp.concatenate([p['qzd_bn1_b'], p['py_bn1_b']])[None]
    h1 = conv_bn_pool_stage(pat1, w1, g1, b1)                            # (1,N*144,128)
    h1 = h1.reshape(N, 12, 12, C_PAD)

    # stage 2: qzd branch uses channels 0:32, py branch 32:64 of h1
    # TODO(synk): conv2's im2col patches are still gathered by XLA into HBM; an
    # in-kernel gather (Element index maps / manual DMA) would cut that traffic.
    pat2 = jnp.stack([im2col_pool_major(h1[..., 0:32], 5),
                      im2col_pool_major(h1[..., 32:64], 5)], axis=0)     # (2,N*64,800)
    w2 = jnp.stack([p['qzd_conv2_w'], p['py_conv2_w']], axis=0)
    g2 = jnp.stack([p['qzd_bn2_g'], p['py_bn2_g']], axis=0)
    b2 = jnp.stack([p['qzd_bn2_b'], p['py_bn2_b']], axis=0)
    h2 = conv_bn_pool_stage(pat2, w2, g2, b2)                            # (2,N*16,128)
    h2 = h2.reshape(2, N, 4, 4, C_PAD)[..., :64]                         # real channels
    # flatten in NHWC order; the fc weights were pre-permuted to match.
    return h2[0].reshape(N, 1024), h2[1].reshape(N, 1024)


# --------------------------- fused FC head kernel ----------------------------

def _heads_kernel(hq_ref, hp_ref, ez_ref, ey_ref, m1_ref, m2_ref,
                  wa_ref, ba_ref, w12_ref, b12_ref, w22_ref, b22_ref,
                  wd_ref, bd_ref,
                  w1a_ref, b1a_ref, w1b_ref, b1b_ref,
                  w2a_ref, b2a_ref, w2b_ref, b2b_ref,
                  wp1_ref, bp1_ref, wph_ref, wpz_ref, bp2_ref,
                  zdmu_ref, zdsig_ref, zymu_ref, zysig_ref, d_ref, y_ref, *, hd):
    # ---- qzd head: fc11 and fc21 share the LHS -> one fused 1024x512 matmul
    t = jnp.dot(hq_ref[...], wa_ref[...],
                preferred_element_type=jnp.float32) + ba_ref[...]
    a = jnp.maximum(t[:, :hd], 0.0)                    # fc11 + ReLU
    s1 = t[:, hd:]                                     # fc21 (no ReLU)
    zd_mu = jnp.dot(a, w12_ref[...], preferred_element_type=jnp.float32) + b12_ref[...]
    s2 = jnp.maximum(jnp.dot(s1, w22_ref[...],
                             preferred_element_type=jnp.float32) + b22_ref[...], 0.0)
    zd_sig = jnp.exp(0.5 * s2)
    zd_q = zd_mu + zd_sig * ez_ref[...]                # Normal(mu, sig).rsample()
    logit_d = jnp.dot(zd_q, wd_ref[...], preferred_element_type=jnp.float32) + bd_ref[...]

    # ---- zd_to_zy (each branch has its own Dropout(0.5) mask, as in torch)
    x1 = zd_mu * m1_ref[...]
    x2 = zd_sig * m2_ref[...]
    h1 = jnp.maximum(jnp.dot(x1, w1a_ref[...],
                             preferred_element_type=jnp.float32) + b1a_ref[...], 0.0)
    zy_mu = jnp.maximum(jnp.dot(h1, w1b_ref[...],
                                preferred_element_type=jnp.float32) + b1b_ref[...], 0.0)
    h2 = jnp.maximum(jnp.dot(x2, w2a_ref[...],
                             preferred_element_type=jnp.float32) + b2a_ref[...], 0.0)
    s = jnp.maximum(jnp.dot(h2, w2b_ref[...],
                            preferred_element_type=jnp.float32) + b2b_ref[...], 0.0)
    zy_sig = jnp.exp(0.5 * s)
    zy_q = zy_mu + zy_sig * ey_ref[...]                # qzy.rsample()

    # ---- py head: fc11 -> fc12 on concat([h, zy_q]) as a split matmul
    ap = jnp.maximum(jnp.dot(hp_ref[...], wp1_ref[...],
                             preferred_element_type=jnp.float32) + bp1_ref[...], 0.0)
    y_hat = (jnp.dot(ap, wph_ref[...], preferred_element_type=jnp.float32)
             + jnp.dot(zy_q, wpz_ref[...], preferred_element_type=jnp.float32)
             + bp2_ref[...])

    zdmu_ref[...] = zd_mu
    zdsig_ref[...] = zd_sig
    zymu_ref[...] = zy_mu
    zysig_ref[...] = zy_sig
    d_ref[...] = logit_d
    y_ref[...] = y_hat


def heads_forward(h_qzd, h_py, eps_zd, eps_zy, m1, m2, p, *, max_tile=256):
    M = h_qzd.shape[0]
    HD = 256
    H4 = 4 * ZD_DIM
    tm = _row_tile(M, max_tile)
    wa = jnp.concatenate([p['qzd_fc11_w'], p['qzd_fc21_w']], axis=1)
    ba = jnp.concatenate([p['qzd_fc11_b'], p['qzd_fc21_b']]).reshape(1, 2 * HD)
    row = lambda c: pl.BlockSpec((tm, c), lambda i: (i, 0))
    cst = lambda s: pl.BlockSpec(s, lambda i: (0,) * len(s))
    b1 = lambda a: a.reshape(1, -1)
    return pl.pallas_call(
        functools.partial(_heads_kernel, hd=HD),
        out_shape=(jax.ShapeDtypeStruct((M, ZD_DIM), jnp.float32),
                   jax.ShapeDtypeStruct((M, ZD_DIM), jnp.float32),
                   jax.ShapeDtypeStruct((M, ZD_DIM), jnp.float32),
                   jax.ShapeDtypeStruct((M, ZD_DIM), jnp.float32),
                   jax.ShapeDtypeStruct((M, D_DIM), jnp.float32),
                   jax.ShapeDtypeStruct((M, Y_DIM), jnp.float32)),
        grid=(M // tm,),
        in_specs=[row(1024), row(1024),
                  row(ZD_DIM), row(ZD_DIM), row(ZD_DIM), row(ZD_DIM),
                  cst((1024, 2 * HD)), cst((1, 2 * HD)),
                  cst((HD, ZD_DIM)), cst((1, ZD_DIM)),
                  cst((HD, ZD_DIM)), cst((1, ZD_DIM)),
                  cst((ZD_DIM, D_DIM)), cst((1, D_DIM)),
                  cst((ZD_DIM, H4)), cst((1, H4)),
                  cst((H4, ZD_DIM)), cst((1, ZD_DIM)),
                  cst((ZD_DIM, H4)), cst((1, H4)),
                  cst((H4, ZD_DIM)), cst((1, ZD_DIM)),
                  cst((1024, HD)), cst((1, HD)),
                  cst((HD, Y_DIM)), cst((ZD_DIM, Y_DIM)), cst((1, Y_DIM))],
        out_specs=(row(ZD_DIM), row(ZD_DIM), row(ZD_DIM), row(ZD_DIM),
                   row(D_DIM), row(Y_DIM)),
        compiler_params=_cparams(("parallel",)),
    )(h_qzd.astype(jnp.bfloat16), h_py.astype(jnp.bfloat16),
      eps_zd, eps_zy, m1, m2,
      wa.astype(jnp.bfloat16), ba,
      p['qzd_fc12_w'], b1(p['qzd_fc12_b']),
      p['qzd_fc22_w'], b1(p['qzd_fc22_b']),
      p['qzd_dlik_w'], b1(p['qzd_dlik_b']),
      p['zy_fc21_w1'], b1(p['zy_fc21_b1']),
      p['zy_fc21_w2'], b1(p['zy_fc21_b2']),
      p['zy_fc22_w1'], b1(p['zy_fc22_b1']),
      p['zy_fc22_w2'], b1(p['zy_fc22_b2']),
      p['py_fc11_w'].astype(jnp.bfloat16), b1(p['py_fc11_b']),
      p['py_fc12_w'][:HD], p['py_fc12_w'][HD:], b1(p['py_fc12_b']))


# --------------------------------- forward ----------------------------------

def jvinet_forward(x_nchw, p, rng):
    N = x_nchw.shape[0]
    x_nhwc = jnp.transpose(x_nchw.astype(jnp.float32), (0, 2, 3, 1))
    h_qzd, h_py = encoders_forward(x_nhwc, p)                  # (N, 1024) each

    # pad the head batch to a bf16-sublane multiple (16) for clean packing
    Mp = _round_up(N, 16)
    pad_rows = lambda a: jnp.pad(a, ((0, Mp - N), (0, 0)))

    k1, k2, k3, k4 = jax.random.split(rng, 4)
    eps_zd = jax.random.normal(k1, (Mp, ZD_DIM), jnp.float32)
    eps_zy = jax.random.normal(k4, (Mp, ZD_DIM), jnp.float32)
    keep = 0.5
    m1 = jax.random.bernoulli(k2, keep, (Mp, ZD_DIM)).astype(jnp.float32) / keep
    m2 = jax.random.bernoulli(k3, keep, (Mp, ZD_DIM)).astype(jnp.float32) / keep

    zd_mu, zd_sig, zy_mu, zy_sig, logit_d, y_hat = heads_forward(
        pad_rows(h_qzd), pad_rows(h_py), eps_zd, eps_zy, m1, m2, p)
    # torch py.forward also returns (h, h_cat_z); JVINet.forward discards them.
    return (zd_mu[:N], zd_sig[:N], zy_mu[:N], zy_sig[:N], logit_d[:N], y_hat[:N])


# ------------------------- deterministic parameters --------------------------

def _nchw_to_nhwc_rows(w):
    """torch flattens the (N,64,4,4) map as (c,h,w); our kernels flatten NHWC.
    Permute the 1024 weight rows once so the forward needs no transpose."""
    c, hh, ww = 64, 4, 4
    hi, wi, ci = jnp.meshgrid(jnp.arange(hh), jnp.arange(ww), jnp.arange(c),
                              indexing='ij')
    perm = (ci * hh * ww + hi * ww + wi).reshape(-1)
    return w[perm]


def init_params(key):
    keys = iter(jax.random.split(key, 32))

    def xavier(shape, fan_in, fan_out):
        bound = (6.0 / (fan_in + fan_out)) ** 0.5
        return jax.random.uniform(next(keys), shape, jnp.float32, -bound, bound)

    def default_linear(in_f, out_f):
        bound = 1.0 / (in_f ** 0.5)
        w = jax.random.uniform(next(keys), (in_f, out_f), jnp.float32, -bound, bound)
        b = jax.random.uniform(next(keys), (out_f,), jnp.float32, -bound, bound)
        return w, b

    p = {}
    for pre in ('qzd_', 'py_'):
        # conv weights stored flattened as (kh*kw*Cin, Cout), bias=False
        p[pre + 'conv1_w'] = xavier((25, 32), 1 * 25, 32 * 25)
        p[pre + 'conv2_w'] = xavier((25 * 32, 64), 32 * 25, 64 * 25)
        p[pre + 'bn1_g'] = jnp.ones((32,), jnp.float32)
        p[pre + 'bn1_b'] = jnp.zeros((32,), jnp.float32)
        p[pre + 'bn2_g'] = jnp.ones((64,), jnp.float32)
        p[pre + 'bn2_b'] = jnp.zeros((64,), jnp.float32)

    # qzd heads
    p['qzd_fc11_w'] = xavier((1024, 256), 1024, 256); p['qzd_fc11_b'] = jnp.zeros((256,), jnp.float32)
    p['qzd_fc12_w'] = xavier((256, ZD_DIM), 256, ZD_DIM); p['qzd_fc12_b'] = jnp.zeros((ZD_DIM,), jnp.float32)
    p['qzd_fc21_w'] = xavier((1024, 256), 1024, 256); p['qzd_fc21_b'] = jnp.zeros((256,), jnp.float32)
    p['qzd_fc22_w'] = xavier((256, ZD_DIM), 256, ZD_DIM); p['qzd_fc22_b'] = jnp.zeros((ZD_DIM,), jnp.float32)
    p['qzd_dlik_w'], p['qzd_dlik_b'] = default_linear(ZD_DIM, D_DIM)

    # zd_to_zy (PyTorch default Linear init)
    p['zy_fc21_w1'], p['zy_fc21_b1'] = default_linear(ZD_DIM, 4 * ZD_DIM)
    p['zy_fc21_w2'], p['zy_fc21_b2'] = default_linear(4 * ZD_DIM, ZD_DIM)
    p['zy_fc22_w1'], p['zy_fc22_b1'] = default_linear(ZD_DIM, 4 * ZD_DIM)
    p['zy_fc22_w2'], p['zy_fc22_b2'] = default_linear(4 * ZD_DIM, ZD_DIM)

    # py heads
    p['py_fc11_w'] = xavier((1024, 256), 1024, 256); p['py_fc11_b'] = jnp.zeros((256,), jnp.float32)
    p['py_fc12_w'] = xavier((256 + ZD_DIM, Y_DIM), 256 + ZD_DIM, Y_DIM)
    p['py_fc12_b'] = jnp.zeros((Y_DIM,), jnp.float32)

    # one-time row permutation: NCHW-flatten -> NHWC-flatten order
    for name in ('qzd_fc11_w', 'qzd_fc21_w', 'py_fc11_w'):
        p[name] = _nchw_to_nhwc_rows(p[name])
    return p


if __name__ == "__main__":
    key = jax.random.PRNGKey(0)
    kx, knoise = jax.random.split(key)
    # MNIST-sized input (28x28 is forced by the 1024-unit flatten in the module)
    x = jax.random.normal(kx, (2, 1, 28, 28), jnp.float32)       # NCHW like PyTorch
    params = init_params(jax.random.PRNGKey(1))

    outs = jax.jit(jvinet_forward)(x, params, knoise)
    jax.block_until_ready(outs)

    zd_mu, zd_sig, zy_mu, zy_sig, d_hat, y_hat = outs
    assert zd_mu.shape == (2, ZD_DIM) and zd_sig.shape == (2, ZD_DIM)
    assert zy_mu.shape == (2, ZD_DIM) and zy_sig.shape == (2, ZD_DIM)
    assert d_hat.shape == (2, D_DIM) and y_hat.shape == (2, Y_DIM)
    assert all(bool(jnp.all(jnp.isfinite(o))) for o in outs)
    print("KERNEL_OK")
</pallas_src>

<mosaic_0001>
module attributes {stable_mosaic.version = 11 : i64} {
  func.func @_conv_mm_stats_kernel(%arg0: i32, %arg1: i32, %arg2: memref<1x576x32xbf16, #tpu.memory_space<vmem>>, %arg3: memref<1x32x128xbf16, #tpu.memory_space<vmem>>, %arg4: memref<1x576x128xbf16, #tpu.memory_space<vmem>>, %arg5: memref<1x8x128xf32, #tpu.memory_space<vmem>>) attributes {dimension_semantics = [#tpu.dimension_semantics<parallel>, #tpu.dimension_semantics<parallel>], iteration_bounds = array<i64: 1, 2>, scalar_prefetch = 0 : i64, scratch_operands = 0 : i64, tpu.core_type = #tpu.core_type<tc>, window_params = [{transform_indices = @transform_0, window_bounds = array<i64: 1, 576, 32>}, {transform_indices = @transform_1, window_bounds = array<i64: 1, 32, 128>}, {transform_indices = @transform_2, window_bounds = array<i64: 1, 576, 128>}, {transform_indices = @transform_3, window_bounds = array<i64: 1, 8, 128>}]} {
    %c0 = arith.constant 0 : index
    %c0_0 = arith.constant 0 : index
    %c0_1 = arith.constant 0 : index
    %0 = vector.load %arg2[%c0, %c0_0, %c0_1] : memref<1x576x32xbf16, #tpu.memory_space<vmem>>, vector<1x576x32xbf16>
    %1 = vector.shape_cast %0 : vector<1x576x32xbf16> to vector<576x32xbf16>
    %c0_2 = arith.constant 0 : index
    %c0_3 = arith.constant 0 : index
    %c0_4 = arith.constant 0 : index
    %2 = vector.load %arg3[%c0_2, %c0_3, %c0_4] : memref<1x32x128xbf16, #tpu.memory_space<vmem>>, vector<1x32x128xbf16>
    %3 = vector.shape_cast %2 : vector<1x32x128xbf16> to vector<32x128xbf16>
    %cst = arith.constant dense<0.000000e+00> : vector<576x128xf32>
    %4 = tpu.matmul %1, %3, %cst {dimension_numbers = #tpu.dot_dimension_numbers<[1], [0], [0], [1], [0, 0, 1, 1], [], []>} : vector<576x32xbf16>, vector<32x128xbf16>, vector<576x128xf32> -> vector<576x128xf32>
    %5 = arith.truncf %4 : vector<576x128xf32> to vector<576x128xbf16>
    %c0_5 = arith.constant 0 : index
    %c0_6 = arith.constant 0 : index
    %c0_7 = arith.constant 0 : index
    %6 = vector.load %arg4[%c0_5, %c0_6, %c0_7] : memref<1x576x128xbf16, #tpu.memory_space<vmem>>, vector<1x576x128xbf16>
    %7 = vector.shape_cast %6 : vector<1x576x128xbf16> to vector<576x128xbf16>
    %8 = vector.shape_cast %5 : vector<576x128xbf16> to vector<1x576x128xbf16>
    tpu.vector_store %arg4[%c0_5, %c0_6, %c0_7], %8 {strides = array<i32>} : memref<1x576x128xbf16, #tpu.memory_space<vmem>>, vector<1x576x128xbf16>,
    %cst_8 = arith.constant dense<0.000000e+00> : vector<128xf32>
    %9 = vector.multi_reduction <add>, %4, %cst_8 [0] : vector<576x128xf32> to vector<128xf32>
    %10 = vector.shape_cast %9 : vector<128xf32> to vector<1x128xf32>
    %11 = arith.mulf %4, %4 : vector<576x128xf32>
    %cst_9 = arith.constant dense<0.000000e+00> : vector<128xf32>
    %12 = vector.multi_reduction <add>, %11, %cst_9 [0] : vector<576x128xf32> to vector<128xf32>
    %13 = vector.shape_cast %12 : vector<128xf32> to vector<1x128xf32>
    %cst_10 = arith.constant 0.000000e+00 : f32
    %14 = vector.broadcast %cst_10 : f32 to vector<6x128xf32>
    %15 = tpu.concatenate %10, %13, %14 in 0 : vector<1x128xf32>, vector<1x128xf32>, vector<6x128xf32> -> vector<8x128xf32>
    %c0_11 = arith.constant 0 : index
    %c0_12 = arith.constant 0 : index
    %c0_13 = arith.constant 0 : index
    %16 = vector.load %arg5[%c0_11, %c0_12, %c0_13] : memref<1x8x128xf32, #tpu.memory_space<vmem>>, vector<1x8x128xf32>
    %17 = vector.shape_cast %16 : vector<1x8x128xf32> to vector<8x128xf32>
    %18 = vector.shape_cast %15 : vector<8x128xf32> to vector<1x8x128xf32>
    tpu.vector_store %arg5[%c0_11, %c0_12, %c0_13], %18 {strides = array<i32>} : memref<1x8x128xf32, #tpu.memory_space<vmem>>, vector<1x8x128xf32>,
    return
  }
  func.func @transform_0(%arg0: i32, %arg1: i32) -> (i32, i32, i32) {
    %c0_i32 = arith.constant 0 : i32
    %c0_i32_0 = arith.constant 0 : i32
    return %arg0, %arg1, %c0_i32 : i32, i32, i32
  }
  func.func @transform_1(%arg0: i32, %arg1: i32) -> (i32, i32, i32) {
    %c0_i32 = arith.constant 0 : i32
    %c0_i32_0 = arith.constant 0 : i32
    %c0_i32_1 = arith.constant 0 : i32
    return %arg0, %c0_i32, %c0_i32_0 : i32, i32, i32
  }
  func.func @transform_2(%arg0: i32, %arg1: i32) -> (i32, i32, i32) {
    %c0_i32 = arith.constant 0 : i32
    %c0_i32_0 = arith.constant 0 : i32
    return %arg0, %arg1, %c0_i32 : i32, i32, i32
  }
  func.func @transform_3(%arg0: i32, %arg1: i32) -> (i32, i32, i32) {
    %c0_i32 = arith.constant 0 : i32
    %c0_i32_0 = arith.constant 0 : i32
    return %arg0, %arg1, %c0_i32 : i32, i32, i32
  }
}

module attributes {stable_mosaic.version = 11 : i64} {
  func.func @_bn_relu_pool_kernel(%arg0: i32, %arg1: i32, %arg2: memref<1x144x128xbf16, #tpu.memory_space<vmem>>, %arg3: memref<1x144x128xbf16, #tpu.memory_space<vmem>>, %arg4: memref<1x144x128xbf16, #tpu.memory_space<vmem>>, %arg5: memref<1x144x128xbf16, #tpu.memory_space<vmem>>, %arg6: memref<1x16x128xf32, #tpu.memory_space<vmem>>, %arg7: memref<1x1x128xf32, #tpu.memory_space<vmem>>, %arg8: memref<1x1x128xf32, #tpu.memory_space<vmem>>, %arg9: memref<1x144x128xbf16, #tpu.memory_space<vmem>>) attributes {dimension_semantics = [#tpu.dimension_semantics<parallel>, #tpu.dimension_semantics<parallel>], iteration_bounds = array<i64: 1, 2>, scalar_prefetch = 0 : i64, scratch_operands = 0 : i64, tpu.core_type = #tpu.core_type<tc>, window_params = [{transform_indices = @transform_0, window_bounds = array<i64: 1, 144, 128>}, {transform_indices = @transform_1, window_bounds = array<i64: 1, 144, 128>}, {transform_indices = @transform_2, window_bounds = array<i64: 1, 144, 128>}, {transform_indices = @transform_3, window_bounds = array<i64: 1, 144, 128>}, {transform_indices = @transform_4, window_bounds = array<i64: 1, 16, 128>}, {transform_indices = @transform_5, window_bounds = array<i64: 1, 1, 128>}, {transform_indices = @transform_6, window_bounds = array<i64: 1, 1, 128>}, {transform_indices = @transform_7, window_bounds = array<i64: 1, 144, 128>}]} {
    %c0 = arith.constant 0 : index
    %c0_0 = arith.constant 0 : index
    %c0_1 = arith.constant 0 : index
    %0 = vector.load %arg6[%c0, %c0_0, %c0_1] : memref<1x16x128xf32, #tpu.memory_space<vmem>>, vector<1x8x128xf32>
    %1 = vector.shape_cast %0 : vector<1x8x128xf32> to vector<8x128xf32>
    %c0_2 = arith.constant 0 : index
    %c8 = arith.constant 8 : index
    %c0_3 = arith.constant 0 : index
    %2 = vector.load %arg6[%c0_2, %c8, %c0_3] : memref<1x16x128xf32, #tpu.memory_space<vmem>>, vector<1x8x128xf32>
    %3 = vector.shape_cast %2 : vector<1x8x128xf32> to vector<8x128xf32>
    %4 = arith.addf %1, %3 : vector<8x128xf32>
    %5 = vector.extract_strided_slice %4 {offsets = [0, 0], sizes = [1, 128], strides = [1, 1]} : vector<8x128xf32> to vector<1x128xf32>
    %cst = arith.constant 8.68055562E-4 : f32
    %6 = vector.broadcast %cst : f32 to vector<1x128xf32>
    %7 = arith.mulf %5, %6 : vector<1x128xf32>
    %8 = vector.extract_strided_slice %4 {offsets = [1, 0], sizes = [1, 128], strides = [1, 1]} : vector<8x128xf32> to vector<1x128xf32>
    %cst_4 = arith.constant 8.68055562E-4 : f32
    %9 = vector.broadcast %cst_4 : f32 to vector<1x128xf32>
    %10 = arith.mulf %8, %9 : vector<1x128xf32>
    %11 = arith.mulf %7, %7 : vector<1x128xf32>
    %12 = arith.subf %10, %11 : vector<1x128xf32>
    %cst_5 = arith.constant 0.000000e+00 : f32
    %13 = vector.broadcast %cst_5 : f32 to vector<1x128xf32>
    %14 = arith.maximumf %12, %13 : vector<1x128xf32>
    %cst_6 = arith.constant 9.99999974E-6 : f32
    %15 = vector.broadcast %cst_6 : f32 to vector<1x128xf32>
    %16 = arith.addf %14, %15 : vector<1x128xf32>
    %17 = math.rsqrt %16 : vector<1x128xf32>
    %c0_7 = arith.constant 0 : index
    %c0_8 = arith.constant 0 : index
    %c0_9 = arith.constant 0 : index
    %18 = vector.load %arg7[%c0_7, %c0_8, %c0_9] : memref<1x1x128xf32, #tpu.memory_space<vmem>>, vector<1x1x128xf32>
    %19 = vector.shape_cast %18 : vector<1x1x128xf32> to vector<1x128xf32>
    %20 = arith.mulf %17, %19 : vector<1x128xf32>
    %c0_10 = arith.constant 0 : index
    %c0_11 = arith.constant 0 : index
    %c0_12 = arith.constant 0 : index
    %21 = vector.load %arg8[%c0_10, %c0_11, %c0_12] : memref<1x1x128xf32, #tpu.memory_space<vmem>>, vector<1x1x128xf32>
    %22 = vector.shape_cast %21 : vector<1x1x128xf32> to vector<1x128xf32>
    %23 = arith.mulf %7, %20 : vector<1x128xf32>
    %24 = arith.subf %22, %23 : vector<1x128xf32>
    %c0_13 = arith.constant 0 : index
    %c0_14 = arith.constant 0 : index
    %c0_15 = arith.constant 0 : index
    %25 = vector.load %arg2[%c0_13, %c0_14, %c0_15] : memref<1x144x128xbf16, #tpu.memory_space<vmem>>, vector<1x144x128xbf16>
    %26 = vector.shape_cast %25 : vector<1x144x128xbf16> to vector<144x128xbf16>
    %27 = arith.extf %26 : vector<144x128xbf16> to vector<144x128xf32>
    %28 = vector.broadcast %20 : vector<1x128xf32> to vector<144x128xf32>
    %29 = arith.mulf %27, %28 : vector<144x128xf32>
    %30 = vector.broadcast %24 : vector<1x128xf32> to vector<144x128xf32>
    %31 = arith.addf %29, %30 : vector<144x128xf32>
    %cst_16 = arith.constant 0.000000e+00 : f32
    %32 = vector.broadcast %cst_16 : f32 to vector<144x128xf32>
    %33 = arith.maximumf %31, %32 : vector<144x128xf32>
    %c0_17 = arith.constant 0 : index
    %c0_18 = arith.constant 0 : index
    %c0_19 = arith.constant 0 : index
    %34 = vector.load %arg3[%c0_17, %c0_18, %c0_19] : memref<1x144x128xbf16, #tpu.memory_space<vmem>>, vector<1x144x128xbf16>
    %35 = vector.shape_cast %34 : vector<1x144x128xbf16> to vector<144x128xbf16>
    %36 = arith.extf %35 : vector<144x128xbf16> to vector<144x128xf32>
    %37 = vector.broadcast %20 : vector<1x128xf32> to vector<144x128xf32>
    %38 = arith.mulf %36, %37 : vector<144x128xf32>
    %39 = vector.broadcast %24 : vector<1x128xf32> to vector<144x128xf32>
    %40 = arith.addf %38, %39 : vector<144x128xf32>
    %cst_20 = arith.constant 0.000000e+00 : f32
    %41 = vector.broadcast %cst_20 : f32 to vector<144x128xf32>
    %42 = arith.maximumf %40, %41 : vector<144x128xf32>
    %43 = arith.maximumf %33, %42 : vector<144x128xf32>
    %c0_21 = arith.constant 0 : index
    %c0_22 = arith.constant 0 : index
    %c0_23 = arith.constant 0 : index
    %44 = vector.load %arg4[%c0_21, %c0_22, %c0_23] : memref<1x144x128xbf16, #tpu.memory_space<vmem>>, vector<1x144x128xbf16>
    %45 = vector.shape_cast %44 : vector<1x144x128xbf16> to vector<144x128xbf16>
    %46 = arith.extf %45 : vector<144x128xbf16> to vector<144x128xf32>
    %47 = vector.broadcast %20 : vector<1x128xf32> to vector<144x128xf32>
    %48 = arith.mulf %46, %47 : vector<144x128xf32>
    %49 = vector.broadcast %24 : vector<1x128xf32> to vector<144x128xf32>
    %50 = arith.addf %48, %49 : vector<144x128xf32>
    %cst_24 = arith.constant 0.000000e+00 : f32
    %51 = vector.broadcast %cst_24 : f32 to vector<144x128xf32>
    %52 = arith.maximumf %50, %51 : vector<144x128xf32>
    %c0_25 = arith.constant 0 : index
    %c0_26 = arith.constant 0 : index
    %c0_27 = arith.constant 0 : index
    %53 = vector.load %arg5[%c0_25, %c0_26, %c0_27] : memref<1x144x128xbf16, #tpu.memory_space<vmem>>, vector<1x144x128xbf16>
    %54 = vector.shape_cast %53 : vector<1x144x128xbf16> to vector<144x128xbf16>
    %55 = arith.extf %54 : vector<144x128xbf16> to vector<144x128xf32>
    %56 = vector.broadcast %20 : vector<1x128xf32> to vector<144x128xf32>
    %57 = arith.mulf %55, %56 : vector<144x128xf32>
    %58 = vector.broadcast %24 : vector<1x128xf32> to vector<144x128xf32>
    %59 = arith.addf %57, %58 : vector<144x128xf32>
    %cst_28 = arith.constant 0.000000e+00 : f32
    %60 = vector.broadcast %cst_28 : f32 to vector<144x128xf32>
    %61 = arith.maximumf %59, %60 : vector<144x128xf32>
    %62 = arith.maximumf %52, %61 : vector<144x128xf32>
    %63 = arith.maximumf %43, %62 : vector<144x128xf32>
    %64 = arith.truncf %63 : vector<144x128xf32> to vector<144x128xbf16>
    %c0_29 = arith.constant 0 : index
    %c0_30 = arith.constant 0 : index
    %c0_31 = arith.constant 0 : index
    %65 = vector.load %arg9[%c0_29, %c0_30, %c0_31] : memref<1x144x128xbf16, #tpu.memory_space<vmem>>, vector<1x144x128xbf16>
    %66 = vector.shape_cast %65 : vector<1x144x128xbf16> to vector<144x128xbf16>
    %67 = vector.shape_cast %64 : vector<144x128xbf16> to vector<1x144x128xbf16>
    tpu.vector_store %arg9[%c0_29, %c0_30, %c0_31], %67 {strides = array<i32>} : memref<1x144x128xbf16, #tpu.memory_space<vmem>>, vector<1x144x128xbf16>,
    return
  }
  func.func @transform_0(%arg0: i32, %arg1: i32) -> (i32, i32, i32) {
    %c0_i32 = arith.constant 0 : i32
    %0 = arith.addi %arg1, %c0_i32 : i32
    %c0_i32_0 = arith.constant 0 : i32
    %c0_i32_1 = arith.constant 0 : i32
    return %arg0, %0, %c0_i32_0 : i32, i32, i32
  }
  func.func @transform_1(%arg0: i32, %arg1: i32) -> (i32, i32, i32) {
    %c2_i32 = arith.constant 2 : i32
    %0 = arith.addi %arg1, %c2_i32 : i32
    %c0_i32 = arith.constant 0 : i32
    %c0_i32_0 = arith.constant 0 : i32
    return %arg0, %0, %c0_i32 : i32, i32, i32
  }
  func.func @transform_2(%arg0: i32, %arg1: i32) -> (i32, i32, i32) {
    %c4_i32 = arith.constant 4 : i32
    %0 = arith.addi %arg1, %c4_i32 : i32
    %c0_i32 = arith.constant 0 : i32
    %c0_i32_0 = arith.constant 0 : i32
    return %arg0, %0, %c0_i32 : i32, i32, i32
  }
  func.func @transform_3(%arg0: i32, %arg1: i32) -> (i32, i32, i32) {
    %c6_i32 = arith.constant 6 : i32
    %0 = arith.addi %arg1, %c6_i32 : i32
    %c0_i32 = arith.constant 0 : i32
    %c0_i32_0 = arith.constant 0 : i32
    return %arg0, %0, %c0_i32 : i32, i32, i32
  }
  func.func @transform_4(%arg0: i32, %arg1: i32) -> (i32, i32, i32) {
    %c0_i32 = arith.constant 0 : i32
    %c0_i32_0 = arith.constant 0 : i32
    %c0_i32_1 = arith.constant 0 : i32
    return %arg0, %c0_i32, %c0_i32_0 : i32, i32, i32
  }
  func.func @transform_5(%arg0: i32, %arg1: i32) -> (i32, i32, i32) {
    %c0_i32 = arith.constant 0 : i32
    %c0_i32_0 = arith.constant 0 : i32
    %c0_i32_1 = arith.constant 0 : i32
    return %arg0, %c0_i32, %c0_i32_0 : i32, i32, i32
  }
  func.func @transform_6(%arg0: i32, %arg1: i32) -> (i32, i32, i32) {
    %c0_i32 = arith.constant 0 : i32
    %c0_i32_0 = arith.constant 0 : i32
    %c0_i32_1 = arith.constant 0 : i32
    return %arg0, %c0_i32, %c0_i32_0 : i32, i32, i32
  }
  func.func @transform_7(%arg0: i32, %arg1: i32) -> (i32, i32, i32) {
    %c0_i32 = arith.constant 0 : i32
    %c0_i32_0 = arith.constant 0 : i32
    return %arg0, %arg1, %c0_i32 : i32, i32, i32
  }
}

module attributes {stable_mosaic.version = 11 : i64} {
  func.func @_conv_mm_stats_kernel(%arg0: i32, %arg1: i32, %arg2: memref<1x128x800xbf16, #tpu.memory_space<vmem>>, %arg3: memref<1x800x128xbf16, #tpu.memory_space<vmem>>, %arg4: memref<1x128x128xbf16, #tpu.memory_space<vmem>>, %arg5: memref<1x8x128xf32, #tpu.memory_space<vmem>>) attributes {dimension_semantics = [#tpu.dimension_semantics<parallel>, #tpu.dimension_semantics<parallel>], iteration_bounds = array<i64: 2, 1>, scalar_prefetch = 0 : i64, scratch_operands = 0 : i64, tpu.core_type = #tpu.core_type<tc>, window_params = [{transform_indices = @transform_0, window_bounds = array<i64: 1, 128, 800>}, {transform_indices = @transform_1, window_bounds = array<i64: 1, 800, 128>}, {transform_indices = @transform_2, window_bounds = array<i64: 1, 128, 128>}, {transform_indices = @transform_3, window_bounds = array<i64: 1, 8, 128>}]} {
    %c0 = arith.constant 0 : index
    %c0_0 = arith.constant 0 : index
    %c0_1 = arith.constant 0 : index
    %0 = vector.load %arg2[%c0, %c0_0, %c0_1] : memref<1x128x800xbf16, #tpu.memory_space<vmem>>, vector<1x128x800xbf16>
    %1 = vector.shape_cast %0 : vector<1x128x800xbf16> to vector<128x800xbf16>
    %c0_2 = arith.constant 0 : index
    %c0_3 = arith.constant 0 : index
    %c0_4 = arith.constant 0 : index
    %2 = vector.load %arg3[%c0_2, %c0_3, %c0_4] : memref<1x800x128xbf16, #tpu.memory_space<vmem>>, vector<1x800x128xbf16>
    %3 = vector.shape_cast %2 : vector<1x800x128xbf16> to vector<800x128xbf16>
    %cst = arith.constant dense<0.000000e+00> : vector<128x128xf32>
    %4 = tpu.matmul %1, %3, %cst {dimension_numbers = #tpu.dot_dimension_numbers<[1], [0], [0], [1], [0, 0, 1, 1], [], []>} : vector<128x800xbf16>, vector<800x128xbf16>, vector<128x128xf32> -> vector<128x128xf32>
    %5 = arith.truncf %4 : vector<128x128xf32> to vector<128x128xbf16>
    %c0_5 = arith.constant 0 : index
    %c0_6 = arith.constant 0 : index
    %c0_7 = arith.constant 0 : index
    %6 = vector.load %arg4[%c0_5, %c0_6, %c0_7] : memref<1x128x128xbf16, #tpu.memory_space<vmem>>, vector<1x128x128xbf16>
    %7 = vector.shape_cast %6 : vector<1x128x128xbf16> to vector<128x128xbf16>
    %8 = vector.shape_cast %5 : vector<128x128xbf16> to vector<1x128x128xbf16>
    tpu.vector_store %arg4[%c0_5, %c0_6, %c0_7], %8 {strides = array<i32>} : memref<1x128x128xbf16, #tpu.memory_space<vmem>>, vector<1x128x128xbf16>,
    %cst_8 = arith.constant dense<0.000000e+00> : vector<128xf32>
    %9 = vector.multi_reduction <add>, %4, %cst_8 [0] : vector<128x128xf32> to vector<128xf32>
    %10 = vector.shape_cast %9 : vector<128xf32> to vector<1x128xf32>
    %11 = arith.mulf %4, %4 : vector<128x128xf32>
    %cst_9 = arith.constant dense<0.000000e+00> : vector<128xf32>
    %12 = vector.multi_reduction <add>, %11, %cst_9 [0] : vector<128x128xf32> to vector<128xf32>
    %13 = vector.shape_cast %12 : vector<128xf32> to vector<1x128xf32>
    %cst_10 = arith.constant 0.000000e+00 : f32
    %14 = vector.broadcast %cst_10 : f32 to vector<6x128xf32>
    %15 = tpu.concatenate %10, %13, %14 in 0 : vector<1x128xf32>, vector<1x128xf32>, vector<6x128xf32> -> vector<8x128xf32>
    %c0_11 = arith.constant 0 : index
    %c0_12 = arith.constant 0 : index
    %c0_13 = arith.constant 0 : index
    %16 = vector.load %arg5[%c0_11, %c0_12, %c0_13] : memref<1x8x128xf32, #tpu.memory_space<vmem>>, vector<1x8x128xf32>
    %17 = vector.shape_cast %16 : vector<1x8x128xf32> to vector<8x128xf32>
    %18 = vector.shape_cast %15 : vector<8x128xf32> to vector<1x8x128xf32>
    tpu.vector_store %arg5[%c0_11, %c0_12, %c0_13], %18 {strides = array<i32>} : memref<1x8x128xf32, #tpu.memory_space<vmem>>, vector<1x8x128xf32>,
    return
  }
  func.func @transform_0(%arg0: i32, %arg1: i32) -> (i32, i32, i32) {
    %c0_i32 = arith.constant 0 : i32
    %c0_i32_0 = arith.constant 0 : i32
    return %arg0, %arg1, %c0_i32 : i32, i32, i32
  }
  func.func @transform_1(%arg0: i32, %arg1: i32) -> (i32, i32, i32) {
    %c0_i32 = arith.constant 0 : i32
    %c0_i32_0 = arith.constant 0 : i32
    %c0_i32_1 = arith.constant 0 : i32
    return %arg0, %c0_i32, %c0_i32_0 : i32, i32, i32
  }
  func.func @transform_2(%arg0: i32, %arg1: i32) -> (i32, i32, i32) {
    %c0_i32 = arith.constant 0 : i32
    %c0_i32_0 = arith.constant 0 : i32
    return %arg0, %arg1, %c0_i32 : i32, i32, i32
  }
  func.func @transform_3(%arg0: i32, %arg1: i32) -> (i32, i32, i32) {
    %c0_i32 = arith.constant 0 : i32
    %c0_i32_0 = arith.constant 0 : i32
    return %arg0, %arg1, %c0_i32 : i32, i32, i32
  }
}

module attributes {stable_mosaic.version = 11 : i64} {
  func.func @_bn_relu_pool_kernel(%arg0: i32, %arg1: i32, %arg2: memref<1x32x128xbf16, #tpu.memory_space<vmem>>, %arg3: memref<1x32x128xbf16, #tpu.memory_space<vmem>>, %arg4: memref<1x32x128xbf16, #tpu.memory_space<vmem>>, %arg5: memref<1x32x128xbf16, #tpu.memory_space<vmem>>, %arg6: memref<1x8x128xf32, #tpu.memory_space<vmem>>, %arg7: memref<1x1x128xf32, #tpu.memory_space<vmem>>, %arg8: memref<1x1x128xf32, #tpu.memory_space<vmem>>, %arg9: memref<1x32x128xbf16, #tpu.memory_space<vmem>>) attributes {dimension_semantics = [#tpu.dimension_semantics<parallel>, #tpu.dimension_semantics<parallel>], iteration_bounds = array<i64: 2, 1>, scalar_prefetch = 0 : i64, scratch_operands = 0 : i64, tpu.core_type = #tpu.core_type<tc>, window_params = [{transform_indices = @transform_0, window_bounds = array<i64: 1, 32, 128>}, {transform_indices = @transform_1, window_bounds = array<i64: 1, 32, 128>}, {transform_indices = @transform_2, window_bounds = array<i64: 1, 32, 128>}, {transform_indices = @transform_3, window_bounds = array<i64: 1, 32, 128>}, {transform_indices = @transform_4, window_bounds = array<i64: 1, 8, 128>}, {transform_indices = @transform_5, window_bounds = array<i64: 1, 1, 128>}, {transform_indices = @transform_6, window_bounds = array<i64: 1, 1, 128>}, {transform_indices = @transform_7, window_bounds = array<i64: 1, 32, 128>}]} {
    %c0 = arith.constant 0 : index
    %c0_0 = arith.constant 0 : index
    %c0_1 = arith.constant 0 : index
    %0 = vector.load %arg6[%c0, %c0_0, %c0_1] : memref<1x8x128xf32, #tpu.memory_space<vmem>>, vector<1x8x128xf32>
    %1 = vector.shape_cast %0 : vector<1x8x128xf32> to vector<8x128xf32>
    %2 = vector.extract_strided_slice %1 {offsets = [0, 0], sizes = [1, 128], strides = [1, 1]} : vector<8x128xf32> to vector<1x128xf32>
    %cst = arith.constant 7.812500e-03 : f32
    %3 = vector.broadcast %cst : f32 to vector<1x128xf32>
    %4 = arith.mulf %2, %3 : vector<1x128xf32>
    %5 = vector.extract_strided_slice %1 {offsets = [1, 0], sizes = [1, 128], strides = [1, 1]} : vector<8x128xf32> to vector<1x128xf32>
    %cst_2 = arith.constant 7.812500e-03 : f32
    %6 = vector.broadcast %cst_2 : f32 to vector<1x128xf32>
    %7 = arith.mulf %5, %6 : vector<1x128xf32>
    %8 = arith.mulf %4, %4 : vector<1x128xf32>
    %9 = arith.subf %7, %8 : vector<1x128xf32>
    %cst_3 = arith.constant 0.000000e+00 : f32
    %10 = vector.broadcast %cst_3 : f32 to vector<1x128xf32>
    %11 = arith.maximumf %9, %10 : vector<1x128xf32>
    %cst_4 = arith.constant 9.99999974E-6 : f32
    %12 = vector.broadcast %cst_4 : f32 to vector<1x128xf32>
    %13 = arith.addf %11, %12 : vector<1x128xf32>
    %14 = math.rsqrt %13 : vector<1x128xf32>
    %c0_5 = arith.constant 0 : index
    %c0_6 = arith.constant 0 : index
    %c0_7 = arith.constant 0 : index
    %15 = vector.load %arg7[%c0_5, %c0_6, %c0_7] : memref<1x1x128xf32, #tpu.memory_space<vmem>>, vector<1x1x128xf32>
    %16 = vector.shape_cast %15 : vector<1x1x128xf32> to vector<1x128xf32>
    %17 = arith.mulf %14, %16 : vector<1x128xf32>
    %c0_8 = arith.constant 0 : index
    %c0_9 = arith.constant 0 : index
    %c0_10 = arith.constant 0 : index
    %18 = vector.load %arg8[%c0_8, %c0_9, %c0_10] : memref<1x1x128xf32, #tpu.memory_space<vmem>>, vector<1x1x128xf32>
    %19 = vector.shape_cast %18 : vector<1x1x128xf32> to vector<1x128xf32>
    %20 = arith.mulf %4, %17 : vector<1x128xf32>
    %21 = arith.subf %19, %20 : vector<1x128xf32>
    %c0_11 = arith.constant 0 : index
    %c0_12 = arith.constant 0 : index
    %c0_13 = arith.constant 0 : index
    %22 = vector.load %arg2[%c0_11, %c0_12, %c0_13] : memref<1x32x128xbf16, #tpu.memory_space<vmem>>, vector<1x32x128xbf16>
    %23 = vector.shape_cast %22 : vector<1x32x128xbf16> to vector<32x128xbf16>
    %24 = arith.extf %23 : vector<32x128xbf16> to vector<32x128xf32>
    %25 = vector.broadcast %17 : vector<1x128xf32> to vector<32x128xf32>
    %26 = arith.mulf %24, %25 : vector<32x128xf32>
    %27 = vector.broadcast %21 : vector<1x128xf32> to vector<32x128xf32>
    %28 = arith.addf %26, %27 : vector<32x128xf32>
    %cst_14 = arith.constant 0.000000e+00 : f32
    %29 = vector.broadcast %cst_14 : f32 to vector<32x128xf32>
    %30 = arith.maximumf %28, %29 : vector<32x128xf32>
    %c0_15 = arith.constant 0 : index
    %c0_16 = arith.constant 0 : index
    %c0_17 = arith.constant 0 : index
    %31 = vector.load %arg3[%c0_15, %c0_16, %c0_17] : memref<1x32x128xbf16, #tpu.memory_space<vmem>>, vector<1x32x128xbf16>
    %32 = vector.shape_cast %31 : vector<1x32x128xbf16> to vector<32x128xbf16>
    %33 = arith.extf %32 : vector<32x128xbf16> to vector<32x128xf32>
    %34 = vector.broadcast %17 : vector<1x128xf32> to vector<32x128xf32>
    %35 = arith.mulf %33, %34 : vector<32x128xf32>
    %36 = vector.broadcast %21 : vector<1x128xf32> to vector<32x128xf32>
    %37 = arith.addf %35, %36 : vector<32x128xf32>
    %cst_18 = arith.constant 0.000000e+00 : f32
    %38 = vector.broadcast %cst_18 : f32 to vector<32x128xf32>
    %39 = arith.maximumf %37, %38 : vector<32x128xf32>
    %40 = arith.maximumf %30, %39 : vector<32x128xf32>
    %c0_19 = arith.constant 0 : index
    %c0_20 = arith.constant 0 : index
    %c0_21 = arith.constant 0 : index
    %41 = vector.load %arg4[%c0_19, %c0_20, %c0_21] : memref<1x32x128xbf16, #tpu.memory_space<vmem>>, vector<1x32x128xbf16>
    %42 = vector.shape_cast %41 : vector<1x32x128xbf16> to vector<32x128xbf16>
    %43 = arith.extf %42 : vector<32x128xbf16> to vector<32x128xf32>
    %44 = vector.broadcast %17 : vector<1x128xf32> to vector<32x128xf32>
    %45 = arith.mulf %43, %44 : vector<32x128xf32>
    %46 = vector.broadcast %21 : vector<1x128xf32> to vector<32x128xf32>
    %47 = arith.addf %45, %46 : vector<32x128xf32>
    %cst_22 = arith.constant 0.000000e+00 : f32
    %48 = vector.broadcast %cst_22 : f32 to vector<32x128xf32>
    %49 = arith.maximumf %47, %48 : vector<32x128xf32>
    %c0_23 = arith.constant 0 : index
    %c0_24 = arith.constant 0 : index
    %c0_25 = arith.constant 0 : index
    %50 = vector.load %arg5[%c0_23, %c0_24, %c0_25] : memref<1x32x128xbf16, #tpu.memory_space<vmem>>, vector<1x32x128xbf16>
    %51 = vector.shape_cast %50 : vector<1x32x128xbf16> to vector<32x128xbf16>
    %52 = arith.extf %51 : vector<32x128xbf16> to vector<32x128xf32>
    %53 = vector.broadcast %17 : vector<1x128xf32> to vector<32x128xf32>
    %54 = arith.mulf %52, %53 : vector<32x128xf32>
    %55 = vector.broadcast %21 : vector<1x128xf32> to vector<32x128xf32>
    %56 = arith.addf %54, %55 : vector<32x128xf32>
    %cst_26 = arith.constant 0.000000e+00 : f32
    %57 = vector.broadcast %cst_26 : f32 to vector<32x128xf32>
    %58 = arith.maximumf %56, %57 : vector<32x128xf32>
    %59 = arith.maximumf %49, %58 : vector<32x128xf32>
    %60 = arith.maximumf %40, %59 : vector<32x128xf32>
    %61 = arith.truncf %60 : vector<32x128xf32> to vector<32x128xbf16>
    %c0_27 = arith.constant 0 : index
    %c0_28 = arith.constant 0 : index
    %c0_29 = arith.constant 0 : index
    %62 = vector.load %arg9[%c0_27, %c0_28, %c0_29] : memref<1x32x128xbf16, #tpu.memory_space<vmem>>, vector<1x32x128xbf16>
    %63 = vector.shape_cast %62 : vector<1x32x128xbf16> to vector<32x128xbf16>
    %64 = vector.shape_cast %61 : vector<32x128xbf16> to vector<1x32x128xbf16>
    tpu.vector_store %arg9[%c0_27, %c0_28, %c0_29], %64 {strides = array<i32>} : memref<1x32x128xbf16, #tpu.memory_space<vmem>>, vector<1x32x128xbf16>,
    return
  }
  func.func @transform_0(%arg0: i32, %arg1: i32) -> (i32, i32, i32) {
    %c0_i32 = arith.constant 0 : i32
    %0 = arith.addi %arg1, %c0_i32 : i32
    %c0_i32_0 = arith.constant 0 : i32
    %c0_i32_1 = arith.constant 0 : i32
    return %arg0, %0, %c0_i32_0 : i32, i32, i32
  }
  func.func @transform_1(%arg0: i32, %arg1: i32) -> (i32, i32, i32) {
    %c1_i32 = arith.constant 1 : i32
    %0 = arith.addi %arg1, %c1_i32 : i32
    %c0_i32 = arith.constant 0 : i32
    %c0_i32_0 = arith.constant 0 : i32
    return %arg0, %0, %c0_i32 : i32, i32, i32
  }
  func.func @transform_2(%arg0: i32, %arg1: i32) -> (i32, i32, i32) {
    %c2_i32 = arith.constant 2 : i32
    %0 = arith.addi %arg1, %c2_i32 : i32
    %c0_i32 = arith.constant 0 : i32
    %c0_i32_0 = arith.constant 0 : i32
    return %arg0, %0, %c0_i32 : i32, i32, i32
  }
  func.func @transform_3(%arg0: i32, %arg1: i32) -> (i32, i32, i32) {
    %c3_i32 = arith.constant 3 : i32
    %0 = arith.addi %arg1, %c3_i32 : i32
    %c0_i32 = arith.constant 0 : i32
    %c0_i32_0 = arith.constant 0 : i32
    return %arg0, %0, %c0_i32 : i32, i32, i32
  }
  func.func @transform_4(%arg0: i32, %arg1: i32) -> (i32, i32, i32) {
    %c0_i32 = arith.constant 0 : i32
    %c0_i32_0 = arith.constant 0 : i32
    %c0_i32_1 = arith.constant 0 : i32
    return %arg0, %c0_i32, %c0_i32_0 : i32, i32, i32
  }
  func.func @transform_5(%arg0: i32, %arg1: i32) -> (i32, i32, i32) {
    %c0_i32 = arith.constant 0 : i32
    %c0_i32_0 = arith.constant 0 : i32
    %c0_i32_1 = arith.constant 0 : i32
    return %arg0, %c0_i32, %c0_i32_0 : i32, i32, i32
  }
  func.func @transform_6(%arg0: i32, %arg1: i32) -> (i32, i32, i32) {
    %c0_i32 = arith.constant 0 : i32
    %c0_i32_0 = arith.constant 0 : i32
    %c0_i32_1 = arith.constant 0 : i32
    return %arg0, %c0_i32, %c0_i32_0 : i32, i32, i32
  }
  func.func @transform_7(%arg0: i32, %arg1: i32) -> (i32, i32, i32) {
    %c0_i32 = arith.constant 0 : i32
    %c0_i32_0 = arith.constant 0 : i32
    return %arg0, %arg1, %c0_i32 : i32, i32, i32
  }
}

module attributes {stable_mosaic.version = 11 : i64} {
  func.func @_heads_kernel(%arg0: i32, %arg1: memref<16x1024xbf16, #tpu.memory_space<vmem>>, %arg2: memref<16x1024xbf16, #tpu.memory_space<vmem>>, %arg3: memref<16x64xf32, #tpu.memory_space<vmem>>, %arg4: memref<16x64xf32, #tpu.memory_space<vmem>>, %arg5: memref<16x64xf32, #tpu.memory_space<vmem>>, %arg6: memref<16x64xf32, #tpu.memory_space<vmem>>, %arg7: memref<1024x512xbf16, #tpu.memory_space<vmem>>, %arg8: memref<1x512xf32, #tpu.memory_space<vmem>>, %arg9: memref<256x64xf32, #tpu.memory_space<vmem>>, %arg10: memref<1x64xf32, #tpu.memory_space<vmem>>, %arg11: memref<256x64xf32, #tpu.memory_space<vmem>>, %arg12: memref<1x64xf32, #tpu.memory_space<vmem>>, %arg13: memref<64x8xf32, #tpu.memory_space<vmem>>, %arg14: memref<1x8xf32, #tpu.memory_space<vmem>>, %arg15: memref<64x256xf32, #tpu.memory_space<vmem>>, %arg16: memref<1x256xf32, #tpu.memory_space<vmem>>, %arg17: memref<256x64xf32, #tpu.memory_space<vmem>>, %arg18: memref<1x64xf32, #tpu.memory_space<vmem>>, %arg19: memref<64x256xf32, #tpu.memory_space<vmem>>, %arg20: memref<1x256xf32, #tpu.memory_space<vmem>>, %arg21: memref<256x64xf32, #tpu.memory_space<vmem>>, %arg22: memref<1x64xf32, #tpu.memory_space<vmem>>, %arg23: memref<1024x256xbf16, #tpu.memory_space<vmem>>, %arg24: memref<1x256xf32, #tpu.memory_space<vmem>>, %arg25: memref<256x10xf32, #tpu.memory_space<vmem>>, %arg26: memref<64x10xf32, #tpu.memory_space<vmem>>, %arg27: memref<1x10xf32, #tpu.memory_space<vmem>>, %arg28: memref<16x64xf32, #tpu.memory_space<vmem>>, %arg29: memref<16x64xf32, #tpu.memory_space<vmem>>, %arg30: memref<16x64xf32, #tpu.memory_space<vmem>>, %arg31: memref<16x64xf32, #tpu.memory_space<vmem>>, %arg32: memref<16x8xf32, #tpu.memory_space<vmem>>, %arg33: memref<16x10xf32, #tpu.memory_space<vmem>>) attributes {dimension_semantics = [#tpu.dimension_semantics<parallel>], iteration_bounds = array<i64: 1>, scalar_prefetch = 0 : i64, scratch_operands = 0 : i64, tpu.core_type = #tpu.core_type<tc>, window_params = [{transform_indices = @transform_0, window_bounds = array<i64: 16, 1024>}, {transform_indices = @transform_1, window_bounds = array<i64: 16, 1024>}, {transform_indices = @transform_2, window_bounds = array<i64: 16, 64>}, {transform_indices = @transform_3, window_bounds = array<i64: 16, 64>}, {transform_indices = @transform_4, window_bounds = array<i64: 16, 64>}, {transform_indices = @transform_5, window_bounds = array<i64: 16, 64>}, {pipeline_mode = #tpu.pipeline_mode<synchronous>, transform_indices = @transform_6, window_bounds = array<i64: 1024, 512>}, {pipeline_mode = #tpu.pipeline_mode<synchronous>, transform_indices = @transform_7, window_bounds = array<i64: 1, 512>}, {pipeline_mode = #tpu.pipeline_mode<synchronous>, transform_indices = @transform_8, window_bounds = array<i64: 256, 64>}, {pipeline_mode = #tpu.pipeline_mode<synchronous>, transform_indices = @transform_9, window_bounds = array<i64: 1, 64>}, {pipeline_mode = #tpu.pipeline_mode<synchronous>, transform_indices = @transform_10, window_bounds = array<i64: 256, 64>}, {pipeline_mode = #tpu.pipeline_mode<synchronous>, transform_indices = @transform_11, window_bounds = array<i64: 1, 64>}, {pipeline_mode = #tpu.pipeline_mode<synchronous>, transform_indices = @transform_12, window_bounds = array<i64: 64, 8>}, {pipeline_mode = #tpu.pipeline_mode<synchronous>, transform_indices = @transform_13, window_bounds = array<i64: 1, 8>}, {pipeline_mode = #tpu.pipeline_mode<synchronous>, transform_indices = @transform_14, window_bounds = array<i64: 64, 256>}, {pipeline_mode = #tpu.pipeline_mode<synchronous>, transform_indices = @transform_15, window_bounds = array<i64: 1, 256>}, {pipeline_mode = #tpu.pipeline_mode<synchronous>, transform_indices = @transform_16, window_bounds = array<i64: 256, 64>}, {pipeline_mode = #tpu.pipeline_mode<synchronous>, transform_indices = @transform_17, window_bounds = array<i64: 1, 64>}, {pipeline_mode = #tpu.pipeline_mode<synchronous>, transform_indices = @transform_18, window_bounds = array<i64: 64, 256>}, {pipeline_mode = #tpu.pipeline_mode<synchronous>, transform_indices = @transform_19, window_bounds = array<i64: 1, 256>}, {pipeline_mode = #tpu.pipeline_mode<synchronous>, transform_indices = @transform_20, window_bounds = array<i64: 256, 64>}, {pipeline_mode = #tpu.pipeline_mode<synchronous>, transform_indices = @transform_21, window_bounds = array<i64: 1, 64>}, {pipeline_mode = #tpu.pipeline_mode<synchronous>, transform_indices = @transform_22, window_bounds = array<i64: 1024, 256>}, {pipeline_mode = #tpu.pipeline_mode<synchronous>, transform_indices = @transform_23, window_bounds = array<i64: 1, 256>}, {pipeline_mode = #tpu.pipeline_mode<synchronous>, transform_indices = @transform_24, window_bounds = array<i64: 256, 10>}, {pipeline_mode = #tpu.pipeline_mode<synchronous>, transform_indices = @transform_25, window_bounds = array<i64: 64, 10>}, {pipeline_mode = #tpu.pipeline_mode<synchronous>, transform_indices = @transform_26, window_bounds = array<i64: 1, 10>}, {transform_indices = @transform_27, window_bounds = array<i64: 16, 64>}, {transform_indices = @transform_28, window_bounds = array<i64: 16, 64>}, {transform_indices = @transform_29, window_bounds = array<i64: 16, 64>}, {transform_indices = @transform_30, window_bounds = array<i64: 16, 64>}, {transform_indices = @transform_31, window_bounds = array<i64: 16, 8>}, {transform_indices = @transform_32, window_bounds = array<i64: 16, 10>}]} {
    %c0 = arith.constant 0 : index
    %c0_0 = arith.constant 0 : index
    %0 = vector.load %arg1[%c0, %c0_0] : memref<16x1024xbf16, #tpu.memory_space<vmem>>, vector<16x1024xbf16>
    %c0_1 = arith.constant 0 : index
    %c0_2 = arith.constant 0 : index
    %1 = vector.load %arg7[%c0_1, %c0_2] : memref<1024x512xbf16, #tpu.memory_space<vmem>>, vector<1024x512xbf16>
    %cst = arith.constant dense<0.000000e+00> : vector<16x512xf32>
    %2 = tpu.matmul %0, %1, %cst {dimension_numbers = #tpu.dot_dimension_numbers<[1], [0], [0], [1], [0, 0, 1, 1], [], []>} : vector<16x1024xbf16>, vector<1024x512xbf16>, vector<16x512xf32> -> vector<16x512xf32>
    %c0_3 = arith.constant 0 : index
    %c0_4 = arith.constant 0 : index
    %3 = vector.load %arg8[%c0_3, %c0_4] : memref<1x512xf32, #tpu.memory_space<vmem>>, vector<1x512xf32>
    %4 = vector.broadcast %3 : vector<1x512xf32> to vector<16x512xf32>
    %5 = arith.addf %2, %4 : vector<16x512xf32>
    %6 = vector.extract_strided_slice %5 {offsets = [0, 0], sizes = [16, 256], strides = [1, 1]} : vector<16x512xf32> to vector<16x256xf32>
    %cst_5 = arith.constant 0.000000e+00 : f32
    %7 = vector.broadcast %cst_5 : f32 to vector<16x256xf32>
    %8 = arith.maximumf %6, %7 : vector<16x256xf32>
    %9 = vector.extract_strided_slice %5 {offsets = [0, 256], sizes = [16, 256], strides = [1, 1]} : vector<16x512xf32> to vector<16x256xf32>
    %c0_6 = arith.constant 0 : index
    %c0_7 = arith.constant 0 : index
    %10 = vector.load %arg9[%c0_6, %c0_7] : memref<256x64xf32, #tpu.memory_space<vmem>>, vector<256x64xf32>
    %cst_8 = arith.constant dense<0.000000e+00> : vector<16x64xf32>
    %11 = tpu.matmul %8, %10, %cst_8 {dimension_numbers = #tpu.dot_dimension_numbers<[1], [0], [0], [1], [0, 0, 1, 1], [], []>} : vector<16x256xf32>, vector<256x64xf32>, vector<16x64xf32> -> vector<16x64xf32>
    %c0_9 = arith.constant 0 : index
    %c0_10 = arith.constant 0 : index
    %12 = vector.load %arg10[%c0_9, %c0_10] : memref<1x64xf32, #tpu.memory_space<vmem>>, vector<1x64xf32>
    %13 = vector.broadcast %12 : vector<1x64xf32> to vector<16x64xf32>
    %14 = arith.addf %11, %13 : vector<16x64xf32>
    %c0_11 = arith.constant 0 : index
    %c0_12 = arith.constant 0 : index
    %15 = vector.load %arg11[%c0_11, %c0_12] : memref<256x64xf32, #tpu.memory_space<vmem>>, vector<256x64xf32>
    %cst_13 = arith.constant dense<0.000000e+00> : vector<16x64xf32>
    %16 = tpu.matmul %9, %15, %cst_13 {dimension_numbers = #tpu.dot_dimension_numbers<[1], [0], [0], [1], [0, 0, 1, 1], [], []>} : vector<16x256xf32>, vector<256x64xf32>, vector<16x64xf32> -> vector<16x64xf32>
    %c0_14 = arith.constant 0 : index
    %c0_15 = arith.constant 0 : index
    %17 = vector.load %arg12[%c0_14, %c0_15] : memref<1x64xf32, #tpu.memory_space<vmem>>, vector<1x64xf32>
    %18 = vector.broadcast %17 : vector<1x64xf32> to vector<16x64xf32>
    %19 = arith.addf %16, %18 : vector<16x64xf32>
    %cst_16 = arith.constant 0.000000e+00 : f32
    %20 = vector.broadcast %cst_16 : f32 to vector<16x64xf32>
    %21 = arith.maximumf %19, %20 : vector<16x64xf32>
    %cst_17 = arith.constant 5.000000e-01 : f32
    %22 = vector.broadcast %cst_17 : f32 to vector<16x64xf32>
    %23 = arith.mulf %22, %21 : vector<16x64xf32>
    %24 = math.exp %23 : vector<16x64xf32>
    %c0_18 = arith.constant 0 : index
    %c0_19 = arith.constant 0 : index
    %25 = vector.load %arg3[%c0_18, %c0_19] : memref<16x64xf32, #tpu.memory_space<vmem>>, vector<16x64xf32>
    %26 = arith.mulf %24, %25 : vector<16x64xf32>
    %27 = arith.addf %14, %26 : vector<16x64xf32>
    %c0_20 = arith.constant 0 : index
    %c0_21 = arith.constant 0 : index
    %28 = vector.load %arg13[%c0_20, %c0_21] : memref<64x8xf32, #tpu.memory_space<vmem>>, vector<64x8xf32>
    %cst_22 = arith.constant dense<0.000000e+00> : vector<16x8xf32>
    %29 = tpu.matmul %27, %28, %cst_22 {dimension_numbers = #tpu.dot_dimension_numbers<[1], [0], [0], [1], [0, 0, 1, 1], [], []>} : vector<16x64xf32>, vector<64x8xf32>, vector<16x8xf32> -> vector<16x8xf32>
    %c0_23 = arith.constant 0 : index
    %c0_24 = arith.constant 0 : index
    %30 = vector.load %arg14[%c0_23, %c0_24] : memref<1x8xf32, #tpu.memory_space<vmem>>, vector<1x8xf32>
    %31 = vector.broadcast %30 : vector<1x8xf32> to vector<16x8xf32>
    %32 = arith.addf %29, %31 : vector<16x8xf32>
    %c0_25 = arith.constant 0 : index
    %c0_26 = arith.constant 0 : index
    %33 = vector.load %arg5[%c0_25, %c0_26] : memref<16x64xf32, #tpu.memory_space<vmem>>, vector<16x64xf32>
    %34 = arith.mulf %14, %33 : vector<16x64xf32>
    %c0_27 = arith.constant 0 : index
    %c0_28 = arith.constant 0 : index
    %35 = vector.load %arg6[%c0_27, %c0_28] : memref<16x64xf32, #tpu.memory_space<vmem>>, vector<16x64xf32>
    %36 = arith.mulf %24, %35 : vector<16x64xf32>
    %c0_29 = arith.constant 0 : index
    %c0_30 = arith.constant 0 : index
    %37 = vector.load %arg15[%c0_29, %c0_30] : memref<64x256xf32, #tpu.memory_space<vmem>>, vector<64x256xf32>
    %cst_31 = arith.constant dense<0.000000e+00> : vector<16x256xf32>
    %38 = tpu.matmul %34, %37, %cst_31 {dimension_numbers = #tpu.dot_dimension_numbers<[1], [0], [0], [1], [0, 0, 1, 1], [], []>} : vector<16x64xf32>, vector<64x256xf32>, vector<16x256xf32> -> vector<16x256xf32>
    %c0_32 = arith.constant 0 : index
    %c0_33 = arith.constant 0 : index
    %39 = vector.load %arg16[%c0_32, %c0_33] : memref<1x256xf32, #tpu.memory_space<vmem>>, vector<1x256xf32>
    %40 = vector.broadcast %39 : vector<1x256xf32> to vector<16x256xf32>
    %41 = arith.addf %38, %40 : vector<16x256xf32>
    %cst_34 = arith.constant 0.000000e+00 : f32
    %42 = vector.broadcast %cst_34 : f32 to vector<16x256xf32>
    %43 = arith.maximumf %41, %42 : vector<16x256xf32>
    %c0_35 = arith.constant 0 : index
    %c0_36 = arith.constant 0 : index
    %44 = vector.load %arg17[%c0_35, %c0_36] : memref<256x64xf32, #tpu.memory_space<vmem>>, vector<256x64xf32>
    %cst_37 = arith.constant dense<0.000000e+00> : vector<16x64xf32>
    %45 = tpu.matmul %43, %44, %cst_37 {dimension_numbers = #tpu.dot_dimension_numbers<[1], [0], [0], [1], [0, 0, 1, 1], [], []>} : vector<16x256xf32>, vector<256x64xf32>, vector<16x64xf32> -> vector<16x64xf32>
    %c0_38 = arith.constant 0 : index
    %c0_39 = arith.constant 0 : index
    %46 = vector.load %arg18[%c0_38, %c0_39] : memref<1x64xf32, #tpu.memory_space<vmem>>, vector<1x64xf32>
    %47 = vector.broadcast %46 : vector<1x64xf32> to vector<16x64xf32>
    %48 = arith.addf %45, %47 : vector<16x64xf32>
    %cst_40 = arith.constant 0.000000e+00 : f32
    %49 = vector.broadcast %cst_40 : f32 to vector<16x64xf32>
    %50 = arith.maximumf %48, %49 : vector<16x64xf32>
    %c0_41 = arith.constant 0 : index
    %c0_42 = arith.constant 0 : index
    %51 = vector.load %arg19[%c0_41, %c0_42] : memref<64x256xf32, #tpu.memory_space<vmem>>, vector<64x256xf32>
    %cst_43 = arith.constant dense<0.000000e+00> : vector<16x256xf32>
    %52 = tpu.matmul %36, %51, %cst_43 {dimension_numbers = #tpu.dot_dimension_numbers<[1], [0], [0], [1], [0, 0, 1, 1], [], []>} : vector<16x64xf32>, vector<64x256xf32>, vector<16x256xf32> -> vector<16x256xf32>
    %c0_44 = arith.constant 0 : index
    %c0_45 = arith.constant 0 : index
    %53 = vector.load %arg20[%c0_44, %c0_45] : memref<1x256xf32, #tpu.memory_space<vmem>>, vector<1x256xf32>
    %54 = vector.broadcast %53 : vector<1x256xf32> to vector<16x256xf32>
    %55 = arith.addf %52, %54 : vector<16x256xf32>
    %cst_46 = arith.constant 0.000000e+00 : f32
    %56 = vector.broadcast %cst_46 : f32 to vector<16x256xf32>
    %57 = arith.maximumf %55, %56 : vector<16x256xf32>
    %c0_47 = arith.constant 0 : index
    %c0_48 = arith.constant 0 : index
    %58 = vector.load %arg21[%c0_47, %c0_48] : memref<256x64xf32, #tpu.memory_space<vmem>>, vector<256x64xf32>
    %cst_49 = arith.constant dense<0.000000e+00> : vector<16x64xf32>
    %59 = tpu.matmul %57, %58, %cst_49 {dimension_numbers = #tpu.dot_dimension_numbers<[1], [0], [0], [1], [0, 0, 1, 1], [], []>} : vector<16x256xf32>, vector<256x64xf32>, vector<16x64xf32> -> vector<16x64xf32>
    %c0_50 = arith.constant 0 : index
    %c0_51 = arith.constant 0 : index
    %60 = vector.load %arg22[%c0_50, %c0_51] : memref<1x64xf32, #tpu.memory_space<vmem>>, vector<1x64xf32>
    %61 = vector.broadcast %60 : vector<1x64xf32> to vector<16x64xf32>
    %62 = arith.addf %59, %61 : vector<16x64xf32>
    %cst_52 = arith.constant 0.000000e+00 : f32
    %63 = vector.broadcast %cst_52 : f32 to vector<16x64xf32>
    %64 = arith.maximumf %62, %63 : vector<16x64xf32>
    %cst_53 = arith.constant 5.000000e-01 : f32
    %65 = vector.broadcast %cst_53 : f32 to vector<16x64xf32>
    %66 = arith.mulf %65, %64 : vector<16x64xf32>
    %67 = math.exp %66 : vector<16x64xf32>
    %c0_54 = arith.constant 0 : index
    %c0_55 = arith.constant 0 : index
    %68 = vector.load %arg4[%c0_54, %c0_55] : memref<16x64xf32, #tpu.memory_space<vmem>>, vector<16x64xf32>
    %69 = arith.mulf %67, %68 : vector<16x64xf32>
    %70 = arith.addf %50, %69 : vector<16x64xf32>
    %c0_56 = arith.constant 0 : index
    %c0_57 = arith.constant 0 : index
    %71 = vector.load %arg2[%c0_56, %c0_57] : memref<16x1024xbf16, #tpu.memory_space<vmem>>, vector<16x1024xbf16>
    %c0_58 = arith.constant 0 : index
    %c0_59 = arith.constant 0 : index
    %72 = vector.load %arg23[%c0_58, %c0_59] : memref<1024x256xbf16, #tpu.memory_space<vmem>>, vector<1024x256xbf16>
    %cst_60 = arith.constant dense<0.000000e+00> : vector<16x256xf32>
    %73 = tpu.matmul %71, %72, %cst_60 {dimension_numbers = #tpu.dot_dimension_numbers<[1], [0], [0], [1], [0, 0, 1, 1], [], []>} : vector<16x1024xbf16>, vector<1024x256xbf16>, vector<16x256xf32> -> vector<16x256xf32>
    %c0_61 = arith.constant 0 : index
    %c0_62 = arith.constant 0 : index
    %74 = vector.load %arg24[%c0_61, %c0_62] : memref<1x256xf32, #tpu.memory_space<vmem>>, vector<1x256xf32>
    %75 = vector.broadcast %74 : vector<1x256xf32> to vector<16x256xf32>
    %76 = arith.addf %73, %75 : vector<16x256xf32>
    %cst_63 = arith.constant 0.000000e+00 : f32
    %77 = vector.broadcast %cst_63 : f32 to vector<16x256xf32>
    %78 = arith.maximumf %76, %77 : vector<16x256xf32>
    %c0_64 = arith.constant 0 : index
    %c0_65 = arith.constant 0 : index
    %79 = vector.load %arg25[%c0_64, %c0_65] : memref<256x10xf32, #tpu.memory_space<vmem>>, vector<256x10xf32>
    %cst_66 = arith.constant dense<0.000000e+00> : vector<16x10xf32>
    %80 = tpu.matmul %78, %79, %cst_66 {dimension_numbers = #tpu.dot_dimension_numbers<[1], [0], [0], [1], [0, 0, 1, 1], [], []>} : vector<16x256xf32>, vector<256x10xf32>, vector<16x10xf32> -> vector<16x10xf32>
    %c0_67 = arith.constant 0 : index
    %c0_68 = arith.constant 0 : index
    %81 = vector.load %arg26[%c0_67, %c0_68] : memref<64x10xf32, #tpu.memory_space<vmem>>, vector<64x10xf32>
    %cst_69 = arith.constant dense<0.000000e+00> : vector<16x10xf32>
    %82 = tpu.matmul %70, %81, %cst_69 {dimension_numbers = #tpu.dot_dimension_numbers<[1], [0], [0], [1], [0, 0, 1, 1], [], []>} : vector<16x64xf32>, vector<64x10xf32>, vector<16x10xf32> -> vector<16x10xf32>
    %83 = arith.addf %80, %82 : vector<16x10xf32>
    %c0_70 = arith.constant 0 : index
    %c0_71 = arith.constant 0 : index
    %84 = vector.load %arg27[%c0_70, %c0_71] : memref<1x10xf32, #tpu.memory_space<vmem>>, vector<1x10xf32>
    %85 = vector.broadcast %84 : vector<1x10xf32> to vector<16x10xf32>
    %86 = arith.addf %83, %85 : vector<16x10xf32>
    %c0_72 = arith.constant 0 : index
    %c0_73 = arith.constant 0 : index
    %87 = vector.load %arg28[%c0_72, %c0_73] : memref<16x64xf32, #tpu.memory_space<vmem>>, vector<16x64xf32>
    tpu.vector_store %arg28[%c0_72, %c0_73], %14 {strides = array<i32>} : memref<16x64xf32, #tpu.memory_space<vmem>>, vector<16x64xf32>,
    %c0_74 = arith.constant 0 : index
    %c0_75 = arith.constant 0 : index
    %88 = vector.load %arg29[%c0_74, %c0_75] : memref<16x64xf32, #tpu.memory_space<vmem>>, vector<16x64xf32>
    tpu.vector_store %arg29[%c0_74, %c0_75], %24 {strides = array<i32>} : memref<16x64xf32, #tpu.memory_space<vmem>>, vector<16x64xf32>,
    %c0_76 = arith.constant 0 : index
    %c0_77 = arith.constant 0 : index
    %89 = vector.load %arg30[%c0_76, %c0_77] : memref<16x64xf32, #tpu.memory_space<vmem>>, vector<16x64xf32>
    tpu.vector_store %arg30[%c0_76, %c0_77], %50 {strides = array<i32>} : memref<16x64xf32, #tpu.memory_space<vmem>>, vector<16x64xf32>,
    %c0_78 = arith.constant 0 : index
    %c0_79 = arith.constant 0 : index
    %90 = vector.load %arg31[%c0_78, %c0_79] : memref<16x64xf32, #tpu.memory_space<vmem>>, vector<16x64xf32>
    tpu.vector_store %arg31[%c0_78, %c0_79], %67 {strides = array<i32>} : memref<16x64xf32, #tpu.memory_space<vmem>>, vector<16x64xf32>,
    %c0_80 = arith.constant 0 : index
    %c0_81 = arith.constant 0 : index
    %91 = vector.load %arg32[%c0_80, %c0_81] : memref<16x8xf32, #tpu.memory_space<vmem>>, vector<16x8xf32>
    tpu.vector_store %arg32[%c0_80, %c0_81], %32 {strides = array<i32>} : memref<16x8xf32, #tpu.memory_space<vmem>>, vector<16x8xf32>,
    %c0_82 = arith.constant 0 : index
    %c0_83 = arith.constant 0 : index
    %92 = vector.load %arg33[%c0_82, %c0_83] : memref<16x10xf32, #tpu.memory_space<vmem>>, vector<16x10xf32>
    tpu.vector_store %arg33[%c0_82, %c0_83], %86 {strides = array<i32>} : memref<16x10xf32, #tpu.memory_space<vmem>>, vector<16x10xf32>,
    return
  }
  func.func @transform_0(%arg0: i32) -> (i32, i32) {
    %c0_i32 = arith.constant 0 : i32
    %c0_i32_0 = arith.constant 0 : i32
    return %arg0, %c0_i32 : i32, i32
  }
  func.func @transform_1(%arg0: i32) -> (i32, i32) {
    %c0_i32 = arith.constant 0 : i32
    %c0_i32_0 = arith.constant 0 : i32
    return %arg0, %c0_i32 : i32, i32
  }
  func.func @transform_2(%arg0: i32) -> (i32, i32) {
    %c0_i32 = arith.constant 0 : i32
    %c0_i32_0 = arith.constant 0 : i32
    return %arg0, %c0_i32 : i32, i32
  }
  func.func @transform_3(%arg0: i32) -> (i32, i32) {
    %c0_i32 = arith.constant 0 : i32
    %c0_i32_0 = arith.constant 0 : i32
    return %arg0, %c0_i32 : i32, i32
  }
  func.func @transform_4(%arg0: i32) -> (i32, i32) {
    %c0_i32 = arith.constant 0 : i32
    %c0_i32_0 = arith.constant 0 : i32
    return %arg0, %c0_i32 : i32, i32
  }
  func.func @transform_5(%arg0: i32) -> (i32, i32) {
    %c0_i32 = arith.constant 0 : i32
    %c0_i32_0 = arith.constant 0 : i32
    return %arg0, %c0_i32 : i32, i32
  }
  func.func @transform_6(%arg0: i32) -> (i32, i32) {
    %c0_i32 = arith.constant 0 : i32
    %c0_i32_0 = arith.constant 0 : i32
    %c0_i32_1 = arith.constant 0 : i32
    return %c0_i32, %c0_i32_0 : i32, i32
  }
  func.func @transform_7(%arg0: i32) -> (i32, i32) {
    %c0_i32 = arith.constant 0 : i32
    %c0_i32_0 = arith.constant 0 : i32
    %c0_i32_1 = arith.constant 0 : i32
    return %c0_i32, %c0_i32_0 : i32, i32
  }
  func.func @transform_8(%arg0: i32) -> (i32, i32) {
    %c0_i32 = arith.constant 0 : i32
    %c0_i32_0 = arith.constant 0 : i32
    %c0_i32_1 = arith.constant 0 : i32
    return %c0_i32, %c0_i32_0 : i32, i32
  }
  func.func @transform_9(%arg0: i32) -> (i32, i32) {
    %c0_i32 = arith.constant 0 : i32
    %c0_i32_0 = arith.constant 0 : i32
    %c0_i32_1 = arith.constant 0 : i32
    return %c0_i32, %c0_i32_0 : i32, i32
  }
  func.func @transform_10(%arg0: i32) -> (i32, i32) {
    %c0_i32 = arith.constant 0 : i32
    %c0_i32_0 = arith.constant 0 : i32
    %c0_i32_1 = arith.constant 0 : i32
    return %c0_i32, %c0_i32_0 : i32, i32
  }
  func.func @transform_11(%arg0: i32) -> (i32, i32) {
    %c0_i32 = arith.constant 0 : i32
    %c0_i32_0 = arith.constant 0 : i32
    %c0_i32_1 = arith.constant 0 : i32
    return %c0_i32, %c0_i32_0 : i32, i32
  }
  func.func @transform_12(%arg0: i32) -> (i32, i32) {
    %c0_i32 = arith.constant 0 : i32
    %c0_i32_0 = arith.constant 0 : i32
    %c0_i32_1 = arith.constant 0 : i32
    return %c0_i32, %c0_i32_0 : i32, i32
  }
  func.func @transform_13(%arg0: i32) -> (i32, i32) {
    %c0_i32 = arith.constant 0 : i32
    %c0_i32_0 = arith.constant 0 : i32
    %c0_i32_1 = arith.constant 0 : i32
    return %c0_i32, %c0_i32_0 : i32, i32
  }
  func.func @transform_14(%arg0: i32) -> (i32, i32) {
    %c0_i32 = arith.constant 0 : i32
    %c0_i32_0 = arith.constant 0 : i32
    %c0_i32_1 = arith.constant 0 : i32
    return %c0_i32, %c0_i32_0 : i32, i32
  }
  func.func @transform_15(%arg0: i32) -> (i32, i32) {
    %c0_i32 = arith.constant 0 : i32
    %c0_i32_0 = arith.constant 0 : i32
    %c0_i32_1 = arith.constant 0 : i32
    return %c0_i32, %c0_i32_0 : i32, i32
  }
  func.func @transform_16(%arg0: i32) -> (i32, i32) {
    %c0_i32 = arith.constant 0 : i32
    %c0_i32_0 = arith.constant 0 : i32
    %c0_i32_1 = arith.constant 0 : i32
    return %c0_i32, %c0_i32_0 : i32, i32
  }
  func.func @transform_17(%arg0: i32) -> (i32, i32) {
    %c0_i32 = arith.constant 0 : i32
    %c0_i32_0 = arith.constant 0 : i32
    %c0_i32_1 = arith.constant 0 : i32
    return %c0_i32, %c0_i32_0 : i32, i32
  }
  func.func @transform_18(%arg0: i32) -> (i32, i32) {
    %c0_i32 = arith.constant 0 : i32
    %c0_i32_0 = arith.constant 0 : i32
    %c0_i32_1 = arith.constant 0 : i32
    return %c0_i32, %c0_i32_0 : i32, i32
  }
  func.func @transform_19(%arg0: i32) -> (i32, i32) {
    %c0_i32 = arith.constant 0 : i32
    %c0_i32_0 = arith.constant 0 : i32
    %c0_i32_1 = arith.constant 0 : i32
    return %c0_i32, %c0_i32_0 : i32, i32
  }
  func.func @transform_20(%arg0: i32) -> (i32, i32) {
    %c0_i32 = arith.constant 0 : i32
    %c0_i32_0 = arith.constant 0 : i32
    %c0_i32_1 = arith.constant 0 : i32
    return %c0_i32, %c0_i32_0 : i32, i32
  }
  func.func @transform_21(%arg0: i32) -> (i32, i32) {
    %c0_i32 = arith.constant 0 : i32
    %c0_i32_0 = arith.constant 0 : i32
    %c0_i32_1 = arith.constant 0 : i32
    return %c0_i32, %c0_i32_0 : i32, i32
  }
  func.func @transform_22(%arg0: i32) -> (i32, i32) {
    %c0_i32 = arith.constant 0 : i32
    %c0_i32_0 = arith.constant 0 : i32
    %c0_i32_1 = arith.constant 0 : i32
    return %c0_i32, %c0_i32_0 : i32, i32
  }
  func.func @transform_23(%arg0: i32) -> (i32, i32) {
    %c0_i32 = arith.constant 0 : i32
    %c0_i32_0 = arith.constant 0 : i32
    %c0_i32_1 = arith.constant 0 : i32
    return %c0_i32, %c0_i32_0 : i32, i32
  }
  func.func @transform_24(%arg0: i32) -> (i32, i32) {
    %c0_i32 = arith.constant 0 : i32
    %c0_i32_0 = arith.constant 0 : i32
    %c0_i32_1 = arith.constant 0 : i32
    return %c0_i32, %c0_i32_0 : i32, i32
  }
  func.func @transform_25(%arg0: i32) -> (i32, i32) {
    %c0_i32 = arith.constant 0 : i32
    %c0_i32_0 = arith.constant 0 : i32
    %c0_i32_1 = arith.constant 0 : i32
    return %c0_i32, %c0_i32_0 : i32, i32
  }
  func.func @transform_26(%arg0: i32) -> (i32, i32) {
    %c0_i32 = arith.constant 0 : i32
    %c0_i32_0 = arith.constant 0 : i32
    %c0_i32_1 = arith.constant 0 : i32
    return %c0_i32, %c0_i32_0 : i32, i32
  }
  func.func @transform_27(%arg0: i32) -> (i32, i32) {
    %c0_i32 = arith.constant 0 : i32
    %c0_i32_0 = arith.constant 0 : i32
    return %arg0, %c0_i32 : i32, i32
  }
  func.func @transform_28(%arg0: i32) -> (i32, i32) {
    %c0_i32 = arith.constant 0 : i32
    %c0_i32_0 = arith.constant 0 : i32
    return %arg0, %c0_i32 : i32, i32
  }
  func.func @transform_29(%arg0: i32) -> (i32, i32) {
    %c0_i32 = arith.constant 0 : i32
    %c0_i32_0 = arith.constant 0 : i32
    return %arg0, %c0_i32 : i32, i32
  }
  func.func @transform_30(%arg0: i32) -> (i32, i32) {
    %c0_i32 = arith.constant 0 : i32
    %c0_i32_0 = arith.constant 0 : i32
    return %arg0, %c0_i32 : i32, i32
  }
  func.func @transform_31(%arg0: i32) -> (i32, i32) {
    %c0_i32 = arith.constant 0 : i32
    %c0_i32_0 = arith.constant 0 : i32
    return %arg0, %c0_i32 : i32, i32
  }
  func.func @transform_32(%arg0: i32) -> (i32, i32) {
    %c0_i32 = arith.constant 0 : i32
    %c0_i32_0 = arith.constant 0 : i32
    return %arg0, %c0_i32 : i32, i32
  }
}

</mosaic_0001>

<bundles_post_ra>
// kernel: jvinet_forward.7
= control target key start
LH: loop header
LB: loop body
LE: loop exit
PB: predicated region body
PF: predicated region fallthrough
CT: control target
= control target key end

     0   :  { %s2358_s12 = smov 0   ;;  %s2360_s13 = smov 0   ;;  %s2740_s0 = inlined_call_operand.vmem [shape: bf16[1,1152,32], index: 0, kind: input, shape index: {}]   ;;  %s2741_s1 = inlined_call_operand.vmem [shape: bf16[1,32,128], index: 1, kind: input, shape index: {}]   ;;  %s2742_s2 = inlined_call_operand.vmem [shape: bf16[1,1152,128], index: 2, kind: output, shape index: {0}]   ;;  %s2743_s3 = inlined_call_operand.vmem [shape: f32[1,16,128], index: 3, kind: output, shape index: {1}]  }
   0x1   :  { %s2362_s14 = smov 0  }
   0x2 LB: > { %s23_s15 = sadd.s32 1, %s2332_s13  ;;  %p1695_p0 = scmp.ge.s32.totalorder %s2336_s14, 1  ;;  %s2336_s14 = sphi %s2362_s14, %s14_s14   ;;  %s2332_s13 = sphi %s2360_s13, %s2745_s13   ;;  %s2328_s12 = sphi %s2358_s12, %s2744_s12  }
   0x3   : > { %p24_p1 = scmp.ge.s32.totalorder %s23_s15, 2  ;;  %p173_p2 = scmp.lt.s32.totalorder %s2336_s14, 3 }
   0x5   : > { %s2747_s15 = smov (%p24_p1, %s23_s15), 0  ;;  %p174_p3 = pnand %p1695_p0, %p173_p2 }
   0x6   : > { %v2276_v0 = vld [vmem:[%s2741_s1] sm:$0xff] (!%p174_p3)   ;;  %s218_s18 = smul.u32 (!%p174_p3), 72, %s2328_s12  ;;  %v2277_v1 = vld [vmem:[%s2741_s1 + $0x8] sm:$0xff] (!%p174_p3)   ;;  %vm520_vm0 = vcmask (!%p174_p3), 261120   ;;  %p245_p5 = scmp.lt.s32.totalorder (!%p174_p3), %s2328_s12, 1  ;;  %vm1536_vm1 = vcmask (!%p174_p3), 1040384  }
   0x7   : > { %177 = sbr.rel (%p174_p3) target bundleno = 393 (0x189), region = 28  ;;  %2172 = vmatprep.subr.bf16.mxu0 (!%p174_p3), %v2276_v0  ;;  %2248 = vmatprep.subr.bf16.mxu1 (!%p174_p3), %v2276_v0  ;;  %vm1538_vm2 = vcmask (!%p174_p3), 1041408  }
   0x8   : > { %p221_p4 = scmp.lt.s32.totalorder (!%p174_p3), %s218_s18, 143  ;;  %2173 = vmatpush3.bf16.msra.mxu0 (!%p174_p3), %v2276_v0  ;;  %2250 = vmatpush3.bf16.msra.mxu1 (!%p174_p3), %v2276_v0 }
   0x9   : > { %2174 = vmatprep.subr.bf16.mxu0 (!%p174_p3), %v2277_v1  ;;  %2249 = vmatprep.subr.bf16.mxu1 (!%p174_p3), %v2277_v1 }
   0xc   : > { %2175 = vmatpush3.bf16.msra.mxu0 (!%p174_p3), %v2277_v1  ;;  %2251 = vmatpush3.bf16.msra.mxu1 (!%p174_p3), %v2277_v1 }
   0xe   : > { %s2749_s18 = smov (!%p221_p4, %s218_s18), 143  ;;  %s2751_s12 = smov (!%p245_p5, %s2328_s12), 1 }
   0xf   : > { %s1696_s21 = sshll.u32 %s2749_s18, 2  ;;  %s1698_s28 = sshll.u32 %s2751_s12, 3 }
  0x10   : > { %s2393_s24 = scalar_lea.vmem %s2740_s0, %s1696_s21  ;;  %s2472_s27 = scalar_lea.vmem %s2742_s2, %s1696_s21 }
  0x11   : > { %v2278_v2 = vld [vmem:[%s2393_s24] sm:$0xff]   ;;  %v2279_v3 = vld [vmem:[%s2393_s24 + $0x8] sm:$0xff]   ;;  %v2280_v4 = vld [vmem:[%s2393_s24 + $0x10] sm:$0xff]   ;;  %s250_s4 = scalar_lea.vmem %s2743_s3, %s1698_s28 }
  0x12   : > { %2176 = vmatprep.mubr.msk.bf16.mxu0 %vm520_vm0, %v2278_v2  ;;  %v2281_v5 = vld [vmem:[%s2393_s24 + $0x18] sm:$0xff]   ;;  %v2282_v6 = vld [vmem:[%s2393_s24 + $0x20] sm:$0xff]   ;;  %v2283_v7 = vld [vmem:[%s2393_s24 + $0x28] sm:$0xff]  }
  0x13   : > { %2177 = vmatmul.mubr.msk.bf16.vlgmr.msra.gmra.mrb[0].mxu0 %vm520_vm0, %v2279_v3  ;;  %v2284_v8 = vld [vmem:[%s2393_s24 + $0x30] sm:$0xff]   ;;  %v2297_v10 = vld [vmem:[%s2393_s24 + $0x98] sm:$0xff]   ;;  %v2298_v11 = vld [vmem:[%s2393_s24 + $0xa0] sm:$0xff]  }
  0x14   : > { %2180 = vmatprep.mubr.msk.bf16.mxu0 %vm520_vm0, %v2280_v4  ;;  %v2296_v9 = vld [vmem:[%s2393_s24 + $0x90] sm:$0xff]   ;;  %v2285_v12 = vld [vmem:[%s2393_s24 + $0x38] sm:$0xff]   ;;  %v2286_v13 = vld [vmem:[%s2393_s24 + $0x40] sm:$0xff]  }
  0x15   : > { %2212 = vmatprep.mubr.msk.bf16.mxu1 %vm520_vm0, %v2296_v9  ;;  %v2299_v14 = vld [vmem:[%s2393_s24 + $0xa8] sm:$0xff]   ;;  %v2300_v15 = vld [vmem:[%s2393_s24 + $0xb0] sm:$0xff]   ;;  %v2301_v18 = vld [vmem:[%s2393_s24 + $0xb8] sm:$0xff]  }
  0x16   : > { %2213 = vmatmul.mubr.msk.bf16.vlgmr.msra.gmra.mrb[0].mxu1 %vm520_vm0, %v2297_v10  ;;  %v2287_v16 = vld [vmem:[%s2393_s24 + $0x48] sm:$0xff]   ;;  %v2288_v17 = vld [vmem:[%s2393_s24 + $0x50] sm:$0xff]   ;;  %v2302_v19 = vld [vmem:[%s2393_s24 + $0xc0] sm:$0xff]  }
  0x17   : > { %2216 = vmatprep.mubr.msk.bf16.mxu1 %vm520_vm0, %v2298_v11  ;;  %v2289_v20 = vld [vmem:[%s2393_s24 + $0x58] sm:$0xff]   ;;  %v2290_v21 = vld [vmem:[%s2393_s24 + $0x60] sm:$0xff]   ;;  %v2303_v22 = vld [vmem:[%s2393_s24 + $0xc8] sm:$0xff]  }
  0x18   : > { %v2304_v23 = vld [vmem:[%s2393_s24 + $0xd0] sm:$0xff]   ;;  %v2291_v24 = vld [vmem:[%s2393_s24 + $0x68] sm:$0xff]   ;;  %v2305_v26 = vld [vmem:[%s2393_s24 + $0xd8] sm:$0xff]  }
  0x19   : > { %v2292_v25 = vld [vmem:[%s2393_s24 + $0x70] sm:$0xff]   ;;  %v2306_v27 = vld [vmem:[%s2393_s24 + $0xe0] sm:$0xff]   ;;  %v2293_v28 = vld [vmem:[%s2393_s24 + $0x78] sm:$0xff]  }
  0x1a   : > { %v2294_v29 = vld [vmem:[%s2393_s24 + $0x80] sm:$0xff]   ;;  %v2307_v30 = vld [vmem:[%s2393_s24 + $0xe8] sm:$0xff]   ;;  %v2308_v31 = vld [vmem:[%s2393_s24 + $0xf0] sm:$0xff]  }
  0x1b   : > { %2181 = vmatmul.mubr.msk.bf16.gmra.mrb[4].mxu0 %vm520_vm0, %v2281_v5  ;;  %v2295_v32 = vld [vmem:[%s2393_s24 + $0x88] sm:$0xff]   ;;  %v2309_v33 = vld [vmem:[%s2393_s24 + $0xf8] sm:$0xff]   ;;  %v2310_v34 = vld [vmem:[%s2393_s24 + $0x100] sm:$0xff]  }
  0x1c   : > { %2184 = vmatprep.mubr.msk.bf16.mxu0 %vm520_vm0, %v2282_v6  ;;  %v2311_v35 = vld [vmem:[%s2393_s24 + $0x108] sm:$0xff]   ;;  %v2312_v36 = vld [vmem:[%s2393_s24 + $0x110] sm:$0xff]   ;;  %v2313_v37 = vld [vmem:[%s2393_s24 + $0x118] sm:$0xff]  }
  0x1e   : > { %2217 = vmatmul.mubr.msk.bf16.gmra.mrb[4].mxu1 %vm520_vm0, %v2299_v14 }
  0x1f   : > { %2220 = vmatprep.mubr.msk.bf16.mxu1 %vm520_vm0, %v2300_v15 }
  0x23   : > { %2185 = vmatmul.mubr.msk.bf16.gmra.mrb[8].mxu0 %vm520_vm0, %v2283_v7 }
  0x24   : > { %2188 = vmatprep.mubr.msk.bf16.mxu0 %vm520_vm0, %v2284_v8 }
  0x26   : > { %2221 = vmatmul.mubr.msk.bf16.gmra.mrb[8].mxu1 %vm520_vm0, %v2301_v18 }
  0x27   : > { %2224 = vmatprep.mubr.msk.bf16.mxu1 %vm520_vm0, %v2302_v19 }
  0x2b   : > { %2189 = vmatmul.mubr.msk.bf16.gmra.mrb[12].mxu0 %vm520_vm0, %v2285_v12 }
  0x2c   : > { %2192 = vmatprep.mubr.msk.bf16.mxu0 %vm520_vm0, %v2286_v13 }
  0x2e   : > { %2225 = vmatmul.mubr.msk.bf16.gmra.mrb[12].mxu1 %vm520_vm0, %v2303_v22 }
  0x2f   : > { %2228 = vmatprep.mubr.msk.bf16.mxu1 %vm520_vm0, %v2304_v23 }
  0x33   : > { %2193 = vmatmul.mubr.msk.bf16.gmra.mrb[16].mxu0 %vm520_vm0, %v2287_v16 }
  0x34   : > { %2196 = vmatprep.mubr.msk.bf16.mxu0 %vm520_vm0, %v2288_v17 }
  0x36   : > { %2229 = vmatmul.mubr.msk.bf16.gmra.mrb[16].mxu1 %vm520_vm0, %v2305_v26 }
  0x37   : > { %2232 = vmatprep.mubr.msk.bf16.mxu1 %vm520_vm0, %v2306_v27 }
  0x3b   : > { %2197 = vmatmul.mubr.msk.bf16.gmra.mrb[20].mxu0 %vm520_vm0, %v2289_v20 }
  0x3c   : > { %2200 = vmatprep.mubr.msk.bf16.mxu0 %vm520_vm0, %v2290_v21 }
  0x3e   : > { %2233 = vmatmul.mubr.msk.bf16.gmra.mrb[20].mxu1 %vm520_vm0, %v2307_v30 }
  0x3f   : > { %2236 = vmatprep.mubr.msk.bf16.mxu1 %vm520_vm0, %v2308_v31 }
  0x43   : > { %2201 = vmatmul.mubr.msk.bf16.gmra.mrb[24].mxu0 %vm520_vm0, %v2291_v24 }
  0x44   : > { %2204 = vmatprep.mubr.msk.bf16.mxu0 %vm520_vm0, %v2292_v25 }
  0x46   : > { %2237 = vmatmul.mubr.msk.bf16.gmra.mrb[24].mxu1 %vm520_vm0, %v2309_v33 }
  0x47   : > { %2240 = vmatprep.mubr.msk.bf16.mxu1 %vm520_vm0, %v2310_v34 }
  0x4b   : > { %2205 = vmatmul.mubr.msk.bf16.gmra.mrb[28].mxu0 %vm520_vm0, %v2293_v28 }
  0x4c   : > { %2208 = vmatprep.mubr.msk.bf16.mxu0 %vm520_vm0, %v2294_v29 }
  0x4e   : > { %2241 = vmatmul.mubr.msk.bf16.gmra.mrb[28].mxu1 %vm520_vm0, %v2311_v35 }
  0x4f   : > { %2244 = vmatprep.mubr.msk.bf16.mxu1 %vm520_vm0, %v2312_v36 }
  0x53   : > { %2209 = vmatmul.mubr.msk.bf16.gmra.mrb[32].mxu0 %vm520_vm0, %v2295_v32 }
  0x56   : > { %2245 = vmatmul.mubr.msk.bf16.gmra.mrb[32].mxu1 %vm520_vm0, %v2313_v37 }
  0xe6   : > { %v2178_v38 = vpop.f32.mrb[0].mxu0 }
  0xe7   : > { %v663_v39 = vpop.f32.mrb[1].mxu0  ;;  %v1389_v47 = vmul.f32 %v2178_v38, %v2178_v38 }
  0xe8   : > { %v2179_v40 = vpop.f32.mrb[2].mxu0  ;;  %v1387_v43 = vmul.f32 %v663_v39, %v663_v39 }
  0xe9   : > { %v1927_v41 = vpack.c.bf16 %v2179_v40, %v2178_v38  ;;  %v666_v42 = vpop.f32.mrb[3].mxu0  ;;  %v1390_v50 = vmul.f32 %v2179_v40, %v2179_v40  ;;  %v2478_v13 = vpop.f32.mrb[0].mxu1 }
  0xea   : > { %v1922_v44 = vpack.c.bf16 %v666_v42, %v663_v39  ;;  %v1310_v45 = vadd.f32 %v666_v42, %v663_v39  ;;  %v1388_v46 = vmul.f32 %v666_v42, %v666_v42  ;;  %v2480_v16 = vpop.f32.mrb[1].mxu1 }
  0xeb   : > { %2099 = vst [vmem:[%s2472_s27 + $0x8] sm:$0xff] %v1927_v41   ;;  %v2482_v21 = vpop.f32.mrb[2].mxu1 }
  0xec   : > { %1923 = vst [vmem:[%s2472_s27] sm:$0xff] %v1922_v44   ;;  %v1311_v48 = vadd.f32 %v2178_v38, %v1310_v45  ;;  %v1459_v49 = vadd.f32 %v1388_v46, %v1387_v43  ;;  %v2017_v22 = vpack.c.bf16 %v2482_v21, %v2478_v13  ;;  %v2487_v23 = vpop.f32.mrb[3].mxu1 }
  0xed   : > { %v2012_v27 = vpack.c.bf16 %v2487_v23, %v2480_v16 }
  0xee   : > { %v1460_v51 = vadd.f32 %v1459_v49, %v1389_v47  ;;  %v2182_v52 = vpop.f32.mrb[4].mxu0  ;;  %v1312_v53 = vadd.f32 %v2179_v40, %v1311_v48  ;;  %2117 = vst [vmem:[%s2472_s27 + $0x98] sm:$0xff] %v2017_v22  }
  0xef   : > { %v679_v54 = vpop.f32.mrb[5].mxu0  ;;  %v1393_v1 = vmul.f32 %v2182_v52, %v2182_v52  ;;  %2116 = vst [vmem:[%s2472_s27 + $0x90] sm:$0xff] %v2012_v27  }
  0xf0   : > { %v1313_v55 = vadd.f32 %v1312_v53, %v679_v54  ;;  %v1391_v56 = vmul.f32 %v679_v54, %v679_v54  ;;  %v1461_v57 = vadd.f32 %v1460_v51, %v1390_v50  ;;  %v2183_v58 = vpop.f32.mrb[6].mxu0 }
  0xf1   : > { %v1937_v59 = vpack.c.bf16 %v2183_v58, %v2182_v52  ;;  %v682_v60 = vpop.f32.mrb[7].mxu0  ;;  %v1394_v4 = vmul.f32 %v2183_v58, %v2183_v58  ;;  %v2494_v37 = vpop.f32.mrb[4].mxu1 }
  0xf2   : > { %v1462_v61 = vadd.f32 %v1461_v57, %v1391_v56  ;;  %v1932_v62 = vpack.c.bf16 %v682_v60, %v679_v54  ;;  %v1314_v63 = vadd.f32 %v1313_v55, %v682_v60  ;;  %v1392_v0 = vmul.f32 %v682_v60, %v682_v60  ;;  %v2496_v40 = vpop.f32.mrb[5].mxu1 }
  0xf3   : > { %2101 = vst [vmem:[%s2472_s27 + $0x18] sm:$0xff] %v1937_v59   ;;  %v2498_v45 = vpop.f32.mrb[6].mxu1 }
  0xf4   : > { %2100 = vst [vmem:[%s2472_s27 + $0x10] sm:$0xff] %v1932_v62   ;;  %v1315_v2 = vadd.f32 %v2182_v52, %v1314_v63  ;;  %v1463_v3 = vadd.f32 %v1462_v61, %v1392_v0  ;;  %v2027_v46 = vpack.c.bf16 %v2498_v45, %v2494_v37  ;;  %v2503_v47 = vpop.f32.mrb[7].mxu1 }
  0xf5   : > { %v2022_v51 = vpack.c.bf16 %v2503_v47, %v2496_v40 }
  0xf6   : > { %v1464_v5 = vadd.f32 %v1463_v3, %v1393_v1  ;;  %v2186_v6 = vpop.f32.mrb[8].mxu0  ;;  %v1316_v7 = vadd.f32 %v2183_v58, %v1315_v2  ;;  %2119 = vst [vmem:[%s2472_s27 + $0xa8] sm:$0xff] %v2027_v46  }
  0xf7   : > { %v695_v8 = vpop.f32.mrb[9].mxu0  ;;  %v1397_v24 = vmul.f32 %v2186_v6, %v2186_v6  ;;  %2118 = vst [vmem:[%s2472_s27 + $0xa0] sm:$0xff] %v2022_v51  }
  0xf8   : > { %v1317_v9 = vadd.f32 %v1316_v7, %v695_v8  ;;  %v1395_v10 = vmul.f32 %v695_v8, %v695_v8  ;;  %v1465_v11 = vadd.f32 %v1464_v5, %v1394_v4  ;;  %v2187_v12 = vpop.f32.mrb[10].mxu0 }
  0xf9   : > { %v1947_v14 = vpack.c.bf16 %v2187_v12, %v2186_v6  ;;  %v698_v15 = vpop.f32.mrb[11].mxu0  ;;  %v1398_v28 = vmul.f32 %v2187_v12, %v2187_v12  ;;  %v2510_v61 = vpop.f32.mrb[8].mxu1 }
  0xfa   : > { %v1466_v17 = vadd.f32 %v1465_v11, %v1395_v10  ;;  %v1942_v18 = vpack.c.bf16 %v698_v15, %v695_v8  ;;  %v1318_v19 = vadd.f32 %v1317_v9, %v698_v15  ;;  %v1396_v20 = vmul.f32 %v698_v15, %v698_v15  ;;  %v2512_v0 = vpop.f32.mrb[9].mxu1 }
  0xfb   : > { %2103 = vst [vmem:[%s2472_s27 + $0x28] sm:$0xff] %v1947_v14   ;;  %v2514_v5 = vpop.f32.mrb[10].mxu1 }
  0xfc   : > { %2102 = vst [vmem:[%s2472_s27 + $0x20] sm:$0xff] %v1942_v18   ;;  %v1319_v25 = vadd.f32 %v2186_v6, %v1318_v19  ;;  %v1467_v26 = vadd.f32 %v1466_v17, %v1396_v20  ;;  %v2037_v6 = vpack.c.bf16 %v2514_v5, %v2510_v61  ;;  %v2519_v7 = vpop.f32.mrb[11].mxu1 }
  0xfd   : > { %v2032_v11 = vpack.c.bf16 %v2519_v7, %v2512_v0 }
  0xfe   : > { %v1468_v29 = vadd.f32 %v1467_v26, %v1397_v24  ;;  %v2190_v30 = vpop.f32.mrb[12].mxu0  ;;  %v1320_v31 = vadd.f32 %v2187_v12, %v1319_v25  ;;  %2121 = vst [vmem:[%s2472_s27 + $0xb8] sm:$0xff] %v2037_v6  }
  0xff   : > { %v711_v32 = vpop.f32.mrb[13].mxu0  ;;  %v1401_v48 = vmul.f32 %v2190_v30, %v2190_v30  ;;  %2120 = vst [vmem:[%s2472_s27 + $0xb0] sm:$0xff] %v2032_v11  }
 0x100   : > { %v1321_v33 = vadd.f32 %v1320_v31, %v711_v32  ;;  %v1399_v34 = vmul.f32 %v711_v32, %v711_v32  ;;  %v1469_v35 = vadd.f32 %v1468_v29, %v1398_v28  ;;  %v2191_v36 = vpop.f32.mrb[14].mxu0 }
 0x101   : > { %v1957_v38 = vpack.c.bf16 %v2191_v36, %v2190_v30  ;;  %v714_v39 = vpop.f32.mrb[15].mxu0  ;;  %v1402_v52 = vmul.f32 %v2191_v36, %v2191_v36  ;;  %v2526_v25 = vpop.f32.mrb[12].mxu1 }
 0x102   : > { %v1470_v41 = vadd.f32 %v1469_v35, %v1399_v34  ;;  %v1952_v42 = vpack.c.bf16 %v714_v39, %v711_v32  ;;  %v1322_v43 = vadd.f32 %v1321_v33, %v714_v39  ;;  %v1400_v44 = vmul.f32 %v714_v39, %v714_v39  ;;  %v2528_v28 = vpop.f32.mrb[13].mxu1 }
 0x103   : > { %2105 = vst [vmem:[%s2472_s27 + $0x38] sm:$0xff] %v1957_v38   ;;  %v2530_v33 = vpop.f32.mrb[14].mxu1 }
 0x104   : > { %2104 = vst [vmem:[%s2472_s27 + $0x30] sm:$0xff] %v1952_v42   ;;  %v1323_v49 = vadd.f32 %v2190_v30, %v1322_v43  ;;  %v1471_v50 = vadd.f32 %v1470_v41, %v1400_v44  ;;  %v2047_v34 = vpack.c.bf16 %v2530_v33, %v2526_v25  ;;  %v2535_v35 = vpop.f32.mrb[15].mxu1 }
 0x105   : > { %v2042_v41 = vpack.c.bf16 %v2535_v35, %v2528_v28 }
 0x106   : > { %v1472_v53 = vadd.f32 %v1471_v50, %v1401_v48  ;;  %v2194_v54 = vpop.f32.mrb[16].mxu0  ;;  %v1324_v55 = vadd.f32 %v2191_v36, %v1323_v49  ;;  %2123 = vst [vmem:[%s2472_s27 + $0xc8] sm:$0xff] %v2047_v34  }
 0x107   : > { %v727_v56 = vpop.f32.mrb[17].mxu0  ;;  %v1405_v8 = vmul.f32 %v2194_v54, %v2194_v54  ;;  %2122 = vst [vmem:[%s2472_s27 + $0xc0] sm:$0xff] %v2042_v41  }
 0x108   : > { %v1325_v57 = vadd.f32 %v1324_v55, %v727_v56  ;;  %v1403_v58 = vmul.f32 %v727_v56, %v727_v56  ;;  %v1473_v59 = vadd.f32 %v1472_v53, %v1402_v52  ;;  %v2195_v60 = vpop.f32.mrb[18].mxu0 }
 0x109   : > { %v1967_v62 = vpack.c.bf16 %v2195_v60, %v2194_v54  ;;  %v730_v63 = vpop.f32.mrb[19].mxu0  ;;  %v1406_v12 = vmul.f32 %v2195_v60, %v2195_v60  ;;  %v2542_v53 = vpop.f32.mrb[16].mxu1 }
 0x10a   : > { %v1474_v1 = vadd.f32 %v1473_v59, %v1403_v58  ;;  %v1962_v2 = vpack.c.bf16 %v730_v63, %v727_v56  ;;  %v1326_v3 = vadd.f32 %v1325_v57, %v730_v63  ;;  %v1404_v4 = vmul.f32 %v730_v63, %v730_v63  ;;  %v2544_v56 = vpop.f32.mrb[17].mxu1 }
 0x10b   : > { %2107 = vst [vmem:[%s2472_s27 + $0x48] sm:$0xff] %v1967_v62   ;;  %v2546_v62 = vpop.f32.mrb[18].mxu1 }
 0x10c   : > { %2106 = vst [vmem:[%s2472_s27 + $0x40] sm:$0xff] %v1962_v2   ;;  %v1327_v9 = vadd.f32 %v2194_v54, %v1326_v3  ;;  %v1475_v10 = vadd.f32 %v1474_v1, %v1404_v4  ;;  %v2057_v63 = vpack.c.bf16 %v2546_v62, %v2542_v53  ;;  %v2551_v1 = vpop.f32.mrb[19].mxu1 }
 0x10d   : > { %v2052_v6 = vpack.c.bf16 %v2551_v1, %v2544_v56 }
 0x10e   : > { %v1476_v14 = vadd.f32 %v1475_v10, %v1405_v8  ;;  %v2198_v15 = vpop.f32.mrb[20].mxu0  ;;  %v1328_v17 = vadd.f32 %v2195_v60, %v1327_v9  ;;  %2125 = vst [vmem:[%s2472_s27 + $0xd8] sm:$0xff] %v2057_v63  }
 0x10f   : > { %v743_v18 = vpop.f32.mrb[21].mxu0  ;;  %v1409_v36 = vmul.f32 %v2198_v15, %v2198_v15  ;;  %2124 = vst [vmem:[%s2472_s27 + $0xd0] sm:$0xff] %v2052_v6  }
 0x110   : > { %v1329_v19 = vadd.f32 %v1328_v17, %v743_v18  ;;  %v1407_v20 = vmul.f32 %v743_v18, %v743_v18  ;;  %v1477_v22 = vadd.f32 %v1476_v14, %v1406_v12  ;;  %v2199_v24 = vpop.f32.mrb[22].mxu0 }
 0x111   : > { %v1977_v26 = vpack.c.bf16 %v2199_v24, %v2198_v15  ;;  %v746_v27 = vpop.f32.mrb[23].mxu0  ;;  %v1410_v42 = vmul.f32 %v2199_v24, %v2199_v24 }
 0x112   : > { %v1478_v29 = vadd.f32 %v1477_v22, %v1407_v20  ;;  %v1972_v30 = vpack.c.bf16 %v746_v27, %v743_v18  ;;  %v1330_v31 = vadd.f32 %v1329_v19, %v746_v27  ;;  %v1408_v32 = vmul.f32 %v746_v27, %v746_v27  ;;  %v2558_v19 = vpop.f32.mrb[20].mxu1 }
 0x113   : > { %2109 = vst [vmem:[%s2472_s27 + $0x58] sm:$0xff] %v1977_v26  }
 0x114   : > { %2108 = vst [vmem:[%s2472_s27 + $0x50] sm:$0xff] %v1972_v30   ;;  %v1331_v38 = vadd.f32 %v2198_v15, %v1330_v31  ;;  %v1479_v39 = vadd.f32 %v1478_v29, %v1408_v32 }
 0x116   : > { %v1480_v43 = vadd.f32 %v1479_v39, %v1409_v36  ;;  %v2202_v44 = vpop.f32.mrb[24].mxu0  ;;  %v1332_v46 = vadd.f32 %v2199_v24, %v1331_v38  ;;  %v2560_v24 = vpop.f32.mrb[21].mxu1 }
 0x117   : > { %v759_v48 = vpop.f32.mrb[25].mxu0  ;;  %v1413_v2 = vmul.f32 %v2202_v44, %v2202_v44  ;;  %v2562_v31 = vpop.f32.mrb[22].mxu1 }
 0x118   : > { %v1333_v49 = vadd.f32 %v1332_v46, %v759_v48  ;;  %v1411_v50 = vmul.f32 %v759_v48, %v759_v48  ;;  %v1481_v51 = vadd.f32 %v1480_v43, %v1410_v42  ;;  %v2203_v52 = vpop.f32.mrb[26].mxu0  ;;  %v2067_v32 = vpack.c.bf16 %v2562_v31, %v2558_v19  ;;  %v2567_v34 = vpop.f32.mrb[23].mxu1 }
 0x119   : > { %v1987_v54 = vpack.c.bf16 %v2203_v52, %v2202_v44  ;;  %v762_v55 = vpop.f32.mrb[27].mxu0  ;;  %v1414_v8 = vmul.f32 %v2203_v52, %v2203_v52  ;;  %v2062_v41 = vpack.c.bf16 %v2567_v34, %v2560_v24 }
 0x11a   : > { %v1482_v57 = vadd.f32 %v1481_v51, %v1411_v50  ;;  %v1982_v58 = vpack.c.bf16 %v762_v55, %v759_v48  ;;  %v1334_v59 = vadd.f32 %v1333_v49, %v762_v55  ;;  %v1412_v60 = vmul.f32 %v762_v55, %v762_v55  ;;  %2127 = vst [vmem:[%s2472_s27 + $0xe8] sm:$0xff] %v2067_v32  }
 0x11b   : > { %2111 = vst [vmem:[%s2472_s27 + $0x68] sm:$0xff] %v1987_v54   ;;  %2126 = vst [vmem:[%s2472_s27 + $0xe0] sm:$0xff] %v2062_v41   ;;  %v2574_v54 = vpop.f32.mrb[24].mxu1 }
 0x11c   : > { %2110 = vst [vmem:[%s2472_s27 + $0x60] sm:$0xff] %v1982_v58   ;;  %v1335_v3 = vadd.f32 %v2202_v44, %v1334_v59  ;;  %v1483_v4 = vadd.f32 %v1482_v57, %v1412_v60  ;;  %v2576_v58 = vpop.f32.mrb[25].mxu1 }
 0x11e   : > { %v1484_v9 = vadd.f32 %v1483_v4, %v1413_v2  ;;  %v2206_v10 = vpop.f32.mrb[28].mxu0  ;;  %v1336_v11 = vadd.f32 %v2203_v52, %v1335_v3  ;;  %v2578_v3 = vpop.f32.mrb[26].mxu1 }
 0x11f   : > { %v775_v12 = vpop.f32.mrb[29].mxu0  ;;  %v1417_v36 = vmul.f32 %v2206_v10, %v2206_v10  ;;  %v2077_v4 = vpack.c.bf16 %v2578_v3, %v2574_v54  ;;  %v2583_v6 = vpop.f32.mrb[27].mxu1 }
 0x120   : > { %v1337_v14 = vadd.f32 %v1336_v11, %v775_v12  ;;  %v1415_v15 = vmul.f32 %v775_v12, %v775_v12  ;;  %v1485_v17 = vadd.f32 %v1484_v9, %v1414_v8  ;;  %v2207_v18 = vpop.f32.mrb[30].mxu0  ;;  %v2072_v11 = vpack.c.bf16 %v2583_v6, %v2576_v58 }
 0x121   : > { %v1997_v20 = vpack.c.bf16 %v2207_v18, %v2206_v10  ;;  %v778_v22 = vpop.f32.mrb[31].mxu0  ;;  %v1418_v42 = vmul.f32 %v2207_v18, %v2207_v18  ;;  %2129 = vst [vmem:[%s2472_s27 + $0xf8] sm:$0xff] %v2077_v4  }
 0x122   : > { %v1486_v26 = vadd.f32 %v1485_v17, %v1415_v15  ;;  %v1992_v27 = vpack.c.bf16 %v778_v22, %v775_v12  ;;  %v1338_v29 = vadd.f32 %v1337_v14, %v778_v22  ;;  %v1416_v30 = vmul.f32 %v778_v22, %v778_v22  ;;  %2128 = vst [vmem:[%s2472_s27 + $0xf0] sm:$0xff] %v2072_v11   ;;  %v2593_v22 = vpop.f32.mrb[28].mxu1 }
 0x123   : > { %2113 = vst [vmem:[%s2472_s27 + $0x78] sm:$0xff] %v1997_v20   ;;  %v1423_v17 = vmul.f32 %v2480_v16, %v2480_v16 }
 0x124   : > { %2112 = vst [vmem:[%s2472_s27 + $0x70] sm:$0xff] %v1992_v27   ;;  %v1339_v38 = vadd.f32 %v2206_v10, %v1338_v29  ;;  %v1487_v39 = vadd.f32 %v1486_v26, %v1416_v30  ;;  %v2595_v26 = vpop.f32.mrb[29].mxu1  ;;  %v1424_v30 = vmul.f32 %v2487_v23, %v2487_v23 }
 0x125   : > { %v2600_v32 = vpop.f32.mrb[30].mxu1 }
 0x126   : > { %v1488_v43 = vadd.f32 %v1487_v39, %v1417_v36  ;;  %v2210_v44 = vpop.f32.mrb[32].mxu0  ;;  %v1340_v46 = vadd.f32 %v2207_v18, %v1339_v38  ;;  %v2087_v36 = vpack.c.bf16 %v2600_v32, %v2593_v22  ;;  %v2604_v38 = vpop.f32.mrb[31].mxu1 }
 0x127   : > { %v791_v48 = vpop.f32.mrb[33].mxu0  ;;  %v1421_v8 = vmul.f32 %v2210_v44, %v2210_v44 }
 0x128   : > { %v1341_v49 = vadd.f32 %v1340_v46, %v791_v48  ;;  %v1419_v50 = vmul.f32 %v791_v48, %v791_v48  ;;  %v1489_v51 = vadd.f32 %v1488_v43, %v1418_v42  ;;  %v2211_v52 = vpop.f32.mrb[34].mxu0  ;;  %v2082_v42 = vpack.c.bf16 %v2604_v38, %v2595_v26  ;;  %2131 = vst [vmem:[%s2472_s27 + $0x108] sm:$0xff] %v2087_v36  }
 0x129   : > { %v2007_v55 = vpack.c.bf16 %v2211_v52, %v2210_v44  ;;  %v794_v57 = vpop.f32.mrb[35].mxu0  ;;  %v1422_v12 = vmul.f32 %v2211_v52, %v2211_v52  ;;  %v1427_v46 = vmul.f32 %v2496_v40, %v2496_v40 }
 0x12a   : > { %v1490_v59 = vadd.f32 %v1489_v51, %v1419_v50  ;;  %v2002_v60 = vpack.c.bf16 %v794_v57, %v791_v48  ;;  %v1342_v63 = vadd.f32 %v1341_v49, %v794_v57  ;;  %v1420_v2 = vmul.f32 %v794_v57, %v794_v57  ;;  %2130 = vst [vmem:[%s2472_s27 + $0x100] sm:$0xff] %v2082_v42  }
 0x12b   : > { %2115 = vst [vmem:[%s2472_s27 + $0x88] sm:$0xff] %v2007_v55   ;;  %v1428_v55 = vmul.f32 %v2503_v47, %v2503_v47 }
 0x12c   : > { %2114 = vst [vmem:[%s2472_s27 + $0x80] sm:$0xff] %v2002_v60   ;;  %v1343_v9 = vadd.f32 %v2210_v44, %v1342_v63  ;;  %v1491_v10 = vadd.f32 %v1490_v59, %v1420_v2 }
 0x12e   : > { %v1492_v14 = vadd.f32 %v1491_v10, %v1421_v8  ;;  %v1344_v15 = vadd.f32 %v2211_v52, %v1343_v9  ;;  %v1431_v9 = vmul.f32 %v2512_v0, %v2512_v0 }
 0x130   : > { %v1345_v18 = vadd.f32 %v1344_v15, %v2480_v16  ;;  %v1493_v20 = vadd.f32 %v1492_v14, %v1422_v12  ;;  %v1425_v16 = vmul.f32 %v2478_v13, %v2478_v13  ;;  %v1432_v14 = vmul.f32 %v2519_v7, %v2519_v7 }
 0x131   : > { %v1433_v15 = vmul.f32 %v2510_v61, %v2510_v61 }
 0x132   : > { %v1494_v27 = vadd.f32 %v1493_v20, %v1423_v17  ;;  %v1346_v29 = vadd.f32 %v1345_v18, %v2487_v23  ;;  %v1426_v23 = vmul.f32 %v2482_v21, %v2482_v21 }
 0x134   : > { %v1347_v39 = vadd.f32 %v2478_v13, %v1346_v29  ;;  %v1495_v41 = vadd.f32 %v1494_v27, %v1424_v30  ;;  %v2619_v13 = vpop.f32.mrb[32].mxu1 }
 0x135   : > { %v2621_v50 = vpop.f32.mrb[33].mxu1 }
 0x136   : > { %v1496_v43 = vadd.f32 %v1495_v41, %v1425_v16  ;;  %v1348_v44 = vadd.f32 %v2482_v21, %v1347_v39  ;;  %v2626_v21 = vpop.f32.mrb[34].mxu1  ;;  %v1436_v16 = vmul.f32 %v2535_v35, %v2535_v35 }
 0x137   : > { %v2097_v57 = vpack.c.bf16 %v2626_v21, %v2619_v13  ;;  %v2630_v59 = vpop.f32.mrb[35].mxu1 }
 0x138   : > { %v1349_v48 = vadd.f32 %v1348_v44, %v2496_v40  ;;  %v1497_v49 = vadd.f32 %v1496_v43, %v1426_v23  ;;  %v1429_v40 = vmul.f32 %v2494_v37, %v2494_v37  ;;  %v2092_v2 = vpack.c.bf16 %v2630_v59, %v2621_v50 }
 0x139   : > { %2133 = vst [vmem:[%s2472_s27 + $0x118] sm:$0xff] %v2097_v57  }
 0x13a   : > { %v1498_v51 = vadd.f32 %v1497_v49, %v1427_v46  ;;  %v1350_v52 = vadd.f32 %v1349_v48, %v2503_v47  ;;  %v1430_v47 = vmul.f32 %v2498_v45, %v2498_v45  ;;  %2132 = vst [vmem:[%s2472_s27 + $0x110] sm:$0xff] %v2092_v2   ;;  %v1440_v48 = vmul.f32 %v2551_v1, %v2551_v1 }
 0x13c   : > { %v1351_v60 = vadd.f32 %v2494_v37, %v1350_v52  ;;  %v1499_v63 = vadd.f32 %v1498_v51, %v1428_v55 }
 0x13e   : > { %v1500_v4 = vadd.f32 %v1499_v63, %v1429_v40  ;;  %v1352_v8 = vadd.f32 %v2498_v45, %v1351_v60  ;;  %v1434_v45 = vmul.f32 %v2514_v5, %v2514_v5  ;;  %v1444_v63 = vmul.f32 %v2567_v34, %v2567_v34 }
 0x140   : > { %v1353_v10 = vadd.f32 %v1352_v8, %v2512_v0  ;;  %v1501_v11 = vadd.f32 %v1500_v4, %v1430_v47  ;;  %v1435_v0 = vmul.f32 %v2528_v28, %v2528_v28 }
 0x142   : > { %v1502_v12 = vadd.f32 %v1501_v11, %v1431_v9  ;;  %v1354_v37 = vadd.f32 %v1353_v10, %v2519_v7 }
 0x144   : > { %v1355_v17 = vadd.f32 %v2510_v61, %v1354_v37  ;;  %v1503_v18 = vadd.f32 %v1502_v12, %v1432_v14  ;;  %v1437_v61 = vmul.f32 %v2526_v25, %v2526_v25  ;;  %v1448_v12 = vmul.f32 %v2583_v6, %v2583_v6 }
 0x146   : > { %v1504_v20 = vadd.f32 %v1503_v18, %v1433_v15  ;;  %v1356_v27 = vadd.f32 %v2514_v5, %v1355_v17  ;;  %v1438_v5 = vmul.f32 %v2530_v33, %v2530_v33 }
 0x148   : > { %v1357_v29 = vadd.f32 %v1356_v27, %v2528_v28  ;;  %v1505_v30 = vadd.f32 %v1504_v20, %v1434_v45  ;;  %v1439_v28 = vmul.f32 %v2544_v56, %v2544_v56  ;;  %v1452_v27 = vmul.f32 %v2604_v38, %v2604_v38 }
 0x14a   : > { %v1506_v36 = vadd.f32 %v1505_v30, %v1435_v0  ;;  %v1358_v7 = vadd.f32 %v1357_v29, %v2535_v35 }
 0x14c   : > { %v1359_v39 = vadd.f32 %v2526_v25, %v1358_v7  ;;  %v1507_v41 = vadd.f32 %v1506_v36, %v1436_v16  ;;  %v1441_v25 = vmul.f32 %v2542_v53, %v2542_v53  ;;  %v1455_v36 = vmul.f32 %v2621_v50, %v2621_v50 }
 0x14e   : > { %v1508_v42 = vadd.f32 %v1507_v41, %v1437_v61  ;;  %v1360_v23 = vadd.f32 %v2530_v33, %v1359_v39  ;;  %v1442_v33 = vmul.f32 %v2546_v62, %v2546_v62  ;;  %v1457_v39 = vmul.f32 %v2619_v13, %v2619_v13 }
 0x150   : > { %v1361_v43 = vadd.f32 %v1360_v23, %v2544_v56  ;;  %v1509_v44 = vadd.f32 %v1508_v42, %v1438_v5  ;;  %v1443_v56 = vmul.f32 %v2560_v24, %v2560_v24 }
 0x152   : > { %v1510_v46 = vadd.f32 %v1509_v44, %v1439_v28  ;;  %v1362_v35 = vadd.f32 %v1361_v43, %v2551_v1 }
 0x154   : > { %v1363_v49 = vadd.f32 %v2542_v53, %v1362_v35  ;;  %v1511_v51 = vadd.f32 %v1510_v46, %v1440_v48  ;;  %v1445_v53 = vmul.f32 %v2558_v19, %v2558_v19 }
 0x156   : > { %v1512_v52 = vadd.f32 %v1511_v51, %v1441_v25  ;;  %v1364_v55 = vadd.f32 %v2546_v62, %v1363_v49  ;;  %v1446_v62 = vmul.f32 %v2562_v31, %v2562_v31 }
 0x158   : > { %v1365_v57 = vadd.f32 %v1364_v55, %v2560_v24  ;;  %v1513_v40 = vadd.f32 %v1512_v52, %v1442_v33  ;;  %v1447_v24 = vmul.f32 %v2576_v58, %v2576_v58 }
 0x15a   : > { %v1514_v60 = vadd.f32 %v1513_v40, %v1443_v56  ;;  %v1366_v1 = vadd.f32 %v1365_v57, %v2567_v34 }
 0x15c   : > { %v1367_v2 = vadd.f32 %v2558_v19, %v1366_v1  ;;  %v1515_v47 = vadd.f32 %v1514_v60, %v1444_v63  ;;  %v1449_v19 = vmul.f32 %v2574_v54, %v2574_v54 }
 0x15e   : > { %v1516_v4 = vadd.f32 %v1515_v47, %v1445_v53  ;;  %v1368_v8 = vadd.f32 %v2562_v31, %v1367_v2  ;;  %v1450_v31 = vmul.f32 %v2578_v3, %v2578_v3 }
 0x160   : > { %v1369_v9 = vadd.f32 %v1368_v8, %v2576_v58  ;;  %v1517_v10 = vadd.f32 %v1516_v4, %v1446_v62  ;;  %v1451_v58 = vmul.f32 %v2595_v26, %v2595_v26 }
 0x162   : > { %v1518_v11 = vadd.f32 %v1517_v10, %v1447_v24  ;;  %v1370_v34 = vadd.f32 %v1369_v9, %v2583_v6 }
 0x164   : > { %v1371_v37 = vadd.f32 %v2574_v54, %v1370_v34  ;;  %v1519_v14 = vadd.f32 %v1518_v11, %v1448_v12  ;;  %v1453_v54 = vmul.f32 %v2593_v22, %v2593_v22 }
 0x166   : > { %v1520_v15 = vadd.f32 %v1519_v14, %v1449_v19  ;;  %v1372_v17 = vadd.f32 %v2578_v3, %v1371_v37  ;;  %v1454_v3 = vmul.f32 %v2600_v32, %v2600_v32 }
 0x168   : > { %v1373_v18 = vadd.f32 %v1372_v17, %v2595_v26  ;;  %v1521_v45 = vadd.f32 %v1520_v15, %v1450_v31 }
 0x16a   : > { %v1522_v20 = vadd.f32 %v1521_v45, %v1451_v58  ;;  %v1374_v6 = vadd.f32 %v1373_v18, %v2604_v38 }
 0x16c   : > { %v1375_v0 = vadd.f32 %v2593_v22, %v1374_v6  ;;  %v1523_v29 = vadd.f32 %v1522_v20, %v1452_v27  ;;  %v1456_v22 = vmul.f32 %v2630_v59, %v2630_v59 }
 0x16e   : > { %v1524_v30 = vadd.f32 %v1523_v29, %v1453_v54  ;;  %v1376_v26 = vadd.f32 %v2600_v32, %v1375_v0  ;;  %v1458_v32 = vmul.f32 %v2626_v21, %v2626_v21 }
 0x170   : > { %v1377_v7 = vadd.f32 %v1376_v26, %v2621_v50  ;;  %v1525_v16 = vadd.f32 %v1524_v30, %v1454_v3 }
 0x172   : > { %v1526_v38 = vadd.f32 %v1525_v16, %v1455_v36  ;;  %v1378_v61 = vadd.f32 %v1377_v7, %v2630_v59 }
 0x174   : > { %v1379_v41 = vadd.f32 %v2619_v13, %v1378_v61  ;;  %v1527_v5 = vadd.f32 %v1526_v38, %v1456_v22 }
 0x176   : > { %v1380_v42 = vadd.f32 %v2626_v21, %v1379_v41  ;;  %v1528_v50 = vadd.f32 %v1527_v5, %v1457_v39 }
 0x178   : > { %v1381_v23 = vrot.slane %v1380_v42, 4  ;;  %v1529_v28 = vadd.f32 %v1528_v50, %v1458_v32 }
 0x17a   : > { %v1382_v43 = vadd.f32 %v1381_v23, %v1380_v42  ;;  %v1530_v44 = vrot.slane %v1529_v28, 4 }
 0x17c   : > { %v1383_v46 = vrot.slane %v1382_v43, 2  ;;  %v1531_v35 = vadd.f32 %v1530_v44, %v1529_v28 }
 0x17e   : > { %v1384_v59 = vadd.f32 %v1383_v46, %v1382_v43  ;;  %v1532_v48 = vrot.slane %v1531_v35, 2 }
 0x180   : > { %v1385_v25 = vrot.slane %v1384_v59, 1  ;;  %v1533_v49 = vadd.f32 %v1532_v48, %v1531_v35 }
 0x182   : > { %v1534_v13 = vrot.slane %v1533_v49, 1  ;;  %v1386_v51 = vadd.f32 %v1385_v25, %v1384_v59 }
 0x184   : > { %v1535_v33 = vadd.f32 %v1534_v13, %v1533_v49 }
 0x186   : > { %v1537_v21 = vsel %vm1536_vm1, %v1386_v51, %v1535_v33 }
 0x187   : > { %v1539_v52 = vsel %vm1538_vm2, %v1537_v21, 0.0 }
 0x188   : > { %1540 = vst [vmem:[%s250_s4] sm:$0xff] %v1539_v52 }
 0x189 PF: > { %s14_s14 = sadd.s32 1, %s2336_s14   ;;  %s2744_s12 = smov %s2332_s13 }
 0x18a   : > { %p11_p6 = scmp.ge.s32.totalorder %s14_s14, 4   ;;  %s2745_s13 = smov %s2747_s15 }
 0x18c   :  { %13 = sbr.rel (!%p11_p6) target bundleno = 2 (0x2), region = 73 }

// kernel: jvinet_forward.8
= control target key start
LH: loop header
LB: loop body
LE: loop exit
PB: predicated region body
PF: predicated region fallthrough
CT: control target
= control target key end

     0   :  { %s1586_s24 = smov 0   ;;  %s1588_s25 = smov 0   ;;  %s2163_s0 = inlined_call_operand.vmem [shape: bf16[1,1152,128], index: 0, kind: input, shape index: {}, may-alias: {0,1,2,3}]   ;;  %s2164_s1 = inlined_call_operand.vmem [shape: bf16[1,1152,128], index: 1, kind: input, shape index: {}, may-alias: {0,1,2,3}]   ;;  %s2165_s2 = inlined_call_operand.vmem [shape: bf16[1,1152,128], index: 2, kind: input, shape index: {}, may-alias: {0,1,2,3}]   ;;  %s2166_s3 = inlined_call_operand.vmem [shape: bf16[1,1152,128], index: 3, kind: input, shape index: {}, may-alias: {0,1,2,3}]   ;;  %s2167_s4 = inlined_call_operand.vmem [shape: f32[1,16,128], index: 4, kind: input, shape index: {}]   ;;  %s2168_s5 = inlined_call_operand.vmem [shape: f32[1,1,128], index: 5, kind: input, shape index: {}]   ;;  %s2169_s6 = inlined_call_operand.vmem [shape: f32[1,1,128], index: 6, kind: input, shape index: {}]   ;;  %s2170_s7 = inlined_call_operand.vmem [shape: bf16[1,288,128], index: 7, kind: output, shape index: {}]  }
   0x1   :  { %s1590_s26 = smov 0  }
   0x2 LB: > { %s26_s27 = sadd.s32 1, %s1540_s25  ;;  %p1222_p0 = scmp.ge.s32.totalorder %s1544_s26, 1  ;;  %s1544_s26 = sphi %s1590_s26, %s17_s26   ;;  %s1540_s25 = sphi %s1588_s25, %s2235_s25   ;;  %s1536_s24 = sphi %s1586_s24, %s2234_s24  }
   0x3   : > { %p27_p1 = scmp.ge.s32.totalorder %s26_s27, 2  ;;  %p347_p2 = scmp.lt.s32.totalorder %s1544_s26, 3 }
   0x5   : > { %s2237_s27 = smov (%p27_p1, %s26_s27), 0  ;;  %p348_p3 = pnand %p1222_p0, %p347_p2 }
   0x7   : > { %351 = sbr.rel (%p348_p3) target bundleno = 139 (0x8b), region = 48 }
   0xe   : > { %s1607_s28 = smul.u32 18, %s1536_s24  ;;  %s438_s29 = sadd.s32 2, %s1536_s24  ;;  %v495_v0 = vld [vmem:[%s2167_s4] sm:$0xff]  ;;  %v496_v1 = vld [vmem:[%s2167_s4 + $0x8] sm:$0xff]  ;;  %v557_v3 = vlaneseq }
   0xf   : > { %s439_s11 = smul.u32 18, %s438_s29  ;;  %s450_s12 = sadd.s32 4, %s1536_s24  ;;  %v497_v2 = vadd.f32 %v496_v1, %v495_v0  ;;  %v1228_v56 = vld [vmem:[%s2168_s5] ss:$0 sm:$0xff] }
  0x10   : > { %p431_p4 = scmp.lt.s32.totalorder %s1607_s28, 143  ;;  %s451_s13 = smul.u32 18, %s450_s12  ;;  %v1624_v6 = vshrl.u32 %v557_v3, 7  ;;  %v515_v50 = vld [vmem:[%s2169_s6] sm:$0x1] }
  0x11   : > { %p442_p5 = scmp.lt.s32.totalorder %s439_s11, 143  ;;  %s462_s14 = sadd.s32 6, %s1536_s24  ;;  %v1619_v4 = vmul.f32 0.00086805556, %v497_v2 }
  0x12   : > { %s432_s15 = scalar_select %p431_p4, %s1607_s28, 143  ;;  %v559_v16 = vsub.s32 1, %v1624_v6 }
  0x13   : > { %s2239_s11 = smov (!%p442_p5, %s439_s11), 143  ;;  %v499_v5 = vmul.f32 %v1619_v4, %v1619_v4  ;;  %p454_p6 = scmp.lt.s32.totalorder %s451_s13, 143 }
  0x14   : > { %s1223_s16 = sshll.u32 %s432_s15, 2  ;;  %s1224_s20 = sshll.u32 %s2239_s11, 2 }
  0x15   : > { %s1629_s19 = scalar_lea.vmem %s2163_s0, %s1223_s16  ;;  %v501_v7 = vrot.slane %v499_v5, 7  ;;  %s1634_s23 = scalar_lea.vmem %s2164_s1, %s1224_s20 }
  0x16   : > { %s463_s24 = smul.u32 18, %s462_s14  ;;  %v1637_v8 = vld [vmem:[%s1629_s19] sm:$0xff]   ;;  %v1640_v9 = vld [vmem:[%s1629_s19 + $0x8] sm:$0xff]   ;;  %s2241_s13 = smov (!%p454_p6, %s451_s13), 143  ;;  %v1650_v13 = vld [vmem:[%s1629_s19 + $0x10] sm:$0xff]  }
  0x17   : > { %v503_v10 = vsub.f32 %v1619_v4, %v501_v7  ;;  %v1644_v11 = vld [vmem:[%s1634_s23] sm:$0xff]   ;;  %v1647_v12 = vld [vmem:[%s1634_s23 + $0x8] sm:$0xff]   ;;  %v1269_v14 = vunpack.c.l.bf16 %v1637_v8  ;;  %v1270_v15 = vunpack.c.h.bf16 %v1637_v8  ;;  %v1657_v18 = vld [vmem:[%s1634_s23 + $0x10] sm:$0xff]   ;;  %s1225_s29 = sshll.u32 %s2241_s13, 2  ;;  %v1273_v22 = vunpack.c.l.bf16 %v1640_v9  ;;  %p488_p8 = scmp.lt.s32.totalorder %s1607_s28, 35 }
  0x18   : > { %p466_p7 = scmp.lt.s32.totalorder %s463_s24, 143  ;;  %v1305_v20 = vunpack.c.l.bf16 %v1644_v11  ;;  %v1306_v21 = vunpack.c.h.bf16 %v1644_v11  ;;  %v1663_v23 = vld [vmem:[%s1629_s19 + $0x18] sm:$0xff]   ;;  %s1671_s9 = scalar_lea.vmem %s2165_s2, %s1225_s29  ;;  %v1274_v25 = vunpack.c.h.bf16 %v1640_v9  ;;  %v1309_v26 = vunpack.c.l.bf16 %v1647_v12  ;;  %v1678_v29 = vld [vmem:[%s1629_s19 + $0x20] sm:$0xff]   ;;  %v1710_v47 = vld [vmem:[%s1629_s19 + $0x28] sm:$0xff]  }
  0x19   : > { %v504_v19 = vmax.f32 %v503_v10, 0.0  ;;  %v1666_v24 = vld [vmem:[%s1634_s23 + $0x18] sm:$0xff]   ;;  %v1310_v27 = vunpack.c.h.bf16 %v1647_v12  ;;  %v1682_v31 = vld [vmem:[%s1671_s9] sm:$0xff]   ;;  %v1685_v32 = vld [vmem:[%s1671_s9 + $0x8] sm:$0xff]   ;;  %s2245_s28 = smov (!%p488_p8, %s1607_s28), 35 }
  0x1a   : > { %s2243_s24 = smov (!%p466_p7, %s463_s24), 143  ;;  %v1691_v36 = vld [vmem:[%s1671_s9 + $0x10] sm:$0xff]   ;;  %v1698_v41 = vld [vmem:[%s1671_s9 + $0x18] sm:$0xff]   ;;  %v1701_v42 = vld [vmem:[%s1634_s23 + $0x20] sm:$0xff]   ;;  %v1341_v43 = vunpack.c.l.bf16 %v1682_v31  ;;  %v1342_v44 = vunpack.c.h.bf16 %v1682_v31  ;;  %v1345_v48 = vunpack.c.l.bf16 %v1685_v32  ;;  %v1346_v49 = vunpack.c.h.bf16 %v1685_v32  ;;  %s1227_s18 = sshll.u32 %s2245_s28, 2 }
  0x1b   : > { %v505_v30 = vadd.f32 1e-05, %v504_v19  ;;  %s1226_s10 = sshll.u32 %s2243_s24, 2  ;;  %v1707_v46 = vld [vmem:[%s1671_s9 + $0x20] sm:$0xff]   ;;  %v1745_v1 = vld [vmem:[%s1634_s23 + $0x28] sm:$0xff]   ;;  %v1762_v60 = vld [vmem:[%s1629_s19 + $0x30] sm:$0xff]   ;;  %v2178_v32 = vunpack.c.h.bf16 %v1650_v13  ;;  %s1932_s28 = scalar_lea.vmem %s2170_s7, %s1227_s18 }
  0x1c   : > { %s1715_s13 = scalar_lea.vmem %s2166_s3, %s1226_s10  ;;  %v1752_v10 = vld [vmem:[%s1671_s9 + $0x28] sm:$0xff]   ;;  %v1765_v58 = vld [vmem:[%s1634_s23 + $0x30] sm:$0xff]   ;;  %v1782_v57 = vld [vmem:[%s1629_s19 + $0x38] sm:$0xff]  }
  0x1d   : > { %1520 = vrsqrt.f32 %v505_v30  ;;  %v1722_v52 = vld [vmem:[%s1715_s13] sm:$0xff]   ;;  %v1725_v53 = vld [vmem:[%s1715_s13 + $0x8] sm:$0xff]   ;;  %v1728_v54 = vld [vmem:[%s1715_s13 + $0x10] sm:$0xff]  }
  0x1e   : > { %v1735_v59 = vld [vmem:[%s1715_s13 + $0x18] sm:$0xff]   ;;  %v1741_v63 = vld [vmem:[%s1715_s13 + $0x20] sm:$0xff]   ;;  %v1377_v2 = vunpack.c.l.bf16 %v1722_v52  ;;  %v1378_v3 = vunpack.c.h.bf16 %v1722_v52  ;;  %v1755_v19 = vld [vmem:[%s1715_s13 + $0x28] sm:$0xff]   ;;  %v2176_v12 = vunpack.c.h.bf16 %v1725_v53 }
  0x1f   : > { %v1772_v55 = vld [vmem:[%s1671_s9 + $0x30] sm:$0xff]   ;;  %v1785_v37 = vld [vmem:[%s1634_s23 + $0x38] sm:$0xff]   ;;  %v1805_v35 = vld [vmem:[%s1629_s19 + $0x40] sm:$0xff]  }
  0x20   : > { %v1775_v40 = vld [vmem:[%s1715_s13 + $0x30] sm:$0xff]   ;;  %v1795_v38 = vld [vmem:[%s1671_s9 + $0x38] sm:$0xff]   ;;  %v1812_v33 = vld [vmem:[%s1634_s23 + $0x40] sm:$0xff]  }
  0x21   : > { %v1802_v45 = vld [vmem:[%s1715_s13 + $0x38] sm:$0xff]   ;;  %v1818_v30 = vld [vmem:[%s1671_s9 + $0x40] sm:$0xff]  }
  0x22   : > { %v1821_v5 = vld [vmem:[%s1715_s13 + $0x40] sm:$0xff]  }
  0x23   : > { %2173 = vst [vmem:[#allocation2_spill] sm:$0xff] %v1821_v5 }
  0x27   : > { %v1521_v39 = vpop.eup %1520 }
  0x28   : > { %v514_v0 = vmul.f32 %v1521_v39, %v1228_v56 }
  0x2a   : > { %v517_v17 = vrot.slane %v514_v0, 1  ;;  %v1829_v39 = vrot.slane %v514_v0, %v559_v16 }
  0x2c   : > { %v519_v16 = vmul.f32 %v517_v17, %v1619_v4  ;;  %v561_v0 = vmul.f32 %v1269_v14, %v1829_v39  ;;  %v562_v28 = vmul.f32 %v1270_v15, %v1829_v39  ;;  %v657_v61 = vmul.f32 %v1305_v20, %v1829_v39 }
  0x2d   : > { %v658_v7 = vmul.f32 %v1306_v21, %v1829_v39  ;;  %v765_v4 = vmul.f32 %v1341_v43, %v1829_v39  ;;  %v766_v14 = vmul.f32 %v1342_v44, %v1829_v39  ;;  %v855_v8 = vmul.f32 %v1377_v2, %v1829_v39 }
  0x2e   : > { %v520_v15 = vsub.f32 %v515_v50, %v519_v16  ;;  %v856_v17 = vmul.f32 %v1378_v3, %v1829_v39  ;;  %v563_v11 = vmul.f32 %v1273_v22, %v1829_v39  ;;  %v564_v20 = vmul.f32 %v1274_v25, %v1829_v39 }
  0x2f   : > { %v659_v21 = vmul.f32 %v1309_v26, %v1829_v39  ;;  %v660_v31 = vmul.f32 %v1310_v27, %v1829_v39  ;;  %v767_v43 = vmul.f32 %v1345_v48, %v1829_v39  ;;  %v768_v9 = vmul.f32 %v1346_v49, %v1829_v39 }
  0x30   : > { %v2174_v22 = vsub.s32 0, %v1624_v6  ;;  %v2175_v26 = vunpack.c.l.bf16 %v1725_v53  ;;  %v858_v27 = vmul.f32 %v2176_v12, %v1829_v39  ;;  %v2177_v50 = vunpack.c.l.bf16 %v1650_v13 }
  0x31   : > { %v566_v49 = vmul.f32 %v2178_v32, %v1829_v39  ;;  %v2179_v6 = vunpack.c.l.bf16 %v1657_v18  ;;  %v2180_v2 = vunpack.c.h.bf16 %v1657_v18  ;;  %v2181_v53 = vunpack.c.l.bf16 %v1691_v36 }
  0x32   : > { %v1886_v25 = vrot.slane %v520_v15, %v2174_v22  ;;  %v857_v44 = vmul.f32 %v2175_v26, %v1829_v39  ;;  %v565_v48 = vmul.f32 %v2177_v50, %v1829_v39 }
  0x33   : > { %v661_v52 = vmul.f32 %v2179_v6, %v1829_v39  ;;  %v662_v3 = vmul.f32 %v2180_v2, %v1829_v39  ;;  %v769_v16 = vmul.f32 %v2181_v53, %v1829_v39 }
  0x34   : > { %v585_v15 = vadd.f32 %v1886_v25, %v561_v0  ;;  %v586_v22 = vadd.f32 %v1886_v25, %v562_v28  ;;  %v675_v26 = vadd.f32 %v657_v61, %v1886_v25  ;;  %v676_v13 = vadd.f32 %v658_v7, %v1886_v25 }
  0x35   : > { %v783_v12 = vadd.f32 %v765_v4, %v1886_v25  ;;  %v784_v18 = vadd.f32 %v766_v14, %v1886_v25  ;;  %v873_v50 = vadd.f32 %v855_v8, %v1886_v25  ;;  %v874_v32 = vadd.f32 %v856_v17, %v1886_v25 }
  0x36   : > { %v603_v6 = vmax.f32 %v585_v15, 0.0  ;;  %v604_v0 = vmax.f32 %v586_v22, 0.0  ;;  %v693_v2 = vmax.f32 %v675_v26, 0.0  ;;  %v694_v28 = vmax.f32 %v676_v13, 0.0 }
  0x37   : > { %v801_v53 = vmax.f32 %v783_v12, 0.0  ;;  %v802_v61 = vmax.f32 %v784_v18, 0.0  ;;  %v891_v62 = vmax.f32 %v873_v50, 0.0  ;;  %v892_v7 = vmax.f32 %v874_v32, 0.0 }
  0x38   : > { %v711_v34 = vmax.f32 %v603_v6, %v693_v2  ;;  %v712_v56 = vmax.f32 %v604_v0, %v694_v28  ;;  %v587_v51 = vadd.f32 %v1886_v25, %v563_v11  ;;  %v588_v4 = vadd.f32 %v1886_v25, %v564_v20 }
  0x39   : > { %v909_v14 = vmax.f32 %v801_v53, %v891_v62  ;;  %v910_v5 = vmax.f32 %v802_v61, %v892_v7  ;;  %v677_v8 = vadd.f32 %v659_v21, %v1886_v25  ;;  %v678_v17 = vadd.f32 %v660_v31, %v1886_v25 }
  0x3a   : > { %v605_v15 = vmax.f32 %v587_v51, 0.0  ;;  %v606_v22 = vmax.f32 %v588_v4, 0.0  ;;  %v785_v26 = vadd.f32 %v767_v43, %v1886_v25  ;;  %v786_v13 = vadd.f32 %v768_v9, %v1886_v25 }
  0x3b   : > { %v927_v12 = vmax.f32 %v711_v34, %v909_v14  ;;  %v928_v18 = vmax.f32 %v712_v56, %v910_v5  ;;  %v695_v50 = vmax.f32 %v677_v8, 0.0  ;;  %v696_v32 = vmax.f32 %v678_v17, 0.0 }
  0x3c   : > { %v803_v62 = vmax.f32 %v785_v26, 0.0  ;;  %v804_v11 = vmax.f32 %v786_v13, 0.0  ;;  %v875_v20 = vadd.f32 %v857_v44, %v1886_v25  ;;  %v876_v51 = vadd.f32 %v858_v27, %v1886_v25 }
  0x3d   : > { %v1414_v21 = vpack.c.bf16 %v928_v18, %v927_v12  ;;  %v713_v31 = vmax.f32 %v605_v15, %v695_v50  ;;  %v714_v43 = vmax.f32 %v606_v22, %v696_v32  ;;  %v589_v34 = vadd.f32 %v1886_v25, %v565_v48 }
  0x3e   : > { %v893_v5 = vmax.f32 %v875_v20, 0.0  ;;  %v894_v56 = vmax.f32 %v876_v51, 0.0  ;;  %v590_v9 = vadd.f32 %v1886_v25, %v566_v49  ;;  %v679_v6 = vadd.f32 %v661_v52, %v1886_v25 }
  0x3f   : > { %1415 = vst [vmem:[%s1932_s28] sm:$0xff] %v1414_v21   ;;  %v607_v0 = vmax.f32 %v589_v34, 0.0  ;;  %v680_v2 = vadd.f32 %v662_v3, %v1886_v25  ;;  %v2182_v44 = vunpack.c.h.bf16 %v1691_v36  ;;  %v787_v27 = vadd.f32 %v769_v16, %v1886_v25 }
  0x40   : > { %v911_v53 = vmax.f32 %v803_v62, %v893_v5  ;;  %v912_v61 = vmax.f32 %v804_v11, %v894_v56  ;;  %v608_v7 = vmax.f32 %v590_v9, 0.0  ;;  %v697_v48 = vmax.f32 %v679_v6, 0.0 }
  0x41   : > { %v770_v28 = vmul.f32 %v2182_v44, %v1829_v39  ;;  %v698_v4 = vmax.f32 %v680_v2, 0.0  ;;  %v805_v49 = vmax.f32 %v787_v27, 0.0  ;;  %v2183_v52 = vunpack.c.l.bf16 %v1728_v54 }
  0x42   : > { %v929_v17 = vmax.f32 %v713_v31, %v911_v53  ;;  %v930_v3 = vmax.f32 %v714_v43, %v912_v61  ;;  %v715_v15 = vmax.f32 %v607_v0, %v697_v48  ;;  %v2184_v36 = vunpack.c.h.bf16 %v1728_v54 }
  0x43   : > { %v788_v14 = vadd.f32 %v770_v28, %v1886_v25  ;;  %v859_v8 = vmul.f32 %v2183_v52, %v1829_v39  ;;  %v716_v22 = vmax.f32 %v608_v7, %v698_v4  ;;  %v2185_v12 = vunpack.c.l.bf16 %v1663_v23 }
  0x44   : > { %v860_v16 = vmul.f32 %v2184_v36, %v1829_v39  ;;  %v1419_v50 = vpack.c.bf16 %v930_v3, %v929_v17  ;;  %v2186_v62 = vunpack.c.h.bf16 %v1663_v23  ;;  %v2187_v20 = vunpack.c.l.bf16 %v1666_v24 }
  0x45   : > { %v806_v26 = vmax.f32 %v788_v14, 0.0  ;;  %v877_v13 = vadd.f32 %v859_v8, %v1886_v25  ;;  %v567_v18 = vmul.f32 %v2185_v12, %v1829_v39  ;;  %v2188_v31 = vunpack.c.h.bf16 %v1666_v24 }
  0x46   : > { %v878_v32 = vadd.f32 %v860_v16, %v1886_v25  ;;  %v568_v11 = vmul.f32 %v2186_v62, %v1829_v39  ;;  %v663_v54 = vmul.f32 %v2187_v20, %v1829_v39  ;;  %v2189_v34 = vunpack.c.l.bf16 %v1698_v41  ;;  %1488 = vst [vmem:[%s1932_s28 + $0x8] sm:$0xff] %v1419_v50  }
  0x47   : > { %v895_v51 = vmax.f32 %v877_v13, 0.0  ;;  %v591_v21 = vadd.f32 %v1886_v25, %v567_v18  ;;  %v664_v43 = vmul.f32 %v2188_v31, %v1829_v39  ;;  %v2190_v6 = vunpack.c.h.bf16 %v1698_v41 }
  0x48   : > { %v771_v5 = vmul.f32 %v2189_v34, %v1829_v39  ;;  %v896_v56 = vmax.f32 %v878_v32, 0.0  ;;  %v592_v23 = vadd.f32 %v1886_v25, %v568_v11  ;;  %v681_v9 = vadd.f32 %v663_v54, %v1886_v25 }
  0x49   : > { %v772_v0 = vmul.f32 %v2190_v6, %v1829_v39  ;;  %v913_v2 = vmax.f32 %v805_v49, %v895_v51  ;;  %v609_v44 = vmax.f32 %v591_v21, 0.0  ;;  %v682_v28 = vadd.f32 %v664_v43, %v1886_v25 }
  0x4a   : > { %v789_v24 = vadd.f32 %v771_v5, %v1886_v25  ;;  %v914_v27 = vmax.f32 %v806_v26, %v896_v56  ;;  %v610_v53 = vmax.f32 %v592_v23, 0.0  ;;  %v699_v61 = vmax.f32 %v681_v9, 0.0 }
  0x4b   : > { %v790_v7 = vadd.f32 %v772_v0, %v1886_v25  ;;  %v931_v48 = vmax.f32 %v715_v15, %v913_v2  ;;  %v700_v4 = vmax.f32 %v682_v28, 0.0  ;;  %v2191_v52 = vunpack.c.l.bf16 %v1735_v59 }
  0x4c   : > { %v807_v14 = vmax.f32 %v789_v24, 0.0  ;;  %v932_v41 = vmax.f32 %v716_v22, %v914_v27  ;;  %v717_v49 = vmax.f32 %v609_v44, %v699_v61  ;;  %v2192_v3 = vunpack.c.h.bf16 %v1735_v59 }
  0x4d   : > { %v861_v8 = vmul.f32 %v2191_v52, %v1829_v39  ;;  %v808_v17 = vmax.f32 %v790_v7, 0.0  ;;  %v718_v16 = vmax.f32 %v610_v53, %v700_v4  ;;  %v2193_v15 = vunpack.c.l.bf16 %v1678_v29 }
  0x4e   : > { %v862_v36 = vmul.f32 %v2192_v3, %v1829_v39  ;;  %v2194_v12 = vunpack.c.h.bf16 %v1678_v29  ;;  %v1424_v50 = vpack.c.bf16 %v932_v41, %v931_v48  ;;  %v2195_v32 = vunpack.c.l.bf16 %v1701_v42 }
  0x4f   : > { %v879_v26 = vadd.f32 %v861_v8, %v1886_v25  ;;  %v569_v13 = vmul.f32 %v2193_v15, %v1829_v39  ;;  %v2196_v59 = vunpack.c.h.bf16 %v1701_v42  ;;  %v2197_v29 = vunpack.c.l.bf16 %v1707_v46 }
  0x50   : > { %v570_v18 = vmul.f32 %v2194_v12, %v1829_v39  ;;  %v880_v22 = vadd.f32 %v862_v36, %v1886_v25  ;;  %v665_v62 = vmul.f32 %v2195_v32, %v1829_v39  ;;  %1489 = vst [vmem:[%s1932_s28 + $0x10] sm:$0xff] %v1424_v50   ;;  %v2198_v5 = vunpack.c.h.bf16 %v1707_v46 }
  0x51   : > { %v666_v11 = vmul.f32 %v2196_v59, %v1829_v39  ;;  %v897_v20 = vmax.f32 %v879_v26, 0.0  ;;  %v593_v54 = vadd.f32 %v1886_v25, %v569_v13  ;;  %v773_v21 = vmul.f32 %v2197_v29, %v1829_v39 }
  0x52   : > { %v594_v51 = vadd.f32 %v1886_v25, %v570_v18  ;;  %v898_v31 = vmax.f32 %v880_v22, 0.0  ;;  %v683_v43 = vadd.f32 %v665_v62, %v1886_v25  ;;  %v774_v42 = vmul.f32 %v2198_v5, %v1829_v39 }
  0x53   : > { %v684_v34 = vadd.f32 %v666_v11, %v1886_v25  ;;  %v915_v56 = vmax.f32 %v807_v14, %v897_v20  ;;  %v611_v23 = vmax.f32 %v593_v54, 0.0  ;;  %v791_v6 = vadd.f32 %v773_v21, %v1886_v25 }
  0x54   : > { %v612_v9 = vmax.f32 %v594_v51, 0.0  ;;  %v916_v0 = vmax.f32 %v808_v17, %v898_v31  ;;  %v701_v2 = vmax.f32 %v683_v43, 0.0  ;;  %v792_v28 = vadd.f32 %v774_v42, %v1886_v25 }
  0x55   : > { %v702_v44 = vmax.f32 %v684_v34, 0.0  ;;  %v933_v24 = vmax.f32 %v717_v49, %v915_v56  ;;  %v809_v27 = vmax.f32 %v791_v6, 0.0  ;;  %v2199_v53 = vunpack.c.l.bf16 %v1741_v63 }
  0x56   : > { %v2200_v46 = vunpack.c.h.bf16 %v1741_v63  ;;  %v934_v48 = vmax.f32 %v718_v16, %v916_v0  ;;  %v719_v4 = vmax.f32 %v611_v23, %v701_v2  ;;  %v810_v52 = vmax.f32 %v792_v28, 0.0 }
  0x57   : > { %v863_v61 = vmul.f32 %v2199_v53, %v1829_v39  ;;  %v720_v14 = vmax.f32 %v612_v9, %v702_v44  ;;  %v2201_v49 = vunpack.c.l.bf16 %v1710_v47  ;;  %v2202_v3 = vunpack.c.h.bf16 %v1710_v47 }
  0x58   : > { %v864_v7 = vmul.f32 %v2200_v46, %v1829_v39  ;;  %v1429_v26 = vpack.c.bf16 %v934_v48, %v933_v24  ;;  %v2203_v63 = vunpack.c.l.bf16 %v1745_v1  ;;  %v2204_v15 = vunpack.c.h.bf16 %v1745_v1 }
  0x59   : > { %v881_v8 = vadd.f32 %v863_v61, %v1886_v25  ;;  %v571_v17 = vmul.f32 %v2201_v49, %v1829_v39  ;;  %v572_v36 = vmul.f32 %v2202_v3, %v1829_v39  ;;  %v2205_v12 = vunpack.c.l.bf16 %v1752_v10 }
  0x5a   : > { %v882_v41 = vadd.f32 %v864_v7, %v1886_v25  ;;  %v667_v16 = vmul.f32 %v2203_v63, %v1829_v39  ;;  %v668_v13 = vmul.f32 %v2204_v15, %v1829_v39  ;;  %1490 = vst [vmem:[%s1932_s28 + $0x18] sm:$0xff] %v1429_v26   ;;  %v2206_v11 = vunpack.c.h.bf16 %v1752_v10 }
  0x5b   : > { %v775_v18 = vmul.f32 %v2205_v12, %v1829_v39  ;;  %v899_v50 = vmax.f32 %v881_v8, 0.0  ;;  %v595_v32 = vadd.f32 %v1886_v25, %v571_v17  ;;  %v596_v47 = vadd.f32 %v1886_v25, %v572_v36 }
  0x5c   : > { %v900_v22 = vmax.f32 %v882_v41, 0.0  ;;  %v685_v62 = vadd.f32 %v667_v16, %v1886_v25  ;;  %v686_v59 = vadd.f32 %v668_v13, %v1886_v25  ;;  %v776_v1 = vmul.f32 %v2206_v11, %v1829_v39 }
  0x5d   : > { %v793_v20 = vadd.f32 %v775_v18, %v1886_v25  ;;  %v917_v54 = vmax.f32 %v809_v27, %v899_v50  ;;  %v613_v29 = vmax.f32 %v595_v32, 0.0  ;;  %v614_v21 = vmax.f32 %v596_v47, 0.0 }
  0x5e   : > { %v918_v51 = vmax.f32 %v810_v52, %v900_v22  ;;  %v703_v31 = vmax.f32 %v685_v62, 0.0  ;;  %v704_v43 = vmax.f32 %v686_v59, 0.0  ;;  %v794_v34 = vadd.f32 %v776_v1, %v1886_v25 }
  0x5f   : > { %v811_v5 = vmax.f32 %v793_v20, 0.0  ;;  %v935_v42 = vmax.f32 %v719_v4, %v917_v54  ;;  %v2207_v23 = vunpack.c.l.bf16 %v1755_v19  ;;  %v2208_v10 = vunpack.c.h.bf16 %v1755_v19 }
  0x60   : > { %v936_v56 = vmax.f32 %v720_v14, %v918_v51  ;;  %v721_v0 = vmax.f32 %v613_v29, %v703_v31  ;;  %v722_v2 = vmax.f32 %v614_v21, %v704_v43  ;;  %v812_v44 = vmax.f32 %v794_v34, 0.0 }
  0x61   : > { %v865_v9 = vmul.f32 %v2207_v23, %v1829_v39  ;;  %v866_v6 = vmul.f32 %v2208_v10, %v1829_v39  ;;  %v2209_v28 = vunpack.c.l.bf16 %v1762_v60  ;;  %v2210_v46 = vunpack.c.h.bf16 %v1762_v60 }
  0x62   : > { %v1434_v27 = vpack.c.bf16 %v936_v56, %v935_v42  ;;  %v2211_v19 = vunpack.c.l.bf16 %v1765_v58  ;;  %v2212_v14 = vunpack.c.h.bf16 %v1765_v58  ;;  %v2213_v8 = vunpack.c.l.bf16 %v1772_v55 }
  0x63   : > { %v573_v24 = vmul.f32 %v2209_v28, %v1829_v39  ;;  %v883_v53 = vadd.f32 %v865_v9, %v1886_v25  ;;  %v884_v61 = vadd.f32 %v866_v6, %v1886_v25  ;;  %v574_v7 = vmul.f32 %v2210_v46, %v1829_v39 }
  0x64   : > { %v669_v4 = vmul.f32 %v2211_v19, %v1829_v39  ;;  %v670_v52 = vmul.f32 %v2212_v14, %v1829_v39  ;;  %v777_v41 = vmul.f32 %v2213_v8, %v1829_v39  ;;  %1491 = vst [vmem:[%s1932_s28 + $0x20] sm:$0xff] %v1434_v27   ;;  %v2214_v3 = vunpack.c.h.bf16 %v1772_v55 }
  0x65   : > { %v597_v48 = vadd.f32 %v1886_v25, %v573_v24  ;;  %v901_v49 = vmax.f32 %v883_v53, 0.0  ;;  %v902_v17 = vmax.f32 %v884_v61, 0.0  ;;  %v598_v60 = vadd.f32 %v1886_v25, %v574_v7 }
  0x66   : > { %v778_v36 = vmul.f32 %v2214_v3, %v1829_v39  ;;  %v687_v63 = vadd.f32 %v669_v4, %v1886_v25  ;;  %v688_v16 = vadd.f32 %v670_v52, %v1886_v25  ;;  %v795_v58 = vadd.f32 %v777_v41, %v1886_v25 }
  0x67   : > { %v615_v26 = vmax.f32 %v597_v48, 0.0  ;;  %v919_v15 = vmax.f32 %v811_v5, %v901_v49  ;;  %v920_v13 = vmax.f32 %v812_v44, %v902_v17  ;;  %v616_v12 = vmax.f32 %v598_v60, 0.0 }
  0x68   : > { %v796_v18 = vadd.f32 %v778_v36, %v1886_v25  ;;  %v705_v50 = vmax.f32 %v687_v63, 0.0  ;;  %v706_v22 = vmax.f32 %v688_v16, 0.0  ;;  %v813_v32 = vmax.f32 %v795_v58, 0.0 }
  0x69   : > { %v2215_v47 = vunpack.c.l.bf16 %v1775_v40  ;;  %v937_v62 = vmax.f32 %v721_v0, %v919_v15  ;;  %v938_v59 = vmax.f32 %v722_v2, %v920_v13  ;;  %v2216_v1 = vunpack.c.h.bf16 %v1775_v40 }
  0x6a   : > { %v814_v11 = vmax.f32 %v796_v18, 0.0  ;;  %v723_v54 = vmax.f32 %v615_v26, %v705_v50  ;;  %v724_v51 = vmax.f32 %v616_v12, %v706_v22  ;;  %v2217_v21 = vunpack.c.l.bf16 %v1782_v57 }
  0x6b   : > { %v867_v55 = vmul.f32 %v2215_v47, %v1829_v39  ;;  %v868_v20 = vmul.f32 %v2216_v1, %v1829_v39  ;;  %v1439_v43 = vpack.c.bf16 %v938_v59, %v937_v62  ;;  %v2218_v5 = vunpack.c.h.bf16 %v1782_v57 }
  0x6c   : > { %v575_v31 = vmul.f32 %v2217_v21, %v1829_v39  ;;  %v2219_v56 = vunpack.c.l.bf16 %v1785_v37  ;;  %v2220_v10 = vunpack.c.h.bf16 %v1785_v37  ;;  %v2221_v0 = vunpack.c.l.bf16 %v1795_v38 }
  0x6d   : > { %v885_v29 = vadd.f32 %v867_v55, %v1886_v25  ;;  %v886_v34 = vadd.f32 %v868_v20, %v1886_v25  ;;  %v576_v42 = vmul.f32 %v2218_v5, %v1829_v39  ;;  %1492 = vst [vmem:[%s1932_s28 + $0x28] sm:$0xff] %v1439_v43   ;;  %v2222_v24 = vunpack.c.h.bf16 %v1795_v38 }
  0x6e   : > { %v671_v40 = vmul.f32 %v2219_v56, %v1829_v39  ;;  %v599_v9 = vadd.f32 %v1886_v25, %v575_v31  ;;  %v672_v6 = vmul.f32 %v2220_v10, %v1829_v39  ;;  %v779_v2 = vmul.f32 %v2221_v0, %v1829_v39 }
  0x6f   : > { %v903_v23 = vmax.f32 %v885_v29, 0.0  ;;  %v904_v44 = vmax.f32 %v886_v34, 0.0  ;;  %v600_v57 = vadd.f32 %v1886_v25, %v576_v42  ;;  %v780_v27 = vmul.f32 %v2222_v24, %v1829_v39 }
  0x70   : > { %v689_v28 = vadd.f32 %v671_v40, %v1886_v25  ;;  %v617_v61 = vmax.f32 %v599_v9, 0.0  ;;  %v690_v46 = vadd.f32 %v672_v6, %v1886_v25  ;;  %v797_v37 = vadd.f32 %v779_v2, %v1886_v25  ;;  %v2231_v40 = vld [vmem:[#allocation2_spill] sm:$0xff] }
  0x71   : > { %v921_v53 = vmax.f32 %v813_v32, %v903_v23  ;;  %v922_v7 = vmax.f32 %v814_v11, %v904_v44  ;;  %v618_v48 = vmax.f32 %v600_v57, 0.0  ;;  %v798_v4 = vadd.f32 %v780_v27, %v1886_v25 }
  0x72   : > { %v707_v19 = vmax.f32 %v689_v28, 0.0  ;;  %v708_v52 = vmax.f32 %v690_v46, 0.0  ;;  %v815_v8 = vmax.f32 %v797_v37, 0.0  ;;  %v2223_v41 = vunpack.c.l.bf16 %v1802_v45 }
  0x73   : > { %v939_v14 = vmax.f32 %v723_v54, %v921_v53  ;;  %v940_v38 = vmax.f32 %v724_v51, %v922_v7  ;;  %v816_v60 = vmax.f32 %v798_v4, 0.0  ;;  %v2224_v3 = vunpack.c.h.bf16 %v1802_v45 }
  0x74   : > { %v869_v49 = vmul.f32 %v2223_v41, %v1829_v39  ;;  %v725_v17 = vmax.f32 %v617_v61, %v707_v19  ;;  %v726_v26 = vmax.f32 %v618_v48, %v708_v52  ;;  %v2225_v16 = vunpack.c.l.bf16 %v1805_v35 }
  0x75   : > { %v870_v36 = vmul.f32 %v2224_v3, %v1829_v39  ;;  %v2226_v15 = vunpack.c.h.bf16 %v1805_v35  ;;  %v1444_v12 = vpack.c.bf16 %v940_v38, %v939_v14  ;;  %v2227_v50 = vunpack.c.l.bf16 %v1812_v33 }
  0x76   : > { %v887_v63 = vadd.f32 %v869_v49, %v1886_v25  ;;  %v577_v58 = vmul.f32 %v2225_v16, %v1829_v39  ;;  %v2228_v45 = vunpack.c.h.bf16 %v1812_v33  ;;  %v2229_v35 = vunpack.c.l.bf16 %v1818_v30 }
  0x77   : > { %v578_v13 = vmul.f32 %v2226_v15, %v1829_v39  ;;  %v888_v18 = vadd.f32 %v870_v36, %v1886_v25  ;;  %v673_v22 = vmul.f32 %v2227_v50, %v1829_v39  ;;  %1493 = vst [vmem:[%s1932_s28 + $0x30] sm:$0xff] %v1444_v12   ;;  %v2230_v54 = vunpack.c.h.bf16 %v1818_v30 }
  0x78   : > { %v674_v32 = vmul.f32 %v2228_v45, %v1829_v39  ;;  %v905_v47 = vmax.f32 %v887_v63, 0.0  ;;  %v601_v55 = vadd.f32 %v1886_v25, %v577_v58  ;;  %v781_v59 = vmul.f32 %v2229_v35, %v1829_v39 }
  0x79   : > { %v602_v62 = vadd.f32 %v1886_v25, %v578_v13  ;;  %v906_v11 = vmax.f32 %v888_v18, 0.0  ;;  %v691_v1 = vadd.f32 %v673_v22, %v1886_v25  ;;  %v782_v33 = vmul.f32 %v2230_v54, %v1829_v39 }
  0x7a   : > { %v692_v20 = vadd.f32 %v674_v32, %v1886_v25  ;;  %v923_v51 = vmax.f32 %v815_v8, %v905_v47  ;;  %v619_v29 = vmax.f32 %v601_v55, 0.0  ;;  %v799_v21 = vadd.f32 %v781_v59, %v1886_v25 }
  0x7b   : > { %v924_v31 = vmax.f32 %v816_v60, %v906_v11  ;;  %v620_v43 = vmax.f32 %v602_v62, 0.0  ;;  %v709_v34 = vmax.f32 %v691_v1, 0.0  ;;  %v800_v5 = vadd.f32 %v782_v33, %v1886_v25 }
  0x7c   : > { %v941_v42 = vmax.f32 %v725_v17, %v923_v51  ;;  %v710_v56 = vmax.f32 %v692_v20, 0.0  ;;  %v2232_v23 = vunpack.c.l.bf16 %v2231_v40  ;;  %v2233_v30 = vunpack.c.h.bf16 %v2231_v40 }
  0x7d   : > { %v942_v6 = vmax.f32 %v726_v26, %v924_v31  ;;  %v817_v0 = vmax.f32 %v799_v21, 0.0  ;;  %v818_v2 = vmax.f32 %v800_v5, 0.0  ;;  %v727_v24 = vmax.f32 %v619_v29, %v709_v34 }
  0x7e   : > { %v871_v9 = vmul.f32 %v2232_v23, %v1829_v39  ;;  %v872_v10 = vmul.f32 %v2233_v30, %v1829_v39  ;;  %v728_v27 = vmax.f32 %v620_v43, %v710_v56 }
  0x7f   : > { %v1449_v28 = vpack.c.bf16 %v942_v6, %v941_v42 }
  0x80   : > { %v889_v44 = vadd.f32 %v871_v9, %v1886_v25  ;;  %v890_v57 = vadd.f32 %v872_v10, %v1886_v25 }
  0x81   : > { %1494 = vst [vmem:[%s1932_s28 + $0x38] sm:$0xff] %v1449_v28  }
  0x82   : > { %v907_v53 = vmax.f32 %v889_v44, 0.0  ;;  %v908_v61 = vmax.f32 %v890_v57, 0.0 }
  0x84   : > { %v925_v46 = vmax.f32 %v817_v0, %v907_v53  ;;  %v926_v37 = vmax.f32 %v818_v2, %v908_v61 }
  0x86   : > { %v943_v7 = vmax.f32 %v727_v24, %v925_v46  ;;  %v944_v48 = vmax.f32 %v728_v27, %v926_v37 }
  0x88   : > { %v1454_v19 = vpack.c.bf16 %v944_v48, %v943_v7 }
  0x8a   : > { %1495 = vst [vmem:[%s1932_s28 + $0x40] sm:$0xff] %v1454_v19  }
  0x8b PF: > { %s17_s26 = sadd.s32 1, %s1544_s26   ;;  %s2234_s24 = smov %s1540_s25 }
  0x8c   : > { %p14_p9 = scmp.ge.s32.totalorder %s17_s26, 4   ;;  %s2235_s25 = smov %s2237_s27 }
  0x8e   :  { %16 = sbr.rel (!%p14_p9) target bundleno = 2 (0x2), region = 96 }

// kernel: squeeze.18
= control target key start
LH: loop header
LB: loop body
LE: loop exit
PB: predicated region body
PF: predicated region fallthrough
CT: control target
= control target key end

     0   :  { %s183_s12 = smov 24  ;;  %s188_s13 = smov 96  ;;  %vm180_vm0 = vcmask 1042433   ;;  %vm185_vm1 = vcmask 1044483   ;;  %vm190_vm2 = vcmask 1046533   ;;  %vm194_vm3 = vcmask 1047559   ;;  %s401_s0 = inlined_call_operand.vmem [shape: bf16[1,2,4,4,64], index: 0, kind: input, shape index: {}]   ;;  %s402_s1 = inlined_call_operand.vmem [shape: bf16[2,1024], index: 1, kind: output, shape index: {}]  }
   0x1   :  { %v308_v0 = vld [vmem:[%s401_s0 + $0x6] sm:$0xff]   ;;  %v312_v1 = vld [vmem:[%s401_s0 + $0x2] sm:$0xf]   ;;  %v125_v2 = vld [vmem:[%s401_s0] ss:$14 sps:$2 sm:$0xf]  }
   0x2   :  { %v49_v3 = vunpack.c.h.bf16 %v308_v0  ;;  %v65_v4 = vunpack.c.l.bf16 %v308_v0  ;;  %v112_v5 = vunpack.c.l.bf16 %v312_v1  ;;  %v126_v6 = vunpack.c.l.bf16 %v125_v2  ;;  %s178_s0 = smov 6  ;;  %s209_s14 = smov 6 }
   0x3   :  { %s214_s15 = smov 24  ;;  %s219_s16 = smov 96  ;;  %vm131_vm4 = vcmask 523264   ;;  %vm198_vm5 = vcmask 1048064   ;;  %v323_v38 = vmov 0.0  }
   0x4   :  { %52 = vst [vmem:[#allocation1 + $0x28] ss:$8 sps:$4 sm:$0xff] %v49_v3   ;;  %68 = vst [vmem:[#allocation1 + $0x18] ss:$8 sps:$4 sm:$0xff] %v65_v4   ;;  %s129_s17 = smov 3  ;;  %s134_s18 = smov 3 }
   0x5   :  { %115 = vst [vmem:[#allocation1 + $0x8] ss:$8 sps:$4 sm:$0xff] %v112_v5   ;;  %128 = vst [vmem:[#allocation1] ss:$56 sps:$4 sm:$0xff] %v126_v6   ;;  %s343_s19 = smov 3  ;;  %s345_s20 = smov 3 }
   0x6   :  { %s347_s21 = smov 3  ;;  %s349_s22 = smov 3 }
   0x7   :  { %s351_s23 = smov 3  ;;  %s353_s24 = smov 3 }
   0x8   :  { %s322_s25 = smov 64  }
   0xb   :  { %v193_v12 = vld [vmem:[#allocation1 + $0x24] sm:$0x80]   ;;  %v153_v25 = vld [vmem:[#allocation1 + $0x20] ss:$2 sm:%s343_s19]  }
   0xc   :  { %v176_v7 = vld [vmem:[#allocation1 + $0x1] sm:$0x1]   ;;  %v184_v9 = vld [vmem:[#allocation1 + $0x71] ss:$-26 sm:%s183_s12]   ;;  %v130_v21 = vld [vmem:[#allocation1] ss:$2 sm:%s129_s17]  }
   0xd   :  { %v179_v8 = vld [vmem:[#allocation1 + $0x3f] ss:$-30 sm:%s178_s0]   ;;  %v207_v13 = vld [vmem:[#allocation1 + $0x11] sm:$0x1]   ;;  %v224_v20 = vld [vmem:[#allocation1 + $0x34] sm:$0x80]  }
   0xe   :  { %v181_v10 = vsel %vm180_vm0, %v179_v8, %v176_v7  ;;  %v189_v11 = vld [vmem:[#allocation1 + $0xbf] ss:$-30 sm:%s188_s13]   ;;  %v210_v15 = vld [vmem:[#allocation1 + $0x4f] ss:$-30 sm:%s209_s14]   ;;  %v135_v22 = vld [vmem:[#allocation1 + $0x8] ss:$2 sm:%s134_s18]  }
   0xf   :  { %v186_v14 = vsel %vm185_vm1, %v184_v9, %v181_v10  ;;  %v215_v16 = vld [vmem:[#allocation1 + $0x81] ss:$-26 sm:%s214_s15]   ;;  %v212_v19 = vsel %vm180_vm0, %v210_v15, %v207_v13  ;;  %132 = vst.msk [vmem:[#allocation0] ss:$8 sm:$0x3] %vm131_vm4, %v130_v21  }
  0x10   :  { %v220_v17 = vld [vmem:[#allocation1 + $0xcf] ss:$-30 sm:%s219_s16]   ;;  %v191_v18 = vsel %vm190_vm2, %v189_v11, %v186_v14  ;;  %v217_v24 = vsel %vm185_vm1, %v215_v16, %v212_v19  ;;  %138 = vst.msk [vmem:[#allocation0 + $0x10] ss:$8 sm:$0x3] %vm131_vm4, %v135_v22  }
  0x11   :  { %v195_v23 = vsel %vm194_vm3, %v193_v12, %v191_v18  ;;  %v159_v26 = vld [vmem:[#allocation1 + $0x28] ss:$2 sm:%s345_s20]   ;;  %v222_v28 = vsel %vm190_vm2, %v220_v17, %v217_v24  ;;  %156 = vst.msk [vmem:[#allocation0 + $0x1] ss:$8 sm:$0x3] %vm131_vm4, %v153_v25  }
  0x12   :  { %v141_v27 = vld [vmem:[#allocation1 + $0x10] ss:$2 sm:%s347_s21]   ;;  %196 = vrot.lane.b32.xlu0 %v195_v23, %s322_s25  ;;  %162 = vst.msk [vmem:[#allocation0 + $0x11] ss:$8 sm:$0x3] %vm131_vm4, %v159_v26   ;;  %v226_v32 = vsel %vm194_vm3, %v224_v20, %v222_v28 }
  0x13   :  { %144 = vst.msk [vmem:[#allocation0 + $0x20] ss:$8 sm:$0x3] %vm131_vm4, %v141_v27   ;;  %v147_v29 = vld [vmem:[#allocation1 + $0x18] ss:$2 sm:%s349_s22]  }
  0x14   :  { %v165_v30 = vld [vmem:[#allocation1 + $0x30] ss:$2 sm:%s351_s23]   ;;  %150 = vst.msk [vmem:[#allocation0 + $0x30] ss:$8 sm:$0x3] %vm131_vm4, %v147_v29  }
  0x15   :  { %v171_v31 = vld [vmem:[#allocation1 + $0x38] ss:$2 sm:%s353_s24]   ;;  %168 = vst.msk [vmem:[#allocation0 + $0x21] ss:$8 sm:$0x3] %vm131_vm4, %v165_v30  }
  0x16   :  { %174 = vst.msk [vmem:[#allocation0 + $0x31] ss:$8 sm:$0x3] %vm131_vm4, %v171_v31   ;;  %227 = vrot.lane.b32.xlu0 %v226_v32, %s322_s25 }
  0x84   :  { %v197_v33 = vpop.permute.xlu0 %196  }
  0x85   :  { %199 = vst.msk [vmem:[#allocation0] sm:$0x3] %vm198_vm5, %v197_v33   ;;  %201 = vst.msk [vmem:[#allocation0 + $0x6] sm:$0xc] %vm198_vm5, %v197_v33  }
  0x86   :  { %203 = vst.msk [vmem:[#allocation0 + $0xc] sm:$0x30] %vm198_vm5, %v197_v33   ;;  %205 = vst.msk [vmem:[#allocation0 + $0x12] sm:$0xc0] %vm198_vm5, %v197_v33  }
  0x88   :  { %v228_v34 = vpop.permute.xlu0 %227  }
  0x89   :  { %231 = vst.msk [vmem:[#allocation0 + $0x20] sm:$0x3] %vm198_vm5, %v228_v34   ;;  %233 = vst.msk [vmem:[#allocation0 + $0x26] sm:$0xc] %vm198_vm5, %v228_v34  }
  0x8a   :  { %235 = vst.msk [vmem:[#allocation0 + $0x2c] sm:$0x30] %vm198_vm5, %v228_v34   ;;  %237 = vst.msk [vmem:[#allocation0 + $0x32] sm:$0xc0] %vm198_vm5, %v228_v34  }
  0x8c   :  { %v242_v35 = vld [vmem:[#allocation0] sm:$0x3]  ;;  %v247_v36 = vld [vmem:[#allocation0 + $0x8] sm:$0x3] }
  0x8d   :  { %v253_v37 = vld [vmem:[#allocation0 + $0x10] sm:$0x3]  ;;  %v243_v39 = vpack.c.bf16 %v323_v38, %v242_v35  ;;  %v248_v40 = vpack.c.bf16 %v323_v38, %v247_v36  ;;  %v260_v42 = vld [vmem:[#allocation0 + $0x18] sm:$0x3] }
  0x8e   :  { %v254_v41 = vpack.c.bf16 %v323_v38, %v253_v37  ;;  %v261_v43 = vpack.c.bf16 %v323_v38, %v260_v42 }
  0x8f   :  { %245 = vst [vmem:[%s402_s1] sm:$0x1] %v243_v39  ;;  %313 = vst [vmem:[%s402_s1 + $0x1] sm:$0x1] %v248_v40 }
  0x90   :  { %314 = vst [vmem:[%s402_s1 + $0x2] sm:$0x1] %v254_v41  ;;  %315 = vst [vmem:[%s402_s1 + $0x3] sm:$0x1] %v261_v43  ;;  %v267_v44 = vld [vmem:[#allocation0 + $0x20] sm:$0x3] }
  0x91   :  { %v274_v45 = vld [vmem:[#allocation0 + $0x28] sm:$0x3]  ;;  %v281_v46 = vld [vmem:[#allocation0 + $0x30] sm:$0x3]  ;;  %v268_v47 = vpack.c.bf16 %v323_v38, %v267_v44  ;;  %v288_v50 = vld [vmem:[#allocation0 + $0x38] sm:$0x3] }
  0x92   :  { %v275_v48 = vpack.c.bf16 %v323_v38, %v274_v45  ;;  %v282_v49 = vpack.c.bf16 %v323_v38, %v281_v46  ;;  %v289_v51 = vpack.c.bf16 %v323_v38, %v288_v50 }
  0x93   :  { %316 = vst [vmem:[%s402_s1 + $0x4] sm:$0x1] %v268_v47 }
  0x94   :  { %317 = vst [vmem:[%s402_s1 + $0x5] sm:$0x1] %v275_v48  ;;  %318 = vst [vmem:[%s402_s1 + $0x6] sm:$0x1] %v282_v49 }
  0x95   :  { %319 = vst [vmem:[%s402_s1 + $0x7] sm:$0x1] %v289_v51 }

// kernel: jvinet_forward.10
= control target key start
LH: loop header
LB: loop body
LE: loop exit
PB: predicated region body
PF: predicated region fallthrough
CT: control target
= control target key end

     0   :  { %s984_s24 = smov 0   ;;  %s986_s25 = smov 0   ;;  %s1042_s0 = inlined_call_operand.vmem [shape: bf16[2,128,128], index: 0, kind: input, shape index: {}, may-alias: {0,1,2,3}]   ;;  %s1043_s1 = inlined_call_operand.vmem [shape: bf16[2,128,128], index: 1, kind: input, shape index: {}, may-alias: {0,1,2,3}]   ;;  %s1044_s2 = inlined_call_operand.vmem [shape: bf16[2,128,128], index: 2, kind: input, shape index: {}, may-alias: {0,1,2,3}]   ;;  %s1045_s3 = inlined_call_operand.vmem [shape: bf16[2,128,128], index: 3, kind: input, shape index: {}, may-alias: {0,1,2,3}]   ;;  %s1046_s4 = inlined_call_operand.vmem [shape: f32[2,8,128], index: 4, kind: input, shape index: {}]   ;;  %s1047_s5 = inlined_call_operand.vmem [shape: f32[2,1,128], index: 5, kind: input, shape index: {}]   ;;  %s1048_s6 = inlined_call_operand.vmem [shape: f32[2,1,128], index: 6, kind: input, shape index: {}]   ;;  %s1049_s7 = inlined_call_operand.vmem [shape: bf16[2,32,128], index: 7, kind: output, shape index: {}]  }
   0x1   :  { %s988_s26 = smov 0  }
   0x2 LB: > { %s29_s27 = sadd.s32 1, %s938_s25  ;;  %p813_p0 = scmp.ge.s32.totalorder %s942_s26, 1  ;;  %s942_s26 = sphi %s988_s26, %s17_s26   ;;  %s938_s25 = sphi %s986_s25, %s1051_s25   ;;  %s934_s24 = sphi %s984_s24, %s1050_s24  }
   0x3   : > { %p31_p1 = scmp.ge.s32.totalorder %s29_s27, 2  ;;  %p346_p2 = scmp.lt.s32.totalorder %s942_s26, 3 }
   0x5   : > { %s1053_s27 = smov (%p31_p1, %s29_s27), 0  ;;  %p347_p3 = pnand %p813_p0, %p346_p2 }
   0x6   : > { %p427_p4 = scmp.lt.s32.totalorder (!%p347_p3), %s934_s24, 1  ;;  %v524_v7 = vlaneseq (!%p347_p3) }
   0x7   : > { %350 = sbr.rel (%p347_p3) target bundleno = 70 (0x46), region = 48 }
   0x8   : > { %v525_v8 = vshrl.u32 (!%p347_p3), %v524_v7, 7 }
   0xa   : > { %v526_v11 = vsub.s32 (!%p347_p3), 1, %v525_v8  ;;  %v535_v18 = vsub.s32 (!%p347_p3), 0, %v525_v8 }
   0xe   : > { %s1055_s24 = smov (!%p427_p4, %s934_s24), 1 }
   0xf   : > { %s822_s28 = sshll.u32 %s1055_s24, 3  ;;  %s832_s9 = sshll.u32 %s1055_s24, 6 }
  0x10   : > { %s475_s8 = scalar_lea.vmem %s1046_s4, %s822_s28  ;;  %s834_s10 = sadd.s32 16, %s832_s9 }
  0x11   : > { %v492_v0 = vld [vmem:[%s475_s8] sm:$0xff]  ;;  %s434_s13 = scalar_lea.vmem %s1042_s0, %s832_s9  ;;  %s836_s14 = sadd.s32 32, %s832_s9 }
  0x12   : > { %v493_v1 = vmul.f32 0.0078125, %v492_v0  ;;  %s838_s15 = sadd.s32 48, %s832_s9  ;;  %s478_s18 = scalar_lea.vmem %s1047_s5, %s1055_s24  ;;  %v845_v10 = vld [vmem:[%s434_s13] sm:$0xff]   ;;  %v889_v13 = vld [vmem:[%s434_s13 + $0x8] sm:$0xff]  }
  0x13   : > { %s445_s21 = scalar_lea.vmem %s1043_s1, %s834_s10  ;;  %s457_s28 = scalar_lea.vmem %s1044_s2, %s836_s14  ;;  %v825_v9 = vld [vmem:[%s478_s18] ss:$0 sm:$0xff]  ;;  %v846_v17 = vunpack.c.l.bf16 %v845_v10  ;;  %v847_v21 = vunpack.c.h.bf16 %v845_v10  ;;  %v850_v23 = vunpack.c.l.bf16 %v889_v13  ;;  %v851_v24 = vunpack.c.h.bf16 %v889_v13 }
  0x14   : > { %v494_v2 = vmul.f32 %v493_v1, %v493_v1  ;;  %s469_s8 = scalar_lea.vmem %s1045_s3, %s838_s15  ;;  %v853_v12 = vld [vmem:[%s445_s21] sm:$0xff]   ;;  %s481_s12 = scalar_lea.vmem %s1048_s6, %s1055_s24  ;;  %v890_v20 = vld [vmem:[%s445_s21 + $0x8] sm:$0xff]  }
  0x15   : > { %v861_v15 = vld [vmem:[%s457_s28] sm:$0xff]   ;;  %v854_v22 = vunpack.c.l.bf16 %v853_v12  ;;  %v891_v25 = vld [vmem:[%s457_s28 + $0x8] sm:$0xff]   ;;  %v855_v28 = vunpack.c.h.bf16 %v853_v12  ;;  %v858_v35 = vunpack.c.l.bf16 %v890_v20  ;;  %v859_v37 = vunpack.c.h.bf16 %v890_v20  ;;  %s839_s10 = sshll.u32 %s1055_s24, 4 }
  0x16   : > { %v496_v3 = vrot.slane %v494_v2, 7  ;;  %v869_v19 = vld [vmem:[%s469_s8] sm:$0xff]   ;;  %v862_v29 = vunpack.c.l.bf16 %v861_v15  ;;  %v892_v30 = vld [vmem:[%s469_s8 + $0x8] sm:$0xff]   ;;  %v863_v32 = vunpack.c.h.bf16 %v861_v15  ;;  %v866_v38 = vunpack.c.l.bf16 %v891_v25  ;;  %s490_s15 = scalar_lea.vmem %s1049_s7, %s839_s10 }
  0x17   : > { %v510_v31 = vld [vmem:[%s481_s12] sm:$0x1]  ;;  %v870_v33 = vunpack.c.l.bf16 %v869_v19  ;;  %v871_v34 = vunpack.c.h.bf16 %v869_v19  ;;  %v867_v39 = vunpack.c.h.bf16 %v891_v25  ;;  %v874_v42 = vunpack.c.l.bf16 %v892_v30 }
  0x18   : > { %v498_v4 = vsub.f32 %v493_v1, %v496_v3  ;;  %v875_v43 = vunpack.c.h.bf16 %v892_v30 }
  0x1a   : > { %v499_v5 = vmax.f32 %v498_v4, 0.0 }
  0x1c   : > { %v500_v6 = vadd.f32 1e-05, %v499_v5 }
  0x1e   : > { %918 = vrsqrt.f32 %v500_v6 }
  0x28   : > { %v919_v14 = vpop.eup %918 }
  0x29   : > { %v509_v16 = vmul.f32 %v919_v14, %v825_v9 }
  0x2b   : > { %v512_v26 = vrot.slane %v509_v16, 1  ;;  %v527_v27 = vrot.slane %v509_v16, %v526_v11 }
  0x2d   : > { %v514_v36 = vmul.f32 %v512_v26, %v493_v1  ;;  %v528_v40 = vmul.f32 %v846_v17, %v527_v27  ;;  %v529_v41 = vmul.f32 %v847_v21, %v527_v27  ;;  %v554_v45 = vmul.f32 %v854_v22, %v527_v27 }
  0x2e   : > { %v555_v46 = vmul.f32 %v855_v28, %v527_v27  ;;  %v578_v47 = vmul.f32 %v862_v29, %v527_v27  ;;  %v579_v48 = vmul.f32 %v863_v32, %v527_v27  ;;  %v598_v49 = vmul.f32 %v870_v33, %v527_v27 }
  0x2f   : > { %v515_v44 = vsub.f32 %v510_v31, %v514_v36  ;;  %v599_v50 = vmul.f32 %v871_v34, %v527_v27  ;;  %v530_v51 = vmul.f32 %v850_v23, %v527_v27  ;;  %v531_v53 = vmul.f32 %v851_v24, %v527_v27 }
  0x30   : > { %v556_v54 = vmul.f32 %v858_v35, %v527_v27  ;;  %v557_v55 = vmul.f32 %v859_v37, %v527_v27  ;;  %v580_v56 = vmul.f32 %v866_v38, %v527_v27  ;;  %v581_v57 = vmul.f32 %v867_v39, %v527_v27 }
  0x31   : > { %v536_v52 = vrot.slane %v515_v44, %v535_v18  ;;  %v600_v58 = vmul.f32 %v874_v42, %v527_v27  ;;  %v601_v59 = vmul.f32 %v875_v43, %v527_v27 }
  0x33   : > { %v538_v60 = vadd.f32 %v536_v52, %v528_v40  ;;  %v539_v61 = vadd.f32 %v536_v52, %v529_v41  ;;  %v558_v62 = vadd.f32 %v554_v45, %v536_v52  ;;  %v559_v63 = vadd.f32 %v555_v46, %v536_v52 }
  0x34   : > { %v582_v0 = vadd.f32 %v578_v47, %v536_v52  ;;  %v583_v1 = vadd.f32 %v579_v48, %v536_v52  ;;  %v602_v2 = vadd.f32 %v598_v49, %v536_v52  ;;  %v603_v3 = vadd.f32 %v599_v50, %v536_v52 }
  0x35   : > { %v542_v4 = vmax.f32 %v538_v60, 0.0  ;;  %v543_v5 = vmax.f32 %v539_v61, 0.0  ;;  %v562_v6 = vmax.f32 %v558_v62, 0.0  ;;  %v563_v7 = vmax.f32 %v559_v63, 0.0 }
  0x36   : > { %v586_v8 = vmax.f32 %v582_v0, 0.0  ;;  %v587_v9 = vmax.f32 %v583_v1, 0.0  ;;  %v606_v10 = vmax.f32 %v602_v2, 0.0  ;;  %v607_v11 = vmax.f32 %v603_v3, 0.0 }
  0x37   : > { %v566_v12 = vmax.f32 %v542_v4, %v562_v6  ;;  %v567_v13 = vmax.f32 %v543_v5, %v563_v7  ;;  %v540_v14 = vadd.f32 %v536_v52, %v530_v51  ;;  %v541_v15 = vadd.f32 %v536_v52, %v531_v53 }
  0x38   : > { %v610_v16 = vmax.f32 %v586_v8, %v606_v10  ;;  %v611_v17 = vmax.f32 %v587_v9, %v607_v11  ;;  %v560_v18 = vadd.f32 %v556_v54, %v536_v52  ;;  %v561_v19 = vadd.f32 %v557_v55, %v536_v52 }
  0x39   : > { %v544_v20 = vmax.f32 %v540_v14, 0.0  ;;  %v545_v21 = vmax.f32 %v541_v15, 0.0  ;;  %v584_v22 = vadd.f32 %v580_v56, %v536_v52  ;;  %v585_v23 = vadd.f32 %v581_v57, %v536_v52 }
  0x3a   : > { %v614_v24 = vmax.f32 %v566_v12, %v610_v16  ;;  %v615_v25 = vmax.f32 %v567_v13, %v611_v17  ;;  %v564_v26 = vmax.f32 %v560_v18, 0.0  ;;  %v565_v27 = vmax.f32 %v561_v19, 0.0 }
  0x3b   : > { %v588_v28 = vmax.f32 %v584_v22, 0.0  ;;  %v589_v29 = vmax.f32 %v585_v23, 0.0  ;;  %v604_v30 = vadd.f32 %v600_v58, %v536_v52  ;;  %v605_v31 = vadd.f32 %v601_v59, %v536_v52 }
  0x3c   : > { %v879_v32 = vpack.c.bf16 %v615_v25, %v614_v24  ;;  %v568_v33 = vmax.f32 %v544_v20, %v564_v26  ;;  %v569_v34 = vmax.f32 %v545_v21, %v565_v27 }
  0x3d   : > { %v608_v35 = vmax.f32 %v604_v30, 0.0  ;;  %v609_v36 = vmax.f32 %v605_v31, 0.0 }
  0x3e   : > { %880 = vst [vmem:[%s490_s15] sm:$0xff] %v879_v32  }
  0x3f   : > { %v612_v37 = vmax.f32 %v588_v28, %v608_v35  ;;  %v613_v38 = vmax.f32 %v589_v29, %v609_v36 }
  0x41   : > { %v616_v39 = vmax.f32 %v568_v33, %v612_v37  ;;  %v617_v40 = vmax.f32 %v569_v34, %v613_v38 }
  0x43   : > { %v884_v41 = vpack.c.bf16 %v617_v40, %v616_v39 }
  0x45   : > { %893 = vst [vmem:[%s490_s15 + $0x8] sm:$0xff] %v884_v41  }
  0x46 PF: > { %s17_s26 = sadd.s32 1, %s942_s26   ;;  %s1050_s24 = smov %s938_s25 }
  0x47   : > { %p14_p5 = scmp.ge.s32.totalorder %s17_s26, 4   ;;  %s1051_s25 = smov %s1053_s27 }
  0x49   :  { %16 = sbr.rel (!%p14_p5) target bundleno = 2 (0x2), region = 96 }

// kernel: jvinet_forward.9
= control target key start
LH: loop header
LB: loop body
LE: loop exit
PB: predicated region body
PF: predicated region fallthrough
CT: control target
= control target key end

     0   :  { %s2340_s12 = smov 0   ;;  %s2342_s13 = smov 0   ;;  %s2561_s0 = inlined_call_operand.vmem [shape: bf16[2,128,800], index: 0, kind: input, shape index: {}]   ;;  %s2562_s1 = inlined_call_operand.vmem [shape: bf16[2,800,128], index: 1, kind: input, shape index: {}]   ;;  %s2563_s2 = inlined_call_operand.vmem [shape: bf16[2,128,128], index: 2, kind: output, shape index: {0}]   ;;  %s2564_s3 = inlined_call_operand.vmem [shape: f32[2,8,128], index: 3, kind: output, shape index: {1}]  }
   0x1   :  { %s2344_s14 = smov 0  }
   0x2 LB: > { %s26_s15 = sadd.s32 1, %s2314_s13  ;;  %p1700_p0 = scmp.ge.s32.totalorder %s2318_s14, 1  ;;  %s2318_s14 = sphi %s2344_s14, %s14_s14   ;;  %s2314_s13 = sphi %s2342_s13, %s2566_s13   ;;  %s2310_s12 = sphi %s2340_s12, %s2565_s12  }
   0x3   : > { %p28_p1 = scmp.ge.s32.totalorder %s26_s15, 2  ;;  %p174_p2 = scmp.lt.s32.totalorder %s2318_s14, 3 }
   0x5   : > { %s2568_s15 = smov (%p28_p1, %s26_s15), 0  ;;  %p175_p3 = pnand %p1700_p0, %p174_p2 }
   0x6   : > { %p220_p4 = scmp.lt.s32.totalorder (!%p175_p3), %s2310_s12, 1  ;;  %vm997_vm0 = vcmask (!%p175_p3), 261120   ;;  %vm1548_vm1 = vcmask (!%p175_p3), 1040384   ;;  %vm1550_vm2 = vcmask (!%p175_p3), 1041408  }
   0x7   : > { %178 = sbr.rel (%p175_p3) target bundleno = 405 (0x195), region = 28 }
   0xe   : > { %s2570_s12 = smov (!%p220_p4, %s2310_s12), 1 }
   0xf   : > { %s2141_s16 = smul.u32 400, %s2570_s12  ;;  %s1838_s24 = sshll.u32 %s2570_s12, 6 }
  0x10   : > { %s2140_s20 = smul.u32 448, %s2570_s12  ;;  %s2527_s27 = scalar_lea.vmem %s2563_s2, %s1838_s24 }
  0x11   : > { %s2364_s19 = scalar_lea.vmem %s2562_s1, %s2141_s16  ;;  %s1705_s28 = sshll.u32 %s2570_s12, 3 }
  0x12   : > { %v2166_v0 = vld [vmem:[%s2364_s19 + $0x40] sm:$0xff]   ;;  %v2170_v4 = vld [vmem:[%s2364_s19 + $0x48] sm:$0xff]   ;;  %v2174_v8 = vld [vmem:[%s2364_s19 + $0x50] sm:$0xff]   ;;  %s2400_s23 = scalar_lea.vmem %s2561_s0, %s2140_s20  ;;  %s251_s4 = scalar_lea.vmem %s2564_s3, %s1705_s28 }
  0x13   : > { %v2167_v1 = vld [vmem:[%s2364_s19 + $0xc0] sm:$0xff]   ;;  %1902 = vmatprep.subr.bf16.mxu0 %v2166_v0  ;;  %v2171_v5 = vld [vmem:[%s2364_s19 + $0xc8] sm:$0xff]   ;;  %v2175_v9 = vld [vmem:[%s2364_s19 + $0xd0] sm:$0xff]  }
  0x14   : > { %v2168_v2 = vld [vmem:[%s2364_s19] sm:$0xff]   ;;  %1966 = vmatprep.subr.bf16.mxu1 %v2167_v1  ;;  %v2172_v6 = vld [vmem:[%s2364_s19 + $0x8] sm:$0xff]   ;;  %v2176_v10 = vld [vmem:[%s2364_s19 + $0x10] sm:$0xff]  }
  0x15   : > { %v2169_v3 = vld [vmem:[%s2364_s19 + $0x80] sm:$0xff]   ;;  %1903 = vmatpush3.bf16.msra.mxu0 %v2168_v2  ;;  %v2173_v7 = vld [vmem:[%s2364_s19 + $0x88] sm:$0xff]   ;;  %v2177_v11 = vld [vmem:[%s2364_s19 + $0x90] sm:$0xff]  }
  0x16   : > { %1967 = vmatpush3.bf16.msra.mxu1 %v2169_v3  ;;  %1904 = vmatprep.subr.bf16.mxu0 %v2170_v4  ;;  %v2178_v12 = vld [vmem:[%s2364_s19 + $0x58] sm:$0xff]   ;;  %v2182_v16 = vld [vmem:[%s2364_s19 + $0x60] sm:$0xff]   ;;  %v2186_v20 = vld [vmem:[%s2364_s19 + $0x68] sm:$0xff]  }
  0x17   : > { %1968 = vmatprep.subr.bf16.mxu1 %v2171_v5  ;;  %v2179_v13 = vld [vmem:[%s2364_s19 + $0xd8] sm:$0xff]   ;;  %v2183_v17 = vld [vmem:[%s2364_s19 + $0xe0] sm:$0xff]   ;;  %v2187_v21 = vld [vmem:[%s2364_s19 + $0xe8] sm:$0xff]  }
  0x18   : > { %v2180_v14 = vld [vmem:[%s2364_s19 + $0x18] sm:$0xff]   ;;  %v2184_v18 = vld [vmem:[%s2364_s19 + $0x20] sm:$0xff]   ;;  %v2188_v22 = vld [vmem:[%s2364_s19 + $0x28] sm:$0xff]  }
  0x19   : > { %1905 = vmatpush3.bf16.msra.mxu0 %v2172_v6  ;;  %v2181_v15 = vld [vmem:[%s2364_s19 + $0x98] sm:$0xff]   ;;  %v2185_v19 = vld [vmem:[%s2364_s19 + $0xa0] sm:$0xff]   ;;  %v2189_v23 = vld [vmem:[%s2364_s19 + $0xa8] sm:$0xff]  }
  0x1a   : > { %1969 = vmatpush3.bf16.msra.mxu1 %v2173_v7  ;;  %1906 = vmatprep.subr.bf16.mxu0 %v2174_v8  ;;  %v2190_v24 = vld [vmem:[%s2364_s19 + $0x70] sm:$0xff]   ;;  %v2194_v28 = vld [vmem:[%s2364_s19 + $0x78] sm:$0xff]   ;;  %v2200_v33 = vld [vmem:[%s2400_s23 + $0x4] ss:$28 sps:$4 sm:$0xff]  }
  0x1b   : > { %1970 = vmatprep.subr.bf16.mxu1 %v2175_v9  ;;  %v2191_v25 = vld [vmem:[%s2364_s19 + $0xf0] sm:$0xff]   ;;  %v2195_v29 = vld [vmem:[%s2364_s19 + $0xf8] sm:$0xff]   ;;  %v2201_v34 = vld [vmem:[%s2400_s23 + $0x8] ss:$28 sps:$4 sm:$0xff]   ;;  %1054 = vmatprep.mubr.bf16.mxu0 %v2200_v33 }
  0x1c   : > { %v2192_v26 = vld [vmem:[%s2364_s19 + $0x30] sm:$0xff]   ;;  %v2196_v30 = vld [vmem:[%s2364_s19 + $0x38] sm:$0xff]   ;;  %v2203_v35 = vld [vmem:[%s2400_s23 + $0xc] ss:$28 sps:$4 sm:$0xff]  }
  0x1d   : > { %1907 = vmatpush3.bf16.msra.mxu0 %v2176_v10  ;;  %v2193_v27 = vld [vmem:[%s2364_s19 + $0xb0] sm:$0xff]   ;;  %v2197_v31 = vld [vmem:[%s2364_s19 + $0xb8] sm:$0xff]   ;;  %v2204_v36 = vld [vmem:[%s2364_s19 + $0x140] sm:$0xff]   ;;  %1151 = vmatprep.mubr.bf16.mxu1 %v2203_v35 }
  0x1e   : > { %1971 = vmatpush3.bf16.msra.mxu1 %v2177_v11  ;;  %1908 = vmatprep.subr.bf16.mxu0 %v2178_v12  ;;  %v2198_v32 = vld [vmem:[%s2400_s23] ss:$28 sps:$4 sm:$0xff]   ;;  %v2210_v40 = vld [vmem:[%s2400_s23 + $0x38] ss:$28 sps:$4 sm:$0xff]   ;;  %v2212_v42 = vld [vmem:[%s2364_s19 + $0x148] sm:$0xff]  }
  0x1f   : > { %1972 = vmatprep.subr.bf16.mxu1 %v2179_v13  ;;  %v2205_v37 = vld [vmem:[%s2364_s19 + $0x100] sm:$0xff]   ;;  %v2206_v38 = vld [vmem:[%s2400_s23 + $0x3c] ss:$28 sps:$4 sm:$0xff]   ;;  %v2213_v43 = vld [vmem:[%s2364_s19 + $0x108] sm:$0xff]  }
  0x20   : > { %v2208_v39 = vld [vmem:[%s2400_s23 + $0x44] ss:$28 sps:$4 sm:$0xff]   ;;  %v2214_v44 = vld [vmem:[%s2400_s23 + $0x74] ss:$28 sps:$4 sm:$0xff]   ;;  %v2216_v45 = vld [vmem:[%s2400_s23 + $0x7c] ss:$28 sps:$4 sm:$0xff]  }
  0x21   : > { %1909 = vmatpush3.bf16.msra.mxu0 %v2180_v14  ;;  %v2211_v41 = vld [vmem:[%s2400_s23 + $0x40] ss:$28 sps:$4 sm:$0xff]   ;;  %v2220_v46 = vld [vmem:[%s2364_s19 + $0x150] sm:$0xff]   ;;  %v2222_v50 = vld [vmem:[%s2400_s23 + $0xac] ss:$28 sps:$4 sm:$0xff]  }
  0x22   : > { %1973 = vmatpush3.bf16.msra.mxu1 %v2181_v15  ;;  %1910 = vmatprep.subr.bf16.mxu0 %v2182_v16  ;;  %v2221_v47 = vld [vmem:[%s2364_s19 + $0x110] sm:$0xff]   ;;  %v2228_v52 = vld [vmem:[%s2364_s19 + $0x158] sm:$0xff]   ;;  %v2236_v54 = vld [vmem:[%s2364_s19 + $0x160] sm:$0xff]  }
  0x23   : > { %1974 = vmatprep.subr.bf16.mxu1 %v2183_v17  ;;  %v2218_v48 = vld [vmem:[%s2400_s23 + $0x70] ss:$28 sps:$4 sm:$0xff]   ;;  %v2219_v49 = vld [vmem:[%s2400_s23 + $0x78] ss:$28 sps:$4 sm:$0xff]   ;;  %v2237_v55 = vld [vmem:[%s2364_s19 + $0x120] sm:$0xff]  }
  0x24   : > { %v2224_v51 = vld [vmem:[%s2400_s23 + $0xb4] ss:$28 sps:$4 sm:$0xff]   ;;  %v2229_v53 = vld [vmem:[%s2364_s19 + $0x118] sm:$0xff]   ;;  %v2226_v56 = vld [vmem:[%s2400_s23 + $0xa8] ss:$28 sps:$4 sm:$0xff]  }
  0x25   : > { %1911 = vmatpush3.bf16.msra.mxu0 %v2184_v18  ;;  %v2227_v57 = vld [vmem:[%s2400_s23 + $0xb0] ss:$28 sps:$4 sm:$0xff]   ;;  %v2230_v58 = vld [vmem:[%s2400_s23 + $0xe4] ss:$28 sps:$4 sm:$0xff]   ;;  %v2238_v2 = vld [vmem:[%s2400_s23 + $0x11c] ss:$28 sps:$4 sm:$0xff]  }
  0x26   : > { %1975 = vmatpush3.bf16.msra.mxu1 %v2185_v19  ;;  %1912 = vmatprep.subr.bf16.mxu0 %v2186_v20  ;;  %v2232_v59 = vld [vmem:[%s2400_s23 + $0xec] ss:$28 sps:$4 sm:$0xff]   ;;  %v2234_v62 = vld [vmem:[%s2400_s23 + $0xe0] ss:$28 sps:$4 sm:$0xff]   ;;  %v2252_v0 = vld [vmem:[%s2364_s19 + $0x170] sm:$0xff]  }
  0x27   : > { %1976 = vmatprep.subr.bf16.mxu1 %v2187_v21  ;;  %v2244_v60 = vld [vmem:[%s2364_s19 + $0x168] sm:$0xff]   ;;  %v2253_v1 = vld [vmem:[%s2364_s19 + $0x130] sm:$0xff]   ;;  %v2240_v3 = vld [vmem:[%s2400_s23 + $0x124] ss:$28 sps:$4 sm:$0xff]  }
  0x28   : > { %v2245_v61 = vld [vmem:[%s2364_s19 + $0x128] sm:$0xff]   ;;  %v2260_v4 = vld [vmem:[%s2364_s19 + $0x178] sm:$0xff]   ;;  %v2246_v8 = vld [vmem:[%s2400_s23 + $0x154] ss:$28 sps:$4 sm:$0xff]  }
  0x29   : > { %1913 = vmatpush3.bf16.msra.mxu0 %v2188_v22  ;;  %v2235_v63 = vld [vmem:[%s2400_s23 + $0xe8] ss:$28 sps:$4 sm:$0xff]   ;;  %v2261_v5 = vld [vmem:[%s2364_s19 + $0x138] sm:$0xff]   ;;  %v2250_v11 = vld [vmem:[%s2400_s23 + $0x150] ss:$28 sps:$4 sm:$0xff]  }
  0x2a   : > { %1977 = vmatpush3.bf16.msra.mxu1 %v2189_v23  ;;  %1914 = vmatprep.subr.bf16.mxu0 %v2190_v24  ;;  %v2242_v6 = vld [vmem:[%s2400_s23 + $0x118] ss:$28 sps:$4 sm:$0xff]   ;;  %v2243_v7 = vld [vmem:[%s2400_s23 + $0x120] ss:$28 sps:$4 sm:$0xff]   ;;  %v2254_v13 = vld [vmem:[%s2400_s23 + $0x18c] ss:$28 sps:$4 sm:$0xff]  }
  0x2b   : > { %1978 = vmatprep.subr.bf16.mxu1 %v2191_v25  ;;  %v2248_v9 = vld [vmem:[%s2400_s23 + $0x15c] ss:$28 sps:$4 sm:$0xff]   ;;  %v2274_v10 = vld [vmem:[%s2364_s19 + $0x180] sm:$0xff]   ;;  %v2256_v14 = vld [vmem:[%s2400_s23 + $0x194] ss:$28 sps:$4 sm:$0xff]  }
  0x2c   : > { %v2251_v12 = vld [vmem:[%s2400_s23 + $0x158] ss:$28 sps:$4 sm:$0xff]   ;;  %v2258_v15 = vld [vmem:[%s2400_s23 + $0x188] ss:$28 sps:$4 sm:$0xff]   ;;  %v2259_v16 = vld [vmem:[%s2400_s23 + $0x190] ss:$28 sps:$4 sm:$0xff]  }
  0x2d   : > { %1915 = vmatpush3.bf16.msra.mxu0 %v2192_v26  ;;  %v2264_v17 = vld [vmem:[%s2400_s23 + $0x14] ss:$28 sps:$4 sm:$0xff]   ;;  %v2267_v18 = vld [vmem:[%s2400_s23 + $0x164] ss:$28 sps:$4 sm:$0xff]   ;;  %v2268_v21 = vld [vmem:[%s2400_s23 + $0x4c] ss:$28 sps:$4 sm:$0xff]  }
  0x2e   : > { %1979 = vmatpush3.bf16.msra.mxu1 %v2193_v27  ;;  %1916 = vmatprep.subr.bf16.mxu0 %v2194_v28  ;;  %v2262_v19 = vld [vmem:[%s2400_s23 + $0x10] ss:$28 sps:$4 sm:$0xff]   ;;  %v2265_v20 = vld [vmem:[%s2400_s23 + $0x160] ss:$28 sps:$4 sm:$0xff]   ;;  %v2272_v24 = vld [vmem:[%s2400_s23 + $0x48] ss:$28 sps:$4 sm:$0xff]  }
  0x2f   : > { %1980 = vmatprep.subr.bf16.mxu1 %v2195_v29  ;;  %v2270_v22 = vld [vmem:[%s2400_s23 + $0x19c] ss:$28 sps:$4 sm:$0xff]   ;;  %v2275_v23 = vld [vmem:[%s2364_s19 + $0x188] sm:$0xff]   ;;  %v2276_v26 = vld [vmem:[%s2400_s23 + $0x84] ss:$28 sps:$4 sm:$0xff]  }
  0x30   : > { %v2273_v25 = vld [vmem:[%s2400_s23 + $0x198] ss:$28 sps:$4 sm:$0xff]   ;;  %v2279_v28 = vld [vmem:[%s2400_s23 + $0x80] ss:$28 sps:$4 sm:$0xff]   ;;  %v2280_v29 = vld [vmem:[%s2400_s23 + $0x50] ss:$28 sps:$4 sm:$0xff]  }
  0x31   : > { %1917 = vmatpush3.bf16.msra.mxu0 %v2196_v30  ;;  %v2278_v27 = vld [vmem:[%s2400_s23 + $0x18] ss:$28 sps:$4 sm:$0xff]   ;;  %v2285_v33 = vld [vmem:[%s2400_s23 + $0xc0] ss:$28 sps:$4 sm:$0xff]  }
  0x32   : > { %1981 = vmatpush3.bf16.msra.mxu1 %v2197_v31  ;;  %2030 = vmatprep.subr.bf16.mxu0 %v2204_v36  ;;  %v2281_v30 = vld [vmem:[%s2400_s23 + $0xbc] ss:$28 sps:$4 sm:$0xff]   ;;  %v2283_v31 = vld [vmem:[%s2400_s23 + $0x88] ss:$28 sps:$4 sm:$0xff]  }
  0x33   : > { %2124 = vmatprep.subr.bf16.mxu1 %v2204_v36  ;;  %v2288_v35 = vld [vmem:[%s2400_s23 + $0xf8] ss:$28 sps:$4 sm:$0xff]   ;;  %v2289_v36 = vld [vmem:[%s2400_s23 + $0xf0] ss:$28 sps:$4 sm:$0xff]  }
  0x34   : > { %1055 = vmatmul.mubr.bf16.vlgmr.msra.gmra.mrb[0].mxu0 %v2198_v32  ;;  %v2284_v32 = vld [vmem:[%s2400_s23 + $0xb8] ss:$28 sps:$4 sm:$0xff]  }
  0x35   : > { %1152 = vmatmul.mubr.bf16.vlgmr.msra.gmra.mrb[0].mxu1 %v2201_v34  ;;  %2031 = vmatpush3.bf16.msra.mxu0 %v2205_v37  ;;  %v2286_v34 = vld [vmem:[%s2400_s23 + $0xf4] ss:$28 sps:$4 sm:$0xff]  }
  0x36   : > { %1062 = vmatprep.mubr.bf16.mxu0 %v2206_v38  ;;  %2132 = vmatpush3.bf16.msra.mxu1 %v2205_v37  ;;  %v2290_v37 = vld [vmem:[%s2400_s23 + $0x130] ss:$28 sps:$4 sm:$0xff]  }
  0x37   : > { %1159 = vmatprep.mubr.bf16.mxu1 %v2208_v39  ;;  %2032 = vmatprep.subr.bf16.mxu0 %v2212_v42  ;;  %v2291_v38 = vld [vmem:[%s2400_s23 + $0x12c] ss:$28 sps:$4 sm:$0xff]  }
  0x38   : > { %2125 = vmatprep.subr.bf16.mxu1 %v2212_v42  ;;  %v2293_v39 = vld [vmem:[%s2400_s23 + $0x168] ss:$28 sps:$4 sm:$0xff]  }
  0x39   : > { %2033 = vmatpush3.bf16.msra.mxu0 %v2213_v43 }
  0x3a   : > { %2133 = vmatpush3.bf16.msra.mxu1 %v2213_v43  ;;  %2034 = vmatprep.subr.bf16.mxu0 %v2220_v46 }
  0x3b   : > { %2126 = vmatprep.subr.bf16.mxu1 %v2220_v46 }
  0x3c   : > { %1063 = vmatmul.mubr.bf16.gmra.mrb[4].mxu0 %v2210_v40  ;;  %v2294_v40 = vld [vmem:[%s2400_s23 + $0x128] ss:$28 sps:$4 sm:$0xff]  }
  0x3d   : > { %1160 = vmatmul.mubr.bf16.gmra.mrb[4].mxu1 %v2211_v41  ;;  %1070 = vmatprep.mubr.bf16.mxu0 %v2214_v44  ;;  %v2295_v41 = vld [vmem:[%s2400_s23 + $0x1a0] ss:$28 sps:$4 sm:$0xff]  }
  0x3e   : > { %1167 = vmatprep.mubr.bf16.mxu1 %v2216_v45  ;;  %2035 = vmatpush3.bf16.msra.mxu0 %v2221_v47 }
  0x3f   : > { %2134 = vmatpush3.bf16.msra.mxu1 %v2221_v47  ;;  %2036 = vmatprep.subr.bf16.mxu0 %v2228_v52 }
  0x40   : > { %2127 = vmatprep.subr.bf16.mxu1 %v2228_v52 }
  0x42   : > { %2037 = vmatpush3.bf16.msra.mxu0 %v2229_v53 }
  0x43   : > { %2135 = vmatpush3.bf16.msra.mxu1 %v2229_v53  ;;  %2038 = vmatprep.subr.bf16.mxu0 %v2236_v54 }
  0x44   : > { %1071 = vmatmul.mubr.bf16.gmra.mrb[8].mxu0 %v2218_v48  ;;  %2128 = vmatprep.subr.bf16.mxu1 %v2236_v54 }
  0x45   : > { %1168 = vmatmul.mubr.bf16.gmra.mrb[8].mxu1 %v2219_v49  ;;  %1078 = vmatprep.mubr.bf16.mxu0 %v2222_v50 }
  0x46   : > { %1175 = vmatprep.mubr.bf16.mxu1 %v2224_v51  ;;  %2039 = vmatpush3.bf16.msra.mxu0 %v2237_v55 }
  0x47   : > { %2136 = vmatpush3.bf16.msra.mxu1 %v2237_v55  ;;  %2040 = vmatprep.subr.bf16.mxu0 %v2244_v60 }
  0x48   : > { %2129 = vmatprep.subr.bf16.mxu1 %v2244_v60 }
  0x4a   : > { %2041 = vmatpush3.bf16.msra.mxu0 %v2245_v61 }
  0x4b   : > { %2137 = vmatpush3.bf16.msra.mxu1 %v2245_v61  ;;  %2042 = vmatprep.subr.bf16.mxu0 %v2252_v0 }
  0x4c   : > { %1079 = vmatmul.mubr.bf16.gmra.mrb[12].mxu0 %v2226_v56  ;;  %2130 = vmatprep.subr.bf16.mxu1 %v2252_v0 }
  0x4d   : > { %1176 = vmatmul.mubr.bf16.gmra.mrb[12].mxu1 %v2227_v57  ;;  %1086 = vmatprep.mubr.bf16.mxu0 %v2230_v58 }
  0x4e   : > { %1183 = vmatprep.mubr.bf16.mxu1 %v2232_v59  ;;  %2043 = vmatpush3.bf16.msra.mxu0 %v2253_v1 }
  0x4f   : > { %2138 = vmatpush3.bf16.msra.mxu1 %v2253_v1  ;;  %2044 = vmatprep.subr.bf16.mxu0 %v2260_v4 }
  0x50   : > { %2131 = vmatprep.subr.bf16.mxu1 %v2260_v4 }
  0x52   : > { %2045 = vmatpush3.bf16.msra.mxu0 %v2261_v5 }
  0x53   : > { %2139 = vmatpush3.bf16.msra.mxu1 %v2261_v5 }
  0x54   : > { %1087 = vmatmul.mubr.bf16.gmra.mrb[16].mxu0 %v2234_v62  ;;  %2104 = vmatprep.subr.bf16.mxu1 %v2274_v10 }
  0x55   : > { %1184 = vmatmul.mubr.bf16.gmra.mrb[16].mxu1 %v2235_v63  ;;  %1094 = vmatprep.mubr.bf16.mxu0 %v2238_v2 }
  0x56   : > { %1191 = vmatprep.mubr.bf16.mxu1 %v2240_v3 }
  0x5c   : > { %1095 = vmatmul.mubr.bf16.gmra.mrb[20].mxu0 %v2242_v6 }
  0x5d   : > { %1192 = vmatmul.mubr.bf16.gmra.mrb[20].mxu1 %v2243_v7  ;;  %1102 = vmatprep.mubr.bf16.mxu0 %v2246_v8 }
  0x5e   : > { %1199 = vmatprep.mubr.bf16.mxu1 %v2248_v9 }
  0x64   : > { %1103 = vmatmul.mubr.bf16.gmra.mrb[24].mxu0 %v2250_v11 }
  0x65   : > { %1200 = vmatmul.mubr.bf16.gmra.mrb[24].mxu1 %v2251_v12  ;;  %1110 = vmatprep.mubr.bf16.mxu0 %v2254_v13 }
  0x66   : > { %1207 = vmatprep.mubr.bf16.mxu1 %v2256_v14 }
  0x6c   : > { %1111 = vmatmul.mubr.bf16.gmra.mrb[28].mxu0 %v2258_v15 }
  0x6d   : > { %1208 = vmatmul.mubr.bf16.gmra.mrb[28].mxu1 %v2259_v16  ;;  %1248 = vmatprep.mubr.bf16.mxu0 %v2264_v17 }
  0x6e   : > { %1296 = vmatprep.mubr.bf16.mxu1 %v2267_v18 }
  0x74   : > { %1249 = vmatmul.mubr.bf16.vlgmr.msra.gmra.mrb[32].mxu0 %v2262_v19 }
  0x75   : > { %1297 = vmatmul.mubr.bf16.vlgmr.msra.gmra.mrb[32].mxu1 %v2265_v20  ;;  %1256 = vmatprep.mubr.bf16.mxu0 %v2268_v21 }
  0x76   : > { %1304 = vmatprep.mubr.bf16.mxu1 %v2270_v22  ;;  %2105 = vmatpush3.bf16.msra.mxu1 %v2274_v10 }
  0x77   : > { %2106 = vmatprep.subr.bf16.mxu1 %v2275_v23 }
  0x7a   : > { %2107 = vmatpush3.bf16.msra.mxu1 %v2275_v23 }
  0x7c   : > { %1257 = vmatmul.mubr.bf16.gmra.mrb[36].mxu0 %v2272_v24 }
  0x7d   : > { %1305 = vmatmul.mubr.bf16.gmra.mrb[36].mxu1 %v2273_v25  ;;  %1264 = vmatprep.mubr.bf16.mxu0 %v2276_v26 }
  0x7e   : > { %2108 = vmatprep.mubr.msk.bf16.mxu1 %vm997_vm0, %v2278_v27 }
  0x84   : > { %1265 = vmatmul.mubr.bf16.gmra.mrb[40].mxu0 %v2279_v28 }
  0x85   : > { %2109 = vmatmul.mubr.msk.bf16.vlgmr.msra.gmra.mrb[40].mxu1 %vm997_vm0, %v2280_v29  ;;  %1272 = vmatprep.mubr.bf16.mxu0 %v2281_v30 }
  0x86   : > { %2112 = vmatprep.mubr.msk.bf16.mxu1 %vm997_vm0, %v2283_v31 }
  0x8c   : > { %1273 = vmatmul.mubr.bf16.gmra.mrb[44].mxu0 %v2284_v32 }
  0x8d   : > { %2113 = vmatmul.mubr.msk.bf16.gmra.mrb[44].mxu1 %vm997_vm0, %v2285_v33  ;;  %1280 = vmatprep.mubr.bf16.mxu0 %v2286_v34 }
  0x8e   : > { %2116 = vmatprep.mubr.msk.bf16.mxu1 %vm997_vm0, %v2288_v35 }
  0x94   : > { %1281 = vmatmul.mubr.bf16.gmra.mrb[48].mxu0 %v2289_v36 }
  0x95   : > { %2117 = vmatmul.mubr.msk.bf16.gmra.mrb[48].mxu1 %vm997_vm0, %v2290_v37  ;;  %1288 = vmatprep.mubr.bf16.mxu0 %v2291_v38 }
  0x96   : > { %2120 = vmatprep.mubr.msk.bf16.mxu1 %vm997_vm0, %v2293_v39 }
  0x9c   : > { %1289 = vmatmul.mubr.bf16.gmra.mrb[52].mxu0 %v2294_v40 }
  0x9d   : > { %2121 = vmatmul.mubr.msk.bf16.gmra.mrb[52].mxu1 %vm997_vm0, %v2295_v41 }
 0x107   : > { %v1918_v42 = vpop.f32.mrb[0].mxu0 }
 0x108   : > { %v1982_v43 = vpop.f32.mrb[0].mxu1  ;;  %v1919_v44 = vpop.f32.mrb[1].mxu0 }
 0x109   : > { %v1920_v45 = vadd.f32 %v1919_v44, %v1918_v42  ;;  %v1983_v46 = vpop.f32.mrb[1].mxu1  ;;  %v1921_v47 = vpop.f32.mrb[2].mxu0 }
 0x10a   : > { %v1984_v48 = vadd.f32 %v1983_v46, %v1982_v43  ;;  %v1985_v49 = vpop.f32.mrb[2].mxu1  ;;  %v1922_v50 = vpop.f32.mrb[3].mxu0 }
 0x10b   : > { %v1923_v51 = vadd.f32 %v1922_v50, %v1921_v47  ;;  %v1986_v52 = vpop.f32.mrb[3].mxu1 }
 0x10c   : > { %v2486_v53 = vadd.f32 %v1984_v48, %v1920_v45  ;;  %v1987_v54 = vadd.f32 %v1986_v52, %v1985_v49 }
 0x10e   : > { %v2488_v55 = vadd.f32 %v1987_v54, %v1923_v51 }
 0x10f   : > { %v1924_v56 = vpop.f32.mrb[4].mxu0 }
 0x110   : > { %v1988_v57 = vpop.f32.mrb[4].mxu1  ;;  %v1925_v58 = vpop.f32.mrb[5].mxu0 }
 0x111   : > { %v1926_v59 = vadd.f32 %v1925_v58, %v1924_v56  ;;  %v1989_v60 = vpop.f32.mrb[5].mxu1  ;;  %v1927_v61 = vpop.f32.mrb[6].mxu0 }
 0x112   : > { %v1990_v62 = vadd.f32 %v1989_v60, %v1988_v57  ;;  %v1991_v63 = vpop.f32.mrb[6].mxu1  ;;  %v1928_v0 = vpop.f32.mrb[7].mxu0 }
 0x113   : > { %v1929_v1 = vadd.f32 %v1928_v0, %v1927_v61  ;;  %v1992_v2 = vpop.f32.mrb[7].mxu1 }
 0x114   : > { %v2490_v3 = vadd.f32 %v1990_v62, %v1926_v59  ;;  %v1993_v4 = vadd.f32 %v1992_v2, %v1991_v63 }
 0x116   : > { %v2492_v5 = vadd.f32 %v1993_v4, %v1929_v1 }
 0x117   : > { %v1930_v6 = vpop.f32.mrb[8].mxu0 }
 0x118   : > { %v1994_v7 = vpop.f32.mrb[8].mxu1  ;;  %v1931_v8 = vpop.f32.mrb[9].mxu0 }
 0x119   : > { %v1932_v9 = vadd.f32 %v1931_v8, %v1930_v6  ;;  %v1995_v10 = vpop.f32.mrb[9].mxu1  ;;  %v1933_v11 = vpop.f32.mrb[10].mxu0 }
 0x11a   : > { %v1996_v12 = vadd.f32 %v1995_v10, %v1994_v7  ;;  %v1997_v13 = vpop.f32.mrb[10].mxu1  ;;  %v1934_v14 = vpop.f32.mrb[11].mxu0 }
 0x11b   : > { %v1935_v15 = vadd.f32 %v1934_v14, %v1933_v11  ;;  %v1998_v16 = vpop.f32.mrb[11].mxu1 }
 0x11c   : > { %v2494_v17 = vadd.f32 %v1996_v12, %v1932_v9  ;;  %v1999_v18 = vadd.f32 %v1998_v16, %v1997_v13 }
 0x11e   : > { %v2496_v19 = vadd.f32 %v1999_v18, %v1935_v15 }
 0x11f   : > { %v1936_v20 = vpop.f32.mrb[12].mxu0 }
 0x120   : > { %v2000_v21 = vpop.f32.mrb[12].mxu1  ;;  %v1937_v22 = vpop.f32.mrb[13].mxu0 }
 0x121   : > { %v1938_v23 = vadd.f32 %v1937_v22, %v1936_v20  ;;  %v2001_v24 = vpop.f32.mrb[13].mxu1  ;;  %v1939_v25 = vpop.f32.mrb[14].mxu0 }
 0x122   : > { %v2002_v26 = vadd.f32 %v2001_v24, %v2000_v21  ;;  %v2003_v27 = vpop.f32.mrb[14].mxu1  ;;  %v1940_v28 = vpop.f32.mrb[15].mxu0 }
 0x123   : > { %v1941_v29 = vadd.f32 %v1940_v28, %v1939_v25  ;;  %v2004_v30 = vpop.f32.mrb[15].mxu1 }
 0x124   : > { %v2498_v31 = vadd.f32 %v2002_v26, %v1938_v23  ;;  %v2005_v32 = vadd.f32 %v2004_v30, %v2003_v27 }
 0x126   : > { %v2500_v33 = vadd.f32 %v2005_v32, %v1941_v29 }
 0x127   : > { %v1942_v34 = vpop.f32.mrb[16].mxu0 }
 0x128   : > { %v2006_v35 = vpop.f32.mrb[16].mxu1  ;;  %v1943_v36 = vpop.f32.mrb[17].mxu0 }
 0x129   : > { %v1944_v37 = vadd.f32 %v1943_v36, %v1942_v34  ;;  %v2007_v38 = vpop.f32.mrb[17].mxu1  ;;  %v1945_v39 = vpop.f32.mrb[18].mxu0 }
 0x12a   : > { %v2008_v40 = vadd.f32 %v2007_v38, %v2006_v35  ;;  %v2009_v41 = vpop.f32.mrb[18].mxu1  ;;  %v1946_v42 = vpop.f32.mrb[19].mxu0 }
 0x12b   : > { %v1947_v43 = vadd.f32 %v1946_v42, %v1945_v39  ;;  %v2010_v44 = vpop.f32.mrb[19].mxu1 }
 0x12c   : > { %v2502_v45 = vadd.f32 %v2008_v40, %v1944_v37  ;;  %v2011_v46 = vadd.f32 %v2010_v44, %v2009_v41 }
 0x12e   : > { %v2504_v47 = vadd.f32 %v2011_v46, %v1947_v43 }
 0x12f   : > { %v1948_v48 = vpop.f32.mrb[20].mxu0 }
 0x130   : > { %v2012_v49 = vpop.f32.mrb[20].mxu1  ;;  %v1949_v50 = vpop.f32.mrb[21].mxu0 }
 0x131   : > { %v1950_v51 = vadd.f32 %v1949_v50, %v1948_v48  ;;  %v2013_v52 = vpop.f32.mrb[21].mxu1  ;;  %v1951_v54 = vpop.f32.mrb[22].mxu0 }
 0x132   : > { %v2014_v56 = vadd.f32 %v2013_v52, %v2012_v49  ;;  %v2015_v57 = vpop.f32.mrb[22].mxu1  ;;  %v1952_v58 = vpop.f32.mrb[23].mxu0 }
 0x133   : > { %v1953_v59 = vadd.f32 %v1952_v58, %v1951_v54  ;;  %v2016_v60 = vpop.f32.mrb[23].mxu1 }
 0x134   : > { %v2506_v61 = vadd.f32 %v2014_v56, %v1950_v51  ;;  %v2017_v62 = vadd.f32 %v2016_v60, %v2015_v57 }
 0x136   : > { %v2508_v63 = vadd.f32 %v2017_v62, %v1953_v59 }
 0x137   : > { %v1954_v0 = vpop.f32.mrb[24].mxu0 }
 0x138   : > { %v2018_v1 = vpop.f32.mrb[24].mxu1  ;;  %v1955_v2 = vpop.f32.mrb[25].mxu0 }
 0x139   : > { %v1956_v4 = vadd.f32 %v1955_v2, %v1954_v0  ;;  %v2019_v6 = vpop.f32.mrb[25].mxu1  ;;  %v1957_v7 = vpop.f32.mrb[26].mxu0 }
 0x13a   : > { %v2020_v8 = vadd.f32 %v2019_v6, %v2018_v1  ;;  %v2021_v9 = vpop.f32.mrb[26].mxu1  ;;  %v1958_v10 = vpop.f32.mrb[27].mxu0 }
 0x13b   : > { %v1959_v11 = vadd.f32 %v1958_v10, %v1957_v7  ;;  %v2022_v12 = vpop.f32.mrb[27].mxu1 }
 0x13c   : > { %v1202_v13 = vadd.f32 %v2020_v8, %v1956_v4  ;;  %v2023_v14 = vadd.f32 %v2022_v12, %v2021_v9 }
 0x13e   : > { %v1205_v15 = vadd.f32 %v2023_v14, %v1959_v11 }
 0x13f   : > { %v1960_v16 = vpop.f32.mrb[28].mxu0 }
 0x140   : > { %v2024_v18 = vpop.f32.mrb[28].mxu1  ;;  %v1961_v20 = vpop.f32.mrb[29].mxu0 }
 0x141   : > { %v1962_v21 = vadd.f32 %v1961_v20, %v1960_v16  ;;  %v2025_v22 = vpop.f32.mrb[29].mxu1  ;;  %v1963_v23 = vpop.f32.mrb[30].mxu0 }
 0x142   : > { %v2026_v24 = vadd.f32 %v2025_v22, %v2024_v18  ;;  %v2027_v25 = vpop.f32.mrb[30].mxu1  ;;  %v1964_v26 = vpop.f32.mrb[31].mxu0 }
 0x143   : > { %v1965_v27 = vadd.f32 %v1964_v26, %v1963_v23  ;;  %v2028_v28 = vpop.f32.mrb[31].mxu1 }
 0x144   : > { %v1210_v29 = vadd.f32 %v2026_v24, %v1962_v21  ;;  %v2029_v30 = vadd.f32 %v2028_v28, %v2027_v25 }
 0x146   : > { %v1213_v32 = vadd.f32 %v2029_v30, %v1965_v27 }
 0x147   : > { %v2046_v34 = vpop.f32.mrb[32].mxu0 }
 0x148   : > { %v2082_v35 = vpop.f32.mrb[32].mxu1  ;;  %v2047_v36 = vpop.f32.mrb[33].mxu0 }
 0x149   : > { %v2048_v37 = vadd.f32 %v2047_v36, %v2046_v34  ;;  %v2083_v38 = vpop.f32.mrb[33].mxu1  ;;  %v2049_v39 = vpop.f32.mrb[34].mxu0 }
 0x14a   : > { %v2084_v40 = vadd.f32 %v2083_v38, %v2082_v35  ;;  %v2085_v41 = vpop.f32.mrb[34].mxu1  ;;  %v2050_v42 = vpop.f32.mrb[35].mxu0 }
 0x14b   : > { %v2051_v43 = vadd.f32 %v2050_v42, %v2049_v39  ;;  %v2086_v44 = vpop.f32.mrb[35].mxu1  ;;  %v1251_v46 = vadd.f32 %v2048_v37, %v2486_v53 }
 0x14c   : > { %v2087_v48 = vadd.f32 %v2086_v44, %v2085_v41  ;;  %v2511_v49 = vadd.f32 %v2084_v40, %v1202_v13 }
 0x14d   : > { %v1254_v50 = vadd.f32 %v2051_v43, %v2488_v55 }
 0x14e   : > { %v2514_v51 = vadd.f32 %v2087_v48, %v1205_v15 }
 0x14f   : > { %v2052_v52 = vpop.f32.mrb[36].mxu0 }
 0x150   : > { %v2088_v54 = vpop.f32.mrb[36].mxu1  ;;  %v2053_v56 = vpop.f32.mrb[37].mxu0 }
 0x151   : > { %v2054_v57 = vadd.f32 %v2053_v56, %v2052_v52  ;;  %v2089_v58 = vpop.f32.mrb[37].mxu1  ;;  %v2055_v59 = vpop.f32.mrb[38].mxu0 }
 0x152   : > { %v2090_v60 = vadd.f32 %v2089_v58, %v2088_v54  ;;  %v2091_v62 = vpop.f32.mrb[38].mxu1  ;;  %v2056_v0 = vpop.f32.mrb[39].mxu0 }
 0x153   : > { %v2057_v1 = vadd.f32 %v2056_v0, %v2055_v59  ;;  %v2092_v2 = vpop.f32.mrb[39].mxu1  ;;  %v1259_v53 = vadd.f32 %v2054_v57, %v2490_v3 }
 0x154   : > { %v2093_v4 = vadd.f32 %v2092_v2, %v2091_v62  ;;  %v2517_v6 = vadd.f32 %v2090_v60, %v1210_v29 }
 0x155   : > { %v1262_v55 = vadd.f32 %v2057_v1, %v2492_v5 }
 0x156   : > { %v2520_v7 = vadd.f32 %v2093_v4, %v1213_v32 }
 0x157   : > { %v2058_v8 = vpop.f32.mrb[40].mxu0 }
 0x158   : > { %v2110_v9 = vpop.f32.mrb[40].mxu1  ;;  %v2059_v10 = vpop.f32.mrb[41].mxu0 }
 0x159   : > { %v1356_v11 = vadd.f32 %v2110_v9, %v1259_v53  ;;  %v2060_v12 = vadd.f32 %v2059_v10, %v2058_v8  ;;  %v1347_v13 = vpop.f32.mrb[41].mxu1  ;;  %v2061_v14 = vpop.f32.mrb[42].mxu0 }
 0x15a   : > { %v1348_v15 = vadd.f32 %v1347_v13, %v1251_v46  ;;  %v2111_v16 = vpop.f32.mrb[42].mxu1  ;;  %v2062_v18 = vpop.f32.mrb[43].mxu0 }
 0x15b   : > { %v1359_v20 = vadd.f32 %v2111_v16, %v1262_v55  ;;  %v2063_v3 = vadd.f32 %v2062_v18, %v2061_v14  ;;  %v1350_v21 = vpop.f32.mrb[43].mxu1  ;;  %v1267_v22 = vadd.f32 %v2060_v12, %v2494_v17  ;;  %v1513_v30 = vmul.f32 %v1356_v11, %v1356_v11 }
 0x15c   : > { %v1351_v5 = vadd.f32 %v1350_v21, %v1254_v50  ;;  %v1511_v25 = vmul.f32 %v1348_v15, %v1348_v15 }
 0x15d   : > { %v1863_v23 = vpack.c.bf16 %v1359_v20, %v1356_v11  ;;  %v1270_v24 = vadd.f32 %v2063_v3, %v2496_v19  ;;  %v1514_v39 = vmul.f32 %v1359_v20, %v1359_v20 }
 0x15e   : > { %v1858_v26 = vpack.c.bf16 %v1351_v5, %v1348_v15  ;;  %v1490_v27 = vadd.f32 %v1351_v5, %v1348_v15  ;;  %v1512_v28 = vmul.f32 %v1351_v5, %v1351_v5 }
 0x15f   : > { %1895 = vst [vmem:[%s2527_s27 + $0x8] sm:$0xff] %v1863_v23   ;;  %v2064_v29 = vpop.f32.mrb[44].mxu0 }
 0x160   : > { %1859 = vst [vmem:[%s2527_s27] sm:$0xff] %v1858_v26   ;;  %v1491_v17 = vadd.f32 %v1490_v27, %v1356_v11  ;;  %v1527_v32 = vadd.f32 %v1512_v28, %v1511_v25  ;;  %v2114_v34 = vpop.f32.mrb[44].mxu1  ;;  %v2065_v35 = vpop.f32.mrb[45].mxu0 }
 0x161   : > { %v2066_v36 = vadd.f32 %v2065_v35, %v2064_v29  ;;  %v1363_v37 = vpop.f32.mrb[45].mxu1  ;;  %v2067_v38 = vpop.f32.mrb[46].mxu0 }
 0x162   : > { %v1528_v40 = vadd.f32 %v1527_v32, %v1513_v30  ;;  %v1364_v41 = vadd.f32 %v1363_v37, %v1267_v22  ;;  %v1492_v42 = vadd.f32 %v1491_v17, %v1359_v20  ;;  %v2115_v19 = vpop.f32.mrb[46].mxu1  ;;  %v2068_v43 = vpop.f32.mrb[47].mxu0 }
 0x163   : > { %v1275_v44 = vadd.f32 %v2066_v36, %v2498_v31  ;;  %v2069_v46 = vadd.f32 %v2068_v43, %v2067_v38  ;;  %v1366_v48 = vpop.f32.mrb[47].mxu1 }
 0x164   : > { %v1493_v50 = vadd.f32 %v1492_v42, %v1364_v41  ;;  %v1515_v52 = vmul.f32 %v1364_v41, %v1364_v41  ;;  %v1529_v54 = vadd.f32 %v1528_v40, %v1514_v39  ;;  %v1367_v56 = vadd.f32 %v1366_v48, %v1270_v24 }
 0x165   : > { %v1372_v57 = vadd.f32 %v2114_v34, %v1275_v44  ;;  %v1278_v58 = vadd.f32 %v2069_v46, %v2500_v33 }
 0x166   : > { %v1530_v59 = vadd.f32 %v1529_v54, %v1515_v52  ;;  %v1868_v60 = vpack.c.bf16 %v1367_v56, %v1364_v41  ;;  %v1494_v62 = vadd.f32 %v1493_v50, %v1367_v56  ;;  %v1516_v0 = vmul.f32 %v1367_v56, %v1367_v56 }
 0x167   : > { %v1517_v1 = vmul.f32 %v1372_v57, %v1372_v57  ;;  %v1375_v2 = vadd.f32 %v2115_v19, %v1278_v58  ;;  %v2070_v53 = vpop.f32.mrb[48].mxu0 }
 0x168   : > { %1896 = vst [vmem:[%s2527_s27 + $0x10] sm:$0xff] %v1868_v60   ;;  %v1495_v31 = vadd.f32 %v1494_v62, %v1372_v57  ;;  %v1531_v4 = vadd.f32 %v1530_v59, %v1516_v0  ;;  %v2071_v55 = vpop.f32.mrb[49].mxu0  ;;  %v2118_v8 = vpop.f32.mrb[48].mxu1 }
 0x169   : > { %v1873_v9 = vpack.c.bf16 %v1375_v2, %v1372_v57  ;;  %v1518_v10 = vmul.f32 %v1375_v2, %v1375_v2  ;;  %v2072_v11 = vadd.f32 %v2071_v55, %v2070_v53  ;;  %v2073_v12 = vpop.f32.mrb[50].mxu0  ;;  %v1379_v13 = vpop.f32.mrb[49].mxu1 }
 0x16a   : > { %v1532_v14 = vadd.f32 %v1531_v4, %v1517_v1  ;;  %v2074_v33 = vpop.f32.mrb[51].mxu0  ;;  %v1496_v15 = vadd.f32 %v1495_v31, %v1375_v2  ;;  %v2119_v16 = vpop.f32.mrb[50].mxu1 }
 0x16b   : > { %1897 = vst [vmem:[%s2527_s27 + $0x18] sm:$0xff] %v1873_v9   ;;  %v2075_v18 = vadd.f32 %v2074_v33, %v2073_v12  ;;  %v1283_v20 = vadd.f32 %v2072_v11, %v2502_v45  ;;  %v1382_v3 = vpop.f32.mrb[51].mxu1 }
 0x16c   : > { %v1533_v21 = vadd.f32 %v1532_v14, %v1518_v10 }
 0x16d   : > { %v1380_v22 = vadd.f32 %v1379_v13, %v1283_v20  ;;  %v1286_v5 = vadd.f32 %v2075_v18, %v2504_v47 }
 0x16f   : > { %v1497_v23 = vadd.f32 %v1496_v15, %v1380_v22  ;;  %v1519_v24 = vmul.f32 %v1380_v22, %v1380_v22  ;;  %v1383_v25 = vadd.f32 %v1382_v3, %v1286_v5  ;;  %v2076_v26 = vpop.f32.mrb[52].mxu0 }
 0x170   : > { %v2122_v27 = vpop.f32.mrb[52].mxu1  ;;  %v2077_v28 = vpop.f32.mrb[53].mxu0 }
 0x171   : > { %v1534_v29 = vadd.f32 %v1533_v21, %v1519_v24  ;;  %v1878_v30 = vpack.c.bf16 %v1383_v25, %v1380_v22  ;;  %v1498_v17 = vadd.f32 %v1497_v23, %v1383_v25  ;;  %v1520_v32 = vmul.f32 %v1383_v25, %v1383_v25  ;;  %v1395_v34 = vpop.f32.mrb[53].mxu1  ;;  %v2079_v35 = vpop.f32.mrb[54].mxu0 }
 0x172   : > { %v1404_v45 = vadd.f32 %v2122_v27, %v2517_v6  ;;  %v2078_v36 = vadd.f32 %v2077_v28, %v2076_v26  ;;  %v1396_v37 = vadd.f32 %v1395_v34, %v2511_v49  ;;  %v2123_v47 = vpop.f32.mrb[54].mxu1  ;;  %v2080_v38 = vpop.f32.mrb[55].mxu0 }
 0x173   : > { %1898 = vst [vmem:[%s2527_s27 + $0x20] sm:$0xff] %v1878_v30   ;;  %v1535_v39 = vadd.f32 %v1534_v29, %v1520_v32  ;;  %v1407_v40 = vadd.f32 %v2123_v47, %v2520_v7  ;;  %v2081_v41 = vadd.f32 %v2080_v38, %v2079_v35  ;;  %v1398_v42 = vpop.f32.mrb[55].mxu1 }
 0x174   : > { %v1291_v19 = vadd.f32 %v2078_v36, %v2506_v61  ;;  %v1399_v43 = vadd.f32 %v1398_v42, %v2514_v51  ;;  %v1523_v58 = vmul.f32 %v1396_v37, %v1396_v37  ;;  %v1525_v0 = vmul.f32 %v1404_v45, %v1404_v45 }
 0x175   : > { %v1893_v44 = vpack.c.bf16 %v1407_v40, %v1404_v45  ;;  %v1294_v6 = vadd.f32 %v2081_v41, %v2508_v63  ;;  %v1526_v2 = vmul.f32 %v1407_v40, %v1407_v40 }
 0x176   : > { %v1388_v46 = vadd.f32 %v2118_v8, %v1291_v19  ;;  %v1888_v48 = vpack.c.bf16 %v1399_v43, %v1396_v37  ;;  %v1524_v51 = vmul.f32 %v1399_v43, %v1399_v43 }
 0x177   : > { %1901 = vst [vmem:[%s2527_s27 + $0x38] sm:$0xff] %v1893_v44   ;;  %v1391_v49 = vadd.f32 %v2119_v16, %v1294_v6 }
 0x178   : > { %v1499_v50 = vadd.f32 %v1498_v17, %v1388_v46  ;;  %v1521_v52 = vmul.f32 %v1388_v46, %v1388_v46  ;;  %1900 = vst [vmem:[%s2527_s27 + $0x30] sm:$0xff] %v1888_v48  }
 0x179   : > { %v1883_v54 = vpack.c.bf16 %v1391_v49, %v1388_v46  ;;  %v1522_v56 = vmul.f32 %v1391_v49, %v1391_v49 }
 0x17a   : > { %v1536_v7 = vadd.f32 %v1535_v39, %v1521_v52  ;;  %v1500_v57 = vadd.f32 %v1499_v50, %v1391_v49 }
 0x17b   : > { %1899 = vst [vmem:[%s2527_s27 + $0x28] sm:$0xff] %v1883_v54  }
 0x17c   : > { %v1501_v59 = vadd.f32 %v1500_v57, %v1396_v37  ;;  %v1537_v61 = vadd.f32 %v1536_v7, %v1522_v56 }
 0x17e   : > { %v1502_v60 = vadd.f32 %v1501_v59, %v1399_v43  ;;  %v1538_v62 = vadd.f32 %v1537_v61, %v1523_v58 }
 0x180   : > { %v1503_v63 = vadd.f32 %v1502_v60, %v1404_v45  ;;  %v1539_v1 = vadd.f32 %v1538_v62, %v1524_v51 }
 0x182   : > { %v1504_v53 = vadd.f32 %v1503_v63, %v1407_v40  ;;  %v1540_v31 = vadd.f32 %v1539_v1, %v1525_v0 }
 0x184   : > { %v1505_v4 = vrot.slane %v1504_v53, 4  ;;  %v1541_v55 = vadd.f32 %v1540_v31, %v1526_v2 }
 0x186   : > { %v1506_v8 = vadd.f32 %v1505_v4, %v1504_v53  ;;  %v1542_v9 = vrot.slane %v1541_v55, 4 }
 0x188   : > { %v1507_v10 = vrot.slane %v1506_v8, 2  ;;  %v1543_v11 = vadd.f32 %v1542_v9, %v1541_v55 }
 0x18a   : > { %v1508_v12 = vadd.f32 %v1507_v10, %v1506_v8  ;;  %v1544_v13 = vrot.slane %v1543_v11, 2 }
 0x18c   : > { %v1509_v14 = vrot.slane %v1508_v12, 1  ;;  %v1545_v33 = vadd.f32 %v1544_v13, %v1543_v11 }
 0x18e   : > { %v1546_v15 = vrot.slane %v1545_v33, 1  ;;  %v1510_v16 = vadd.f32 %v1509_v14, %v1508_v12 }
 0x190   : > { %v1547_v18 = vadd.f32 %v1546_v15, %v1545_v33 }
 0x192   : > { %v1549_v20 = vsel %vm1548_vm1, %v1510_v16, %v1547_v18 }
 0x193   : > { %v1551_v3 = vsel %vm1550_vm2, %v1549_v20, 0.0 }
 0x194   : > { %1552 = vst [vmem:[%s251_s4] sm:$0xff] %v1551_v3 }
 0x195 PF: > { %s14_s14 = sadd.s32 1, %s2318_s14   ;;  %s2565_s12 = smov %s2314_s13 }
 0x196   : > { %p11_p5 = scmp.ge.s32.totalorder %s14_s14, 4   ;;  %s2566_s13 = smov %s2568_s15 }
 0x198   :  { %13 = sbr.rel (!%p11_p5) target bundleno = 2 (0x2), region = 73 }

// kernel: jvinet_forward.11
= control target key start
LH: loop header
LB: loop body
LE: loop exit
PB: predicated region body
PF: predicated region fallthrough
CT: control target
= control target key end

     0   :  { %s5730_s3 = smov 6   ;;  %s5731_s10 = smov 8   ;;  %vm2336_vm0 = vcmask 523264   ;;  %vm4117_vm1 = vcmask 64512   ;;  %vm4120_vm2 = vcmask 80896   ;;  %s6661_s0 = inlined_call_operand.smem [shape: u32[33], index: -1, kind: input, shape index: {}] }
   0x1   :  { %s5771_s6 = sld [smem:[%s6661_s0 + %s5730_s3]]   ;;  %s5732_s14 = smov 10  }
   0x2   :  { %s5814_s9 = sld [smem:[%s6661_s0]]   ;;  %s5733_s18 = smov 7  }
   0x3   :  { %s6091_s13 = sld [smem:[%s6661_s0 + %s5731_s10]]   ;;  %s5734_s22 = smov 14  }
   0x4   :  { %s6128_s17 = sld [smem:[%s6661_s0 + %s5732_s14]]   ;;  %s5736_s26 = smov 9  }
   0x5   :  { %s4153_s21 = sld [smem:[%s6661_s0 + %s5733_s18]]   ;;  %s5737_s30 = smov 4  }
   0x6   :  { %s6186_s25 = sld [smem:[%s6661_s0 + %s5734_s22]]   ;;  %s5738_s4 = smov 27  }
   0x7   :  { %v5146_v0 = vld [vmem:[%s5771_s6 + $0x4] ss:$16 sps:$4 sm:$0xff]   ;;  %v5150_v2 = vld [vmem:[%s5771_s6] ss:$16 sps:$4 sm:$0xff]   ;;  %s4155_s29 = sld [smem:[%s6661_s0 + %s5736_s26]]   ;;  %s5739_s8 = smov 18  }
   0x8   :  { %v5148_v1 = vld [vmem:[%s5771_s6 + $0x204] ss:$16 sps:$4 sm:$0xff]   ;;  %1731 = vmatprep.subr.bf16.mxu1 %v5146_v0  ;;  %v5151_v3 = vld [vmem:[%s5771_s6 + $0x200] ss:$16 sps:$4 sm:$0xff]   ;;  %v126_v50 = vld [vmem:[%s5814_s9 + $0x8] sm:$0xff]  ;;  %s4150_s3 = sld [smem:[%s6661_s0 + %s5737_s30]]   ;;  %s5740_s12 = smov 12  }
   0x9   :  { %1774 = vmatprep.subr.bf16.mxu0 %v5148_v1  ;;  %v5152_v4 = vld [vmem:[%s5771_s6 + $0x24] ss:$16 sps:$4 sm:$0xff]   ;;  %1732 = vmatpush1.bf16.msra.mxu1 %v5150_v2  ;;  %v5156_v6 = vld [vmem:[%s5771_s6 + $0x20] ss:$16 sps:$4 sm:$0xff]   ;;  %v130_v51 = vld [vmem:[%s5814_s9 + $0x28] sm:$0xff]  ;;  %s6224_s7 = sld [smem:[%s6661_s0 + %s5738_s4]]   ;;  %s5741_s16 = smov 16  }
   0xa   :  { %1775 = vmatpush1.bf16.msra.mxu0 %v5151_v3  ;;  %v5154_v5 = vld [vmem:[%s5771_s6 + $0x224] ss:$16 sps:$4 sm:$0xff]   ;;  %1733 = vmatprep.subr.bf16.mxu1 %v5152_v4  ;;  %v5157_v7 = vld [vmem:[%s5771_s6 + $0x220] ss:$16 sps:$4 sm:$0xff]   ;;  %v5832_v55 = vcombine.high %v126_v50, %v130_v51  ;;  %s6229_s11 = sld [smem:[%s6661_s0 + %s5739_s8]]   ;;  %s5742_s20 = smov 22  }
   0xb   :  { %1776 = vmatprep.subr.bf16.mxu0 %v5154_v5  ;;  %v5158_v8 = vld [vmem:[%s5771_s6 + $0x44] ss:$16 sps:$4 sm:$0xff]   ;;  %v5162_v10 = vld [vmem:[%s5771_s6 + $0x40] ss:$16 sps:$4 sm:$0xff]   ;;  %s6238_s15 = sld [smem:[%s6661_s0 + %s5740_s12]]   ;;  %s5743_s24 = smov 11  }
   0xc   :  { %v5160_v9 = vld [vmem:[%s5771_s6 + $0x244] ss:$16 sps:$4 sm:$0xff]   ;;  %v5163_v11 = vld [vmem:[%s5771_s6 + $0x240] ss:$16 sps:$4 sm:$0xff]   ;;  %1806 = vmatprep.mubr.bf16.mxu0 %v5832_v55  ;;  %s6279_s19 = sld [smem:[%s6661_s0 + %s5741_s16]]   ;;  %s5744_s28 = smov 5  }
   0xd   :  { %1734 = vmatpush1.bf16.msra.mxu1 %v5156_v6  ;;  %v5164_v12 = vld [vmem:[%s5771_s6 + $0x64] ss:$16 sps:$4 sm:$0xff]   ;;  %v5168_v14 = vld [vmem:[%s5771_s6 + $0x60] ss:$16 sps:$4 sm:$0xff]   ;;  %s6286_s23 = sld [smem:[%s6661_s0 + %s5742_s20]]   ;;  %s5745_s2 = smov 2  }
   0xe   :  { %1777 = vmatpush1.bf16.msra.mxu0 %v5157_v7  ;;  %1735 = vmatprep.subr.bf16.mxu1 %v5158_v8  ;;  %v5166_v13 = vld [vmem:[%s5771_s6 + $0x264] ss:$16 sps:$4 sm:$0xff]   ;;  %v5169_v15 = vld [vmem:[%s5771_s6 + $0x260] ss:$16 sps:$4 sm:$0xff]   ;;  %v5247_v7 = vld [vmem:[%s5771_s6 + $0xc] ss:$16 sps:$4 sm:$0xff]   ;;  %s4157_s27 = sld [smem:[%s6661_s0 + %s5743_s24]]  }
   0xf   :  { %1778 = vmatprep.subr.bf16.mxu0 %v5160_v9  ;;  %v5170_v16 = vld [vmem:[%s5771_s6 + $0x84] ss:$16 sps:$4 sm:$0xff]   ;;  %v5174_v18 = vld [vmem:[%s5771_s6 + $0x80] ss:$16 sps:$4 sm:$0xff]   ;;  %v5853_v9 = vcombine.low %v126_v50, %v130_v51  ;;  %v5299_v50 = vld [vmem:[%s5771_s6 + $0x128] ss:$16 sps:$4 sm:$0xff]   ;;  %s4151_s1 = sld [smem:[%s6661_s0 + %s5744_s28]]  }
  0x10   :  { %v5172_v17 = vld [vmem:[%s5771_s6 + $0x284] ss:$16 sps:$4 sm:$0xff]   ;;  %v5175_v19 = vld [vmem:[%s5771_s6 + $0x280] ss:$16 sps:$4 sm:$0xff]   ;;  %s4148_s5 = sld [smem:[%s6661_s0 + %s5745_s2]]   ;;  %s5747_s10 = smov 20  }
  0x11   :  { %1736 = vmatpush1.bf16.msra.mxu1 %v5162_v10  ;;  %v5176_v20 = vld [vmem:[%s5771_s6 + $0xa4] ss:$16 sps:$4 sm:$0xff]   ;;  %v5180_v22 = vld [vmem:[%s5771_s6 + $0xa0] ss:$16 sps:$4 sm:$0xff]   ;;  %s5748_s14 = smov 15   ;;  %s5749_s18 = smov 1  }
  0x12   :  { %1779 = vmatpush1.bf16.msra.mxu0 %v5163_v11  ;;  %1737 = vmatprep.subr.bf16.mxu1 %v5164_v12  ;;  %v5178_v21 = vld [vmem:[%s5771_s6 + $0x2a4] ss:$16 sps:$4 sm:$0xff]   ;;  %v5181_v23 = vld [vmem:[%s5771_s6 + $0x2a0] ss:$16 sps:$4 sm:$0xff]   ;;  %v5245_v11 = vld [vmem:[%s5771_s6 + $0x8] ss:$16 sps:$4 sm:$0xff]  }
  0x13   :  { %1780 = vmatprep.subr.bf16.mxu0 %v5166_v13  ;;  %v5182_v24 = vld [vmem:[%s5771_s6 + $0xc4] ss:$16 sps:$4 sm:$0xff]   ;;  %v5186_v26 = vld [vmem:[%s5771_s6 + $0xc0] ss:$16 sps:$4 sm:$0xff]   ;;  %v5253_v13 = vld [vmem:[%s5771_s6 + $0x2c] ss:$16 sps:$4 sm:$0xff]  }
  0x14   :  { %v5184_v25 = vld [vmem:[%s5771_s6 + $0x2c4] ss:$16 sps:$4 sm:$0xff]   ;;  %v5187_v27 = vld [vmem:[%s5771_s6 + $0x2c0] ss:$16 sps:$4 sm:$0xff]   ;;  %s5750_s22 = smov 19  }
  0x15   :  { %1738 = vmatpush1.bf16.msra.mxu1 %v5168_v14  ;;  %v5188_v28 = vld [vmem:[%s5771_s6 + $0xe4] ss:$16 sps:$4 sm:$0xff]   ;;  %v5192_v30 = vld [vmem:[%s5771_s6 + $0xe0] ss:$16 sps:$4 sm:$0xff]   ;;  %s4165_s26 = sld [smem:[%s6661_s0 + %s5750_s22]]  }
  0x16   :  { %1781 = vmatpush1.bf16.msra.mxu0 %v5169_v15  ;;  %1739 = vmatprep.subr.bf16.mxu1 %v5170_v16  ;;  %v5190_v29 = vld [vmem:[%s5771_s6 + $0x2e4] ss:$16 sps:$4 sm:$0xff]   ;;  %v5193_v31 = vld [vmem:[%s5771_s6 + $0x2e0] ss:$16 sps:$4 sm:$0xff]   ;;  %v5251_v15 = vld [vmem:[%s5771_s6 + $0x28] ss:$16 sps:$4 sm:$0xff]  }
  0x17   :  { %1782 = vmatprep.subr.bf16.mxu0 %v5172_v17  ;;  %v5194_v32 = vld [vmem:[%s5771_s6 + $0x104] ss:$16 sps:$4 sm:$0xff]   ;;  %v5198_v34 = vld [vmem:[%s5771_s6 + $0x100] ss:$16 sps:$4 sm:$0xff]   ;;  %v5259_v17 = vld [vmem:[%s5771_s6 + $0x4c] ss:$16 sps:$4 sm:$0xff]  }
  0x18   :  { %v5196_v33 = vld [vmem:[%s5771_s6 + $0x304] ss:$16 sps:$4 sm:$0xff]   ;;  %v5199_v35 = vld [vmem:[%s5771_s6 + $0x300] ss:$16 sps:$4 sm:$0xff]  }
  0x19   :  { %1740 = vmatpush1.bf16.msra.mxu1 %v5174_v18  ;;  %v5200_v36 = vld [vmem:[%s5771_s6 + $0x124] ss:$16 sps:$4 sm:$0xff]   ;;  %v5204_v38 = vld [vmem:[%s5771_s6 + $0x120] ss:$16 sps:$4 sm:$0xff]  }
  0x1a   :  { %1783 = vmatpush1.bf16.msra.mxu0 %v5175_v19  ;;  %1741 = vmatprep.subr.bf16.mxu1 %v5176_v20  ;;  %v5202_v37 = vld [vmem:[%s5771_s6 + $0x324] ss:$16 sps:$4 sm:$0xff]   ;;  %v5205_v39 = vld [vmem:[%s5771_s6 + $0x320] ss:$16 sps:$4 sm:$0xff]   ;;  %v5257_v19 = vld [vmem:[%s5771_s6 + $0x48] ss:$16 sps:$4 sm:$0xff]  }
  0x1b   :  { %1784 = vmatprep.subr.bf16.mxu0 %v5178_v21  ;;  %v5206_v40 = vld [vmem:[%s5771_s6 + $0x144] ss:$16 sps:$4 sm:$0xff]   ;;  %v5210_v42 = vld [vmem:[%s5771_s6 + $0x140] ss:$16 sps:$4 sm:$0xff]   ;;  %v5265_v21 = vld [vmem:[%s5771_s6 + $0x6c] ss:$16 sps:$4 sm:$0xff]  }
  0x1c   :  { %v5208_v41 = vld [vmem:[%s5771_s6 + $0x344] ss:$16 sps:$4 sm:$0xff]   ;;  %v5211_v43 = vld [vmem:[%s5771_s6 + $0x340] ss:$16 sps:$4 sm:$0xff]  }
  0x1d   :  { %1742 = vmatpush1.bf16.msra.mxu1 %v5180_v22  ;;  %v5212_v44 = vld [vmem:[%s5771_s6 + $0x164] ss:$16 sps:$4 sm:$0xff]   ;;  %v5216_v46 = vld [vmem:[%s5771_s6 + $0x160] ss:$16 sps:$4 sm:$0xff]  }
  0x1e   :  { %1785 = vmatpush1.bf16.msra.mxu0 %v5181_v23  ;;  %1743 = vmatprep.subr.bf16.mxu1 %v5182_v24  ;;  %v5214_v45 = vld [vmem:[%s5771_s6 + $0x364] ss:$16 sps:$4 sm:$0xff]   ;;  %v5217_v47 = vld [vmem:[%s5771_s6 + $0x360] ss:$16 sps:$4 sm:$0xff]   ;;  %v5263_v23 = vld [vmem:[%s5771_s6 + $0x68] ss:$16 sps:$4 sm:$0xff]  }
  0x1f   :  { %1786 = vmatprep.subr.bf16.mxu0 %v5184_v25  ;;  %v125_v48 = vld [vmem:[%s5814_s9] sm:$0xff]  ;;  %v5271_v25 = vld [vmem:[%s5771_s6 + $0x8c] ss:$16 sps:$4 sm:$0xff]  }
  0x20   :  { %v129_v49 = vld [vmem:[%s5814_s9 + $0x20] sm:$0xff] }
  0x21   :  { %1744 = vmatpush1.bf16.msra.mxu1 %v5186_v26  ;;  %v5218_v52 = vld [vmem:[%s5771_s6 + $0x184] ss:$16 sps:$4 sm:$0xff]   ;;  %v4180_v53 = vcombine.high %v125_v48, %v129_v49  ;;  %v5222_v56 = vld [vmem:[%s5771_s6 + $0x180] ss:$16 sps:$4 sm:$0xff]   ;;  %v5851_v8 = vcombine.low %v125_v48, %v129_v49  ;;  %v5301_v48 = vld [vmem:[%s5771_s6 + $0x12c] ss:$16 sps:$4 sm:$0xff]  }
  0x22   :  { %1787 = vmatpush1.bf16.msra.mxu0 %v5187_v27  ;;  %1745 = vmatprep.subr.bf16.mxu1 %v5188_v28  ;;  %v5220_v54 = vld [vmem:[%s5771_s6 + $0x384] ss:$16 sps:$4 sm:$0xff]   ;;  %v5223_v57 = vld [vmem:[%s5771_s6 + $0x380] ss:$16 sps:$4 sm:$0xff]   ;;  %v5269_v27 = vld [vmem:[%s5771_s6 + $0x88] ss:$16 sps:$4 sm:$0xff]  }
  0x23   :  { %1788 = vmatprep.subr.bf16.mxu0 %v5190_v29  ;;  %1763 = vmatprep.mubr.bf16.mxu1 %v4180_v53  ;;  %v5224_v58 = vld [vmem:[%s5771_s6 + $0x1a4] ss:$16 sps:$4 sm:$0xff]   ;;  %v5228_v60 = vld [vmem:[%s5771_s6 + $0x1a0] ss:$16 sps:$4 sm:$0xff]   ;;  %v5277_v29 = vld [vmem:[%s5771_s6 + $0xac] ss:$16 sps:$4 sm:$0xff]  }
  0x24   :  { %v5226_v59 = vld [vmem:[%s5771_s6 + $0x3a4] ss:$16 sps:$4 sm:$0xff]   ;;  %v5229_v61 = vld [vmem:[%s5771_s6 + $0x3a0] ss:$16 sps:$4 sm:$0xff]  }
  0x25   :  { %1746 = vmatpush1.bf16.msra.mxu1 %v5192_v30  ;;  %v5230_v62 = vld [vmem:[%s5771_s6 + $0x1c4] ss:$16 sps:$4 sm:$0xff]   ;;  %v5234_v0 = vld [vmem:[%s5771_s6 + $0x1c0] ss:$16 sps:$4 sm:$0xff]  }
  0x26   :  { %1789 = vmatpush1.bf16.msra.mxu0 %v5193_v31  ;;  %1747 = vmatprep.subr.bf16.mxu1 %v5194_v32  ;;  %v5232_v63 = vld [vmem:[%s5771_s6 + $0x3c4] ss:$16 sps:$4 sm:$0xff]   ;;  %v5235_v1 = vld [vmem:[%s5771_s6 + $0x3c0] ss:$16 sps:$4 sm:$0xff]   ;;  %v5275_v31 = vld [vmem:[%s5771_s6 + $0xa8] ss:$16 sps:$4 sm:$0xff]  }
  0x27   :  { %1790 = vmatprep.subr.bf16.mxu0 %v5196_v33  ;;  %v5236_v2 = vld [vmem:[%s5771_s6 + $0x1e4] ss:$16 sps:$4 sm:$0xff]   ;;  %v5240_v4 = vld [vmem:[%s5771_s6 + $0x1e0] ss:$16 sps:$4 sm:$0xff]   ;;  %v5283_v33 = vld [vmem:[%s5771_s6 + $0xcc] ss:$16 sps:$4 sm:$0xff]  }
  0x28   :  { %v5238_v3 = vld [vmem:[%s5771_s6 + $0x3e4] ss:$16 sps:$4 sm:$0xff]   ;;  %v5241_v5 = vld [vmem:[%s5771_s6 + $0x3e0] ss:$16 sps:$4 sm:$0xff]  }
  0x29   :  { %1748 = vmatpush1.bf16.msra.mxu1 %v5198_v34  ;;  %v5244_v6 = vld [vmem:[%s5771_s6 + $0x404] ss:$16 sps:$4 sm:$0xff]   ;;  %v5242_v10 = vld [vmem:[%s5771_s6 + $0x400] ss:$16 sps:$4 sm:$0xff]  }
  0x2a   :  { %1791 = vmatpush1.bf16.msra.mxu0 %v5199_v35  ;;  %1749 = vmatprep.subr.bf16.mxu1 %v5200_v36  ;;  %v5250_v12 = vld [vmem:[%s5771_s6 + $0x424] ss:$16 sps:$4 sm:$0xff]   ;;  %v5248_v14 = vld [vmem:[%s5771_s6 + $0x420] ss:$16 sps:$4 sm:$0xff]  }
  0x2b   :  { %1792 = vmatprep.subr.bf16.mxu0 %v5202_v37  ;;  %v5256_v16 = vld [vmem:[%s5771_s6 + $0x444] ss:$16 sps:$4 sm:$0xff]   ;;  %v5254_v18 = vld [vmem:[%s5771_s6 + $0x440] ss:$16 sps:$4 sm:$0xff]   ;;  %v5281_v37 = vld [vmem:[%s5771_s6 + $0xc8] ss:$16 sps:$4 sm:$0xff]  }
  0x2c   :  { %v5262_v20 = vld [vmem:[%s5771_s6 + $0x464] ss:$16 sps:$4 sm:$0xff]   ;;  %v5260_v22 = vld [vmem:[%s5771_s6 + $0x460] ss:$16 sps:$4 sm:$0xff]  }
  0x2d   :  { %1750 = vmatpush1.bf16.msra.mxu1 %v5204_v38  ;;  %v5268_v24 = vld [vmem:[%s5771_s6 + $0x484] ss:$16 sps:$4 sm:$0xff]   ;;  %v5266_v26 = vld [vmem:[%s5771_s6 + $0x480] ss:$16 sps:$4 sm:$0xff]  }
  0x2e   :  { %1793 = vmatpush1.bf16.msra.mxu0 %v5205_v39  ;;  %1751 = vmatprep.subr.bf16.mxu1 %v5206_v40  ;;  %v5274_v28 = vld [vmem:[%s5771_s6 + $0x4a4] ss:$16 sps:$4 sm:$0xff]   ;;  %v5272_v30 = vld [vmem:[%s5771_s6 + $0x4a0] ss:$16 sps:$4 sm:$0xff]   ;;  %v5289_v40 = vld [vmem:[%s5771_s6 + $0xec] ss:$16 sps:$4 sm:$0xff]  }
  0x2f   :  { %1794 = vmatprep.subr.bf16.mxu0 %v5208_v41  ;;  %v5280_v32 = vld [vmem:[%s5771_s6 + $0x4c4] ss:$16 sps:$4 sm:$0xff]   ;;  %v5278_v36 = vld [vmem:[%s5771_s6 + $0x4c0] ss:$16 sps:$4 sm:$0xff]  }
  0x30   :  { %v5882_v34 = vld [vmem:[%s5814_s9 + $0x10] sm:$0xff] }
  0x31   :  { %1752 = vmatpush1.bf16.msra.mxu1 %v5210_v42  ;;  %v5885_v35 = vld [vmem:[%s5814_s9 + $0x30] sm:$0xff]  ;;  %v5287_v42 = vld [vmem:[%s5771_s6 + $0xe8] ss:$16 sps:$4 sm:$0xff]  }
  0x32   :  { %1795 = vmatpush1.bf16.msra.mxu0 %v5211_v43  ;;  %1753 = vmatprep.subr.bf16.mxu1 %v5212_v44  ;;  %v5891_v38 = vcombine.high %v5882_v34, %v5885_v35  ;;  %v5286_v39 = vld [vmem:[%s5771_s6 + $0x4e4] ss:$16 sps:$4 sm:$0xff]   ;;  %v5284_v41 = vld [vmem:[%s5771_s6 + $0x4e0] ss:$16 sps:$4 sm:$0xff]   ;;  %v5295_v44 = vld [vmem:[%s5771_s6 + $0x10c] ss:$16 sps:$4 sm:$0xff]  }
  0x33   :  { %1796 = vmatprep.subr.bf16.mxu0 %v5214_v45  ;;  %v5292_v43 = vld [vmem:[%s5771_s6 + $0x504] ss:$16 sps:$4 sm:$0xff]   ;;  %v5290_v45 = vld [vmem:[%s5771_s6 + $0x500] ss:$16 sps:$4 sm:$0xff]  }
  0x34   :  { %v5296_v49 = vld [vmem:[%s5771_s6 + $0x520] ss:$16 sps:$4 sm:$0xff]   ;;  %v5304_v51 = vld [vmem:[%s5771_s6 + $0x544] ss:$16 sps:$4 sm:$0xff]  }
  0x35   :  { %1754 = vmatpush1.bf16.msra.mxu1 %v5216_v46  ;;  %v5293_v46 = vld [vmem:[%s5771_s6 + $0x108] ss:$16 sps:$4 sm:$0xff]  }
  0x36   :  { %1797 = vmatpush1.bf16.msra.mxu0 %v5217_v47  ;;  %1755 = vmatprep.subr.bf16.mxu1 %v5218_v52  ;;  %v5298_v47 = vld [vmem:[%s5771_s6 + $0x524] ss:$16 sps:$4 sm:$0xff]   ;;  %v5307_v52 = vld [vmem:[%s5771_s6 + $0x14c] ss:$16 sps:$4 sm:$0xff]  }
  0x37   :  { %1798 = vmatprep.subr.bf16.mxu0 %v5220_v54  ;;  %v5305_v54 = vld [vmem:[%s5771_s6 + $0x148] ss:$16 sps:$4 sm:$0xff]  }
  0x39   :  { %1756 = vmatpush1.bf16.msra.mxu1 %v5222_v56  ;;  %v5310_v56 = vld [vmem:[%s5771_s6 + $0x564] ss:$16 sps:$4 sm:$0xff]  }
  0x3a   :  { %1799 = vmatpush1.bf16.msra.mxu0 %v5223_v57  ;;  %1757 = vmatprep.subr.bf16.mxu1 %v5224_v58  ;;  %v5313_v57 = vld [vmem:[%s5771_s6 + $0x16c] ss:$16 sps:$4 sm:$0xff]   ;;  %v5308_v58 = vld [vmem:[%s5771_s6 + $0x560] ss:$16 sps:$4 sm:$0xff]  }
  0x3b   :  { %1800 = vmatprep.subr.bf16.mxu0 %v5226_v59  ;;  %v5311_v59 = vld [vmem:[%s5771_s6 + $0x168] ss:$16 sps:$4 sm:$0xff]  }
  0x3d   :  { %1758 = vmatpush1.bf16.msra.mxu1 %v5228_v60  ;;  %v5316_v60 = vld [vmem:[%s5771_s6 + $0x584] ss:$16 sps:$4 sm:$0xff]  }
  0x3e   :  { %1801 = vmatpush1.bf16.msra.mxu0 %v5229_v61  ;;  %1759 = vmatprep.subr.bf16.mxu1 %v5230_v62  ;;  %v5319_v61 = vld [vmem:[%s5771_s6 + $0x18c] ss:$16 sps:$4 sm:$0xff]   ;;  %v5314_v62 = vld [vmem:[%s5771_s6 + $0x580] ss:$16 sps:$4 sm:$0xff]  }
  0x3f   :  { %1802 = vmatprep.subr.bf16.mxu0 %v5232_v63  ;;  %v5317_v63 = vld [vmem:[%s5771_s6 + $0x188] ss:$16 sps:$4 sm:$0xff]  }
  0x41   :  { %1760 = vmatpush1.bf16.msra.mxu1 %v5234_v0  ;;  %v5322_v0 = vld [vmem:[%s5771_s6 + $0x5a4] ss:$16 sps:$4 sm:$0xff]  }
  0x42   :  { %1803 = vmatpush1.bf16.msra.mxu0 %v5235_v1  ;;  %1761 = vmatprep.subr.bf16.mxu1 %v5236_v2  ;;  %v5325_v1 = vld [vmem:[%s5771_s6 + $0x1ac] ss:$16 sps:$4 sm:$0xff]   ;;  %v5320_v2 = vld [vmem:[%s5771_s6 + $0x5a0] ss:$16 sps:$4 sm:$0xff]  }
  0x43   :  { %1804 = vmatprep.subr.bf16.mxu0 %v5238_v3  ;;  %v5323_v3 = vld [vmem:[%s5771_s6 + $0x1a8] ss:$16 sps:$4 sm:$0xff]  }
  0x45   :  { %1762 = vmatpush1.bf16.msra.mxu1 %v5240_v4  ;;  %v5328_v4 = vld [vmem:[%s5771_s6 + $0x5c4] ss:$16 sps:$4 sm:$0xff]  }
  0x46   :  { %1805 = vmatpush1.bf16.msra.mxu0 %v5241_v5  ;;  %1903 = vmatprep.subr.bf16.mxu1 %v5247_v7  ;;  %v5331_v5 = vld [vmem:[%s5771_s6 + $0x1cc] ss:$16 sps:$4 sm:$0xff]   ;;  %v5329_v7 = vld [vmem:[%s5771_s6 + $0x1c8] ss:$16 sps:$4 sm:$0xff]  }
  0x47   :  { %1817 = vmatprep.subr.bf16.mxu0 %v5244_v6  ;;  %v5326_v6 = vld [vmem:[%s5771_s6 + $0x5c0] ss:$16 sps:$4 sm:$0xff]  }
  0x48   :  { %1764 = vmatmul.mubr.bf16.vlgmr.msra.gmra.mrb[0].mxu1 %v5851_v8 }
  0x49   :  { %1807 = vmatmul.mubr.bf16.vlgmr.msra.gmra.mrb[0].mxu0 %v5853_v9  ;;  %1904 = vmatpush1.bf16.msra.mxu1 %v5245_v11  ;;  %v5337_v11 = vld [vmem:[%s5771_s6 + $0x1ec] ss:$16 sps:$4 sm:$0xff]  }
  0x4a   :  { %1818 = vmatpush1.bf16.msra.mxu0 %v5242_v10  ;;  %1905 = vmatprep.subr.bf16.mxu1 %v5253_v13  ;;  %v5334_v10 = vld [vmem:[%s5771_s6 + $0x5e4] ss:$16 sps:$4 sm:$0xff]   ;;  %v5335_v13 = vld [vmem:[%s5771_s6 + $0x1e8] ss:$16 sps:$4 sm:$0xff]  }
  0x4b   :  { %1819 = vmatprep.subr.bf16.mxu0 %v5250_v12  ;;  %1935 = vmatprep.mubr.bf16.mxu1 %v4180_v53  ;;  %v5302_v53 = vld [vmem:[%s5771_s6 + $0x540] ss:$16 sps:$4 sm:$0xff]  }
  0x4c   :  { %1849 = vmatprep.mubr.bf16.mxu0 %v5891_v38  ;;  %v5332_v12 = vld [vmem:[%s5771_s6 + $0x5e0] ss:$16 sps:$4 sm:$0xff]  }
  0x4d   :  { %1906 = vmatpush1.bf16.msra.mxu1 %v5251_v15  ;;  %v5343_v15 = vld [vmem:[%s5771_s6 + $0x20c] ss:$16 sps:$4 sm:$0xff]  }
  0x4e   :  { %1820 = vmatpush1.bf16.msra.mxu0 %v5248_v14  ;;  %1907 = vmatprep.subr.bf16.mxu1 %v5259_v17  ;;  %v5340_v14 = vld [vmem:[%s5771_s6 + $0x604] ss:$16 sps:$4 sm:$0xff]   ;;  %v5338_v17 = vld [vmem:[%s5771_s6 + $0x600] ss:$16 sps:$4 sm:$0xff]  }
  0x4f   :  { %1821 = vmatprep.subr.bf16.mxu0 %v5256_v16  ;;  %v5934_v16 = vcombine.low %v5882_v34, %v5885_v35  ;;  %v5362_v34 = vld [vmem:[%s5771_s6 + $0x680] ss:$16 sps:$4 sm:$0xff]   ;;  %v5365_v35 = vld [vmem:[%s5771_s6 + $0x288] ss:$16 sps:$4 sm:$0xff]  }
  0x51   :  { %1908 = vmatpush1.bf16.msra.mxu1 %v5257_v19  ;;  %v5346_v19 = vld [vmem:[%s5771_s6 + $0x624] ss:$16 sps:$4 sm:$0xff]  }
  0x52   :  { %1822 = vmatpush1.bf16.msra.mxu0 %v5254_v18  ;;  %1909 = vmatprep.subr.bf16.mxu1 %v5265_v21  ;;  %v5341_v18 = vld [vmem:[%s5771_s6 + $0x208] ss:$16 sps:$4 sm:$0xff]  }
  0x53   :  { %1823 = vmatprep.subr.bf16.mxu0 %v5262_v20  ;;  %v5349_v20 = vld [vmem:[%s5771_s6 + $0x22c] ss:$16 sps:$4 sm:$0xff]  }
  0x54   :  { %v5941_v21 = vld [vmem:[%s5814_s9 + $0x18] sm:$0xff] }
  0x55   :  { %1910 = vmatpush1.bf16.msra.mxu1 %v5263_v23  ;;  %v5344_v23 = vld [vmem:[%s5771_s6 + $0x620] ss:$16 sps:$4 sm:$0xff]  }
  0x56   :  { %1824 = vmatpush1.bf16.msra.mxu0 %v5260_v22  ;;  %1911 = vmatprep.subr.bf16.mxu1 %v5271_v25  ;;  %v5944_v22 = vld [vmem:[%s5814_s9 + $0x38] sm:$0xff] }
  0x57   :  { %1825 = vmatprep.subr.bf16.mxu0 %v5268_v24  ;;  %v5347_v24 = vld [vmem:[%s5771_s6 + $0x228] ss:$16 sps:$4 sm:$0xff]   ;;  %v5952_v25 = vcombine.high %v5941_v21, %v5944_v22 }
  0x59   :  { %1912 = vmatpush1.bf16.msra.mxu1 %v5269_v27  ;;  %v5355_v27 = vld [vmem:[%s5771_s6 + $0x24c] ss:$16 sps:$4 sm:$0xff]  }
  0x5a   :  { %1826 = vmatpush1.bf16.msra.mxu0 %v5266_v26  ;;  %1913 = vmatprep.subr.bf16.mxu1 %v5277_v29  ;;  %v5352_v26 = vld [vmem:[%s5771_s6 + $0x644] ss:$16 sps:$4 sm:$0xff]  }
  0x5b   :  { %1827 = vmatprep.subr.bf16.mxu0 %v5274_v28  ;;  %v5353_v28 = vld [vmem:[%s5771_s6 + $0x248] ss:$16 sps:$4 sm:$0xff]   ;;  %v5358_v29 = vld [vmem:[%s5771_s6 + $0x664] ss:$16 sps:$4 sm:$0xff]  }
  0x5d   :  { %1914 = vmatpush1.bf16.msra.mxu1 %v5275_v31  ;;  %v5356_v31 = vld [vmem:[%s5771_s6 + $0x660] ss:$16 sps:$4 sm:$0xff]  }
  0x5e   :  { %1828 = vmatpush1.bf16.msra.mxu0 %v5272_v30  ;;  %1915 = vmatprep.subr.bf16.mxu1 %v5283_v33  ;;  %v5361_v30 = vld [vmem:[%s5771_s6 + $0x26c] ss:$16 sps:$4 sm:$0xff]  }
  0x5f   :  { %1829 = vmatprep.subr.bf16.mxu0 %v5280_v32  ;;  %v5359_v32 = vld [vmem:[%s5771_s6 + $0x268] ss:$16 sps:$4 sm:$0xff]   ;;  %v5367_v33 = vld [vmem:[%s5771_s6 + $0x28c] ss:$16 sps:$4 sm:$0xff]  }
  0x61   :  { %1916 = vmatpush1.bf16.msra.mxu1 %v5281_v37  ;;  %v5373_v37 = vld [vmem:[%s5771_s6 + $0x2ac] ss:$16 sps:$4 sm:$0xff]  }
  0x62   :  { %1830 = vmatpush1.bf16.msra.mxu0 %v5278_v36  ;;  %1917 = vmatprep.subr.bf16.mxu1 %v5289_v40  ;;  %v5370_v36 = vld [vmem:[%s5771_s6 + $0x6a4] ss:$16 sps:$4 sm:$0xff]   ;;  %v5371_v40 = vld [vmem:[%s5771_s6 + $0x2a8] ss:$16 sps:$4 sm:$0xff]  }
  0x63   :  { %1831 = vmatprep.subr.bf16.mxu0 %v5286_v39  ;;  %v5368_v39 = vld [vmem:[%s5771_s6 + $0x6a0] ss:$16 sps:$4 sm:$0xff]  }
  0x65   :  { %1918 = vmatpush1.bf16.msra.mxu1 %v5287_v42  ;;  %v5379_v42 = vld [vmem:[%s5771_s6 + $0x2cc] ss:$16 sps:$4 sm:$0xff]  }
  0x66   :  { %1832 = vmatpush1.bf16.msra.mxu0 %v5284_v41  ;;  %1919 = vmatprep.subr.bf16.mxu1 %v5295_v44  ;;  %v5376_v41 = vld [vmem:[%s5771_s6 + $0x6c4] ss:$16 sps:$4 sm:$0xff]   ;;  %v5377_v44 = vld [vmem:[%s5771_s6 + $0x2c8] ss:$16 sps:$4 sm:$0xff]  }
  0x67   :  { %1833 = vmatprep.subr.bf16.mxu0 %v5292_v43  ;;  %v5374_v43 = vld [vmem:[%s5771_s6 + $0x6c0] ss:$16 sps:$4 sm:$0xff]  }
  0x69   :  { %1920 = vmatpush1.bf16.msra.mxu1 %v5293_v46  ;;  %v5385_v46 = vld [vmem:[%s5771_s6 + $0x2ec] ss:$16 sps:$4 sm:$0xff]  }
  0x6a   :  { %1834 = vmatpush1.bf16.msra.mxu0 %v5290_v45  ;;  %1921 = vmatprep.subr.bf16.mxu1 %v5301_v48  ;;  %v5382_v45 = vld [vmem:[%s5771_s6 + $0x6e4] ss:$16 sps:$4 sm:$0xff]   ;;  %v5383_v48 = vld [vmem:[%s5771_s6 + $0x2e8] ss:$16 sps:$4 sm:$0xff]  }
  0x6b   :  { %1835 = vmatprep.subr.bf16.mxu0 %v5298_v47  ;;  %v5380_v47 = vld [vmem:[%s5771_s6 + $0x6e0] ss:$16 sps:$4 sm:$0xff]  }
  0x6d   :  { %1922 = vmatpush1.bf16.msra.mxu1 %v5299_v50  ;;  %v5391_v50 = vld [vmem:[%s5771_s6 + $0x30c] ss:$16 sps:$4 sm:$0xff]  }
  0x6e   :  { %1836 = vmatpush1.bf16.msra.mxu0 %v5296_v49  ;;  %1923 = vmatprep.subr.bf16.mxu1 %v5307_v52  ;;  %v5388_v49 = vld [vmem:[%s5771_s6 + $0x704] ss:$16 sps:$4 sm:$0xff]   ;;  %v5389_v52 = vld [vmem:[%s5771_s6 + $0x308] ss:$16 sps:$4 sm:$0xff]  }
  0x6f   :  { %1837 = vmatprep.subr.bf16.mxu0 %v5304_v51  ;;  %v5386_v51 = vld [vmem:[%s5771_s6 + $0x700] ss:$16 sps:$4 sm:$0xff]  }
  0x71   :  { %1924 = vmatpush1.bf16.msra.mxu1 %v5305_v54  ;;  %v5397_v54 = vld [vmem:[%s5771_s6 + $0x32c] ss:$16 sps:$4 sm:$0xff]  }
  0x72   :  { %1838 = vmatpush1.bf16.msra.mxu0 %v5302_v53  ;;  %1925 = vmatprep.subr.bf16.mxu1 %v5313_v57  ;;  %v5394_v53 = vld [vmem:[%s5771_s6 + $0x724] ss:$16 sps:$4 sm:$0xff]   ;;  %v5395_v57 = vld [vmem:[%s5771_s6 + $0x328] ss:$16 sps:$4 sm:$0xff]  }
  0x73   :  { %1839 = vmatprep.subr.bf16.mxu0 %v5310_v56  ;;  %v5392_v56 = vld [vmem:[%s5771_s6 + $0x720] ss:$16 sps:$4 sm:$0xff]  }
  0x75   :  { %1926 = vmatpush1.bf16.msra.mxu1 %v5311_v59  ;;  %v5403_v59 = vld [vmem:[%s5771_s6 + $0x34c] ss:$16 sps:$4 sm:$0xff]  }
  0x76   :  { %1840 = vmatpush1.bf16.msra.mxu0 %v5308_v58  ;;  %1927 = vmatprep.subr.bf16.mxu1 %v5319_v61  ;;  %v5400_v58 = vld [vmem:[%s5771_s6 + $0x744] ss:$16 sps:$4 sm:$0xff]   ;;  %v5401_v61 = vld [vmem:[%s5771_s6 + $0x348] ss:$16 sps:$4 sm:$0xff]  }
  0x77   :  { %1841 = vmatprep.subr.bf16.mxu0 %v5316_v60  ;;  %v5398_v60 = vld [vmem:[%s5771_s6 + $0x740] ss:$16 sps:$4 sm:$0xff]  }
  0x79   :  { %1928 = vmatpush1.bf16.msra.mxu1 %v5317_v63  ;;  %v5409_v63 = vld [vmem:[%s5771_s6 + $0x36c] ss:$16 sps:$4 sm:$0xff]  }
  0x7a   :  { %1842 = vmatpush1.bf16.msra.mxu0 %v5314_v62  ;;  %1929 = vmatprep.subr.bf16.mxu1 %v5325_v1  ;;  %v5406_v62 = vld [vmem:[%s5771_s6 + $0x764] ss:$16 sps:$4 sm:$0xff]   ;;  %v5407_v1 = vld [vmem:[%s5771_s6 + $0x368] ss:$16 sps:$4 sm:$0xff]  }
  0x7b   :  { %1843 = vmatprep.subr.bf16.mxu0 %v5322_v0  ;;  %v5404_v0 = vld [vmem:[%s5771_s6 + $0x760] ss:$16 sps:$4 sm:$0xff]  }
  0x7d   :  { %1930 = vmatpush1.bf16.msra.mxu1 %v5323_v3  ;;  %v5415_v3 = vld [vmem:[%s5771_s6 + $0x38c] ss:$16 sps:$4 sm:$0xff]  }
  0x7e   :  { %1844 = vmatpush1.bf16.msra.mxu0 %v5320_v2  ;;  %1931 = vmatprep.subr.bf16.mxu1 %v5331_v5  ;;  %v5412_v2 = vld [vmem:[%s5771_s6 + $0x784] ss:$16 sps:$4 sm:$0xff]   ;;  %v5413_v5 = vld [vmem:[%s5771_s6 + $0x388] ss:$16 sps:$4 sm:$0xff]  }
  0x7f   :  { %1845 = vmatprep.subr.bf16.mxu0 %v5328_v4  ;;  %v5410_v4 = vld [vmem:[%s5771_s6 + $0x780] ss:$16 sps:$4 sm:$0xff]  }
  0x81   :  { %1932 = vmatpush1.bf16.msra.mxu1 %v5329_v7  ;;  %v5421_v7 = vld [vmem:[%s5771_s6 + $0x3ac] ss:$16 sps:$4 sm:$0xff]  }
  0x82   :  { %1846 = vmatpush1.bf16.msra.mxu0 %v5326_v6  ;;  %1933 = vmatprep.subr.bf16.mxu1 %v5337_v11  ;;  %v5418_v6 = vld [vmem:[%s5771_s6 + $0x7a4] ss:$16 sps:$4 sm:$0xff]   ;;  %v5419_v11 = vld [vmem:[%s5771_s6 + $0x3a8] ss:$16 sps:$4 sm:$0xff]  }
  0x83   :  { %1847 = vmatprep.subr.bf16.mxu0 %v5334_v10  ;;  %v5416_v10 = vld [vmem:[%s5771_s6 + $0x7a0] ss:$16 sps:$4 sm:$0xff]  }
  0x85   :  { %1934 = vmatpush1.bf16.msra.mxu1 %v5335_v13  ;;  %v5427_v13 = vld [vmem:[%s5771_s6 + $0x3cc] ss:$16 sps:$4 sm:$0xff]  }
  0x86   :  { %1848 = vmatpush1.bf16.msra.mxu0 %v5332_v12  ;;  %1946 = vmatprep.subr.bf16.mxu1 %v5343_v15  ;;  %v5424_v12 = vld [vmem:[%s5771_s6 + $0x7c4] ss:$16 sps:$4 sm:$0xff]   ;;  %v5425_v15 = vld [vmem:[%s5771_s6 + $0x3c8] ss:$16 sps:$4 sm:$0xff]  }
  0x87   :  { %1860 = vmatprep.subr.bf16.mxu0 %v5340_v14  ;;  %v5422_v14 = vld [vmem:[%s5771_s6 + $0x7c0] ss:$16 sps:$4 sm:$0xff]  }
  0x88   :  { %1936 = vmatmul.mubr.bf16.vlgmr.msra.gmra.mrb[4].mxu1 %v5851_v8  ;;  %v5350_v8 = vld [vmem:[%s5771_s6 + $0x640] ss:$16 sps:$4 sm:$0xff]  }
  0x89   :  { %1850 = vmatmul.mubr.bf16.vlgmr.msra.gmra.mrb[0].mxu0 %v5934_v16  ;;  %1947 = vmatpush1.bf16.msra.mxu1 %v5341_v18  ;;  %v5433_v18 = vld [vmem:[%s5771_s6 + $0x3ec] ss:$16 sps:$4 sm:$0xff]  }
  0x8a   :  { %1861 = vmatpush1.bf16.msra.mxu0 %v5338_v17  ;;  %1948 = vmatprep.subr.bf16.mxu1 %v5349_v20  ;;  %v5430_v17 = vld [vmem:[%s5771_s6 + $0x7e4] ss:$16 sps:$4 sm:$0xff]   ;;  %v5431_v20 = vld [vmem:[%s5771_s6 + $0x3e8] ss:$16 sps:$4 sm:$0xff]  }
  0x8b   :  { %1862 = vmatprep.subr.bf16.mxu0 %v5346_v19  ;;  %1892 = vmatprep.mubr.bf16.mxu0 %v5952_v25  ;;  %v5428_v19 = vld [vmem:[%s5771_s6 + $0x7e0] ss:$16 sps:$4 sm:$0xff]  }
  0x8c   :  { %1978 = vmatprep.mubr.bf16.mxu1 %v5832_v55  ;;  %v5364_v55 = vld [vmem:[%s5771_s6 + $0x684] ss:$16 sps:$4 sm:$0xff]  }
  0x8d   :  { %1949 = vmatpush1.bf16.msra.mxu1 %v5347_v24  ;;  %v6015_v24 = vcombine.low %v5941_v21, %v5944_v22  ;;  %v5442_v21 = vld [vmem:[%s5771_s6 + $0x44c] ss:$16 sps:$4 sm:$0xff]   ;;  %v5440_v22 = vld [vmem:[%s5771_s6 + $0x448] ss:$16 sps:$4 sm:$0xff]  }
  0x8e   :  { %1863 = vmatpush1.bf16.msra.mxu0 %v5344_v23  ;;  %1950 = vmatprep.subr.bf16.mxu1 %v5355_v27  ;;  %v5436_v23 = vld [vmem:[%s5771_s6 + $0x40c] ss:$16 sps:$4 sm:$0xff]  }
  0x8f   :  { %1864 = vmatprep.subr.bf16.mxu0 %v5352_v26  ;;  %v5434_v26 = vld [vmem:[%s5771_s6 + $0x408] ss:$16 sps:$4 sm:$0xff]   ;;  %v5439_v27 = vld [vmem:[%s5771_s6 + $0x42c] ss:$16 sps:$4 sm:$0xff]  }
  0x91   :  { %1951 = vmatpush1.bf16.msra.mxu1 %v5353_v28  ;;  %v5445_v28 = vld [vmem:[%s5771_s6 + $0x46c] ss:$16 sps:$4 sm:$0xff]  }
  0x92   :  { %1865 = vmatpush1.bf16.msra.mxu0 %v5350_v8  ;;  %1952 = vmatprep.subr.bf16.mxu1 %v5361_v30  ;;  %v5437_v8 = vld [vmem:[%s5771_s6 + $0x428] ss:$16 sps:$4 sm:$0xff]  }
  0x93   :  { %1866 = vmatprep.subr.bf16.mxu0 %v5358_v29  ;;  %v5443_v29 = vld [vmem:[%s5771_s6 + $0x468] ss:$16 sps:$4 sm:$0xff]  }
  0x94   :  { %v5446_v30 = vld [vmem:[%s5771_s6 + $0x488] ss:$16 sps:$4 sm:$0xff]  }
  0x95   :  { %1953 = vmatpush1.bf16.msra.mxu1 %v5359_v32  ;;  %v5454_v32 = vld [vmem:[%s5771_s6 + $0x4cc] ss:$16 sps:$4 sm:$0xff]  }
  0x96   :  { %1867 = vmatpush1.bf16.msra.mxu0 %v5356_v31  ;;  %1954 = vmatprep.subr.bf16.mxu1 %v5367_v33  ;;  %v5449_v31 = vld [vmem:[%s5771_s6 + $0x4a8] ss:$16 sps:$4 sm:$0xff]   ;;  %v5457_v33 = vld [vmem:[%s5771_s6 + $0x4ec] ss:$16 sps:$4 sm:$0xff]  }
  0x97   :  { %1868 = vmatprep.subr.bf16.mxu0 %v5364_v55  ;;  %v5452_v55 = vld [vmem:[%s5771_s6 + $0x4c8] ss:$16 sps:$4 sm:$0xff]  }
  0x99   :  { %1955 = vmatpush1.bf16.msra.mxu1 %v5365_v35  ;;  %v5460_v35 = vld [vmem:[%s5771_s6 + $0x50c] ss:$16 sps:$4 sm:$0xff]  }
  0x9a   :  { %1869 = vmatpush1.bf16.msra.mxu0 %v5362_v34  ;;  %1956 = vmatprep.subr.bf16.mxu1 %v5373_v37  ;;  %v5455_v34 = vld [vmem:[%s5771_s6 + $0x4e8] ss:$16 sps:$4 sm:$0xff]   ;;  %v5463_v37 = vld [vmem:[%s5771_s6 + $0x52c] ss:$16 sps:$4 sm:$0xff]  }
  0x9b   :  { %1870 = vmatprep.subr.bf16.mxu0 %v5370_v36  ;;  %v5458_v36 = vld [vmem:[%s5771_s6 + $0x508] ss:$16 sps:$4 sm:$0xff]  }
  0x9d   :  { %1957 = vmatpush1.bf16.msra.mxu1 %v5371_v40  ;;  %v5466_v40 = vld [vmem:[%s5771_s6 + $0x54c] ss:$16 sps:$4 sm:$0xff]  }
  0x9e   :  { %1871 = vmatpush1.bf16.msra.mxu0 %v5368_v39  ;;  %1958 = vmatprep.subr.bf16.mxu1 %v5379_v42  ;;  %v5461_v39 = vld [vmem:[%s5771_s6 + $0x528] ss:$16 sps:$4 sm:$0xff]   ;;  %v5469_v42 = vld [vmem:[%s5771_s6 + $0x56c] ss:$16 sps:$4 sm:$0xff]  }
  0x9f   :  { %1872 = vmatprep.subr.bf16.mxu0 %v5376_v41  ;;  %v5464_v41 = vld [vmem:[%s5771_s6 + $0x548] ss:$16 sps:$4 sm:$0xff]  }
  0xa1   :  { %1959 = vmatpush1.bf16.msra.mxu1 %v5377_v44  ;;  %v5472_v44 = vld [vmem:[%s5771_s6 + $0x58c] ss:$16 sps:$4 sm:$0xff]  }
  0xa2   :  { %1873 = vmatpush1.bf16.msra.mxu0 %v5374_v43  ;;  %1960 = vmatprep.subr.bf16.mxu1 %v5385_v46  ;;  %v5467_v43 = vld [vmem:[%s5771_s6 + $0x568] ss:$16 sps:$4 sm:$0xff]   ;;  %v5475_v46 = vld [vmem:[%s5771_s6 + $0x5ac] ss:$16 sps:$4 sm:$0xff]  }
  0xa3   :  { %1874 = vmatprep.subr.bf16.mxu0 %v5382_v45  ;;  %v5470_v45 = vld [vmem:[%s5771_s6 + $0x588] ss:$16 sps:$4 sm:$0xff]  }
  0xa5   :  { %1961 = vmatpush1.bf16.msra.mxu1 %v5383_v48  ;;  %v5478_v48 = vld [vmem:[%s5771_s6 + $0x5cc] ss:$16 sps:$4 sm:$0xff]  }
  0xa6   :  { %1875 = vmatpush1.bf16.msra.mxu0 %v5380_v47  ;;  %1962 = vmatprep.subr.bf16.mxu1 %v5391_v50  ;;  %v5473_v47 = vld [vmem:[%s5771_s6 + $0x5a8] ss:$16 sps:$4 sm:$0xff]   ;;  %v5481_v50 = vld [vmem:[%s5771_s6 + $0x5ec] ss:$16 sps:$4 sm:$0xff]  }
  0xa7   :  { %1876 = vmatprep.subr.bf16.mxu0 %v5388_v49  ;;  %v5476_v49 = vld [vmem:[%s5771_s6 + $0x5c8] ss:$16 sps:$4 sm:$0xff]  }
  0xa9   :  { %1963 = vmatpush1.bf16.msra.mxu1 %v5389_v52  ;;  %v5484_v52 = vld [vmem:[%s5771_s6 + $0x60c] ss:$16 sps:$4 sm:$0xff]  }
  0xaa   :  { %1877 = vmatpush1.bf16.msra.mxu0 %v5386_v51  ;;  %1964 = vmatprep.subr.bf16.mxu1 %v5397_v54  ;;  %v5479_v51 = vld [vmem:[%s5771_s6 + $0x5e8] ss:$16 sps:$4 sm:$0xff]   ;;  %v5487_v54 = vld [vmem:[%s5771_s6 + $0x62c] ss:$16 sps:$4 sm:$0xff]  }
  0xab   :  { %1878 = vmatprep.subr.bf16.mxu0 %v5394_v53  ;;  %v5482_v53 = vld [vmem:[%s5771_s6 + $0x608] ss:$16 sps:$4 sm:$0xff]  }
  0xad   :  { %1965 = vmatpush1.bf16.msra.mxu1 %v5395_v57  ;;  %v5490_v57 = vld [vmem:[%s5771_s6 + $0x64c] ss:$16 sps:$4 sm:$0xff]  }
  0xae   :  { %1879 = vmatpush1.bf16.msra.mxu0 %v5392_v56  ;;  %1966 = vmatprep.subr.bf16.mxu1 %v5403_v59  ;;  %v5485_v56 = vld [vmem:[%s5771_s6 + $0x628] ss:$16 sps:$4 sm:$0xff]   ;;  %v5493_v59 = vld [vmem:[%s5771_s6 + $0x66c] ss:$16 sps:$4 sm:$0xff]  }
  0xaf   :  { %1880 = vmatprep.subr.bf16.mxu0 %v5400_v58  ;;  %v5488_v58 = vld [vmem:[%s5771_s6 + $0x648] ss:$16 sps:$4 sm:$0xff]  }
  0xb1   :  { %1967 = vmatpush1.bf16.msra.mxu1 %v5401_v61  ;;  %v5496_v61 = vld [vmem:[%s5771_s6 + $0x68c] ss:$16 sps:$4 sm:$0xff]  }
  0xb2   :  { %1881 = vmatpush1.bf16.msra.mxu0 %v5398_v60  ;;  %1968 = vmatprep.subr.bf16.mxu1 %v5409_v63  ;;  %v5491_v60 = vld [vmem:[%s5771_s6 + $0x668] ss:$16 sps:$4 sm:$0xff]   ;;  %v5502_v63 = vld [vmem:[%s5771_s6 + $0x6cc] ss:$16 sps:$4 sm:$0xff]  }
  0xb3   :  { %1882 = vmatprep.subr.bf16.mxu0 %v5406_v62  ;;  %v5499_v62 = vld [vmem:[%s5771_s6 + $0x6ac] ss:$16 sps:$4 sm:$0xff]  }
  0xb5   :  { %1969 = vmatpush1.bf16.msra.mxu1 %v5407_v1 }
  0xb6   :  { %1883 = vmatpush1.bf16.msra.mxu0 %v5404_v0  ;;  %1970 = vmatprep.subr.bf16.mxu1 %v5415_v3 }
  0xb7   :  { %1884 = vmatprep.subr.bf16.mxu0 %v5412_v2  ;;  %v5500_v2 = vld [vmem:[%s5771_s6 + $0x6c8] ss:$16 sps:$4 sm:$0xff]  }
  0xb9   :  { %1971 = vmatpush1.bf16.msra.mxu1 %v5413_v5 }
  0xba   :  { %1885 = vmatpush1.bf16.msra.mxu0 %v5410_v4  ;;  %1972 = vmatprep.subr.bf16.mxu1 %v5421_v7  ;;  %v5505_v4 = vld [vmem:[%s5771_s6 + $0x6ec] ss:$16 sps:$4 sm:$0xff]  }
  0xbb   :  { %1886 = vmatprep.subr.bf16.mxu0 %v5418_v6  ;;  %v5503_v6 = vld [vmem:[%s5771_s6 + $0x6e8] ss:$16 sps:$4 sm:$0xff]   ;;  %v5508_v7 = vld [vmem:[%s5771_s6 + $0x70c] ss:$16 sps:$4 sm:$0xff]  }
  0xbd   :  { %1973 = vmatpush1.bf16.msra.mxu1 %v5419_v11  ;;  %v5511_v11 = vld [vmem:[%s5771_s6 + $0x72c] ss:$16 sps:$4 sm:$0xff]  }
  0xbe   :  { %1887 = vmatpush1.bf16.msra.mxu0 %v5416_v10  ;;  %1974 = vmatprep.subr.bf16.mxu1 %v5427_v13  ;;  %v5506_v10 = vld [vmem:[%s5771_s6 + $0x708] ss:$16 sps:$4 sm:$0xff]   ;;  %v5514_v13 = vld [vmem:[%s5771_s6 + $0x74c] ss:$16 sps:$4 sm:$0xff]  }
  0xbf   :  { %1888 = vmatprep.subr.bf16.mxu0 %v5424_v12  ;;  %v5509_v12 = vld [vmem:[%s5771_s6 + $0x728] ss:$16 sps:$4 sm:$0xff]  }
  0xc1   :  { %1975 = vmatpush1.bf16.msra.mxu1 %v5425_v15  ;;  %v5517_v15 = vld [vmem:[%s5771_s6 + $0x76c] ss:$16 sps:$4 sm:$0xff]  }
  0xc2   :  { %1889 = vmatpush1.bf16.msra.mxu0 %v5422_v14  ;;  %1976 = vmatprep.subr.bf16.mxu1 %v5433_v18  ;;  %v5512_v14 = vld [vmem:[%s5771_s6 + $0x748] ss:$16 sps:$4 sm:$0xff]   ;;  %v5520_v18 = vld [vmem:[%s5771_s6 + $0x78c] ss:$16 sps:$4 sm:$0xff]  }
  0xc3   :  { %1890 = vmatprep.subr.bf16.mxu0 %v5430_v17  ;;  %v5515_v17 = vld [vmem:[%s5771_s6 + $0x768] ss:$16 sps:$4 sm:$0xff]  }
  0xc5   :  { %1977 = vmatpush1.bf16.msra.mxu1 %v5431_v20  ;;  %v5523_v20 = vld [vmem:[%s5771_s6 + $0x7ac] ss:$16 sps:$4 sm:$0xff]  }
  0xc6   :  { %1891 = vmatpush1.bf16.msra.mxu0 %v5428_v19  ;;  %1989 = vmatprep.subr.bf16.mxu1 %v5436_v23  ;;  %v5518_v19 = vld [vmem:[%s5771_s6 + $0x788] ss:$16 sps:$4 sm:$0xff]  }
  0xc7   :  { %v5521_v23 = vld [vmem:[%s5771_s6 + $0x7a8] ss:$16 sps:$4 sm:$0xff]  }
  0xc8   :  { %1979 = vmatmul.mubr.bf16.vlgmr.msra.gmra.mrb[4].mxu1 %v5853_v9  ;;  %v5448_v9 = vld [vmem:[%s5771_s6 + $0x48c] ss:$16 sps:$4 sm:$0xff]  }
  0xc9   :  { %1893 = vmatmul.mubr.bf16.vlgmr.msra.gmra.mrb[0].mxu0 %v6015_v24  ;;  %1990 = vmatpush1.bf16.msra.mxu1 %v5434_v26  ;;  %v5526_v26 = vld [vmem:[%s5771_s6 + $0x7cc] ss:$16 sps:$4 sm:$0xff]  }
  0xca   :  { %2021 = vmatprep.mubr.bf16.mxu1 %v5891_v38  ;;  %1991 = vmatprep.subr.bf16.mxu1 %v5439_v27  ;;  %v5451_v38 = vld [vmem:[%s5771_s6 + $0x4ac] ss:$16 sps:$4 sm:$0xff]   ;;  %v5524_v27 = vld [vmem:[%s5771_s6 + $0x7c8] ss:$16 sps:$4 sm:$0xff]  }
  0xcd   :  { %1992 = vmatpush1.bf16.msra.mxu1 %v5437_v8  ;;  %v5529_v8 = vld [vmem:[%s5771_s6 + $0x7ec] ss:$16 sps:$4 sm:$0xff]  }
  0xce   :  { %1993 = vmatprep.subr.bf16.mxu1 %v5442_v21  ;;  %v2095_v21 = vld [vmem:[%s6091_s13 + $0x80] sm:$0xff] }
  0xd1   :  { %1994 = vmatpush1.bf16.msra.mxu1 %v5440_v22  ;;  %v2096_v22 = vld [vmem:[%s6091_s13 + $0x88] sm:$0xff] }
  0xd2   :  { %1995 = vmatprep.subr.bf16.mxu1 %v5445_v28  ;;  %v5527_v28 = vld [vmem:[%s5771_s6 + $0x7e8] ss:$16 sps:$4 sm:$0xff]  }
  0xd5   :  { %1996 = vmatpush1.bf16.msra.mxu1 %v5443_v29  ;;  %v4841_v29 = vpack.c.bf16 %v2096_v22, %v2095_v21 }
  0xd6   :  { %1997 = vmatprep.subr.bf16.mxu1 %v5448_v9  ;;  %v2079_v9 = vld [vmem:[%s6091_s13] sm:$0xff] }
  0xd9   :  { %1998 = vmatpush1.bf16.msra.mxu1 %v5446_v30  ;;  %v2080_v30 = vld [vmem:[%s6091_s13 + $0x8] sm:$0xff] }
  0xda   :  { %1999 = vmatprep.subr.bf16.mxu1 %v5451_v38  ;;  %v2097_v38 = vld [vmem:[%s6091_s13 + $0x90] sm:$0xff] }
  0xdd   :  { %2000 = vmatpush1.bf16.msra.mxu1 %v5449_v31  ;;  %v2098_v31 = vld [vmem:[%s6091_s13 + $0x98] sm:$0xff] }
  0xde   :  { %2001 = vmatprep.subr.bf16.mxu1 %v5454_v32  ;;  %v4843_v32 = vpack.c.bf16 %v2080_v30, %v2079_v9  ;;  %v2193_v30 = vld [vmem:[%s6128_s17] sm:$0xff] }
  0xe1   :  { %2002 = vmatpush1.bf16.msra.mxu1 %v5452_v55  ;;  %v4845_v55 = vpack.c.bf16 %v2098_v31, %v2097_v38  ;;  %v2194_v38 = vld [vmem:[%s6128_s17 + $0x8] sm:$0xff] }
  0xe2   :  { %2003 = vmatprep.subr.bf16.mxu1 %v5457_v33  ;;  %v2081_v33 = vld [vmem:[%s6091_s13 + $0x10] sm:$0xff] }
  0xe5   :  { %2004 = vmatpush1.bf16.msra.mxu1 %v5455_v34  ;;  %v2082_v34 = vld [vmem:[%s6091_s13 + $0x18] sm:$0xff] }
  0xe6   :  { %2005 = vmatprep.subr.bf16.mxu1 %v5460_v35  ;;  %v2099_v35 = vld [vmem:[%s6091_s13 + $0xa0] sm:$0xff] }
  0xe9   :  { %2006 = vmatpush1.bf16.msra.mxu1 %v5458_v36  ;;  %v2100_v36 = vld [vmem:[%s6091_s13 + $0xa8] sm:$0xff] }
  0xea   :  { %2007 = vmatprep.subr.bf16.mxu1 %v5463_v37  ;;  %v4847_v37 = vpack.c.bf16 %v2082_v34, %v2081_v33  ;;  %v2211_v33 = vld [vmem:[%s6128_s17 + $0x90] sm:$0xff]  ;;  %v2212_v34 = vld [vmem:[%s6128_s17 + $0x98] sm:$0xff] }
  0xed   :  { %2008 = vmatpush1.bf16.msra.mxu1 %v5461_v39  ;;  %v4849_v39 = vpack.c.bf16 %v2100_v36, %v2099_v35 }
  0xee   :  { %2009 = vmatprep.subr.bf16.mxu1 %v5466_v40  ;;  %v2083_v40 = vld [vmem:[%s6091_s13 + $0x20] sm:$0xff] }
  0xf1   :  { %2010 = vmatpush1.bf16.msra.mxu1 %v5464_v41  ;;  %v2084_v41 = vld [vmem:[%s6091_s13 + $0x28] sm:$0xff] }
  0xf2   :  { %2011 = vmatprep.subr.bf16.mxu1 %v5469_v42  ;;  %v2101_v42 = vld [vmem:[%s6091_s13 + $0xb0] sm:$0xff] }
  0xf5   :  { %2012 = vmatpush1.bf16.msra.mxu1 %v5467_v43  ;;  %v2102_v43 = vld [vmem:[%s6091_s13 + $0xb8] sm:$0xff] }
  0xf6   :  { %2013 = vmatprep.subr.bf16.mxu1 %v5472_v44  ;;  %v4851_v44 = vpack.c.bf16 %v2084_v41, %v2083_v40  ;;  %v2195_v40 = vld [vmem:[%s6128_s17 + $0x10] sm:$0xff]  ;;  %v2196_v41 = vld [vmem:[%s6128_s17 + $0x18] sm:$0xff] }
  0xf9   :  { %2014 = vmatpush1.bf16.msra.mxu1 %v5470_v45  ;;  %v4853_v45 = vpack.c.bf16 %v2102_v43, %v2101_v42  ;;  %v2213_v42 = vld [vmem:[%s6128_s17 + $0xa0] sm:$0xff]  ;;  %v2214_v43 = vld [vmem:[%s6128_s17 + $0xa8] sm:$0xff] }
  0xfa   :  { %2015 = vmatprep.subr.bf16.mxu1 %v5475_v46  ;;  %v2085_v46 = vld [vmem:[%s6091_s13 + $0x30] sm:$0xff] }
  0xfd   :  { %2016 = vmatpush1.bf16.msra.mxu1 %v5473_v47  ;;  %v2103_v47 = vld [vmem:[%s6091_s13 + $0xc0] sm:$0xff] }
  0xfe   :  { %2017 = vmatprep.subr.bf16.mxu1 %v5478_v48  ;;  %v2104_v48 = vld [vmem:[%s6091_s13 + $0xc8] sm:$0xff] }
 0x101   :  { %2018 = vmatpush1.bf16.msra.mxu1 %v5476_v49 }
 0x102   :  { %2019 = vmatprep.subr.bf16.mxu1 %v5481_v50  ;;  %v4857_v50 = vpack.c.bf16 %v2104_v48, %v2103_v47  ;;  %v2198_v47 = vld [vmem:[%s6128_s17 + $0x28] sm:$0xff]  ;;  %v2215_v48 = vld [vmem:[%s6128_s17 + $0xb0] sm:$0xff] }
 0x105   :  { %2020 = vmatpush1.bf16.msra.mxu1 %v5479_v51  ;;  %v2087_v51 = vld [vmem:[%s6091_s13 + $0x40] sm:$0xff] }
 0x106   :  { %2032 = vmatprep.subr.bf16.mxu1 %v5484_v52  ;;  %v2088_v52 = vld [vmem:[%s6091_s13 + $0x48] sm:$0xff] }
 0x108   :  { %2022 = vmatmul.mubr.bf16.vlgmr.msra.gmra.mrb[4].mxu1 %v5934_v16  ;;  %v5494_v16 = vld [vmem:[%s5771_s6 + $0x688] ss:$16 sps:$4 sm:$0xff]  }
 0x109   :  { %2033 = vmatpush1.bf16.msra.mxu1 %v5482_v53  ;;  %2064 = vmatprep.mubr.bf16.mxu1 %v5952_v25  ;;  %v5497_v25 = vld [vmem:[%s5771_s6 + $0x6a8] ss:$16 sps:$4 sm:$0xff]   ;;  %v2105_v53 = vld [vmem:[%s6091_s13 + $0xd0] sm:$0xff]  ;;  %s5746_s6 = smov 28  }
 0x10a   :  { %2034 = vmatprep.subr.bf16.mxu1 %v5487_v54  ;;  %v2106_v54 = vld [vmem:[%s6091_s13 + $0xd8] sm:$0xff]  ;;  %s4174_s9 = sld [smem:[%s6661_s0 + %s5746_s6]]  }
 0x10d   :  { %2035 = vmatpush1.bf16.msra.mxu1 %v5485_v56  ;;  %v4859_v56 = vpack.c.bf16 %v2088_v52, %v2087_v51  ;;  %v2199_v52 = vld [vmem:[%s6128_s17 + $0x30] sm:$0xff] }
 0x10e   :  { %2036 = vmatprep.subr.bf16.mxu1 %v5490_v57  ;;  %v4861_v57 = vpack.c.bf16 %v2106_v54, %v2105_v53  ;;  %v2200_v53 = vld [vmem:[%s6128_s17 + $0x38] sm:$0xff]  ;;  %v2217_v54 = vld [vmem:[%s6128_s17 + $0xc0] sm:$0xff] }
 0x111   :  { %2037 = vmatpush1.bf16.msra.mxu1 %v5488_v58  ;;  %v2089_v58 = vld [vmem:[%s6091_s13 + $0x50] sm:$0xff] }
 0x112   :  { %2038 = vmatprep.subr.bf16.mxu1 %v5493_v59  ;;  %v2090_v59 = vld [vmem:[%s6091_s13 + $0x58] sm:$0xff] }
 0x115   :  { %2039 = vmatpush1.bf16.msra.mxu1 %v5491_v60  ;;  %v2107_v60 = vld [vmem:[%s6091_s13 + $0xe0] sm:$0xff] }
 0x116   :  { %2040 = vmatprep.subr.bf16.mxu1 %v5496_v61  ;;  %v2108_v61 = vld [vmem:[%s6091_s13 + $0xe8] sm:$0xff] }
 0x119   :  { %2041 = vmatpush1.bf16.msra.mxu1 %v5494_v16  ;;  %v4863_v16 = vpack.c.bf16 %v2090_v59, %v2089_v58  ;;  %v2201_v59 = vld [vmem:[%s6128_s17 + $0x40] sm:$0xff] }
 0x11a   :  { %2042 = vmatprep.subr.bf16.mxu1 %v5499_v62  ;;  %v4865_v62 = vpack.c.bf16 %v2108_v61, %v2107_v60  ;;  %v2202_v60 = vld [vmem:[%s6128_s17 + $0x48] sm:$0xff]  ;;  %v2219_v61 = vld [vmem:[%s6128_s17 + $0xd0] sm:$0xff] }
 0x11b   :  { %v6066_v0 = vpop.f32.mrb[0].mxu1 }
 0x11c   :  { %v6068_v1 = vpop.f32.mrb[1].mxu1 }
 0x11d   :  { %2043 = vmatpush1.bf16.msra.mxu1 %v5497_v25  ;;  %v6071_v3 = vpop.f32.mrb[2].mxu1  ;;  %v2091_v25 = vld [vmem:[%s6091_s13 + $0x60] sm:$0xff] }
 0x11e   :  { %2044 = vmatprep.subr.bf16.mxu1 %v5502_v63  ;;  %v6074_v5 = vpop.f32.mrb[3].mxu1  ;;  %v2092_v63 = vld [vmem:[%s6091_s13 + $0x68] sm:$0xff] }
 0x121   :  { %2045 = vmatpush1.bf16.msra.mxu1 %v5500_v2  ;;  %v2109_v2 = vld [vmem:[%s6091_s13 + $0xf0] sm:$0xff] }
 0x122   :  { %2046 = vmatprep.subr.bf16.mxu1 %v5505_v4  ;;  %v2110_v4 = vld [vmem:[%s6091_s13 + $0xf8] sm:$0xff] }
 0x125   :  { %2047 = vmatpush1.bf16.msra.mxu1 %v5503_v6  ;;  %v4867_v6 = vpack.c.bf16 %v2092_v63, %v2091_v25  ;;  %v2203_v63 = vld [vmem:[%s6128_s17 + $0x50] sm:$0xff] }
 0x126   :  { %2048 = vmatprep.subr.bf16.mxu1 %v5508_v7  ;;  %v4869_v7 = vpack.c.bf16 %v2110_v4, %v2109_v2  ;;  %v2204_v2 = vld [vmem:[%s6128_s17 + $0x58] sm:$0xff]  ;;  %v2221_v4 = vld [vmem:[%s6128_s17 + $0xe0] sm:$0xff] }
 0x129   :  { %2049 = vmatpush1.bf16.msra.mxu1 %v5506_v10  ;;  %v2093_v10 = vld [vmem:[%s6091_s13 + $0x70] sm:$0xff] }
 0x12a   :  { %2050 = vmatprep.subr.bf16.mxu1 %v5511_v11  ;;  %v2094_v11 = vld [vmem:[%s6091_s13 + $0x78] sm:$0xff] }
 0x12d   :  { %2051 = vmatpush1.bf16.msra.mxu1 %v5509_v12  ;;  %v2209_v12 = vld [vmem:[%s6128_s17 + $0x80] sm:$0xff] }
 0x12e   :  { %2052 = vmatprep.subr.bf16.mxu1 %v5514_v13  ;;  %v2210_v13 = vld [vmem:[%s6128_s17 + $0x88] sm:$0xff] }
 0x131   :  { %2053 = vmatpush1.bf16.msra.mxu1 %v5512_v14  ;;  %v4871_v14 = vpack.c.bf16 %v2094_v11, %v2093_v10  ;;  %v2205_v11 = vld [vmem:[%s6128_s17 + $0x60] sm:$0xff] }
 0x132   :  { %2054 = vmatprep.subr.bf16.mxu1 %v5517_v15  ;;  %v4873_v15 = vpack.c.bf16 %v2210_v13, %v2209_v12  ;;  %v2206_v12 = vld [vmem:[%s6128_s17 + $0x68] sm:$0xff]  ;;  %v2223_v13 = vld [vmem:[%s6128_s17 + $0xf0] sm:$0xff] }
 0x135   :  { %2055 = vmatpush1.bf16.msra.mxu1 %v5515_v17  ;;  %v391_v17 = vlaneseq }
 0x136   :  { %2056 = vmatprep.subr.bf16.mxu1 %v5520_v18 }
 0x137   :  { %v6141_v18 = vshrl.u32 %v391_v17, 7 }
 0x139   :  { %2057 = vmatpush1.bf16.msra.mxu1 %v5518_v19  ;;  %v6144_v19 = vsub.s32 0, %v6141_v18 }
 0x13a   :  { %2058 = vmatprep.subr.bf16.mxu1 %v5523_v20  ;;  %v6146_v20 = vld [vmem:[%s4153_s21] sm:$0xf]  ;;  %s6362_s21 = sld [smem:[%s6661_s0 + %s5749_s18]]  }
 0x13d   :  { %2059 = vmatpush1.bf16.msra.mxu1 %v5521_v23  ;;  %v6149_v23 = vsub.s32 1, %v6141_v18 }
 0x13e   :  { %2060 = vmatprep.subr.bf16.mxu1 %v5526_v26  ;;  %v394_v26 = vrot.slane %v6146_v20, %v6144_v19 }
 0x141   :  { %2061 = vmatpush1.bf16.msra.mxu1 %v5524_v27  ;;  %v398_v27 = vrot.slane %v6146_v20, %v6149_v23 }
 0x142   :  { %2062 = vmatprep.subr.bf16.mxu1 %v5529_v8  ;;  %v1766_v8 = vadd.f32 %v6066_v0, %v394_v26 }
 0x143   :  { %v1768_v21 = vadd.f32 %v6068_v1, %v398_v27  ;;  %v1772_v31 = vadd.f32 %v6074_v5, %v398_v27  ;;  %v2208_v27 = vld [vmem:[%s6128_s17 + $0x78] sm:$0xff] }
 0x145   :  { %2063 = vmatpush1.bf16.msra.mxu1 %v5527_v28  ;;  %v1770_v28 = vadd.f32 %v6071_v3, %v394_v26  ;;  %v2207_v26 = vld [vmem:[%s6128_s17 + $0x70] sm:$0xff] }
 0x146   :  { %4842 = vmatprep.subr.bf16.mxu1 %v4841_v29 }
 0x148   :  { %2065 = vmatmul.mubr.bf16.vlgmr.msra.gmra.mrb[4].mxu1 %v6015_v24  ;;  %v2086_v24 = vld [vmem:[%s6091_s13 + $0x38] sm:$0xff]  ;;  %s6343_s13 = sld [smem:[%s6661_s0 + %s5747_s10]]  }
 0x149   :  { %4844 = vmatpush3.bf16.msra.mxu1 %v4843_v32  ;;  %v4855_v49 = vpack.c.bf16 %v2086_v24, %v2085_v46  ;;  %v4881_v46 = vpack.c.bf16 %v2214_v43, %v2213_v42  ;;  %v2197_v24 = vld [vmem:[%s6128_s17 + $0x20] sm:$0xff] }
 0x14a   :  { %4846 = vmatprep.subr.bf16.mxu1 %v4845_v55 }
 0x14d   :  { %4848 = vmatpush3.bf16.msra.mxu1 %v4847_v37  ;;  %v4875_v37 = vpack.c.bf16 %v2194_v38, %v2193_v30 }
 0x14e   :  { %4850 = vmatprep.subr.bf16.mxu1 %v4849_v39  ;;  %v4877_v39 = vpack.c.bf16 %v2212_v34, %v2211_v33  ;;  %v2431_v33 = vld [vmem:[%s6186_s25 + $0x28] sm:$0xff]  ;;  %v2433_v34 = vld [vmem:[%s6186_s25 + $0x38] sm:$0xff] }
 0x151   :  { %4852 = vmatpush3.bf16.msra.mxu1 %v4851_v44  ;;  %v4879_v44 = vpack.c.bf16 %v2196_v41, %v2195_v40  ;;  %v2435_v41 = vld [vmem:[%s6186_s25 + $0x48] sm:$0xff] }
 0x152   :  { %4854 = vmatprep.subr.bf16.mxu1 %v4853_v45 }
 0x155   :  { %4856 = vmatpush3.bf16.msra.mxu1 %v4855_v49  ;;  %v2216_v49 = vld [vmem:[%s6128_s17 + $0xb8] sm:$0xff] }
 0x156   :  { %4858 = vmatprep.subr.bf16.mxu1 %v4857_v50  ;;  %v4883_v50 = vpack.c.bf16 %v2198_v47, %v2197_v24  ;;  %v4885_v51 = vpack.c.bf16 %v2216_v49, %v2215_v48  ;;  %v2439_v24 = vld [vmem:[%s6186_s25 + $0x68] sm:$0xff]  ;;  %v2441_v47 = vld [vmem:[%s6186_s25 + $0x78] sm:$0xff]  ;;  %v5735_v49 = vmov 0.0  }
 0x159   :  { %4860 = vmatpush3.bf16.msra.mxu1 %v4859_v56  ;;  %v2218_v56 = vld [vmem:[%s6128_s17 + $0xc8] sm:$0xff] }
 0x15a   :  { %4862 = vmatprep.subr.bf16.mxu1 %v4861_v57  ;;  %v4887_v57 = vpack.c.bf16 %v2200_v53, %v2199_v52  ;;  %v4889_v58 = vpack.c.bf16 %v2218_v56, %v2217_v54  ;;  %v2440_v52 = vld [vmem:[%s6186_s25 + $0x70] sm:$0xff]  ;;  %v4443_v56 = vld [vmem:[%s4155_s29] ss:$0 sm:$0xff]  ;;  %s5759_s29 = smov 30  }
 0x15b   :  { %s4176_s2 = sld [smem:[%s6661_s0 + %s5759_s29]]  }
 0x15d   :  { %4864 = vmatpush3.bf16.msra.mxu1 %v4863_v16  ;;  %v2220_v16 = vld [vmem:[%s6128_s17 + $0xd8] sm:$0xff] }
 0x15e   :  { %4866 = vmatprep.subr.bf16.mxu1 %v4865_v62  ;;  %v4891_v62 = vpack.c.bf16 %v2202_v60, %v2201_v59  ;;  %v4893_v25 = vpack.c.bf16 %v2220_v16, %v2219_v61  ;;  %v2418_v59 = vld [vmem:[%s4150_s3] sm:$0xff]  ;;  %v2658_v16 = vld [vmem:[%s6229_s11 + $0x8] sm:$0xff] }
 0x161   :  { %4868 = vmatpush3.bf16.msra.mxu1 %v4867_v6  ;;  %v2222_v6 = vld [vmem:[%s6128_s17 + $0xe8] sm:$0xff] }
 0x162   :  { %4870 = vmatprep.subr.bf16.mxu1 %v4869_v7  ;;  %v4895_v7 = vpack.c.bf16 %v2204_v2, %v2203_v63  ;;  %v4897_v10 = vpack.c.bf16 %v2222_v6, %v2221_v4  ;;  %v2657_v2 = vld [vmem:[%s6229_s11] sm:$0xff]  ;;  %v2659_v4 = vld [vmem:[%s6229_s11 + $0x10] sm:$0xff] }
 0x165   :  { %4872 = vmatpush3.bf16.msra.mxu1 %v4871_v14  ;;  %v2224_v14 = vld [vmem:[%s6128_s17 + $0xf8] sm:$0xff]  ;;  %s4161_s17 = sld [smem:[%s6661_s0 + %s5748_s14]]  }
 0x166   :  { %4874 = vmatprep.subr.bf16.mxu1 %v4873_v15  ;;  %v4899_v15 = vpack.c.bf16 %v2206_v12, %v2205_v11  ;;  %v4901_v17 = vpack.c.bf16 %v2224_v14, %v2223_v13  ;;  %v2419_v11 = vld [vmem:[%s4150_s3 + $0x8] sm:$0xff]  ;;  %v2664_v14 = vld [vmem:[%s6229_s11 + $0x38] sm:$0xff]  ;;  %s5760_s3 = smov 23  }
 0x167   :  { %v2662_v13 = vld [vmem:[%s6229_s11 + $0x28] sm:$0xff]  ;;  %s4169_s6 = sld [smem:[%s6661_s0 + %s5760_s3]]  }
 0x19c   :  { %v1894_v22 = vpop.f32.mrb[0].mxu0 }
 0x19d   :  { %v5066_v29 = vadd.f32 %v1894_v22, %v1766_v8  ;;  %v1896_v9 = vpop.f32.mrb[1].mxu0  ;;  %v2427_v8 = vld [vmem:[%s6186_s25 + $0x8] sm:$0xff]  ;;  %v4903_v22 = vpack.c.bf16 %v2208_v27, %v2207_v26  ;;  %v2663_v26 = vld [vmem:[%s6229_s11 + $0x30] sm:$0xff] }
 0x19e   :  { %v5068_v32 = vadd.f32 %v1896_v9, %v1768_v21  ;;  %v1898_v55 = vpop.f32.mrb[2].mxu0  ;;  %v2429_v21 = vld [vmem:[%s6186_s25 + $0x18] sm:$0xff]  ;;  %v401_v9 = vsub.s32 2, %v6141_v18 }
 0x19f   :  { %v5070_v0 = vadd.f32 %v1898_v55, %v1770_v28  ;;  %v1900_v35 = vpop.f32.mrb[3].mxu0  ;;  %v2075_v3 = vmax.f32 %v5066_v29, 0.0  ;;  %v4921_v28 = vpack.c.bf16 %v2429_v21, %v2427_v8  ;;  %v405_v29 = vsub.s32 3, %v6141_v18  ;;  %v2321_v21 = vld [vmem:[%s6238_s15] sm:$0xff] }
 0x1a0   :  { %v2076_v1 = vmax.f32 %v5068_v32, 0.0  ;;  %v5072_v36 = vadd.f32 %v1900_v35, %v1772_v31  ;;  %v402_v38 = vrot.slane %v6146_v20, %v401_v9  ;;  %v2426_v31 = vld [vmem:[%s6186_s25] sm:$0xff]  ;;  %v2428_v32 = vld [vmem:[%s6186_s25 + $0x10] sm:$0xff]  ;;  %v4925_v18 = vpack.c.bf16 %v2433_v34, %v2431_v33  ;;  %v2668_v9 = vld [vmem:[%s6229_s11 + $0x58] sm:$0xff] }
 0x1a1   :  { %v2077_v45 = vmax.f32 %v5070_v0, 0.0  ;;  %v406_v30 = vrot.slane %v6146_v20, %v405_v29  ;;  %v2432_v20 = vld [vmem:[%s6186_s25 + $0x30] sm:$0xff]  ;;  %v2666_v29 = vld [vmem:[%s6229_s11 + $0x48] sm:$0xff]  ;;  %v2324_v33 = vld [vmem:[%s6238_s15 + $0x18] sm:$0xff] }
 0x1a2   :  { %v2078_v5 = vmax.f32 %v5072_v36, 0.0  ;;  %2182 = vmatprep.mubr.f32.mxu1 %v2076_v1  ;;  %v4923_v36 = vpack.c.bf16 %v2428_v32, %v2426_v31  ;;  %v2667_v31 = vld [vmem:[%s6229_s11 + $0x50] sm:$0xff] }
 0x1a3   :  { %2183 = vmatmul.mubr.f32.vlgmr.msra.gmra.mrb[8].mxu1 %v2075_v3 }
 0x1a4   :  { %2187 = vmatprep.mubr.f32.mxu1 %v2078_v5  ;;  %4876 = vmatpush3.bf16.msra.mxu1 %v4875_v37  ;;  %v2437_v5 = vld [vmem:[%s6186_s25 + $0x58] sm:$0xff] }
 0x1a5   :  { %4878 = vmatprep.subr.bf16.mxu1 %v4877_v39  ;;  %v2430_v39 = vld [vmem:[%s6186_s25 + $0x20] sm:$0xff] }
 0x1a6   :  { %v4927_v42 = vpack.c.bf16 %v2432_v20, %v2430_v39  ;;  %v2326_v39 = vld [vmem:[%s6238_s15 + $0x28] sm:$0xff] }
 0x1a7   :  { %2188 = vmatmul.mubr.f32.gmra.mrb[10].mxu1 %v2077_v45  ;;  %v2434_v45 = vld [vmem:[%s6186_s25 + $0x40] sm:$0xff] }
 0x1a8   :  { %4880 = vmatpush3.bf16.msra.mxu1 %v4879_v44  ;;  %v4929_v44 = vpack.c.bf16 %v2437_v5, %v2435_v41  ;;  %v2328_v41 = vld [vmem:[%s6238_s15 + $0x38] sm:$0xff] }
 0x1a9   :  { %4882 = vmatprep.subr.bf16.mxu1 %v4881_v46  ;;  %v2436_v46 = vld [vmem:[%s6186_s25 + $0x50] sm:$0xff] }
 0x1aa   :  { %v4931_v48 = vpack.c.bf16 %v2436_v46, %v2434_v45  ;;  %v4444_v46 = vld [vmem:[%s4157_s27] ss:$0 sm:$0xff]  ;;  %s5751_s27 = smov 13  }
 0x1ab   :  { %s4159_s30 = sld [smem:[%s6661_s0 + %s5751_s27]]  }
 0x1ac   :  { %4884 = vmatpush3.bf16.msra.mxu1 %v4883_v50  ;;  %v4933_v50 = vpack.c.bf16 %v2441_v47, %v2439_v24 }
 0x1ad   :  { %4886 = vmatprep.subr.bf16.mxu1 %v4885_v51  ;;  %v2438_v51 = vld [vmem:[%s6186_s25 + $0x60] sm:$0xff]  ;;  %s5758_s25 = smov 3  }
 0x1ae   :  { %v4935_v53 = vpack.c.bf16 %v2440_v52, %v2438_v51  ;;  %s4149_s28 = sld [smem:[%s6661_s0 + %s5758_s25]]  }
 0x1b0   :  { %4888 = vmatpush3.bf16.msra.mxu1 %v4887_v57 }
 0x1b1   :  { %4890 = vmatprep.subr.bf16.mxu1 %v4889_v58 }
 0x1b4   :  { %4892 = vmatpush3.bf16.msra.mxu1 %v4891_v62  ;;  %v2660_v62 = vld [vmem:[%s6229_s11 + $0x18] sm:$0xff] }
 0x1b5   :  { %4894 = vmatprep.subr.bf16.mxu1 %v4893_v25  ;;  %v4969_v63 = vpack.c.bf16 %v2660_v62, %v2658_v16  ;;  %v2422_v16 = vld [vmem:[%s4151_s1] sm:$0xff] }
 0x1b6   :  { %v2315_v62 = vld [vmem:[%s4148_s5] sm:$0xff] }
 0x1b8   :  { %4896 = vmatpush3.bf16.msra.mxu1 %v4895_v7 }
 0x1b9   :  { %4898 = vmatprep.subr.bf16.mxu1 %v4897_v10  ;;  %v4971_v10 = vpack.c.bf16 %v2659_v4, %v2657_v2  ;;  %v2423_v4 = vld [vmem:[%s4151_s1 + $0x8] sm:$0xff]  ;;  %s5752_s1 = smov 31  }
 0x1ba   :  { %s4177_s4 = sld [smem:[%s6661_s0 + %s5752_s1]]  }
 0x1bc   :  { %4900 = vmatpush3.bf16.msra.mxu1 %v4899_v15  ;;  %v4973_v15 = vpack.c.bf16 %v2664_v14, %v2662_v13  ;;  %v2559_v14 = vld [vmem:[%s6279_s19 + $0x90] sm:$0xff] }
 0x1bd   :  { %4902 = vmatprep.subr.bf16.mxu1 %v4901_v17  ;;  %v2661_v17 = vld [vmem:[%s6229_s11 + $0x20] sm:$0xff] }
 0x1be   :  { %v4975_v8 = vpack.c.bf16 %v2663_v26, %v2661_v17 }
 0x1c0   :  { %4904 = vmatpush3.bf16.msra.mxu1 %v4903_v22  ;;  %v2322_v22 = vld [vmem:[%s6238_s15 + $0x8] sm:$0xff] }
 0x1c1   :  { %4922 = vmatprep.subr.bf16.mxu1 %v4921_v28  ;;  %v4905_v28 = vpack.c.bf16 %v2322_v22, %v2321_v21  ;;  %v2543_v21 = vld [vmem:[%s6279_s19 + $0x10] sm:$0xff]  ;;  %v2561_v22 = vld [vmem:[%s6279_s19 + $0xa0] sm:$0xff] }
 0x1c3   :  { %4906 = vmatprep.subr.bf16.mxu0 %v4905_v28 }
 0x1c4   :  { %4908 = vmatpush3.bf16.msra.mxu0 %v4905_v28  ;;  %v2562_v28 = vld [vmem:[%s6279_s19 + $0xa8] sm:$0xff] }
 0x21b   :  { %v2066_v55 = vpop.f32.mrb[4].mxu1 }
 0x21c   :  { %v2068_v0 = vpop.f32.mrb[5].mxu1  ;;  %v5073_v37 = vadd.f32 %v2066_v55, %v402_v38  ;;  %v2323_v55 = vld [vmem:[%s6238_s15 + $0x10] sm:$0xff] }
 0x21d   :  { %v5074_v35 = vadd.f32 %v2068_v0, %v406_v30  ;;  %v2070_v1 = vpop.f32.mrb[6].mxu1  ;;  %v4909_v34 = vpack.c.bf16 %v2324_v33, %v2323_v55  ;;  %v2670_v0 = vld [vmem:[%s6229_s11 + $0x68] sm:$0xff]  ;;  %v2547_v33 = vld [vmem:[%s6279_s19 + $0x30] sm:$0xff] }
 0x21e   :  { %v2072_v3 = vpop.f32.mrb[7].mxu1  ;;  %v5075_v43 = vadd.f32 %v2070_v1, %v402_v38  ;;  %v2665_v38 = vld [vmem:[%s6229_s11 + $0x40] sm:$0xff] }
 0x21f   :  { %v5076_v40 = vadd.f32 %v2072_v3, %v406_v30  ;;  %2296 = vmatprep.mubr.f32.mxu1 %v5074_v35  ;;  %v4977_v30 = vpack.c.bf16 %v2668_v9, %v2666_v29  ;;  %v4979_v32 = vpack.c.bf16 %v2667_v31, %v2665_v38  ;;  %v2672_v35 = vld [vmem:[%s6229_s11 + $0x78] sm:$0xff]  ;;  %4910 = vmatprep.subr.bf16.mxu0 %v4909_v34  ;;  %v2546_v38 = vld [vmem:[%s6279_s19 + $0x28] sm:$0xff] }
 0x220   :  { %2297 = vmatmul.mubr.f32.vlgmr.msra.gmra.mrb[12].mxu1 %v5073_v37  ;;  %v4981_v1 = vpack.c.bf16 %v2672_v35, %v2670_v0  ;;  %v2671_v37 = vld [vmem:[%s6229_s11 + $0x70] sm:$0xff]  ;;  %4912 = vmatpush3.bf16.msra.mxu0 %v4909_v34  ;;  %v4945_v9 = vpack.c.bf16 %v2562_v28, %v2561_v22  ;;  %v2564_v31 = vld [vmem:[%s6279_s19 + $0xb8] sm:$0xff]  ;;  %v2565_v0 = vld [vmem:[%s6279_s19 + $0xc0] sm:$0xff] }
 0x221   :  { %2301 = vmatprep.mubr.f32.mxu1 %v5076_v40  ;;  %4924 = vmatpush1.bf16.msra.mxu1 %v4923_v36  ;;  %v2669_v36 = vld [vmem:[%s6229_s11 + $0x60] sm:$0xff]  ;;  %v2327_v40 = vld [vmem:[%s6238_s15 + $0x30] sm:$0xff]  ;;  %v2548_v34 = vld [vmem:[%s6279_s19 + $0x38] sm:$0xff]  ;;  %s5762_s11 = smov 32  }
 0x222   :  { %4926 = vmatprep.subr.bf16.mxu1 %v4925_v18  ;;  %v4983_v3 = vpack.c.bf16 %v2671_v37, %v2669_v36  ;;  %v2325_v18 = vld [vmem:[%s6238_s15 + $0x20] sm:$0xff]  ;;  %v4917_v5 = vpack.c.bf16 %v2328_v41, %v2327_v40  ;;  %v2566_v35 = vld [vmem:[%s6279_s19 + $0xc8] sm:$0xff]  ;;  %v2551_v41 = vld [vmem:[%s6279_s19 + $0x50] sm:$0xff]  ;;  %s4178_s14 = sld [smem:[%s6661_s0 + %s5762_s11]]  }
 0x223   :  { %v4913_v20 = vpack.c.bf16 %v2326_v39, %v2325_v18  ;;  %v4953_v36 = vpack.c.bf16 %v2566_v35, %v2565_v0  ;;  %v2549_v37 = vld [vmem:[%s6279_s19 + $0x40] sm:$0xff]  ;;  %v2567_v18 = vld [vmem:[%s6279_s19 + $0xd0] sm:$0xff]  ;;  %v2568_v39 = vld [vmem:[%s6279_s19 + $0xd8] sm:$0xff] }
 0x224   :  { %2302 = vmatmul.mubr.f32.gmra.mrb[14].mxu1 %v5075_v43  ;;  %v2558_v43 = vld [vmem:[%s6279_s19 + $0x88] sm:$0xff]  ;;  %v4957_v40 = vpack.c.bf16 %v2568_v39, %v2567_v18 }
 0x225   :  { %4928 = vmatpush1.bf16.msra.mxu1 %v4927_v42  ;;  %2524 = vmatprep.mubr.f32.mxu1 %v5735_v49  ;;  %v2557_v42 = vld [vmem:[%s6279_s19 + $0x80] sm:$0xff] }
 0x226   :  { %4930 = vmatprep.subr.bf16.mxu1 %v4929_v44  ;;  %4914 = vmatprep.subr.bf16.mxu0 %v4913_v20  ;;  %v4937_v44 = vpack.c.bf16 %v2558_v43, %v2557_v42  ;;  %v2569_v42 = vld [vmem:[%s6279_s19 + $0xe0] sm:$0xff]  ;;  %v2570_v43 = vld [vmem:[%s6279_s19 + $0xe8] sm:$0xff] }
 0x227   :  { %4916 = vmatpush3.bf16.msra.mxu0 %v4913_v20 }
 0x228   :  { %4918 = vmatprep.subr.bf16.mxu0 %v4917_v5 }
 0x229   :  { %4932 = vmatpush1.bf16.msra.mxu1 %v4931_v48 }
 0x22a   :  { %4934 = vmatprep.subr.bf16.mxu1 %v4933_v50 }
 0x22b   :  { %4920 = vmatpush3.bf16.msra.mxu0 %v4917_v5  ;;  %v2552_v5 = vld [vmem:[%s6279_s19 + $0x58] sm:$0xff] }
 0x22c   :  { %4938 = vmatprep.subr.bf16.mxu0 %v4937_v44  ;;  %v4959_v44 = vpack.c.bf16 %v2552_v5, %v2551_v41 }
 0x22d   :  { %4936 = vmatpush1.bf16.msra.mxu1 %v4935_v53 }
 0x22e   :  { %4970 = vmatprep.subr.bf16.mxu1 %v4969_v63 }
 0x276   :  { %v4625_v54 = vpop.f32.mrb[8].mxu1 }
 0x277   :  { %v4626_v57 = vpop.f32.mrb[9].mxu1 }
 0x278   :  { %v4627_v58 = vadd.f32 %v4626_v57, %v4625_v54 }
 0x27a   :  { %v6231_v60 = vadd.f32 %v4627_v58, %v4443_v56  ;;  %v4628_v61 = vpop.f32.mrb[10].mxu1 }
 0x27b   :  { %v4629_v25 = vpop.f32.mrb[11].mxu1 }
 0x27c   :  { %v2420_v6 = vmul.f32 %v2418_v59, %v6231_v60  ;;  %4109 = vst.msk [vmem:[%s6224_s7] sm:$0xff] %vm2336_vm0, %v6231_v60  ;;  %v4630_v7 = vadd.f32 %v4629_v25, %v4628_v61 }
 0x27e   :  { %v6246_v12 = vadd.f32 %v4630_v7, %v4443_v56  ;;  %4448 = vmatmul.mubr.msk.f32.vlgmr.msra.gmra.mrb[16].mxu1 %vm2336_vm0, %v2420_v6  ;;  %v2316_v6 = vld [vmem:[%s4148_s5 + $0x8] sm:$0xff]  ;;  %s5753_s5 = smov 17  }
 0x27f   :  { %2530 = vmatprep.mubr.f32.mxu1 %v5735_v49  ;;  %4972 = vmatpush1.bf16.msra.mxu1 %v4971_v10  ;;  %v2541_v10 = vld [vmem:[%s6279_s19] sm:$0xff]  ;;  %s4163_s8 = sld [smem:[%s6661_s0 + %s5753_s5]]  }
 0x280   :  { %v2421_v27 = vmul.f32 %v2419_v11, %v6246_v12  ;;  %4110 = vst.msk [vmem:[%s6224_s7 + $0x8] sm:$0xff] %vm2336_vm0, %v6246_v12  ;;  %4974 = vmatprep.subr.bf16.mxu1 %v4973_v15  ;;  %v2542_v11 = vld [vmem:[%s6279_s19 + $0x8] sm:$0xff]  ;;  %v2560_v15 = vld [vmem:[%s6279_s19 + $0x98] sm:$0xff]  ;;  %s5761_s7 = smov 26  }
 0x281   :  { %s4172_s10 = sld [smem:[%s6661_s0 + %s5761_s7]]  }
 0x282   :  { %4449 = vmatmul.mubr.msk.f32.gmra.mrb[18].mxu1 %vm2336_vm0, %v2421_v27 }
 0x283   :  { %4976 = vmatpush1.bf16.msra.mxu1 %v4975_v8  ;;  %2755 = vmatprep.mubr.f32.mxu1 %v5735_v49  ;;  %v4941_v8 = vpack.c.bf16 %v2560_v15, %v2559_v14 }
 0x284   :  { %4978 = vmatprep.subr.bf16.mxu1 %v4977_v30  ;;  %v2545_v30 = vld [vmem:[%s6279_s19 + $0x20] sm:$0xff] }
 0x287   :  { %4980 = vmatpush1.bf16.msra.mxu1 %v4979_v32  ;;  %v4947_v32 = vpack.c.bf16 %v2546_v38, %v2545_v30  ;;  %v2779_v30 = vld [vmem:[%s6343_s13 + $0x38] sm:$0xff] }
 0x288   :  { %4982 = vmatprep.subr.bf16.mxu1 %v4981_v1  ;;  %v4951_v1 = vpack.c.bf16 %v2548_v34, %v2547_v33  ;;  %v2796_v33 = vld [vmem:[%s6343_s13 + $0xc0] sm:$0xff]  ;;  %v2797_v34 = vld [vmem:[%s6343_s13 + $0xc8] sm:$0xff] }
 0x289   :  { %v5001_v18 = vpack.c.bf16 %v2797_v34, %v2796_v33  ;;  %v5575_v33 = vld [vmem:[%s6286_s23 + $0xf0] ss:$8 sps:$4 sm:$0xff]   ;;  %v5580_v34 = vld [vmem:[%s6286_s23 + $0x104] ss:$8 sps:$4 sm:$0xff]  }
 0x28b   :  { %4984 = vmatpush1.bf16.msra.mxu1 %v4983_v3  ;;  %v2550_v3 = vld [vmem:[%s6279_s19 + $0x48] sm:$0xff] }
 0x28c   :  { %v4955_v20 = vpack.c.bf16 %v2550_v3, %v2549_v37  ;;  %v6376_v37 = vld [vmem:[%s6362_s21] sm:$0xff] }
 0x28d   :  { %v6379_v3 = vld [vmem:[%s6362_s21 + $0x20] sm:$0xff] }
 0x2f3   :  { %v4663_v45 = vpop.f32.mrb[12].mxu1 }
 0x2f4   :  { %v4664_v24 = vpop.f32.mrb[13].mxu1 }
 0x2f5   :  { %v4665_v47 = vadd.f32 %v4664_v24, %v4663_v45  ;;  %v4961_v45 = vpack.c.bf16 %v2570_v43, %v2569_v42  ;;  %v2554_v24 = vld [vmem:[%s6279_s19 + $0x68] sm:$0xff]  ;;  %v5533_v42 = vld [vmem:[%s6286_s23 + $0x10] ss:$8 sps:$4 sm:$0xff]   ;;  %v4455_v43 = vcombine.high %v6376_v37, %v6379_v3 }
 0x2f7   :  { %v2299_v48 = vadd.f32 %v4665_v47, %v4444_v46  ;;  %v4666_v50 = vpop.f32.mrb[14].mxu1  ;;  %v2571_v47 = vld [vmem:[%s6279_s19 + $0xf0] sm:$0xff] }
 0x2f8   :  { %v4667_v51 = vpop.f32.mrb[15].mxu1 }
 0x2f9   :  { %v2307_v52 = vmax.f32 %v2299_v48, 0.0  ;;  %v4668_v53 = vadd.f32 %v4667_v51, %v4666_v50  ;;  %v2572_v48 = vld [vmem:[%s6279_s19 + $0xf8] sm:$0xff] }
 0x2fa   :  { %v4965_v51 = vpack.c.bf16 %v2572_v48, %v2571_v47  ;;  %v2782_v48 = vld [vmem:[%s6343_s13 + $0x50] sm:$0xff] }
 0x2fb   :  { %v2309_v54 = vmul.f32 0.5, %v2307_v52  ;;  %v2304_v56 = vadd.f32 %v4668_v53, %v4444_v46  ;;  %v2553_v46 = vld [vmem:[%s6279_s19 + $0x60] sm:$0xff]  ;;  %v2555_v52 = vld [vmem:[%s6279_s19 + $0x70] sm:$0xff]  ;;  %v2556_v53 = vld [vmem:[%s6279_s19 + $0x78] sm:$0xff] }
 0x2fc   :  { %v4963_v50 = vpack.c.bf16 %v2554_v24, %v2553_v46  ;;  %v5538_v24 = vld [vmem:[%s6286_s23 + $0x24] ss:$8 sps:$4 sm:$0xff]  }
 0x2fd   :  { %v2311_v57 = vmul.f32 1.442695, %v2309_v54  ;;  %v2308_v58 = vmax.f32 %v2304_v56, 0.0  ;;  %v4967_v54 = vpack.c.bf16 %v2556_v53, %v2555_v52  ;;  %v5532_v56 = vld [vmem:[%s6286_s23 + $0x4] ss:$8 sps:$4 sm:$0xff]  }
 0x2fe   :  { %v5536_v52 = vld [vmem:[%s6286_s23 + $0x20] ss:$8 sps:$4 sm:$0xff]  }
 0x2ff   :  { %5722 = vpow2.f32 %v2311_v57  ;;  %v2310_v59 = vmul.f32 0.5, %v2308_v58  ;;  %v2788_v57 = vld [vmem:[%s6343_s13 + $0x80] sm:$0xff]  ;;  %v2789_v58 = vld [vmem:[%s6343_s13 + $0x88] sm:$0xff] }
 0x300   :  { %v2800_v53 = vld [vmem:[%s6343_s13 + $0xe0] sm:$0xff] }
 0x301   :  { %v2313_v61 = vmul.f32 1.442695, %v2310_v59  ;;  %v4985_v59 = vpack.c.bf16 %v2789_v58, %v2788_v57  ;;  %v2784_v58 = vld [vmem:[%s6343_s13 + $0x60] sm:$0xff] }
 0x303   :  { %5724 = vpow2.f32 %v2313_v61  ;;  %v2772_v61 = vld [vmem:[%s6343_s13] sm:$0xff]  ;;  %4986 = vmatprep.subr.bf16.mxu1 %v4985_v59  ;;  %v2785_v59 = vld [vmem:[%s6343_s13 + $0x68] sm:$0xff] }
 0x309   :  { %v5723_v25 = vpop.eup %5722 }
 0x30a   :  { %4111 = vst.msk [vmem:[%s4174_s9] sm:$0xff] %vm2336_vm0, %v5723_v25  ;;  %v2424_v63 = vmul.f32 %v5723_v25, %v2422_v16  ;;  %v2317_v2 = vmul.f32 %v5723_v25, %v2315_v62  ;;  %v2773_v16 = vld [vmem:[%s6343_s13 + $0x8] sm:$0xff]  ;;  %v2790_v25 = vld [vmem:[%s6343_s13 + $0x90] sm:$0xff] }
 0x30b   :  { %v4987_v62 = vpack.c.bf16 %v2773_v16, %v2772_v61  ;;  %v5011_v61 = vpack.c.bf16 %v2785_v59, %v2784_v58  ;;  %v5539_v16 = vld [vmem:[%s6286_s23 + $0x30] ss:$8 sps:$4 sm:$0xff]   ;;  %v5616_v58 = vld [vmem:[%s6286_s23 + $0x1c4] ss:$8 sps:$4 sm:$0xff]   ;;  %v5614_v59 = vld [vmem:[%s6286_s23 + $0x1c0] ss:$8 sps:$4 sm:$0xff]  }
 0x30c   :  { %4451 = vmatmul.mubr.msk.f32.vlgmr.msra.gmra.mrb[20].mxu1 %vm2336_vm0, %v2424_v63  ;;  %v2319_v7 = vadd.f32 %v2317_v2, %v6231_v60  ;;  %v4939_v60 = vpack.c.bf16 %v2542_v11, %v2541_v10  ;;  %v2791_v63 = vld [vmem:[%s6343_s13 + $0x98] sm:$0xff]  ;;  %v2792_v11 = vld [vmem:[%s6343_s13 + $0xa0] sm:$0xff] }
 0x30d   :  { %v5725_v13 = vpop.eup %5724  ;;  %2761 = vmatprep.mubr.f32.mxu1 %v5735_v49  ;;  %v2544_v49 = vld [vmem:[%s6279_s19 + $0x18] sm:$0xff]  ;;  %4988 = vmatpush3.bf16.msra.mxu1 %v4987_v62  ;;  %v4989_v2 = vpack.c.bf16 %v2791_v63, %v2790_v25  ;;  %v2802_v62 = vld [vmem:[%s6343_s13 + $0xf0] sm:$0xff]  ;;  %v5544_v63 = vld [vmem:[%s6286_s23 + $0x44] ss:$8 sps:$4 sm:$0xff]  }
 0x30e   :  { %4112 = vst.msk [vmem:[%s4174_s9 + $0x8] sm:$0xff] %vm2336_vm0, %v5725_v13  ;;  %4819 = vmatprep.mubr.msk.f32.mxu0 %vm2336_vm0, %v2319_v7  ;;  %v2425_v17 = vmul.f32 %v5725_v13, %v2423_v4  ;;  %v2318_v26 = vmul.f32 %v5725_v13, %v2316_v6  ;;  %v4943_v29 = vpack.c.bf16 %v2544_v49, %v2543_v21  ;;  %v2774_v4 = vld [vmem:[%s6343_s13 + $0x10] sm:$0xff]  ;;  %v2775_v6 = vld [vmem:[%s6343_s13 + $0x18] sm:$0xff]  ;;  %v2442_v7 = vld [vmem:[%s4161_s17] sm:$0x3]  ;;  %s5754_s9 = smov 29  }
 0x30f   :  { %v4991_v10 = vpack.c.bf16 %v2775_v6, %v2774_v4  ;;  %4990 = vmatprep.subr.bf16.mxu1 %v4989_v2  ;;  %v2793_v13 = vld [vmem:[%s6343_s13 + $0xa8] sm:$0xff]  ;;  %v2447_v14 = vrot.slane %v2442_v7, %v6144_v19  ;;  %v2794_v21 = vld [vmem:[%s6343_s13 + $0xb0] sm:$0xff]  ;;  %v2795_v49 = vld [vmem:[%s6343_s13 + $0xb8] sm:$0xff]  ;;  %s4175_s12 = sld [smem:[%s6661_s0 + %s5754_s9]]   ;;  %s5756_s17 = smov 24  }
 0x310   :  { %4452 = vmatmul.mubr.msk.f32.gmra.mrb[22].mxu1 %vm2336_vm0, %v2425_v17  ;;  %v2320_v27 = vadd.f32 %v2318_v26, %v6246_v12  ;;  %v2563_v12 = vld [vmem:[%s6279_s19 + $0xb0] sm:$0xff]  ;;  %v4993_v15 = vpack.c.bf16 %v2793_v13, %v2792_v11  ;;  %v2776_v17 = vld [vmem:[%s6343_s13 + $0x20] sm:$0xff]  ;;  %v2777_v26 = vld [vmem:[%s6343_s13 + $0x28] sm:$0xff]  ;;  %s6599_s20 = sld [smem:[%s6661_s0 + %s5756_s17]]  }
 0x311   :  { %v4949_v55 = vpack.c.bf16 %v2564_v31, %v2563_v12  ;;  %4992 = vmatpush3.bf16.msra.mxu1 %v4991_v10  ;;  %v2803_v25 = vld [vmem:[%s6343_s13 + $0xf8] sm:$0xff]  ;;  %v2786_v4 = vld [vmem:[%s6343_s13 + $0x70] sm:$0xff]  ;;  %v5542_v10 = vld [vmem:[%s6286_s23 + $0x40] ss:$8 sps:$4 sm:$0xff]  }
 0x312   :  { %4820 = vmatmul.mubr.msk.f32.vlgmr.msra.gmra.mrb[4].mxu0 %vm2336_vm0, %v2320_v27  ;;  %v4995_v27 = vpack.c.bf16 %v2777_v26, %v2776_v17  ;;  %4994 = vmatprep.subr.bf16.mxu1 %v4993_v15  ;;  %v5013_v2 = vpack.c.bf16 %v2803_v25, %v2802_v62  ;;  %v2787_v6 = vld [vmem:[%s6343_s13 + $0x78] sm:$0xff]  ;;  %v5548_v15 = vld [vmem:[%s6286_s23 + $0x60] ss:$8 sps:$4 sm:$0xff]   ;;  %v5622_v62 = vld [vmem:[%s6286_s23 + $0x1e4] ss:$8 sps:$4 sm:$0xff]  }
 0x313   :  { %4940 = vmatpush3.bf16.msra.mxu0 %v4939_v60  ;;  %v2451_v60 = vrot.slane %v2442_v7, %v6149_v23  ;;  %v5015_v7 = vpack.c.bf16 %v2787_v6, %v2786_v4  ;;  %v5547_v11 = vld [vmem:[%s6286_s23 + $0x54] ss:$8 sps:$4 sm:$0xff]   ;;  %v5545_v13 = vld [vmem:[%s6286_s23 + $0x50] ss:$8 sps:$4 sm:$0xff]   ;;  %v5620_v25 = vld [vmem:[%s6286_s23 + $0x1e0] ss:$8 sps:$4 sm:$0xff]  }
 0x314   :  { %4942 = vmatprep.subr.bf16.mxu0 %v4941_v8  ;;  %v5553_v17 = vld [vmem:[%s6286_s23 + $0x74] ss:$8 sps:$4 sm:$0xff]   ;;  %v5551_v26 = vld [vmem:[%s6286_s23 + $0x70] ss:$8 sps:$4 sm:$0xff]   ;;  %v5628_v4 = vld [vmem:[%s6286_s23 + $0x204] ss:$8 sps:$4 sm:$0xff]  }
 0x315   :  { %4996 = vmatpush3.bf16.msra.mxu1 %v4995_v27  ;;  %v5554_v27 = vld [vmem:[%s6286_s23 + $0x80] ss:$8 sps:$4 sm:$0xff]   ;;  %v6473_v6 = vld [vmem:[%s6362_s21 + $0x10] sm:$0xff] }
 0x317   :  { %4944 = vmatpush3.bf16.msra.mxu0 %v4943_v29  ;;  %v4997_v29 = vpack.c.bf16 %v2795_v49, %v2794_v21  ;;  %v5557_v21 = vld [vmem:[%s6286_s23 + $0x90] ss:$8 sps:$4 sm:$0xff]   ;;  %v5562_v49 = vld [vmem:[%s6286_s23 + $0xa4] ss:$8 sps:$4 sm:$0xff]  }
 0x318   :  { %4946 = vmatprep.subr.bf16.mxu0 %v4945_v9  ;;  %v2778_v9 = vld [vmem:[%s6343_s13 + $0x30] sm:$0xff] }
 0x319   :  { %v4999_v12 = vpack.c.bf16 %v2779_v30, %v2778_v9  ;;  %4998 = vmatprep.subr.bf16.mxu1 %v4997_v29  ;;  %v5563_v29 = vld [vmem:[%s6286_s23 + $0xb0] ss:$8 sps:$4 sm:$0xff]   ;;  %v5568_v9 = vld [vmem:[%s6286_s23 + $0xc4] ss:$8 sps:$4 sm:$0xff]   ;;  %v5566_v30 = vld [vmem:[%s6286_s23 + $0xc0] ss:$8 sps:$4 sm:$0xff]  }
 0x31b   :  { %4948 = vmatpush3.bf16.msra.mxu0 %v4947_v32  ;;  %5000 = vmatpush3.bf16.msra.mxu1 %v4999_v12  ;;  %v5569_v12 = vld [vmem:[%s6286_s23 + $0xd0] ss:$8 sps:$4 sm:$0xff]  }
 0x31c   :  { %4950 = vmatprep.subr.bf16.mxu0 %v4949_v55  ;;  %v5530_v55 = vld [vmem:[%s6286_s23] ss:$8 sps:$4 sm:$0xff]   ;;  %5002 = vmatprep.subr.bf16.mxu1 %v5001_v18 }
 0x31f   :  { %4952 = vmatpush3.bf16.msra.mxu0 %v4951_v1 }
 0x320   :  { %4954 = vmatprep.subr.bf16.mxu0 %v4953_v36  ;;  %v5535_v36 = vld [vmem:[%s6286_s23 + $0x14] ss:$8 sps:$4 sm:$0xff]  }
 0x323   :  { %4956 = vmatpush3.bf16.msra.mxu0 %v4955_v20  ;;  %v2780_v20 = vld [vmem:[%s6343_s13 + $0x40] sm:$0xff] }
 0x324   :  { %4958 = vmatprep.subr.bf16.mxu0 %v4957_v40  ;;  %v2781_v40 = vld [vmem:[%s6343_s13 + $0x48] sm:$0xff] }
 0x325   :  { %v5003_v41 = vpack.c.bf16 %v2781_v40, %v2780_v20  ;;  %v5581_v20 = vld [vmem:[%s6286_s23 + $0x110] ss:$8 sps:$4 sm:$0xff]   ;;  %v5586_v40 = vld [vmem:[%s6286_s23 + $0x124] ss:$8 sps:$4 sm:$0xff]  }
 0x327   :  { %4960 = vmatpush3.bf16.msra.mxu0 %v4959_v44  ;;  %v2798_v44 = vld [vmem:[%s6343_s13 + $0xd0] sm:$0xff]  ;;  %5004 = vmatpush3.bf16.msra.mxu1 %v5003_v41 }
 0x328   :  { %4962 = vmatprep.subr.bf16.mxu0 %v4961_v45  ;;  %v2799_v45 = vld [vmem:[%s6343_s13 + $0xd8] sm:$0xff] }
 0x329   :  { %v5005_v47 = vpack.c.bf16 %v2799_v45, %v2798_v44  ;;  %v5587_v41 = vld [vmem:[%s6286_s23 + $0x130] ss:$8 sps:$4 sm:$0xff]   ;;  %v5598_v45 = vld [vmem:[%s6286_s23 + $0x164] ss:$8 sps:$4 sm:$0xff]  }
 0x32a   :  { %v5593_v44 = vld [vmem:[%s6286_s23 + $0x150] ss:$8 sps:$4 sm:$0xff]  }
 0x32b   :  { %4964 = vmatpush3.bf16.msra.mxu0 %v4963_v50  ;;  %v2783_v50 = vld [vmem:[%s6343_s13 + $0x58] sm:$0xff]  ;;  %5006 = vmatprep.subr.bf16.mxu1 %v5005_v47 }
 0x32c   :  { %4966 = vmatprep.subr.bf16.mxu0 %v4965_v51  ;;  %v5007_v51 = vpack.c.bf16 %v2783_v50, %v2782_v48  ;;  %v5599_v47 = vld [vmem:[%s6286_s23 + $0x170] ss:$8 sps:$4 sm:$0xff]   ;;  %v5604_v48 = vld [vmem:[%s6286_s23 + $0x184] ss:$8 sps:$4 sm:$0xff]   ;;  %v5602_v50 = vld [vmem:[%s6286_s23 + $0x180] ss:$8 sps:$4 sm:$0xff]  }
 0x32e   :  { %5008 = vmatpush3.bf16.msra.mxu1 %v5007_v51  ;;  %v5607_v51 = vld [vmem:[%s6286_s23 + $0x194] ss:$8 sps:$4 sm:$0xff]  }
 0x32f   :  { %4968 = vmatpush3.bf16.msra.mxu0 %v4967_v54  ;;  %v2801_v54 = vld [vmem:[%s6343_s13 + $0xe8] sm:$0xff]  ;;  %s5755_s13 = smov 25  }
 0x330   :  { %3728 = vmatprep.subr.bf16.mxu0 %v5532_v56  ;;  %v5541_v56 = vld [vmem:[%s6286_s23 + $0x34] ss:$8 sps:$4 sm:$0xff]   ;;  %v5009_v57 = vpack.c.bf16 %v2801_v54, %v2800_v53  ;;  %v5610_v53 = vld [vmem:[%s6286_s23 + $0x1a4] ss:$8 sps:$4 sm:$0xff]   ;;  %v5608_v54 = vld [vmem:[%s6286_s23 + $0x1a0] ss:$8 sps:$4 sm:$0xff]   ;;  %s6576_s16 = sld [smem:[%s6661_s0 + %s5755_s13]]  }
 0x332   :  { %5010 = vmatprep.subr.bf16.mxu1 %v5009_v57  ;;  %v5611_v57 = vld [vmem:[%s6286_s23 + $0x1b0] ss:$8 sps:$4 sm:$0xff]  }
 0x333   :  { %5012 = vmatpush3.bf16.msra.mxu1 %v5011_v61  ;;  %v5619_v61 = vld [vmem:[%s6286_s23 + $0x1d4] ss:$8 sps:$4 sm:$0xff]  }
 0x334   :  { %5014 = vmatprep.subr.bf16.mxu1 %v5013_v2  ;;  %v5623_v2 = vld [vmem:[%s6286_s23 + $0x1f0] ss:$8 sps:$4 sm:$0xff]  }
 0x337   :  { %5016 = vmatpush3.bf16.msra.mxu1 %v5015_v7  ;;  %v6476_v7 = vld [vmem:[%s6362_s21 + $0x30] sm:$0xff] }
 0x351   :  { %v2526_v8 = vpop.f32.mrb[16].mxu1 }
 0x352   :  { %v2527_v22 = vadd.f32 %v2526_v8, %v2447_v14  ;;  %v2528_v28 = vpop.f32.mrb[17].mxu1  ;;  %v5559_v8 = vld [vmem:[%s6286_s23 + $0x94] ss:$8 sps:$4 sm:$0xff]  }
 0x353   :  { %v2529_v38 = vadd.f32 %v2528_v28, %v2451_v60  ;;  %v5565_v28 = vld [vmem:[%s6286_s23 + $0xb4] ss:$8 sps:$4 sm:$0xff]  }
 0x354   :  { %v2537_v0 = vmax.f32 %v2527_v22, 0.0  ;;  %v5560_v22 = vld [vmem:[%s6286_s23 + $0xa0] ss:$8 sps:$4 sm:$0xff]  }
 0x355   :  { %v2538_v31 = vmax.f32 %v2529_v38, 0.0  ;;  %v2532_v32 = vpop.f32.mrb[18].mxu1  ;;  %v5571_v38 = vld [vmem:[%s6286_s23 + $0xd4] ss:$8 sps:$4 sm:$0xff]  }
 0x356   :  { %v2533_v35 = vadd.f32 %v2532_v32, %v2447_v14  ;;  %v2534_v1 = vpop.f32.mrb[19].mxu1  ;;  %v5550_v14 = vld [vmem:[%s6286_s23 + $0x64] ss:$8 sps:$4 sm:$0xff]   ;;  %v5572_v32 = vld [vmem:[%s6286_s23 + $0xe0] ss:$8 sps:$4 sm:$0xff]  }
 0x357   :  { %v2535_v39 = vadd.f32 %v2534_v1, %v2451_v60  ;;  %2644 = vmatprep.mubr.f32.mxu0 %v2538_v31  ;;  %v5556_v60 = vld [vmem:[%s6286_s23 + $0x84] ss:$8 sps:$4 sm:$0xff]   ;;  %v4454_v1 = vcombine.low %v6376_v37, %v6379_v3  ;;  %v5584_v37 = vld [vmem:[%s6286_s23 + $0x120] ss:$8 sps:$4 sm:$0xff]   ;;  %v5589_v3 = vld [vmem:[%s6286_s23 + $0x134] ss:$8 sps:$4 sm:$0xff]  }
 0x358   :  { %2645 = vmatmul.mubr.f32.vlgmr.msra.gmra.mrb[6].mxu0 %v2537_v0  ;;  %v2539_v46 = vmax.f32 %v2533_v35, 0.0  ;;  %v5574_v31 = vld [vmem:[%s6286_s23 + $0xe4] ss:$8 sps:$4 sm:$0xff]  }
 0x359   :  { %v2540_v5 = vmax.f32 %v2535_v39, 0.0  ;;  %3729 = vmatpush1.bf16.msra.mxu0 %v5530_v55  ;;  %v5577_v55 = vld [vmem:[%s6286_s23 + $0xf4] ss:$8 sps:$4 sm:$0xff]   ;;  %v6428_v0 = vld [vmem:[%s6362_s21 + $0x8] sm:$0xff] }
 0x35a   :  { %3730 = vmatprep.subr.bf16.mxu0 %v5535_v36  ;;  %v6431_v35 = vld [vmem:[%s6362_s21 + $0x28] sm:$0xff]  ;;  %v5583_v39 = vld [vmem:[%s6286_s23 + $0x114] ss:$8 sps:$4 sm:$0xff]  }
 0x35b   :  { %2649 = vmatprep.mubr.f32.mxu0 %v2540_v5  ;;  %v5578_v36 = vld [vmem:[%s6286_s23 + $0x100] ss:$8 sps:$4 sm:$0xff]   ;;  %v4457_v18 = vcombine.high %v6428_v0, %v6431_v35  ;;  %v5592_v5 = vld [vmem:[%s6286_s23 + $0x144] ss:$8 sps:$4 sm:$0xff]  }
 0x35c   :  { %2650 = vmatmul.mubr.f32.gmra.mrb[8].mxu0 %v2539_v46  ;;  %v5596_v46 = vld [vmem:[%s6286_s23 + $0x160] ss:$8 sps:$4 sm:$0xff]  }
 0x35d   :  { %3731 = vmatpush1.bf16.msra.mxu0 %v5533_v42  ;;  %3760 = vmatprep.mubr.bf16.mxu0 %v4455_v43  ;;  %v5590_v42 = vld [vmem:[%s6286_s23 + $0x140] ss:$8 sps:$4 sm:$0xff]   ;;  %v5595_v43 = vld [vmem:[%s6286_s23 + $0x154] ss:$8 sps:$4 sm:$0xff]  }
 0x35e   :  { %3732 = vmatprep.subr.bf16.mxu0 %v5538_v24  ;;  %v5601_v24 = vld [vmem:[%s6286_s23 + $0x174] ss:$8 sps:$4 sm:$0xff]  }
 0x361   :  { %3733 = vmatpush1.bf16.msra.mxu0 %v5536_v52  ;;  %v5605_v52 = vld [vmem:[%s6286_s23 + $0x190] ss:$8 sps:$4 sm:$0xff]  }
 0x362   :  { %3734 = vmatprep.subr.bf16.mxu0 %v5541_v56  ;;  %v5613_v56 = vld [vmem:[%s6286_s23 + $0x1b4] ss:$8 sps:$4 sm:$0xff]  }
 0x365   :  { %3735 = vmatpush1.bf16.msra.mxu0 %v5539_v16  ;;  %v5617_v16 = vld [vmem:[%s6286_s23 + $0x1d0] ss:$8 sps:$4 sm:$0xff]  }
 0x366   :  { %3736 = vmatprep.subr.bf16.mxu0 %v5544_v63  ;;  %v5625_v63 = vld [vmem:[%s6286_s23 + $0x1f4] ss:$8 sps:$4 sm:$0xff]  }
 0x369   :  { %3737 = vmatpush1.bf16.msra.mxu0 %v5542_v10  ;;  %v4456_v10 = vcombine.low %v6428_v0, %v6431_v35 }
 0x36a   :  { %3738 = vmatprep.subr.bf16.mxu0 %v5547_v11  ;;  %v5626_v11 = vld [vmem:[%s6286_s23 + $0x200] ss:$8 sps:$4 sm:$0xff]  }
 0x36d   :  { %3739 = vmatpush1.bf16.msra.mxu0 %v5545_v13  ;;  %v4459_v13 = vcombine.high %v6473_v6, %v6476_v7 }
 0x36e   :  { %3740 = vmatprep.subr.bf16.mxu0 %v5550_v14  ;;  %v5631_v14 = vld [vmem:[%s6286_s23 + $0x214] ss:$8 sps:$4 sm:$0xff]  }
 0x371   :  { %3741 = vmatpush1.bf16.msra.mxu0 %v5548_v15  ;;  %v5629_v15 = vld [vmem:[%s6286_s23 + $0x210] ss:$8 sps:$4 sm:$0xff]  }
 0x372   :  { %3742 = vmatprep.subr.bf16.mxu0 %v5553_v17  ;;  %v5634_v17 = vld [vmem:[%s6286_s23 + $0x224] ss:$8 sps:$4 sm:$0xff]  }
 0x375   :  { %3743 = vmatpush1.bf16.msra.mxu0 %v5551_v26  ;;  %v2673_v26 = vld [vmem:[%s4165_s26] sm:$0x3] }
 0x376   :  { %3744 = vmatprep.subr.bf16.mxu0 %v5556_v60  ;;  %v5632_v60 = vld [vmem:[%s6286_s23 + $0x220] ss:$8 sps:$4 sm:$0xff]  }
 0x379   :  { %3745 = vmatpush1.bf16.msra.mxu0 %v5554_v27  ;;  %v2678_v27 = vrot.slane %v2673_v26, %v6144_v19 }
 0x37a   :  { %3746 = vmatprep.subr.bf16.mxu0 %v5559_v8  ;;  %v2682_v8 = vrot.slane %v2673_v26, %v6149_v23  ;;  %v5689_v26 = vld [vmem:[%s6286_s23 + $0x350] ss:$8 sps:$4 sm:$0xff]  }
 0x37d   :  { %3747 = vmatpush1.bf16.msra.mxu0 %v5557_v21  ;;  %v5637_v21 = vld [vmem:[%s6286_s23 + $0x234] ss:$8 sps:$4 sm:$0xff]  }
 0x37e   :  { %3748 = vmatprep.subr.bf16.mxu0 %v5562_v49 }
 0x381   :  { %3749 = vmatpush1.bf16.msra.mxu0 %v5560_v22 }
 0x382   :  { %3750 = vmatprep.subr.bf16.mxu0 %v5565_v28 }
 0x385   :  { %3751 = vmatpush1.bf16.msra.mxu0 %v5563_v29  ;;  %v5635_v29 = vld [vmem:[%s6286_s23 + $0x230] ss:$8 sps:$4 sm:$0xff]  }
 0x386   :  { %3752 = vmatprep.subr.bf16.mxu0 %v5568_v9 }
 0x389   :  { %3753 = vmatpush1.bf16.msra.mxu0 %v5566_v30  ;;  %v5640_v30 = vld [vmem:[%s6286_s23 + $0x244] ss:$8 sps:$4 sm:$0xff]  }
 0x38a   :  { %3754 = vmatprep.subr.bf16.mxu0 %v5571_v38 }
 0x38d   :  { %3755 = vmatpush1.bf16.msra.mxu0 %v5569_v12 }
 0x38e   :  { %3756 = vmatprep.subr.bf16.mxu0 %v5574_v31  ;;  %v4445_v31 = vld [vmem:[%s4159_s30] ss:$0 sm:$0xff] }
 0x391   :  { %3757 = vmatpush1.bf16.msra.mxu0 %v5572_v32 }
 0x392   :  { %3758 = vmatprep.subr.bf16.mxu0 %v5577_v55 }
 0x395   :  { %3759 = vmatpush1.bf16.msra.mxu0 %v5575_v33 }
 0x396   :  { %3771 = vmatprep.subr.bf16.mxu0 %v5580_v34  ;;  %v5638_v34 = vld [vmem:[%s6286_s23 + $0x240] ss:$8 sps:$4 sm:$0xff]  }
 0x398   :  { %3761 = vmatmul.mubr.bf16.vlgmr.msra.gmra.mrb[12].mxu0 %v4454_v1  ;;  %v5643_v1 = vld [vmem:[%s6286_s23 + $0x254] ss:$8 sps:$4 sm:$0xff]  }
 0x399   :  { %3772 = vmatpush1.bf16.msra.mxu0 %v5578_v36  ;;  %3803 = vmatprep.mubr.bf16.mxu0 %v4457_v18 }
 0x39a   :  { %3773 = vmatprep.subr.bf16.mxu0 %v5583_v39 }
 0x39d   :  { %3774 = vmatpush1.bf16.msra.mxu0 %v5581_v20 }
 0x39e   :  { %3775 = vmatprep.subr.bf16.mxu0 %v5586_v40 }
 0x3a1   :  { %3776 = vmatpush1.bf16.msra.mxu0 %v5584_v37  ;;  %v5641_v37 = vld [vmem:[%s6286_s23 + $0x250] ss:$8 sps:$4 sm:$0xff]  }
 0x3a2   :  { %3777 = vmatprep.subr.bf16.mxu0 %v5589_v3  ;;  %v5646_v3 = vld [vmem:[%s6286_s23 + $0x264] ss:$8 sps:$4 sm:$0xff]  }
 0x3a5   :  { %3778 = vmatpush1.bf16.msra.mxu0 %v5587_v41  ;;  %v5644_v41 = vld [vmem:[%s6286_s23 + $0x260] ss:$8 sps:$4 sm:$0xff]  }
 0x3a6   :  { %3779 = vmatprep.subr.bf16.mxu0 %v5592_v5  ;;  %v5649_v5 = vld [vmem:[%s6286_s23 + $0x274] ss:$8 sps:$4 sm:$0xff]  }
 0x3a9   :  { %3780 = vmatpush1.bf16.msra.mxu0 %v5590_v42  ;;  %v5647_v42 = vld [vmem:[%s6286_s23 + $0x270] ss:$8 sps:$4 sm:$0xff]  }
 0x3aa   :  { %3781 = vmatprep.subr.bf16.mxu0 %v5595_v43  ;;  %v5652_v43 = vld [vmem:[%s6286_s23 + $0x284] ss:$8 sps:$4 sm:$0xff]  }
 0x3ad   :  { %3782 = vmatpush1.bf16.msra.mxu0 %v5593_v44  ;;  %v5650_v44 = vld [vmem:[%s6286_s23 + $0x280] ss:$8 sps:$4 sm:$0xff]  }
 0x3ae   :  { %3783 = vmatprep.subr.bf16.mxu0 %v5598_v45  ;;  %v5655_v45 = vld [vmem:[%s6286_s23 + $0x294] ss:$8 sps:$4 sm:$0xff]  }
 0x3b1   :  { %3784 = vmatpush1.bf16.msra.mxu0 %v5596_v46  ;;  %v5653_v46 = vld [vmem:[%s6286_s23 + $0x290] ss:$8 sps:$4 sm:$0xff]  }
 0x3b2   :  { %3785 = vmatprep.subr.bf16.mxu0 %v5601_v24  ;;  %v5658_v24 = vld [vmem:[%s6286_s23 + $0x2a4] ss:$8 sps:$4 sm:$0xff]  }
 0x3b5   :  { %3786 = vmatpush1.bf16.msra.mxu0 %v5599_v47  ;;  %v5656_v47 = vld [vmem:[%s6286_s23 + $0x2a0] ss:$8 sps:$4 sm:$0xff]  }
 0x3b6   :  { %3787 = vmatprep.subr.bf16.mxu0 %v5604_v48  ;;  %v5661_v48 = vld [vmem:[%s6286_s23 + $0x2b4] ss:$8 sps:$4 sm:$0xff]  }
 0x3b9   :  { %3788 = vmatpush1.bf16.msra.mxu0 %v5602_v50  ;;  %v5659_v50 = vld [vmem:[%s6286_s23 + $0x2b0] ss:$8 sps:$4 sm:$0xff]  }
 0x3ba   :  { %3789 = vmatprep.subr.bf16.mxu0 %v5607_v51  ;;  %v5664_v51 = vld [vmem:[%s6286_s23 + $0x2c4] ss:$8 sps:$4 sm:$0xff]  }
 0x3bd   :  { %3790 = vmatpush1.bf16.msra.mxu0 %v5605_v52  ;;  %v5662_v52 = vld [vmem:[%s6286_s23 + $0x2c0] ss:$8 sps:$4 sm:$0xff]  }
 0x3be   :  { %3791 = vmatprep.subr.bf16.mxu0 %v5610_v53  ;;  %v5667_v53 = vld [vmem:[%s6286_s23 + $0x2d4] ss:$8 sps:$4 sm:$0xff]  }
 0x3c1   :  { %3792 = vmatpush1.bf16.msra.mxu0 %v5608_v54  ;;  %v5665_v54 = vld [vmem:[%s6286_s23 + $0x2d0] ss:$8 sps:$4 sm:$0xff]  }
 0x3c2   :  { %3793 = vmatprep.subr.bf16.mxu0 %v5613_v56  ;;  %v5670_v56 = vld [vmem:[%s6286_s23 + $0x2e4] ss:$8 sps:$4 sm:$0xff]  }
 0x3c5   :  { %3794 = vmatpush1.bf16.msra.mxu0 %v5611_v57  ;;  %v5668_v57 = vld [vmem:[%s6286_s23 + $0x2e0] ss:$8 sps:$4 sm:$0xff]  }
 0x3c6   :  { %3795 = vmatprep.subr.bf16.mxu0 %v5616_v58  ;;  %v5673_v58 = vld [vmem:[%s6286_s23 + $0x2f4] ss:$8 sps:$4 sm:$0xff]  }
 0x3c9   :  { %3796 = vmatpush1.bf16.msra.mxu0 %v5614_v59  ;;  %v5671_v59 = vld [vmem:[%s6286_s23 + $0x2f0] ss:$8 sps:$4 sm:$0xff]  }
 0x3ca   :  { %3797 = vmatprep.subr.bf16.mxu0 %v5619_v61  ;;  %v5676_v61 = vld [vmem:[%s6286_s23 + $0x304] ss:$8 sps:$4 sm:$0xff]  }
 0x3cd   :  { %3798 = vmatpush1.bf16.msra.mxu0 %v5617_v16  ;;  %v6523_v16 = vld [vmem:[%s6362_s21 + $0x18] sm:$0xff] }
 0x3ce   :  { %3799 = vmatprep.subr.bf16.mxu0 %v5622_v62  ;;  %v6526_v62 = vld [vmem:[%s6362_s21 + $0x38] sm:$0xff] }
 0x3d1   :  { %3800 = vmatpush1.bf16.msra.mxu0 %v5620_v25  ;;  %v4458_v25 = vcombine.low %v6473_v6, %v6476_v7  ;;  %v5680_v6 = vld [vmem:[%s6286_s23 + $0x320] ss:$8 sps:$4 sm:$0xff]   ;;  %v5685_v7 = vld [vmem:[%s6286_s23 + $0x334] ss:$8 sps:$4 sm:$0xff]  }
 0x3d2   :  { %3801 = vmatprep.subr.bf16.mxu0 %v5625_v63  ;;  %v5674_v63 = vld [vmem:[%s6286_s23 + $0x300] ss:$8 sps:$4 sm:$0xff]  }
 0x3d5   :  { %3802 = vmatpush1.bf16.msra.mxu0 %v5623_v2  ;;  %v4461_v2 = vcombine.high %v6523_v16, %v6526_v62 }
 0x3d6   :  { %3814 = vmatprep.subr.bf16.mxu0 %v5628_v4  ;;  %v5679_v4 = vld [vmem:[%s6286_s23 + $0x314] ss:$8 sps:$4 sm:$0xff]  }
 0x3d8   :  { %3804 = vmatmul.mubr.bf16.vlgmr.msra.gmra.mrb[12].mxu0 %v4456_v10  ;;  %v5677_v10 = vld [vmem:[%s6286_s23 + $0x310] ss:$8 sps:$4 sm:$0xff]  }
 0x3d9   :  { %3815 = vmatpush1.bf16.msra.mxu0 %v5626_v11  ;;  %3846 = vmatprep.mubr.bf16.mxu0 %v4459_v13  ;;  %v5682_v11 = vld [vmem:[%s6286_s23 + $0x324] ss:$8 sps:$4 sm:$0xff]   ;;  %v5683_v13 = vld [vmem:[%s6286_s23 + $0x330] ss:$8 sps:$4 sm:$0xff]  }
 0x3da   :  { %3816 = vmatprep.subr.bf16.mxu0 %v5631_v14  ;;  %v5688_v14 = vld [vmem:[%s6286_s23 + $0x344] ss:$8 sps:$4 sm:$0xff]  }
 0x3dd   :  { %3817 = vmatpush1.bf16.msra.mxu0 %v5629_v15  ;;  %v5686_v15 = vld [vmem:[%s6286_s23 + $0x340] ss:$8 sps:$4 sm:$0xff]  }
 0x3de   :  { %3818 = vmatprep.subr.bf16.mxu0 %v5634_v17  ;;  %v5691_v17 = vld [vmem:[%s6286_s23 + $0x354] ss:$8 sps:$4 sm:$0xff]  }
 0x3df   :  { %v2757_v49 = vpop.f32.mrb[20].mxu1 }
 0x3e0   :  { %v2758_v22 = vadd.f32 %v2757_v49, %v2678_v27  ;;  %v2759_v28 = vpop.f32.mrb[21].mxu1 }
 0x3e1   :  { %3819 = vmatpush1.bf16.msra.mxu0 %v5632_v60  ;;  %v2760_v9 = vadd.f32 %v2759_v28, %v2682_v8  ;;  %v5694_v60 = vld [vmem:[%s6286_s23 + $0x364] ss:$8 sps:$4 sm:$0xff]   ;;  %v5697_v28 = vld [vmem:[%s6286_s23 + $0x374] ss:$8 sps:$4 sm:$0xff]  }
 0x3e2   :  { %3820 = vmatprep.subr.bf16.mxu0 %v5637_v21  ;;  %v2768_v32 = vmax.f32 %v2758_v22, 0.0  ;;  %v5692_v22 = vld [vmem:[%s6286_s23 + $0x360] ss:$8 sps:$4 sm:$0xff]  }
 0x3e3   :  { %v2769_v38 = vmax.f32 %v2760_v9, 0.0  ;;  %v2763_v12 = vpop.f32.mrb[22].mxu1 }
 0x3e4   :  { %v2764_v55 = vadd.f32 %v2763_v12, %v2678_v27  ;;  %v2765_v33 = vpop.f32.mrb[23].mxu1 }
 0x3e5   :  { %3821 = vmatpush1.bf16.msra.mxu0 %v5635_v29  ;;  %v2766_v0 = vadd.f32 %v2765_v33, %v2682_v8  ;;  %v4821_v35 = vpop.f32.mrb[4].mxu0  ;;  %2875 = vmatprep.mubr.f32.mxu1 %v2769_v38  ;;  %v4450_v8 = vld [vmem:[%s4163_s8] ss:$0 sm:$0xff] }
 0x3e6   :  { %3822 = vmatprep.subr.bf16.mxu0 %v5640_v30  ;;  %v2415_v36 = vadd.f32 %v4821_v35, %v4445_v31  ;;  %v2409_v18 = vpop.f32.mrb[5].mxu0  ;;  %2876 = vmatmul.mubr.f32.vlgmr.msra.gmra.mrb[24].mxu1 %v2768_v32  ;;  %v2770_v40 = vmax.f32 %v2764_v55, 0.0  ;;  %v5700_v32 = vld [vmem:[%s6286_s23 + $0x384] ss:$8 sps:$4 sm:$0xff]   ;;  %v5701_v35 = vld [vmem:[%s6286_s23 + $0x390] ss:$8 sps:$4 sm:$0xff]  }
 0x3e7   :  { %v2771_v39 = vmax.f32 %v2766_v0, 0.0  ;;  %v2410_v20 = vadd.f32 %v4445_v31, %v2409_v18  ;;  %v5695_v31 = vld [vmem:[%s6286_s23 + $0x370] ss:$8 sps:$4 sm:$0xff]   ;;  %v5703_v0 = vld [vmem:[%s6286_s23 + $0x394] ss:$8 sps:$4 sm:$0xff]  }
 0x3e8   :  { %4119 = vst.msk [vmem:[%s4177_s4 + $0x8] sm:$0xff] %vm4117_vm1, %v2415_v36  ;;  %v5704_v36 = vld [vmem:[%s6286_s23 + $0x3a0] ss:$8 sps:$4 sm:$0xff]   ;;  %v5709_v18 = vld [vmem:[%s6286_s23 + $0x3b4] ss:$8 sps:$4 sm:$0xff]  }
 0x3e9   :  { %3823 = vmatpush1.bf16.msra.mxu0 %v5638_v34  ;;  %4118 = vst.msk [vmem:[%s4177_s4] sm:$0xff] %vm4117_vm1, %v2410_v20  ;;  %2880 = vmatprep.mubr.f32.mxu1 %v2771_v39  ;;  %v5698_v34 = vld [vmem:[%s6286_s23 + $0x380] ss:$8 sps:$4 sm:$0xff]   ;;  %v5707_v39 = vld [vmem:[%s6286_s23 + $0x3b0] ss:$8 sps:$4 sm:$0xff]  }
 0x3ea   :  { %3824 = vmatprep.subr.bf16.mxu0 %v5643_v1  ;;  %2881 = vmatmul.mubr.f32.gmra.mrb[26].mxu1 %v2770_v40  ;;  %v5706_v1 = vld [vmem:[%s6286_s23 + $0x3a4] ss:$8 sps:$4 sm:$0xff]   ;;  %v5710_v40 = vld [vmem:[%s6286_s23 + $0x3c0] ss:$8 sps:$4 sm:$0xff]  }
 0x3eb   :  { %v5712_v20 = vld [vmem:[%s6286_s23 + $0x3c4] ss:$8 sps:$4 sm:$0xff]  }
 0x3ed   :  { %3825 = vmatpush1.bf16.msra.mxu0 %v5641_v37  ;;  %v5715_v37 = vld [vmem:[%s6286_s23 + $0x3d4] ss:$8 sps:$4 sm:$0xff]  }
 0x3ee   :  { %3826 = vmatprep.subr.bf16.mxu0 %v5646_v3  ;;  %v3936_v3 = vld [vmem:[%s6576_s16] sm:$0xff] }
 0x3f1   :  { %3827 = vmatpush1.bf16.msra.mxu0 %v5644_v41  ;;  %v3937_v41 = vld [vmem:[%s6576_s16 + $0x8] sm:$0xff] }
 0x3f2   :  { %3828 = vmatprep.subr.bf16.mxu0 %v5649_v5  ;;  %v5017_v5 = vpack.c.bf16 %v3937_v41, %v3936_v3  ;;  %v3910_v3 = vld [vmem:[%s6599_s20 + $0x30] sm:$0xff]  ;;  %v3911_v41 = vld [vmem:[%s6599_s20 + $0x38] sm:$0xff] }
 0x3f4   :  { %5018 = vmatprep.subr.bf16.mxu1 %v5017_v5 }
 0x3f5   :  { %3829 = vmatpush1.bf16.msra.mxu0 %v5647_v42  ;;  %v5713_v42 = vld [vmem:[%s6286_s23 + $0x3d0] ss:$8 sps:$4 sm:$0xff]   ;;  %5020 = vmatpush3.bf16.msra.mxu1 %v5017_v5  ;;  %v3928_v5 = vld [vmem:[%s6599_s20 + $0xc0] sm:$0xff] }
 0x3f6   :  { %3830 = vmatprep.subr.bf16.mxu0 %v5652_v43  ;;  %v5718_v43 = vld [vmem:[%s6286_s23 + $0x3e4] ss:$8 sps:$4 sm:$0xff]  }
 0x3f9   :  { %3831 = vmatpush1.bf16.msra.mxu0 %v5650_v44  ;;  %v3938_v44 = vld [vmem:[%s6576_s16 + $0x10] sm:$0xff] }
 0x3fa   :  { %3832 = vmatprep.subr.bf16.mxu0 %v5655_v45  ;;  %v3939_v45 = vld [vmem:[%s6576_s16 + $0x18] sm:$0xff] }
 0x3fd   :  { %3833 = vmatpush1.bf16.msra.mxu0 %v5653_v46  ;;  %v5021_v46 = vpack.c.bf16 %v3939_v45, %v3938_v44  ;;  %v3912_v45 = vld [vmem:[%s6599_s20 + $0x40] sm:$0xff] }
 0x3fe   :  { %3834 = vmatprep.subr.bf16.mxu0 %v5658_v24  ;;  %v5716_v24 = vld [vmem:[%s6286_s23 + $0x3e0] ss:$8 sps:$4 sm:$0xff]  }
 0x3ff   :  { %5022 = vmatprep.subr.bf16.mxu1 %v5021_v46 }
 0x400   :  { %5024 = vmatpush3.bf16.msra.mxu1 %v5021_v46  ;;  %v3913_v46 = vld [vmem:[%s6599_s20 + $0x48] sm:$0xff] }
 0x401   :  { %3835 = vmatpush1.bf16.msra.mxu0 %v5656_v47  ;;  %v5721_v47 = vld [vmem:[%s6286_s23 + $0x3f4] ss:$8 sps:$4 sm:$0xff]  }
 0x402   :  { %3836 = vmatprep.subr.bf16.mxu0 %v5661_v48  ;;  %v3940_v48 = vld [vmem:[%s6576_s16 + $0x20] sm:$0xff] }
 0x405   :  { %3837 = vmatpush1.bf16.msra.mxu0 %v5659_v50  ;;  %v3941_v50 = vld [vmem:[%s6576_s16 + $0x28] sm:$0xff] }
 0x406   :  { %3838 = vmatprep.subr.bf16.mxu0 %v5664_v51  ;;  %v5025_v51 = vpack.c.bf16 %v3941_v50, %v3940_v48  ;;  %v5051_v48 = vpack.c.bf16 %v3913_v46, %v3912_v45 }
 0x408   :  { %5026 = vmatprep.subr.bf16.mxu1 %v5025_v51 }
 0x409   :  { %3839 = vmatpush1.bf16.msra.mxu0 %v5662_v52  ;;  %v5719_v52 = vld [vmem:[%s6286_s23 + $0x3f0] ss:$8 sps:$4 sm:$0xff]   ;;  %5028 = vmatpush3.bf16.msra.mxu1 %v5025_v51  ;;  %s5757_s23 = smov 21  }
 0x40a   :  { %3840 = vmatprep.subr.bf16.mxu0 %v5667_v53  ;;  %v3942_v53 = vld [vmem:[%s6576_s16 + $0x30] sm:$0xff]  ;;  %s4167_s24 = sld [smem:[%s6661_s0 + %s5757_s23]]  }
 0x40b   :  { %v3914_v51 = vld [vmem:[%s6599_s20 + $0x50] sm:$0xff] }
 0x40d   :  { %3841 = vmatpush1.bf16.msra.mxu0 %v5665_v54  ;;  %v3943_v54 = vld [vmem:[%s6576_s16 + $0x38] sm:$0xff] }
 0x40e   :  { %3842 = vmatprep.subr.bf16.mxu0 %v5670_v56  ;;  %v4460_v56 = vcombine.low %v6523_v16, %v6526_v62 }
 0x410   :  { %v4453_v62 = vld [vmem:[%s4167_s24] ss:$0 sm:$0xff] }
 0x411   :  { %3843 = vmatpush1.bf16.msra.mxu0 %v5668_v57  ;;  %v5029_v57 = vpack.c.bf16 %v3943_v54, %v3942_v53  ;;  %v3932_v53 = vld [vmem:[%s6599_s20 + $0xe0] sm:$0xff]  ;;  %v3933_v54 = vld [vmem:[%s6599_s20 + $0xe8] sm:$0xff] }
 0x412   :  { %3844 = vmatprep.subr.bf16.mxu0 %v5673_v58  ;;  %v3920_v58 = vld [vmem:[%s6599_s20 + $0x80] sm:$0xff] }
 0x413   :  { %5030 = vmatprep.subr.bf16.mxu1 %v5029_v57 }
 0x414   :  { %5032 = vmatpush3.bf16.msra.mxu1 %v5029_v57  ;;  %v5057_v57 = vpack.c.bf16 %v3933_v54, %v3932_v53 }
 0x415   :  { %3845 = vmatpush1.bf16.msra.mxu0 %v5671_v59  ;;  %v3921_v59 = vld [vmem:[%s6599_s20 + $0x88] sm:$0xff] }
 0x416   :  { %3857 = vmatprep.subr.bf16.mxu0 %v5676_v61  ;;  %v5033_v61 = vpack.c.bf16 %v3921_v59, %v3920_v58  ;;  %v3916_v58 = vld [vmem:[%s6599_s20 + $0x60] sm:$0xff]  ;;  %v3917_v59 = vld [vmem:[%s6599_s20 + $0x68] sm:$0xff] }
 0x418   :  { %3847 = vmatmul.mubr.bf16.vlgmr.msra.gmra.mrb[12].mxu0 %v4458_v25  ;;  %5034 = vmatprep.subr.bf16.mxu1 %v5033_v61  ;;  %v3934_v61 = vld [vmem:[%s6599_s20 + $0xf0] sm:$0xff] }
 0x419   :  { %3858 = vmatpush1.bf16.msra.mxu0 %v5674_v63  ;;  %3889 = vmatprep.mubr.bf16.mxu0 %v4461_v2 }
 0x41a   :  { %3859 = vmatprep.subr.bf16.mxu0 %v5679_v4 }
 0x41d   :  { %3860 = vmatpush1.bf16.msra.mxu0 %v5677_v10 }
 0x41e   :  { %3861 = vmatprep.subr.bf16.mxu0 %v5682_v11 }
 0x421   :  { %3862 = vmatpush1.bf16.msra.mxu0 %v5680_v6 }
 0x422   :  { %3863 = vmatprep.subr.bf16.mxu0 %v5685_v7 }
 0x425   :  { %3864 = vmatpush1.bf16.msra.mxu0 %v5683_v13 }
 0x426   :  { %3865 = vmatprep.subr.bf16.mxu0 %v5688_v14 }
 0x429   :  { %3866 = vmatpush1.bf16.msra.mxu0 %v5686_v15 }
 0x42a   :  { %3867 = vmatprep.subr.bf16.mxu0 %v5691_v17 }
 0x42b   :  { %v4711_v27 = vpop.f32.mrb[6].mxu0 }
 0x42c   :  { %v4712_v21 = vpop.f32.mrb[7].mxu0 }
 0x42d   :  { %v4713_v49 = vadd.f32 %v4712_v21, %v4711_v27  ;;  %3868 = vmatpush1.bf16.msra.mxu0 %v5689_v26  ;;  %v2895_v21 = vld [vmem:[%s4149_s28 + $0x8] sm:$0xff] }
 0x42e   :  { %3869 = vmatprep.subr.bf16.mxu0 %v5694_v60  ;;  %v2894_v60 = vld [vmem:[%s4149_s28] sm:$0xff] }
 0x42f   :  { %v6552_v29 = vadd.f32 %v4713_v49, %v4450_v8  ;;  %v4714_v9 = vpop.f32.mrb[8].mxu0 }
 0x430   :  { %v4715_v30 = vpop.f32.mrb[9].mxu0 }
 0x431   :  { %v2655_v38 = vmax.f32 %v6552_v29, 0.0  ;;  %v4716_v12 = vadd.f32 %v4715_v30, %v4714_v9  ;;  %3870 = vmatpush1.bf16.msra.mxu0 %v5692_v22  ;;  %v3904_v22 = vld [vmem:[%s6599_s20] sm:$0xff]  ;;  %v3922_v30 = vld [vmem:[%s6599_s20 + $0x90] sm:$0xff] }
 0x432   :  { %3871 = vmatprep.subr.bf16.mxu0 %v5697_v28  ;;  %v3905_v28 = vld [vmem:[%s6599_s20 + $0x8] sm:$0xff] }
 0x433   :  { %4113 = vst.msk [vmem:[%s4175_s12] sm:$0xff] %vm2336_vm0, %v2655_v38  ;;  %v6560_v55 = vadd.f32 %v4716_v12, %v4450_v8  ;;  %v3923_v12 = vld [vmem:[%s6599_s20 + $0x98] sm:$0xff] }
 0x435   :  { %v2656_v33 = vmax.f32 %v6560_v55, 0.0  ;;  %3872 = vmatpush1.bf16.msra.mxu0 %v5695_v31  ;;  %v3926_v55 = vld [vmem:[%s6599_s20 + $0xb0] sm:$0xff] }
 0x436   :  { %3873 = vmatprep.subr.bf16.mxu0 %v5700_v32  ;;  %v5035_v32 = vpack.c.bf16 %v3905_v28, %v3904_v22 }
 0x437   :  { %4114 = vst.msk [vmem:[%s4175_s12 + $0x8] sm:$0xff] %vm2336_vm0, %v2656_v33 }
 0x439   :  { %3874 = vmatpush1.bf16.msra.mxu0 %v5698_v34  ;;  %v5037_v34 = vpack.c.bf16 %v3923_v12, %v3922_v30  ;;  %v4592_v12 = vld [vmem:[%s4172_s10] ss:$0 sm:$0xff] }
 0x43a   :  { %3875 = vmatprep.subr.bf16.mxu0 %v5703_v0  ;;  %v3907_v0 = vld [vmem:[%s6599_s20 + $0x18] sm:$0xff] }
 0x43d   :  { %3876 = vmatpush1.bf16.msra.mxu0 %v5701_v35  ;;  %v3924_v35 = vld [vmem:[%s6599_s20 + $0xa0] sm:$0xff] }
 0x43e   :  { %3877 = vmatprep.subr.bf16.mxu0 %v5706_v1  ;;  %v3925_v1 = vld [vmem:[%s6599_s20 + $0xa8] sm:$0xff] }
 0x441   :  { %3878 = vmatpush1.bf16.msra.mxu0 %v5704_v36 }
 0x442   :  { %3879 = vmatprep.subr.bf16.mxu0 %v5709_v18  ;;  %v5041_v18 = vpack.c.bf16 %v3925_v1, %v3924_v35 }
 0x445   :  { %3880 = vmatpush1.bf16.msra.mxu0 %v5707_v39  ;;  %v3908_v39 = vld [vmem:[%s6599_s20 + $0x20] sm:$0xff] }
 0x446   :  { %3881 = vmatprep.subr.bf16.mxu0 %v5712_v20  ;;  %v3909_v20 = vld [vmem:[%s6599_s20 + $0x28] sm:$0xff] }
 0x449   :  { %3882 = vmatpush1.bf16.msra.mxu0 %v5710_v40  ;;  %v5043_v40 = vpack.c.bf16 %v3909_v20, %v3908_v39 }
 0x44a   :  { %3883 = vmatprep.subr.bf16.mxu0 %v5715_v37 }
 0x44d   :  { %3884 = vmatpush1.bf16.msra.mxu0 %v5713_v42  ;;  %v3929_v42 = vld [vmem:[%s6599_s20 + $0xc8] sm:$0xff] }
 0x44e   :  { %3885 = vmatprep.subr.bf16.mxu0 %v5718_v43  ;;  %v5047_v43 = vpack.c.bf16 %v3911_v41, %v3910_v3  ;;  %v5049_v44 = vpack.c.bf16 %v3929_v42, %v3928_v5 }
 0x451   :  { %3886 = vmatpush1.bf16.msra.mxu0 %v5716_v24  ;;  %v3930_v24 = vld [vmem:[%s6599_s20 + $0xd0] sm:$0xff] }
 0x452   :  { %3887 = vmatprep.subr.bf16.mxu0 %v5721_v47  ;;  %v3931_v47 = vld [vmem:[%s6599_s20 + $0xd8] sm:$0xff] }
 0x453   :  { %v5053_v50 = vpack.c.bf16 %v3931_v47, %v3930_v24 }
 0x455   :  { %3888 = vmatpush1.bf16.msra.mxu0 %v5719_v52  ;;  %v3915_v52 = vld [vmem:[%s6599_s20 + $0x58] sm:$0xff] }
 0x458   :  { %3890 = vmatmul.mubr.bf16.vlgmr.msra.gmra.mrb[12].mxu0 %v4460_v56  ;;  %v5055_v56 = vpack.c.bf16 %v3915_v52, %v3914_v51 }
 0x4b9   :  { %v4749_v16 = vpop.f32.mrb[24].mxu1 }
 0x4ba   :  { %v4750_v25 = vpop.f32.mrb[25].mxu1 }
 0x4bb   :  { %v4751_v63 = vadd.f32 %v4750_v25, %v4749_v16  ;;  %v3935_v16 = vld [vmem:[%s6599_s20 + $0xf8] sm:$0xff] }
 0x4bc   :  { %v5061_v25 = vpack.c.bf16 %v3935_v16, %v3934_v61 }
 0x4bd   :  { %v2878_v2 = vadd.f32 %v4751_v63, %v4453_v62  ;;  %v4752_v4 = vpop.f32.mrb[26].mxu1  ;;  %v3918_v63 = vld [vmem:[%s6599_s20 + $0x70] sm:$0xff] }
 0x4be   :  { %v4753_v10 = vpop.f32.mrb[27].mxu1 }
 0x4bf   :  { %v2886_v11 = vmax.f32 %v2878_v2, 0.0  ;;  %v4754_v6 = vadd.f32 %v4753_v10, %v4752_v4  ;;  %v3919_v2 = vld [vmem:[%s6599_s20 + $0x78] sm:$0xff]  ;;  %v3036_v10 = vld [vmem:[%s4169_s6] sm:$0x3] }
 0x4c0   :  { %v5063_v4 = vpack.c.bf16 %v3919_v2, %v3918_v63 }
 0x4c1   :  { %v2888_v7 = vmul.f32 0.5, %v2886_v11  ;;  %v2883_v13 = vadd.f32 %v4754_v6, %v4453_v62  ;;  %v5059_v62 = vpack.c.bf16 %v3917_v59, %v3916_v58  ;;  %v3041_v11 = vrot.slane %v3036_v10, %v6144_v19 }
 0x4c2   :  { %v3045_v6 = vrot.slane %v3036_v10, %v6149_v23 }
 0x4c3   :  { %v2890_v14 = vmul.f32 1.442695, %v2888_v7  ;;  %v2887_v15 = vmax.f32 %v2883_v13, 0.0 }
 0x4c5   :  { %5726 = vpow2.f32 %v2890_v14  ;;  %v2889_v17 = vmul.f32 0.5, %v2887_v15 }
 0x4c7   :  { %v2892_v26 = vmul.f32 1.442695, %v2889_v17 }
 0x4c9   :  { %5728 = vpow2.f32 %v2892_v26 }
 0x4cf   :  { %v5727_v27 = vpop.eup %5726 }
 0x4d0   :  { %4115 = vst.msk [vmem:[%s4176_s2] sm:$0xff] %vm2336_vm0, %v5727_v27  ;;  %v2896_v8 = vmul.f32 %v5727_v27, %v2894_v60 }
 0x4d2   :  { %v2898_v49 = vadd.f32 %v2896_v8, %v2655_v38  ;;  %v3906_v38 = vld [vmem:[%s6599_s20 + $0x10] sm:$0xff] }
 0x4d3   :  { %v5729_v9 = vpop.eup %5728  ;;  %v5039_v36 = vpack.c.bf16 %v3907_v0, %v3906_v38 }
 0x4d4   :  { %v2897_v31 = vmul.f32 %v5729_v9, %v2895_v21  ;;  %4116 = vst.msk [vmem:[%s4176_s2 + $0x8] sm:$0xff] %vm2336_vm0, %v5729_v9  ;;  %4838 = vmatprep.mubr.msk.f32.mxu1 %vm2336_vm0, %v2898_v49 }
 0x4d6   :  { %v2899_v29 = vadd.f32 %v2897_v31, %v2656_v33  ;;  %v3927_v33 = vld [vmem:[%s6599_s20 + $0xb8] sm:$0xff] }
 0x4d7   :  { %v5045_v37 = vpack.c.bf16 %v3927_v33, %v3926_v55 }
 0x4d8   :  { %4839 = vmatmul.mubr.msk.f32.vlgmr.msra.gmra.mrb[28].mxu1 %vm2336_vm0, %v2899_v29 }
 0x4d9   :  { %5036 = vmatpush3.bf16.msra.mxu1 %v5035_v32 }
 0x4da   :  { %5038 = vmatprep.subr.bf16.mxu1 %v5037_v34 }
 0x4dd   :  { %5040 = vmatpush3.bf16.msra.mxu1 %v5039_v36 }
 0x4de   :  { %5042 = vmatprep.subr.bf16.mxu1 %v5041_v18 }
 0x4e1   :  { %5044 = vmatpush3.bf16.msra.mxu1 %v5043_v40 }
 0x4e2   :  { %5046 = vmatprep.subr.bf16.mxu1 %v5045_v37 }
 0x4e5   :  { %5048 = vmatpush3.bf16.msra.mxu1 %v5047_v43 }
 0x4e6   :  { %5050 = vmatprep.subr.bf16.mxu1 %v5049_v44 }
 0x4e9   :  { %5052 = vmatpush3.bf16.msra.mxu1 %v5051_v48 }
 0x4ea   :  { %5054 = vmatprep.subr.bf16.mxu1 %v5053_v50 }
 0x4ed   :  { %5056 = vmatpush3.bf16.msra.mxu1 %v5055_v56 }
 0x4ee   :  { %5058 = vmatprep.subr.bf16.mxu1 %v5057_v57 }
 0x4f1   :  { %5060 = vmatpush3.bf16.msra.mxu1 %v5059_v62 }
 0x4f2   :  { %5062 = vmatprep.subr.bf16.mxu1 %v5061_v25 }
 0x4f5   :  { %5064 = vmatpush3.bf16.msra.mxu1 %v5063_v4 }
 0x52b   :  { %v3891_v7 = vpop.f32.mrb[12].mxu0 }
 0x52c   :  { %v5077_v13 = vadd.f32 %v3891_v7, %v3041_v11  ;;  %v3893_v14 = vpop.f32.mrb[13].mxu0 }
 0x52d   :  { %v5078_v15 = vadd.f32 %v3893_v14, %v3045_v6  ;;  %v3895_v17 = vpop.f32.mrb[14].mxu0 }
 0x52e   :  { %v3897_v26 = vpop.f32.mrb[15].mxu0  ;;  %v3900_v8 = vmax.f32 %v5077_v13, 0.0  ;;  %v5079_v21 = vadd.f32 %v3895_v17, %v3041_v11 }
 0x52f   :  { %v3901_v60 = vmax.f32 %v5078_v15, 0.0  ;;  %v5080_v27 = vadd.f32 %v3897_v26, %v3045_v6 }
 0x530   :  { %v3902_v22 = vmax.f32 %v5079_v21, 0.0 }
 0x531   :  { %v3903_v49 = vmax.f32 %v5080_v27, 0.0  ;;  %4089 = vmatprep.mubr.f32.mxu1 %v3901_v60 }
 0x532   :  { %4090 = vmatmul.mubr.f32.vlgmr.msra.gmra.mrb[30].mxu1 %v3900_v8 }
 0x533   :  { %4094 = vmatprep.mubr.f32.mxu1 %v3903_v49 }
 0x536   :  { %4095 = vmatmul.mubr.f32.gmra.mrb[32].mxu1 %v3902_v22 }
 0x5ab   :  { %v4840_v28 = vpop.f32.mrb[28].mxu1 }
 0x5ac   :  { %v4016_v19 = vpop.f32.mrb[29].mxu1 }
 0x605   :  { %v4797_v23 = vpop.f32.mrb[30].mxu1 }
 0x606   :  { %v4798_v9 = vpop.f32.mrb[31].mxu1 }
 0x607   :  { %v4799_v30 = vadd.f32 %v4798_v9, %v4797_v23 }
 0x609   :  { %v4092_v31 = vadd.f32 %v4799_v30, %v4016_v19  ;;  %v4800_v32 = vpop.f32.mrb[32].mxu1 }
 0x60a   :  { %v4801_v29 = vpop.f32.mrb[33].mxu1 }
 0x60b   :  { %v4107_v34 = vadd.f32 %v4592_v12, %v4092_v31  ;;  %v4802_v38 = vadd.f32 %v4801_v29, %v4800_v32 }
 0x60d   :  { %4121 = vst.msk [vmem:[%s4178_s14] sm:$0xff] %vm4120_vm2, %v4107_v34  ;;  %v4097_v0 = vadd.f32 %v4840_v28, %v4802_v38 }
 0x60f   :  { %v4108_v35 = vadd.f32 %v4592_v12, %v4097_v0 }
 0x611   :  { %4122 = vst.msk [vmem:[%s4178_s14 + $0x8] sm:$0xff] %vm4120_vm2, %v4108_v35 }

</bundles_post_ra>
